<compile_context>
chip_gen: v6e
topology: v6e:2x2x1
jax: 0.10.0
libtpu: 0.0.40
codegen_flags: <defaults>
</compile_context>

<pallas_src>
import jax
import jax.numpy as jnp
from jax.experimental import pallas as pl
from jax.experimental.pallas import tpu as pltpu


def gat_layer_kernel(x_ref, adj_ref, w_ref, b_ref, w1_ref, b1_ref, w2_ref,
                     b2_ref, out_ref):
    """One GAT layer over a block of `Bt` graphs.

    x_ref   : (Bt*N, Din) bf16   node features, graph*node rows stacked
    adj_ref : (Bt, N, N)  bf16   adjacency
    w_ref   : (Din, M)    bf16   W[l] weight (pre-transposed to (in, out))
    b_ref   : (1, M)      f32    W[l] bias
    w1_ref  : (M, 2H)     bf16   fused afcs[0] weight  [W1a | W1b]
    b1_ref  : (1, H)      f32    afcs[0] bias
    w2_ref  : (1, H)      f32    afcs[2] weight (row vector)
    b2_ref  : (1, 1)      f32    afcs[2] bias (SMEM scalar)
    out_ref : (Bt, N, M)  f32
    """
    Bt, N, _ = adj_ref.shape
    M = w_ref.shape[1]
    H = w2_ref.shape[1]

    # h = W[l](feature): one stacked (Bt*N, Din) x (Din, M) MXU matmul.
    h = jnp.dot(x_ref[...], w_ref[...],
                preferred_element_type=jnp.float32) + b_ref[...]      # (Bt*N, M)
    h_bf = h.astype(jnp.bfloat16)

    # Fused attention projections: pre = h @ [W1a | W1b]  ->  (Bt*N, 2H).
    pre = jnp.dot(h_bf, w1_ref[...], preferred_element_type=jnp.float32)
    pre_i = pre[:, :H].reshape(Bt, N, H)      # contribution of node i (rows)
    pre_j = pre[:, H:].reshape(Bt, N, H)      # contribution of node j (cols)

    # Pairwise logits: e[b,i,j] = w2 . relu(pre_i[b,i] + pre_j[b,j] + b1) + b2.
    z = pre_i[:, :, None, :] + pre_j[:, None, :, :] + b1_ref[...]     # (Bt,N,N,H)
    z = jnp.maximum(z, 0.0)                                           # afcs ReLU
    e = jnp.sum(z * w2_ref[...], axis=-1) + b2_ref[0, 0]              # (Bt,N,N)
    e = jnp.where(e >= 0.0, e, 0.01 * e)                              # LeakyReLU

    # Masked softmax over neighbours, then re-mask by adjacency.
    adj = adj_ref[...].astype(jnp.float32)
    masked = jnp.where(adj == 0.0, jnp.float32(-1e9), e)
    m = jnp.max(masked, axis=-1, keepdims=True)
    p = jnp.exp(masked - m)
    s = jnp.sum(p, axis=-1, keepdims=True)
    attn = p * pl.reciprocal(s, approx=True) * adj                    # (Bt,N,N)

    # feature = ReLU(attention @ h): per-graph batched matmul (f32 acc).
    h3 = h.reshape(Bt, N, M).astype(jnp.bfloat16)
    out = jnp.einsum('bij,bjm->bim', attn.astype(jnp.bfloat16), h3,
                     preferred_element_type=jnp.float32)
    out_ref[...] = jnp.maximum(out, 0.0)


def _pick_block_b(batch, n_nodes, hidden, target_rows=256,
                  pairwise_budget_bytes=8 * 1024 * 1024):
    """Largest divisor of `batch` with block_b*N ~ target_rows and whose
    (block_b, N, N, H) f32 pairwise intermediate stays under a VMEM budget."""
    by_rows = max(1, target_rows // max(n_nodes, 1))
    by_vmem = max(1, pairwise_budget_bytes //
                  max(n_nodes * n_nodes * hidden * 4, 1))
    bt = max(1, min(batch, by_rows, by_vmem))
    while batch % bt:
        bt -= 1
    return bt


def gat_layer(feature, adj_bf, w, b, w1, b1, w2, b2, *, block_b):
    B, N, Din = feature.shape
    M = w.shape[1]
    assert B % block_b == 0
    rows = block_b * N

    x_flat = feature.reshape(B * N, Din).astype(jnp.bfloat16)
    w_bf = w.astype(jnp.bfloat16)
    w1_bf = w1.astype(jnp.bfloat16)

    def resident(arr):
        # Full-array block with a constant index map: weights stay in VMEM
        # across all grid steps.
        return pl.BlockSpec(arr.shape, lambda bb: (0,) * arr.ndim)

    return pl.pallas_call(
        gat_layer_kernel,
        out_shape=jax.ShapeDtypeStruct((B, N, M), jnp.float32),
        grid_spec=pltpu.PrefetchScalarGridSpec(
            num_scalar_prefetch=0,
            grid=(B // block_b,),
            in_specs=[
                pl.BlockSpec((rows, Din), lambda bb: (bb, 0)),         # features
                pl.BlockSpec((block_b, N, N), lambda bb: (bb, 0, 0)),  # adjacency
                resident(w_bf),                                        # W (in,out)
                resident(b),                                           # W bias
                resident(w1_bf),                                       # [W1a|W1b]
                resident(b1),                                          # afcs[0] bias
                resident(w2),                                          # afcs[2] weight
                pl.BlockSpec(memory_space=pltpu.MemorySpace.SMEM),     # b2 scalar
            ],
            out_specs=pl.BlockSpec((block_b, N, M), lambda bb: (bb, 0, 0)),
        ),
        compiler_params=pltpu.CompilerParams(
            dimension_semantics=("parallel",),
            vmem_limit_bytes=48 * 1024 * 1024,
        ),
    )(x_flat, adj_bf, w_bf, b, w1_bf, b1, w2, b2)


def gat_forward(feature, adj, layer_params, *, block_b=None):
    B, N, _ = feature.shape
    if block_b is None:
        hidden = layer_params[0][4].shape[1]
        block_b = _pick_block_b(B, N, hidden)
    adj_bf = adj.astype(jnp.bfloat16)   # halves N^2 DMA; exact for 0/1 masks
    for (w, b, w1a, w1b, b1, w2, b2) in layer_params:
        w1 = jnp.concatenate([w1a, w1b], axis=1)   # fuse afcs[0] into one matmul
        feature = gat_layer(feature, adj_bf, w, b, w1, b1, w2, b2,
                            block_b=block_b)
    return feature


def gat_reference(feature, adj, layer_params):
    # Plain-JAX reference mirroring the kernel's bf16-matmul / f32-accumulate
    # numerics (elementwise math in f32).
    bf, f32 = jnp.bfloat16, jnp.float32
    for (w, b, w1a, w1b, b1, w2, b2) in layer_params:
        h = jnp.einsum('bnd,dm->bnm', feature.astype(bf), w.astype(bf),
                       preferred_element_type=f32) + b[0]
        w1 = jnp.concatenate([w1a, w1b], axis=1).astype(bf)
        pre = jnp.einsum('bnm,mh->bnh', h.astype(bf), w1,
                         preferred_element_type=f32)
        H = w1a.shape[1]
        pre_i, pre_j = pre[..., :H], pre[..., H:]
        z = jax.nn.relu(pre_i[:, :, None, :] + pre_j[:, None, :, :] + b1[0])
        e = jnp.sum(z * w2[0], axis=-1) + b2[0, 0]
        e = jnp.where(e >= 0.0, e, 0.01 * e)
        masked = jnp.where(adj == 0.0, -1e9, e)
        attn = jax.nn.softmax(masked, axis=-1) * adj
        feature = jax.nn.relu(
            jnp.einsum('bij,bjm->bim', attn.astype(bf), h.astype(bf),
                       preferred_element_type=f32))
    return feature


if __name__ == "__main__":
    B, N = 32, 8                       # 32 graphs of 8 nodes -> 256 stacked rows
    in_dim, mem_dim, hidden = 16, 128, 128
    num_layers = 2

    key = jax.random.PRNGKey(0)
    keys = jax.random.split(key, 2 + num_layers * 7)

    feature = jax.random.normal(keys[0], (B, N, in_dim), dtype=jnp.float32)
    adj = (jax.random.uniform(keys[1], (B, N, N)) > 0.4).astype(jnp.float32)
    adj = jnp.maximum(adj, jnp.eye(N, dtype=jnp.float32)[None])  # self-loops

    layer_params = []
    kidx = 2
    for layer in range(num_layers):
        din = in_dim if layer == 0 else mem_dim
        w = jax.random.normal(keys[kidx + 0], (din, mem_dim), jnp.float32) / jnp.sqrt(din)
        b = jax.random.normal(keys[kidx + 1], (1, mem_dim), jnp.float32) * 0.01
        w1a = jax.random.normal(keys[kidx + 2], (mem_dim, hidden), jnp.float32) / jnp.sqrt(2 * mem_dim)
        w1b = jax.random.normal(keys[kidx + 3], (mem_dim, hidden), jnp.float32) / jnp.sqrt(2 * mem_dim)
        b1 = jax.random.normal(keys[kidx + 4], (1, hidden), jnp.float32) * 0.01
        w2 = jax.random.normal(keys[kidx + 5], (1, hidden), jnp.float32) / jnp.sqrt(hidden)
        b2 = jax.random.normal(keys[kidx + 6], (1, 1), jnp.float32) * 0.01
        layer_params.append((w, b, w1a, w1b, b1, w2, b2))
        kidx += 7

    out = gat_forward(feature, adj, layer_params)
    out = jax.block_until_ready(out)

    ref = gat_reference(feature, adj, layer_params)
    assert out.shape == (B, N, mem_dim)
    assert jnp.allclose(out, ref, atol=5e-2, rtol=5e-2), "mismatch vs JAX reference"

    print("KERNEL_OK")
</pallas_src>

<mosaic_0001>
module attributes {stable_mosaic.version = 11 : i64} {
  func.func @gat_layer_kernel(%arg0: i32, %arg1: memref<256x16xbf16, #tpu.memory_space<vmem>>, %arg2: memref<32x8x8xbf16, #tpu.memory_space<vmem>>, %arg3: memref<16x128xbf16, #tpu.memory_space<vmem>>, %arg4: memref<1x128xf32, #tpu.memory_space<vmem>>, %arg5: memref<128x256xbf16, #tpu.memory_space<vmem>>, %arg6: memref<1x128xf32, #tpu.memory_space<vmem>>, %arg7: memref<1x128xf32, #tpu.memory_space<vmem>>, %arg8: memref<1x1xf32, #tpu.memory_space<smem>>, %arg9: memref<32x8x128xf32, #tpu.memory_space<vmem>>) attributes {dimension_semantics = [#tpu.dimension_semantics<parallel>], iteration_bounds = array<i64: 1>, scalar_prefetch = 0 : i64, scratch_operands = 0 : i64, tpu.core_type = #tpu.core_type<tc>, window_params = [{transform_indices = @transform_0, window_bounds = array<i64: 256, 16>}, {transform_indices = @transform_1, window_bounds = array<i64: 32, 8, 8>}, {pipeline_mode = #tpu.pipeline_mode<synchronous>, transform_indices = @transform_2, window_bounds = array<i64: 16, 128>}, {pipeline_mode = #tpu.pipeline_mode<synchronous>, transform_indices = @transform_3, window_bounds = array<i64: 1, 128>}, {pipeline_mode = #tpu.pipeline_mode<synchronous>, transform_indices = @transform_4, window_bounds = array<i64: 128, 256>}, {pipeline_mode = #tpu.pipeline_mode<synchronous>, transform_indices = @transform_5, window_bounds = array<i64: 1, 128>}, {pipeline_mode = #tpu.pipeline_mode<synchronous>, transform_indices = @transform_6, window_bounds = array<i64: 1, 128>}, {transform_indices = @transform_7, window_bounds = array<i64: 1, 1>}, {transform_indices = @transform_8, window_bounds = array<i64: 32, 8, 128>}]} {
    %c0 = arith.constant 0 : index
    %c0_0 = arith.constant 0 : index
    %0 = vector.load %arg1[%c0, %c0_0] : memref<256x16xbf16, #tpu.memory_space<vmem>>, vector<256x16xbf16>
    %c0_1 = arith.constant 0 : index
    %c0_2 = arith.constant 0 : index
    %1 = vector.load %arg3[%c0_1, %c0_2] : memref<16x128xbf16, #tpu.memory_space<vmem>>, vector<16x128xbf16>
    %cst = arith.constant dense<0.000000e+00> : vector<256x128xf32>
    %2 = tpu.matmul %0, %1, %cst {dimension_numbers = #tpu.dot_dimension_numbers<[1], [0], [0], [1], [0, 0, 1, 1], [], []>} : vector<256x16xbf16>, vector<16x128xbf16>, vector<256x128xf32> -> vector<256x128xf32>
    %c0_3 = arith.constant 0 : index
    %c0_4 = arith.constant 0 : index
    %3 = vector.load %arg4[%c0_3, %c0_4] : memref<1x128xf32, #tpu.memory_space<vmem>>, vector<1x128xf32>
    %4 = vector.broadcast %3 : vector<1x128xf32> to vector<256x128xf32>
    %5 = arith.addf %2, %4 : vector<256x128xf32>
    %6 = arith.truncf %5 : vector<256x128xf32> to vector<256x128xbf16>
    %c0_5 = arith.constant 0 : index
    %c0_6 = arith.constant 0 : index
    %7 = vector.load %arg5[%c0_5, %c0_6] : memref<128x256xbf16, #tpu.memory_space<vmem>>, vector<128x256xbf16>
    %cst_7 = arith.constant dense<0.000000e+00> : vector<256x256xf32>
    %8 = tpu.matmul %6, %7, %cst_7 {dimension_numbers = #tpu.dot_dimension_numbers<[1], [0], [0], [1], [0, 0, 1, 1], [], []>} : vector<256x128xbf16>, vector<128x256xbf16>, vector<256x256xf32> -> vector<256x256xf32>
    %9 = vector.extract_strided_slice %8 {offsets = [0, 0], sizes = [256, 128], strides = [1, 1]} : vector<256x256xf32> to vector<256x128xf32>
    %10 = vector.shape_cast %9 : vector<256x128xf32> to vector<32x8x128xf32>
    %11 = vector.extract_strided_slice %8 {offsets = [0, 128], sizes = [256, 128], strides = [1, 1]} : vector<256x256xf32> to vector<256x128xf32>
    %12 = vector.shape_cast %11 : vector<256x128xf32> to vector<32x8x128xf32>
    %13 = vector.shape_cast %10 : vector<32x8x128xf32> to vector<32x8x1x128xf32>
    %14 = vector.shape_cast %12 : vector<32x8x128xf32> to vector<32x1x8x128xf32>
    %15 = vector.broadcast %13 : vector<32x8x1x128xf32> to vector<32x8x8x128xf32>
    %16 = vector.broadcast %14 : vector<32x1x8x128xf32> to vector<32x8x8x128xf32>
    %17 = arith.addf %15, %16 : vector<32x8x8x128xf32>
    %c0_8 = arith.constant 0 : index
    %c0_9 = arith.constant 0 : index
    %18 = vector.load %arg6[%c0_8, %c0_9] : memref<1x128xf32, #tpu.memory_space<vmem>>, vector<1x128xf32>
    %19 = vector.shape_cast %18 : vector<1x128xf32> to vector<1x1x1x128xf32>
    %20 = vector.broadcast %19 : vector<1x1x1x128xf32> to vector<32x8x8x128xf32>
    %21 = arith.addf %17, %20 : vector<32x8x8x128xf32>
    %cst_10 = arith.constant 0.000000e+00 : f32
    %22 = vector.broadcast %cst_10 : f32 to vector<32x8x8x128xf32>
    %23 = arith.maximumf %21, %22 : vector<32x8x8x128xf32>
    %c0_11 = arith.constant 0 : index
    %c0_12 = arith.constant 0 : index
    %24 = vector.load %arg7[%c0_11, %c0_12] : memref<1x128xf32, #tpu.memory_space<vmem>>, vector<1x128xf32>
    %25 = vector.shape_cast %24 : vector<1x128xf32> to vector<1x1x1x128xf32>
    %26 = vector.broadcast %25 : vector<1x1x1x128xf32> to vector<32x8x8x128xf32>
    %27 = arith.mulf %23, %26 : vector<32x8x8x128xf32>
    %cst_13 = arith.constant dense<0.000000e+00> : vector<32x8x8xf32>
    %28 = vector.multi_reduction <add>, %27, %cst_13 [3] : vector<32x8x8x128xf32> to vector<32x8x8xf32>
    %c0_14 = arith.constant 0 : index
    %c0_15 = arith.constant 0 : index
    %29 = memref.load %arg8[%c0_14, %c0_15] : memref<1x1xf32, #tpu.memory_space<smem>>
    %30 = vector.broadcast %29 : f32 to vector<32x8x8xf32>
    %31 = arith.addf %28, %30 : vector<32x8x8xf32>
    %cst_16 = arith.constant 0.000000e+00 : f32
    %32 = vector.broadcast %cst_16 : f32 to vector<32x8x8xf32>
    %33 = arith.cmpf oge, %31, %32 : vector<32x8x8xf32>
    %cst_17 = arith.constant 0.00999999977 : f32
    %34 = vector.broadcast %cst_17 : f32 to vector<32x8x8xf32>
    %35 = arith.mulf %34, %31 : vector<32x8x8xf32>
    %36 = arith.select %33, %31, %35 : vector<32x8x8xi1>, vector<32x8x8xf32>
    %c0_18 = arith.constant 0 : index
    %c0_19 = arith.constant 0 : index
    %c0_20 = arith.constant 0 : index
    %37 = vector.load %arg2[%c0_18, %c0_19, %c0_20] : memref<32x8x8xbf16, #tpu.memory_space<vmem>>, vector<32x8x8xbf16>
    %38 = arith.extf %37 : vector<32x8x8xbf16> to vector<32x8x8xf32>
    %cst_21 = arith.constant 0.000000e+00 : f32
    %39 = vector.broadcast %cst_21 : f32 to vector<32x8x8xf32>
    %40 = arith.cmpf oeq, %38, %39 : vector<32x8x8xf32>
    %cst_22 = arith.constant -1.000000e+09 : f32
    %41 = vector.broadcast %cst_22 : f32 to vector<32x8x8xf32>
    %42 = arith.select %40, %41, %36 : vector<32x8x8xi1>, vector<32x8x8xf32>
    %cst_23 = arith.constant dense<0xFF800000> : vector<32x8xf32>
    %43 = vector.multi_reduction <maximumf>, %42, %cst_23 [2] : vector<32x8x8xf32> to vector<32x8xf32>
    %44 = vector.shape_cast %43 : vector<32x8xf32> to vector<32x8x1xf32>
    %45 = vector.broadcast %44 : vector<32x8x1xf32> to vector<32x8x8xf32>
    %46 = arith.subf %42, %45 : vector<32x8x8xf32>
    %47 = math.exp %46 : vector<32x8x8xf32>
    %cst_24 = arith.constant dense<0.000000e+00> : vector<32x8xf32>
    %48 = vector.multi_reduction <add>, %47, %cst_24 [2] : vector<32x8x8xf32> to vector<32x8xf32>
    %49 = vector.shape_cast %48 : vector<32x8xf32> to vector<32x8x1xf32>
    %50 = tpu.reciprocal %49 {approx = true} : vector<32x8x1xf32> -> vector<32x8x1xf32>
    %51 = vector.broadcast %50 : vector<32x8x1xf32> to vector<32x8x8xf32>
    %52 = arith.mulf %47, %51 : vector<32x8x8xf32>
    %53 = arith.mulf %52, %38 : vector<32x8x8xf32>
    %54 = vector.shape_cast %5 : vector<256x128xf32> to vector<32x8x128xf32>
    %55 = arith.truncf %54 : vector<32x8x128xf32> to vector<32x8x128xbf16>
    %56 = arith.truncf %53 : vector<32x8x8xf32> to vector<32x8x8xbf16>
    "tpu.trace_start"() <{level = 10 : i32, message = "bij,bjm->bim"}> : () -> ()
    %cst_25 = arith.constant dense<0.000000e+00> : vector<32x8x128xf32>
    %57 = tpu.matmul %56, %55, %cst_25 {dimension_numbers = #tpu.dot_dimension_numbers<[2], [1], [1], [2], [0, 0, 0, 1, 1, 2], [0], [0]>} : vector<32x8x8xbf16>, vector<32x8x128xbf16>, vector<32x8x128xf32> -> vector<32x8x128xf32>
    "tpu.trace_stop"() : () -> ()
    %cst_26 = arith.constant 0.000000e+00 : f32
    %58 = vector.broadcast %cst_26 : f32 to vector<32x8x128xf32>
    %59 = arith.maximumf %57, %58 : vector<32x8x128xf32>
    %c0_27 = arith.constant 0 : index
    %c0_28 = arith.constant 0 : index
    %c0_29 = arith.constant 0 : index
    %60 = vector.load %arg9[%c0_27, %c0_28, %c0_29] : memref<32x8x128xf32, #tpu.memory_space<vmem>>, vector<32x8x128xf32>
    tpu.vector_store %arg9[%c0_27, %c0_28, %c0_29], %59 {strides = array<i32>} : memref<32x8x128xf32, #tpu.memory_space<vmem>>, vector<32x8x128xf32>,
    return
  }
  func.func @transform_0(%arg0: i32) -> (i32, i32) {
    %c0_i32 = arith.constant 0 : i32
    %c0_i32_0 = arith.constant 0 : i32
    return %arg0, %c0_i32 : i32, i32
  }
  func.func @transform_1(%arg0: i32) -> (i32, i32, i32) {
    %c0_i32 = arith.constant 0 : i32
    %c0_i32_0 = arith.constant 0 : i32
    %c0_i32_1 = arith.constant 0 : i32
    return %arg0, %c0_i32, %c0_i32_0 : i32, i32, i32
  }
  func.func @transform_2(%arg0: i32) -> (i32, i32) {
    %c0_i32 = arith.constant 0 : i32
    %c0_i32_0 = arith.constant 0 : i32
    %c0_i32_1 = arith.constant 0 : i32
    return %c0_i32, %c0_i32_0 : i32, i32
  }
  func.func @transform_3(%arg0: i32) -> (i32, i32) {
    %c0_i32 = arith.constant 0 : i32
    %c0_i32_0 = arith.constant 0 : i32
    %c0_i32_1 = arith.constant 0 : i32
    return %c0_i32, %c0_i32_0 : i32, i32
  }
  func.func @transform_4(%arg0: i32) -> (i32, i32) {
    %c0_i32 = arith.constant 0 : i32
    %c0_i32_0 = arith.constant 0 : i32
    %c0_i32_1 = arith.constant 0 : i32
    return %c0_i32, %c0_i32_0 : i32, i32
  }
  func.func @transform_5(%arg0: i32) -> (i32, i32) {
    %c0_i32 = arith.constant 0 : i32
    %c0_i32_0 = arith.constant 0 : i32
    %c0_i32_1 = arith.constant 0 : i32
    return %c0_i32, %c0_i32_0 : i32, i32
  }
  func.func @transform_6(%arg0: i32) -> (i32, i32) {
    %c0_i32 = arith.constant 0 : i32
    %c0_i32_0 = arith.constant 0 : i32
    %c0_i32_1 = arith.constant 0 : i32
    return %c0_i32, %c0_i32_0 : i32, i32
  }
  func.func @transform_7(%arg0: i32) -> (i32, i32) {
    %c0_i32 = arith.constant 0 : i32
    %c0_i32_0 = arith.constant 0 : i32
    %c0_i32_1 = arith.constant 0 : i32
    return %c0_i32, %c0_i32_0 : i32, i32
  }
  func.func @transform_8(%arg0: i32) -> (i32, i32, i32) {
    %c0_i32 = arith.constant 0 : i32
    %c0_i32_0 = arith.constant 0 : i32
    %c0_i32_1 = arith.constant 0 : i32
    return %arg0, %c0_i32, %c0_i32_0 : i32, i32, i32
  }
}

</mosaic_0001>

<bundles_post_ra>
// kernel: tpu_custom_call.1
= control target key start
LH: loop header
LB: loop body
LE: loop exit
PB: predicated region body
PF: predicated region fallthrough
CT: control target
= control target key end

     0   :  { %vm159_vm0 = vcmask 130048   ;;  %s16690_s0 = inlined_call_operand.vmem [shape: bf16[256,16], index: 0, kind: input, shape index: {}]   ;;  %s16691_s1 = inlined_call_operand.vmem [shape: bf16[32,8,8], index: 1, kind: input, shape index: {}]   ;;  %s16692_s2 = inlined_call_operand.vmem [shape: bf16[16,128], index: 2, kind: input, shape index: {}]   ;;  %s16693_s3 = inlined_call_operand.vmem [shape: f32[1,128], index: 3, kind: input, shape index: {}]   ;;  %s16694_s4 = inlined_call_operand.vmem [shape: bf16[128,256], index: 4, kind: input, shape index: {}]   ;;  %s16695_s5 = inlined_call_operand.vmem [shape: f32[1,128], index: 5, kind: input, shape index: {}]   ;;  %s16696_s6 = inlined_call_operand.vmem [shape: f32[1,128], index: 6, kind: input, shape index: {}]   ;;  %s16697_s7 = inlined_call_operand.<no memory space> [shape: f32[1,1], index: 7, kind: input, shape index: {}]   ;;  %s16698_s8 = inlined_call_operand.hbm [shape: f32[32,8,128], index: 8, kind: output, shape index: {}]  }
   0x1   :  { %v10282_v0 = vld [vmem:[%s16692_s2] sm:$0xff]   ;;  %v10284_v2 = vld [vmem:[%s16690_s0 + $0x8] sm:$0xff]   ;;  %v10285_v3 = vld [vmem:[%s16690_s0 + $0x10] sm:$0xff]  }
   0x2   :  { %v10283_v1 = vld [vmem:[%s16690_s0] sm:$0xff]   ;;  %10049 = vmatprep.subr.bf16.mxu0 %v10282_v0  ;;  %v10286_v4 = vld [vmem:[%s16690_s0 + $0x18] sm:$0xff]   ;;  %v10288_v12 = vld [vmem:[%s16690_s0 + $0x28] sm:$0xff]  }
   0x3   :  { %10050 = vmatpush3.bf16.msra.mxu0 %v10282_v0  ;;  %10051 = vmatprep.mubr.msk.bf16.mxu0 %vm159_vm0, %v10283_v1  ;;  %v10291_v5 = vld [vmem:[%s16694_s4 + $0x74] ss:$8 sps:$4 sm:$0xff]   ;;  %v10293_v6 = vld [vmem:[%s16694_s4 + $0x70] ss:$8 sps:$4 sm:$0xff]   ;;  %v10287_v7 = vld [vmem:[%s16690_s0 + $0x20] sm:$0xff]  }
   0x4   :  { %481 = vmatprep.subr.bf16.mxu1 %v10291_v5  ;;  %v10294_v8 = vld [vmem:[%s16694_s4 + $0x64] ss:$8 sps:$4 sm:$0xff]   ;;  %v10296_v9 = vld [vmem:[%s16694_s4 + $0x60] ss:$8 sps:$4 sm:$0xff]   ;;  %v10297_v10 = vld [vmem:[%s16694_s4 + $0x54] ss:$8 sps:$4 sm:$0xff]  }
   0x5   :  { %482 = vmatpush1.bf16.msra.mxu1 %v10293_v6  ;;  %v10299_v11 = vld [vmem:[%s16694_s4 + $0x50] ss:$8 sps:$4 sm:$0xff]   ;;  %v10300_v13 = vld [vmem:[%s16694_s4 + $0x44] ss:$8 sps:$4 sm:$0xff]   ;;  %v10302_v15 = vld [vmem:[%s16694_s4 + $0x40] ss:$8 sps:$4 sm:$0xff]  }
   0x6   :  { %10052 = vmatmul.mubr.msk.bf16.vlgmr.msra.gmra.mxu0 %vm159_vm0, %v10284_v2  ;;  %483 = vmatprep.subr.bf16.mxu1 %v10294_v8  ;;  %v10289_v14 = vld [vmem:[%s16690_s0 + $0x30] sm:$0xff]  }
   0x7   :  { %10055 = vmatprep.mubr.msk.bf16.mxu0 %vm159_vm0, %v10285_v3  ;;  %v10303_v16 = vld [vmem:[%s16694_s4 + $0x34] ss:$8 sps:$4 sm:$0xff]  }
   0x9   :  { %484 = vmatpush1.bf16.msra.mxu1 %v10296_v9 }
   0xa   :  { %485 = vmatprep.subr.bf16.mxu1 %v10297_v10 }
   0xd   :  { %486 = vmatpush1.bf16.msra.mxu1 %v10299_v11 }
   0xe   :  { %10056 = vmatmul.mubr.msk.bf16.gmra.mxu0 %vm159_vm0, %v10286_v4  ;;  %487 = vmatprep.subr.bf16.mxu1 %v10300_v13 }
   0xf   :  { %10059 = vmatprep.mubr.msk.bf16.mxu0 %vm159_vm0, %v10287_v7 }
  0x16   :  { %10060 = vmatmul.mubr.msk.bf16.gmra.mxu0 %vm159_vm0, %v10288_v12 }
  0x17   :  { %10063 = vmatprep.mubr.msk.bf16.mxu0 %vm159_vm0, %v10289_v14 }
  0x18   :  { %14 = vsyncpa [#allocation4], 0  ;;  %488 = vmatpush1.bf16.msra.mxu1 %v10302_v15  ;;  %v10305_v17 = vld [vmem:[%s16694_s4 + $0x30] ss:$8 sps:$4 sm:$0xff]   ;;  %v10306_v18 = vld [vmem:[%s16694_s4 + $0x24] ss:$8 sps:$4 sm:$0xff]   ;;  %v710_v14 = vlaneseq }
  0x19   :  { %489 = vmatprep.subr.bf16.mxu1 %v10303_v16  ;;  %v10290_v19 = vld [vmem:[%s16690_s0 + $0x38] sm:$0xff]   ;;  %v10308_v20 = vld [vmem:[%s16694_s4 + $0x20] ss:$8 sps:$4 sm:$0xff]   ;;  %v10312_v23 = vld [vmem:[%s16694_s4 + $0x4] ss:$8 sps:$4 sm:$0xff]   ;;  %v16699_v25 = vmov 0.0  }
  0x1a   :  { %v10309_v21 = vld [vmem:[%s16694_s4 + $0x14] ss:$8 sps:$4 sm:$0xff]   ;;  %v10311_v22 = vld [vmem:[%s16694_s4 + $0x10] ss:$8 sps:$4 sm:$0xff]   ;;  %v10314_v24 = vld [vmem:[%s16694_s4] ss:$8 sps:$4 sm:$0xff]   ;;  %10083 = vmatprep.subr.bf16.mxu0 %v16699_v25 }
  0x1b   :  { %v16701_v26 = vmov 0   ;;  %v10315_v27 = vld [vmem:[%s16690_s0 + $0x40] sm:$0xff]   ;;  %v10316_v28 = vld [vmem:[%s16690_s0 + $0x48] sm:$0xff]   ;;  %v10317_v29 = vld [vmem:[%s16690_s0 + $0x50] sm:$0xff]   ;;  %vm8255_vm1 = vcmask 1043456   ;;  %v711_v15 = vshrl.u32 %v710_v14, 7 }
  0x1c   :  { %490 = vmatpush1.bf16.msra.mxu1 %v10305_v17  ;;  %513 = vmatprep.mubr.bf16.mxu1 %v16701_v26  ;;  %v10318_v30 = vld [vmem:[%s16690_s0 + $0x58] sm:$0xff]   ;;  %v10319_v31 = vld [vmem:[%s16690_s0 + $0x60] sm:$0xff]   ;;  %v10320_v32 = vld [vmem:[%s16690_s0 + $0x68] sm:$0xff]   ;;  %v6483_v16 = vand.u32 127, %v710_v14  ;;  %vm7508_vm4 = vcmask 1041409   ;;  %vm7510_vm5 = vcmask 1042434  }
  0x1d   :  { %491 = vmatprep.subr.bf16.mxu1 %v10306_v18  ;;  %v10652_v34 = vld [vmem:[%s16693_s3] ss:$0 sm:$0xff]  ;;  %vm7512_vm7 = vcmask 1043459  }
  0x1e   :  { %10064 = vmatmul.mubr.msk.bf16.gmra.mxu0 %vm159_vm0, %v10290_v19  ;;  %v10724_v17 = vsub.s32 %v6483_v16, %v711_v15 }
  0x1f   :  { %10067 = vmatprep.mubr.msk.bf16.mxu0 %vm159_vm0, %v10315_v27 }
  0x20   :  { %492 = vmatpush1.bf16.msra.mxu1 %v10308_v20 }
  0x21   :  { %493 = vmatprep.subr.bf16.mxu1 %v10309_v21  ;;  %v10321_v21 = vld [vmem:[%s16690_s0 + $0x70] sm:$0xff]  }
  0x24   :  { %494 = vmatpush1.bf16.msra.mxu1 %v10311_v22  ;;  %v10322_v22 = vld [vmem:[%s16690_s0 + $0x78] sm:$0xff]  }
  0x25   :  { %495 = vmatprep.subr.bf16.mxu1 %v10312_v23 }
  0x26   :  { %10068 = vmatmul.mubr.msk.bf16.gmra.mxu0 %vm159_vm0, %v10316_v28 }
  0x27   :  { %10071 = vmatprep.mubr.msk.bf16.mxu0 %vm159_vm0, %v10317_v29 }
  0x28   :  { %496 = vmatpush1.bf16.msra.mxu1 %v10314_v24 }
  0x29   :  { %10155 = vmatprep.subr.bf16.mxu1 %v16699_v25 }
  0x2e   :  { %10072 = vmatmul.mubr.msk.bf16.gmra.mxu0 %vm159_vm0, %v10318_v30 }
  0x2f   :  { %10075 = vmatprep.mubr.msk.bf16.mxu0 %vm159_vm0, %v10319_v31 }
  0x36   :  { %10076 = vmatmul.mubr.msk.bf16.gmra.mxu0 %vm159_vm0, %v10320_v32 }
  0x37   :  { %10079 = vmatprep.mubr.msk.bf16.mxu0 %vm159_vm0, %v10321_v21 }
  0x3e   :  { %10080 = vmatmul.mubr.msk.bf16.gmra.mxu0 %vm159_vm0, %v10322_v22 }
  0xc6   :  { %v10053_v33 = vpop.f32.mrf.mxu0 }
  0xc7   :  { %v10666_v48 = vadd.f32 %v10053_v33, %v10652_v34 }
  0xc8   :  { %v242_v35 = vpop.f32.mrf.mxu0 }
  0xc9   :  { %v243_v36 = vadd.f32 %v10652_v34, %v242_v35  ;;  %16940 = vst [vmem:[#allocation8_spill] sm:$0xff] %v10666_v48 }
  0xca   :  { %v10054_v37 = vpop.f32.mrf.mxu0 }
  0xcb   :  { %v8188_v38 = vpack.c.bf16 %v243_v36, %v243_v36  ;;  %v10663_v46 = vadd.f32 %v10054_v37, %v10652_v34 }
  0xcc   :  { %v245_v39 = vpop.f32.mrf.mxu0 }
  0xcd   :  { %v10656_v40 = vadd.f32 %v10652_v34, %v245_v39  ;;  %v8257_v41 = vsel %vm8255_vm1, %v8188_v38, 0  ;;  %16939 = vst [vmem:[#allocation7_spill] sm:$0xff] %v10663_v46  ;;  %v370_v50 = vpack.c.bf16 %v10663_v46, %v10666_v48 }
  0xce   :  { %10084 = vmatpush3.bf16.msra.mxu0 %v8257_v41  ;;  %v10057_v42 = vpop.f32.mrf.mxu0 }
  0xcf   :  { %16938 = vst [vmem:[#allocation6_spill] sm:$0xff] %v10656_v40  ;;  %v369_v43 = vpack.c.bf16 %v10656_v40, %v243_v36  ;;  %10089 = vmatprep.subr.bf16.mxu0 %v16699_v25  ;;  %v10680_v59 = vadd.f32 %v10057_v42, %v10652_v34 }
  0xd0   :  { %v258_v44 = vpop.f32.mrf.mxu0 }
  0xd1   :  { %514 = vmatmul.mubr.bf16.vlgmr.msra.gmra.mxu1 %v369_v43  ;;  %v10671_v52 = vadd.f32 %v10652_v34, %v258_v44  ;;  %16943 = vst [vmem:[#allocation11_spill] sm:$0xff] %v10680_v59  ;;  %v10489_v44 = vmov 1966171168  }
  0xd2   :  { %523 = vmatprep.mubr.bf16.mxu1 %v16701_v26  ;;  %v10058_v45 = vpop.f32.mrf.mxu0 }
  0xd3   :  { %16941 = vst [vmem:[#allocation9_spill] sm:$0xff] %v10671_v52  ;;  %v10683_v60 = vadd.f32 %v10058_v45, %v10652_v34  ;;  %v708_v45 = vunpack.c.l.s4 %v10489_v44 }
  0xd4   :  { %v261_v47 = vpop.f32.mrf.mxu0 }
  0xd5   :  { %v10674_v53 = vadd.f32 %v10652_v34, %v261_v47  ;;  %16944 = vst [vmem:[#allocation12_spill] sm:$0xff] %v10683_v60  ;;  %v372_v63 = vpack.c.bf16 %v10683_v60, %v10680_v59  ;;  %v709_v47 = vunpack.c.0.s8 %v708_v45 }
  0xd6   :  { %v10061_v49 = vpop.f32.mrf.mxu0 }
  0xd7   :  { %16942 = vst [vmem:[#allocation10_spill] sm:$0xff] %v10674_v53  ;;  %v371_v56 = vpack.c.bf16 %v10674_v53, %v10671_v52  ;;  %v10701_v4 = vadd.f32 %v10061_v49, %v10652_v34  ;;  %v10770_v49 = vsub.s32 %v709_v47, %v711_v15 }
  0xd8   :  { %v274_v51 = vpop.f32.mrf.mxu0 }
  0xd9   :  { %524 = vmatmul.mubr.bf16.gmra.mxu1 %v370_v50  ;;  %v10692_v1 = vadd.f32 %v10652_v34, %v274_v51  ;;  %16947 = vst [vmem:[#allocation15_spill] sm:$0xff] %v10701_v4 }
  0xda   :  { %533 = vmatprep.mubr.bf16.mxu1 %v16701_v26  ;;  %v10062_v54 = vpop.f32.mrf.mxu0 }
  0xdb   :  { %16945 = vst [vmem:[#allocation13_spill] sm:$0xff] %v10692_v1  ;;  %v10704_v5 = vadd.f32 %v10062_v54, %v10652_v34 }
  0xdc   :  { %v277_v55 = vpop.f32.mrf.mxu0 }
  0xdd   :  { %v10695_v2 = vadd.f32 %v10652_v34, %v277_v55  ;;  %16948 = vst [vmem:[#allocation16_spill] sm:$0xff] %v10704_v5  ;;  %v374_v7 = vpack.c.bf16 %v10704_v5, %v10701_v4 }
  0xde   :  { %v10065_v57 = vpop.f32.mrf.mxu0 }
  0xdf   :  { %16946 = vst [vmem:[#allocation14_spill] sm:$0xff] %v10695_v2  ;;  %v373_v3 = vpack.c.bf16 %v10695_v2, %v10692_v1  ;;  %v10715_v11 = vadd.f32 %v10065_v57, %v10652_v34 }
  0xe0   :  { %v290_v58 = vpop.f32.mrf.mxu0 }
  0xe1   :  { %534 = vmatmul.mubr.bf16.gmra.mxu1 %v371_v56  ;;  %v291_v61 = vadd.f32 %v10652_v34, %v290_v58  ;;  %16950 = vst [vmem:[#allocation18_spill] sm:$0xff] %v10715_v11  ;;  %v10774_v56 = vsub.s32 0, %v711_v15 }
  0xe2   :  { %543 = vmatprep.mubr.bf16.mxu1 %v16701_v26  ;;  %v10066_v6 = vpop.f32.mrf.mxu0 }
  0xe3   :  { %v8200_v62 = vpack.c.bf16 %v291_v61, %v291_v61  ;;  %v10718_v12 = vadd.f32 %v10066_v6, %v10652_v34 }
  0xe4   :  { %v293_v8 = vpop.f32.mrf.mxu0 }
  0xe5   :  { %v8809_v0 = vsel %vm8255_vm1, %v8200_v62, 0  ;;  %v10710_v9 = vadd.f32 %v10652_v34, %v293_v8  ;;  %16951 = vst [vmem:[#allocation19_spill] sm:$0xff] %v10718_v12  ;;  %v376_v13 = vpack.c.bf16 %v10718_v12, %v10715_v11 }
  0xe6   :  { %10156 = vmatpush3.bf16.msra.mxu1 %v8809_v0  ;;  %v10069_v18 = vpop.f32.mrf.mxu0 }
  0xe7   :  { %10167 = vmatprep.subr.bf16.mxu1 %v16699_v25  ;;  %16949 = vst [vmem:[#allocation17_spill] sm:$0xff] %v10710_v9  ;;  %v375_v10 = vpack.c.bf16 %v10710_v9, %v291_v61  ;;  %v10743_v29 = vadd.f32 %v10069_v18, %v10652_v34 }
  0xe8   :  { %v306_v19 = vpop.f32.mrf.mxu0 }
  0xe9   :  { %544 = vmatmul.mubr.bf16.gmra.mxu1 %v372_v63  ;;  %v10733_v23 = vadd.f32 %v10652_v34, %v306_v19  ;;  %16954 = vst [vmem:[#allocation22_spill] sm:$0xff] %v10743_v29 }
  0xea   :  { %553 = vmatprep.mubr.bf16.mxu1 %v16701_v26  ;;  %v10070_v20 = vpop.f32.mrf.mxu0 }
  0xeb   :  { %16952 = vst [vmem:[#allocation20_spill] sm:$0xff] %v10733_v23  ;;  %v10746_v30 = vadd.f32 %v10070_v20, %v10652_v34 }
  0xec   :  { %v309_v24 = vpop.f32.mrf.mxu0 }
  0xed   :  { %v10738_v27 = vadd.f32 %v10652_v34, %v309_v24  ;;  %16955 = vst [vmem:[#allocation23_spill] sm:$0xff] %v10746_v30  ;;  %v378_v31 = vpack.c.bf16 %v10746_v30, %v10743_v29  ;;  %v10795_v24 = vld [vmem:[%s16696_s6] ss:$0 sm:$0xff] }
  0xee   :  { %v10073_v32 = vpop.f32.mrf.mxu0 }
  0xef   :  { %16953 = vst [vmem:[#allocation21_spill] sm:$0xff] %v10738_v27  ;;  %v377_v28 = vpack.c.bf16 %v10738_v27, %v10733_v23  ;;  %v10761_v41 = vadd.f32 %v10073_v32, %v10652_v34 }
  0xf0   :  { %v322_v33 = vpop.f32.mrf.mxu0 }
  0xf1   :  { %554 = vmatmul.mubr.bf16.gmra.mxu1 %v373_v3  ;;  %v10753_v36 = vadd.f32 %v10652_v34, %v322_v33  ;;  %16958 = vst [vmem:[#allocation26_spill] sm:$0xff] %v10761_v41 }
  0xf2   :  { %563 = vmatprep.mubr.bf16.mxu1 %v16701_v26  ;;  %v10074_v35 = vpop.f32.mrf.mxu0 }
  0xf3   :  { %16956 = vst [vmem:[#allocation24_spill] sm:$0xff] %v10753_v36  ;;  %v10764_v42 = vadd.f32 %v10074_v35, %v10652_v34 }
  0xf4   :  { %v325_v37 = vpop.f32.mrf.mxu0 }
  0xf5   :  { %v10756_v38 = vadd.f32 %v10652_v34, %v325_v37  ;;  %16959 = vst [vmem:[#allocation27_spill] sm:$0xff] %v10764_v42  ;;  %v380_v43 = vpack.c.bf16 %v10764_v42, %v10761_v41 }
  0xf7   :  { %16957 = vst [vmem:[#allocation25_spill] sm:$0xff] %v10756_v38  ;;  %v379_v39 = vpack.c.bf16 %v10756_v38, %v10753_v36 }
  0xf9   :  { %564 = vmatmul.mubr.bf16.gmra.mxu1 %v374_v7 }
  0xfa   :  { %573 = vmatprep.mubr.bf16.mxu1 %v16701_v26 }
 0x101   :  { %574 = vmatmul.mubr.bf16.gmra.mxu1 %v375_v10 }
 0x102   :  { %583 = vmatprep.mubr.bf16.mxu1 %v16701_v26 }
 0x109   :  { %584 = vmatmul.mubr.bf16.gmra.mxu1 %v376_v13  ;;  %v10785_v13 = vld [vmem:[%s16695_s5] ss:$0 sm:$0xff] }
 0x10a   :  { %593 = vmatprep.mubr.bf16.mxu1 %v16701_v26 }
 0x111   :  { %594 = vmatmul.mubr.bf16.gmra.mxu1 %v377_v28 }
 0x112   :  { %603 = vmatprep.mubr.bf16.mxu1 %v16701_v26 }
 0x119   :  { %604 = vmatmul.mubr.bf16.gmra.mxu1 %v378_v31 }
 0x11a   :  { %613 = vmatprep.mubr.bf16.mxu1 %v16701_v26 }
 0x121   :  { %614 = vmatmul.mubr.bf16.gmra.mxu1 %v379_v39 }
 0x122   :  { %623 = vmatprep.mubr.bf16.mxu1 %v16701_v26 }
 0x129   :  { %624 = vmatmul.mubr.bf16.gmra.mxu1 %v380_v43 }
 0x12a   :  { %633 = vmatprep.mubr.bf16.mxu1 %v16701_v26 }
 0x191   :  { %v515_v50 = vpop.f32.mrf.mxu1 }
 0x192   :  { %v713_v51 = vrot.slane %v515_v50, %v10770_v49  ;;  %v706_v54 = vcombine.high %v515_v50, %v515_v50 }
 0x193   :  { %v517_v34 = vpop.f32.mrf.mxu1 }
 0x194   :  { %v729_v55 = vrot.slane %v713_v51, %v10770_v49  ;;  %v721_v57 = vcombine.high %v713_v51, %v713_v51  ;;  %v720_v58 = vrot.slane %v706_v54, %v10770_v49 }
 0x195   :  { %v519_v61 = vpop.f32.mrf.mxu1 }
 0x196   :  { %v2277_v62 = vrot.slane %v729_v55, %v10774_v56  ;;  %v743_v63 = vrot.slane %v721_v57, %v10770_v49  ;;  %v762_v0 = vrot.slane %v519_v61, %v10770_v49  ;;  %v722_v3 = vcombine.high %v720_v58, %v720_v58 }
 0x197   :  { %v751_v6 = vcombine.high %v729_v55, %v729_v55  ;;  %v736_v8 = vrot.slane %v720_v58, %v10770_v49  ;;  %v755_v22 = vcombine.high %v519_v61, %v519_v61  ;;  %v10805_v61 = vpop.f32.mrf.mxu1 }
 0x198   :  { %v3554_v7 = vadd.f32 %v2277_v62, %v517_v34  ;;  %v2281_v10 = vrot.slane %v743_v63, %v10774_v56  ;;  %v753_v14 = vcombine.high %v743_v63, %v743_v63  ;;  %v770_v15 = vcombine.high %v762_v0, %v762_v0 }
 0x199   :  { %v750_v16 = vrot.slane %v722_v3, %v10770_v49  ;;  %v778_v18 = vrot.slane %v762_v0, %v10770_v49  ;;  %v2285_v20 = vrot.slane %v751_v6, %v10774_v56  ;;  %v2293_v21 = vrot.slane %v736_v8, %v10774_v56 }
 0x19a   :  { %v3817_v19 = vadd.f32 %v10785_v13, %v3554_v7  ;;  %v3555_v28 = vadd.f32 %v2281_v10, %v517_v34  ;;  %v792_v31 = vrot.slane %v770_v15, %v10770_v49  ;;  %v2289_v35 = vrot.slane %v753_v14, %v10774_v56 }
 0x19b   :  { %v3556_v33 = vadd.f32 %v2285_v20, %v517_v34  ;;  %v752_v37 = vcombine.high %v736_v8, %v736_v8  ;;  %v754_v39 = vcombine.high %v750_v16, %v750_v16  ;;  %v2309_v44 = vrot.slane %v778_v18, %v10774_v56 }
 0x19c   :  { %v4073_v32 = vmax.f32 %v3817_v19, 0.0  ;;  %v3818_v43 = vadd.f32 %v10785_v13, %v3555_v28  ;;  %v769_v47 = vrot.slane %v755_v22, %v10770_v49  ;;  %v800_v50 = vcombine.high %v778_v18, %v778_v18 }
 0x19d   :  { %v3819_v51 = vadd.f32 %v10785_v13, %v3556_v33  ;;  %v2313_v54 = vrot.slane %v792_v31, %v10774_v56  ;;  %v3557_v57 = vadd.f32 %v2289_v35, %v517_v34  ;;  %v3558_v58 = vadd.f32 %v2293_v21, %v517_v34 }
 0x19e   :  { %v4336_v45 = vmul.f32 %v10795_v24, %v4073_v32  ;;  %v4074_v55 = vmax.f32 %v3818_v43, 0.0  ;;  %v2297_v63 = vrot.slane %v750_v16, %v10774_v56  ;;  %v2301_v0 = vrot.slane %v752_v37, %v10774_v56 }
 0x19f   :  { %v4075_v62 = vmax.f32 %v3819_v51, 0.0  ;;  %v2305_v3 = vrot.slane %v754_v39, %v10774_v56  ;;  %v3820_v7 = vadd.f32 %v10785_v13, %v3557_v57  ;;  %v3821_v8 = vadd.f32 %v10785_v13, %v3558_v58 }
 0x1a0   :  { %4592 = vadd.xlane.f32.xlu0 %v4336_v45  ;;  %v4337_v6 = vmul.f32 %v10795_v24, %v4074_v55  ;;  %v3562_v10 = vadd.f32 %v2309_v44, %v10805_v61  ;;  %v3559_v15 = vadd.f32 %v2297_v63, %v517_v34  ;;  %v3560_v18 = vadd.f32 %v2301_v0, %v517_v34  ;;  %v525_v55 = vpop.f32.mrf.mxu1 }
 0x1a1   :  { %v4338_v14 = vmul.f32 %v10795_v24, %v4075_v62  ;;  %v3561_v19 = vadd.f32 %v2305_v3, %v517_v34  ;;  %v2317_v20 = vrot.slane %v800_v50, %v10774_v56  ;;  %v4076_v16 = vmax.f32 %v3820_v7, 0.0 }
 0x1a2   :  { %v4077_v21 = vmax.f32 %v3821_v8, 0.0  ;;  %v771_v22 = vcombine.high %v769_v47, %v769_v47  ;;  %v785_v28 = vrot.slane %v769_v47, %v10770_v49  ;;  %v3822_v32 = vadd.f32 %v10785_v13, %v3559_v15 }
 0x1a3   :  { %4596 = vadd.xlane.f32.xlu1 %v4338_v14  ;;  %v3823_v33 = vadd.f32 %v10785_v13, %v3560_v18  ;;  %v802_v35 = vcombine.high %v792_v31, %v792_v31  ;;  %v3825_v39 = vadd.f32 %v10785_v13, %v3562_v10  ;;  %v3563_v34 = vadd.f32 %v2313_v54, %v10805_v61 }
 0x1a4   :  { %4594 = vadd.xlane.f32.xlu0 %v4337_v6  ;;  %v4340_v37 = vmul.f32 %v10795_v24, %v4077_v21  ;;  %v4339_v43 = vmul.f32 %v10795_v24, %v4076_v16  ;;  %v4078_v44 = vmax.f32 %v3822_v32, 0.0  ;;  %v3824_v50 = vadd.f32 %v10785_v13, %v3561_v19 }
 0x1a5   :  { %v4079_v45 = vmax.f32 %v3823_v33, 0.0  ;;  %v3564_v47 = vadd.f32 %v2317_v20, %v10805_v61  ;;  %v799_v51 = vrot.slane %v771_v22, %v10770_v49  ;;  %v2325_v31 = vrot.slane %v785_v28, %v10774_v56  ;;  %v10839_v22 = vpop.f32.mrf.mxu1 }
 0x1a6   :  { %v4081_v58 = vmax.f32 %v3825_v39, 0.0  ;;  %v3826_v54 = vadd.f32 %v10785_v13, %v3563_v34  ;;  %v4341_v62 = vmul.f32 %v10795_v24, %v4078_v44  ;;  %v4080_v63 = vmax.f32 %v3824_v50, 0.0 }
 0x1a7   :  { %4598 = vadd.xlane.f32.xlu1 %v4339_v43  ;;  %v4342_v57 = vmul.f32 %v10795_v24, %v4079_v45  ;;  %v3827_v0 = vadd.f32 %v10785_v13, %v3564_v47  ;;  %v2321_v3 = vrot.slane %v802_v35, %v10774_v56  ;;  %v811_v6 = vrot.slane %v525_v55, %v10770_v49 }
 0x1a8   :  { %4600 = vadd.xlane.f32.xlu0 %v4340_v37  ;;  %v804_v7 = vcombine.high %v525_v55, %v525_v55  ;;  %v4344_v8 = vmul.f32 %v10795_v24, %v4081_v58  ;;  %v4343_v15 = vmul.f32 %v10795_v24, %v4080_v63  ;;  %v4082_v18 = vmax.f32 %v3826_v54, 0.0 }
 0x1a9   :  { %v4083_v10 = vmax.f32 %v3827_v0, 0.0  ;;  %v3565_v14 = vadd.f32 %v2321_v3, %v10805_v61  ;;  %v3566_v19 = vadd.f32 %v2325_v31, %v10805_v61  ;;  %v2329_v20 = vrot.slane %v799_v51, %v10774_v56  ;;  %v529_v31 = vpop.f32.mrf.mxu1 }
 0x1aa   :  { %v819_v21 = vcombine.high %v811_v6, %v811_v6  ;;  %v801_v35 = vcombine.high %v785_v28, %v785_v28  ;;  %v803_v37 = vcombine.high %v799_v51, %v799_v51  ;;  %v818_v34 = vrot.slane %v804_v7, %v10770_v49 }
 0x1ab   :  { %4602 = vadd.xlane.f32.xlu1 %v4341_v62  ;;  %v3828_v16 = vadd.f32 %v10785_v13, %v3565_v14  ;;  %v3829_v32 = vadd.f32 %v10785_v13, %v3566_v19  ;;  %v3567_v33 = vadd.f32 %v2329_v20, %v10805_v61  ;;  %v4346_v39 = vmul.f32 %v10795_v24, %v4083_v10 }
 0x1ac   :  { %4604 = vadd.xlane.f32.xlu0 %v4342_v57  ;;  %v4345_v43 = vmul.f32 %v10795_v24, %v4082_v18  ;;  %v827_v50 = vrot.slane %v811_v6, %v10770_v49  ;;  %v841_v47 = vrot.slane %v819_v21, %v10770_v49  ;;  %v2333_v51 = vrot.slane %v801_v35, %v10774_v56 }
 0x1ad   :  { %v4084_v44 = vmax.f32 %v3828_v16, 0.0  ;;  %v4085_v45 = vmax.f32 %v3829_v32, 0.0  ;;  %v3830_v55 = vadd.f32 %v10785_v13, %v3567_v33  ;;  %v2337_v57 = vrot.slane %v803_v37, %v10774_v56 }
 0x1ae   :  { %v820_v58 = vcombine.high %v818_v34, %v818_v34  ;;  %v853_v63 = vcombine.high %v529_v31, %v529_v31  ;;  %v860_v0 = vrot.slane %v529_v31, %v10770_v49  ;;  %v3568_v3 = vadd.f32 %v2333_v51, %v10805_v61 }
 0x1af   :  { %4606 = vadd.xlane.f32.xlu1 %v4343_v15  ;;  %v4348_v28 = vmul.f32 %v10795_v24, %v4085_v45  ;;  %v4347_v54 = vmul.f32 %v10795_v24, %v4084_v44  ;;  %v4086_v62 = vmax.f32 %v3830_v55, 0.0  ;;  %v3569_v6 = vadd.f32 %v2337_v57, %v10805_v61 }
 0x1b0   :  { %4608 = vadd.xlane.f32.xlu0 %v4344_v8  ;;  %v2341_v7 = vrot.slane %v827_v50, %v10774_v56  ;;  %v2345_v8 = vrot.slane %v841_v47, %v10774_v56  ;;  %v834_v10 = vrot.slane %v818_v34, %v10770_v49  ;;  %v849_v14 = vcombine.high %v827_v50, %v827_v50 }
 0x1b1   :  { %v3831_v15 = vadd.f32 %v10785_v13, %v3568_v3  ;;  %v4349_v18 = vmul.f32 %v10795_v24, %v4086_v62  ;;  %v3832_v19 = vadd.f32 %v10785_v13, %v3569_v6  ;;  %v848_v20 = vrot.slane %v820_v58, %v10770_v49 }
 0x1b2   :  { %v867_v16 = vrot.slane %v853_v63, %v10770_v49  ;;  %v868_v21 = vcombine.high %v860_v0, %v860_v0  ;;  %v876_v32 = vrot.slane %v860_v0, %v10770_v49  ;;  %v3570_v35 = vadd.f32 %v2341_v7, %v10839_v22 }
 0x1b3   :  { %4610 = vadd.xlane.f32.xlu1 %v4345_v43  ;;  %v4087_v61 = vmax.f32 %v3831_v15, 0.0  ;;  %v4088_v33 = vmax.f32 %v3832_v19, 0.0  ;;  %v3571_v37 = vadd.f32 %v2345_v8, %v10839_v22  ;;  %v2349_v34 = vrot.slane %v849_v14, %v10774_v56 }
 0x1b4   :  { %4612 = vadd.xlane.f32.xlu0 %v4346_v39  ;;  %v851_v39 = vcombine.high %v841_v47, %v841_v47  ;;  %v2357_v43 = vrot.slane %v834_v10, %v10774_v56  ;;  %v850_v45 = vcombine.high %v834_v10, %v834_v10  ;;  %v3833_v31 = vadd.f32 %v10785_v13, %v3570_v35 }
 0x1b5   :  { %v4350_v44 = vmul.f32 %v10795_v24, %v4087_v61  ;;  %v4351_v50 = vmul.f32 %v10795_v24, %v4088_v33  ;;  %v852_v55 = vcombine.high %v848_v20, %v848_v20  ;;  %v890_v51 = vrot.slane %v868_v21, %v10770_v49  ;;  %v10889_v33 = vpop.f32.mrf.mxu1 }
 0x1b6   :  { %v898_v57 = vcombine.high %v876_v32, %v876_v32  ;;  %v4089_v58 = vmax.f32 %v3833_v31, 0.0  ;;  %v3834_v47 = vadd.f32 %v10785_v13, %v3571_v37  ;;  %v3572_v62 = vadd.f32 %v2349_v34, %v10839_v22 }
 0x1b7   :  { %4614 = vadd.xlane.f32.xlu1 %v4347_v54  ;;  %v2373_v54 = vrot.slane %v876_v32, %v10774_v56  ;;  %v2353_v63 = vrot.slane %v851_v39, %v10774_v56  ;;  %v3574_v0 = vadd.f32 %v2357_v43, %v10839_v22  ;;  %v2361_v7 = vrot.slane %v848_v20, %v10774_v56 }
 0x1b8   :  { %4616 = vadd.xlane.f32.xlu0 %v4348_v28  ;;  %v869_v28 = vcombine.high %v867_v16, %v867_v16  ;;  %v4352_v3 = vmul.f32 %v10795_v24, %v4089_v58  ;;  %v4090_v6 = vmax.f32 %v3834_v47, 0.0  ;;  %v2365_v8 = vrot.slane %v850_v45, %v10774_v56 }
 0x1b9   :  { %v3835_v10 = vadd.f32 %v10785_v13, %v3572_v62  ;;  %v3573_v14 = vadd.f32 %v2353_v63, %v10839_v22  ;;  %v3837_v15 = vadd.f32 %v10785_v13, %v3574_v0  ;;  %v2377_v19 = vrot.slane %v890_v51, %v10774_v56 }
 0x1ba   :  { %v4353_v21 = vmul.f32 %v10795_v24, %v4090_v6  ;;  %v3575_v61 = vadd.f32 %v2361_v7, %v10839_v22  ;;  %v3576_v32 = vadd.f32 %v2365_v8, %v10839_v22  ;;  %v900_v20 = vcombine.high %v890_v51, %v890_v51 }
 0x1bb   :  { %4618 = vadd.xlane.f32.xlu1 %v4349_v18  ;;  %v2369_v18 = vrot.slane %v852_v55, %v10774_v56  ;;  %v4091_v35 = vmax.f32 %v3835_v10, 0.0  ;;  %v3836_v37 = vadd.f32 %v10785_v13, %v3573_v14  ;;  %v883_v34 = vrot.slane %v867_v16, %v10770_v49 }
 0x1bc   :  { %4620 = vadd.xlane.f32.xlu0 %v4350_v44  ;;  %v2381_v43 = vrot.slane %v898_v57, %v10774_v56  ;;  %v3838_v44 = vadd.f32 %v10785_v13, %v3575_v61  ;;  %v3578_v45 = vadd.f32 %v2373_v54, %v10889_v33  ;;  %v4093_v51 = vmax.f32 %v3837_v15, 0.0 }
 0x1bd   :  { %v3577_v39 = vadd.f32 %v2369_v18, %v10839_v22  ;;  %v4354_v31 = vmul.f32 %v10795_v24, %v4091_v35  ;;  %v4092_v55 = vmax.f32 %v3836_v37, 0.0  ;;  %v3839_v58 = vadd.f32 %v10785_v13, %v3576_v32 }
 0x1be   :  { %v897_v47 = vrot.slane %v869_v28, %v10770_v49  ;;  %v3579_v16 = vadd.f32 %v2377_v19, %v10889_v33  ;;  %v4094_v62 = vmax.f32 %v3838_v44, 0.0  ;;  %v2385_v54 = vrot.slane %v900_v20, %v10774_v56 }
 0x1bf   :  { %4622 = vadd.xlane.f32.xlu1 %v4351_v50  ;;  %v535_v50 = vpop.f32.mrf.mxu1  ;;  %v4355_v57 = vmul.f32 %v10795_v24, %v4092_v55  ;;  %v3840_v63 = vadd.f32 %v10785_v13, %v3577_v39  ;;  %v899_v0 = vcombine.high %v883_v34, %v883_v34  ;;  %v3841_v6 = vadd.f32 %v10785_v13, %v3578_v45 }
 0x1c0   :  { %4624 = vadd.xlane.f32.xlu0 %v4352_v3  ;;  %v909_v22 = vrot.slane %v535_v50, %v10770_v49  ;;  %v902_v3 = vcombine.high %v535_v50, %v535_v50  ;;  %v2389_v7 = vrot.slane %v883_v34, %v10774_v56  ;;  %v4356_v28 = vmul.f32 %v10795_v24, %v4093_v51 }
 0x1c1   :  { %v4095_v8 = vmax.f32 %v3839_v58, 0.0  ;;  %v3580_v10 = vadd.f32 %v2381_v43, %v10889_v33  ;;  %v901_v14 = vcombine.high %v897_v47, %v897_v47  ;;  %v3842_v18 = vadd.f32 %v10785_v13, %v3579_v16  ;;  %v10915_v39 = vpop.f32.mrf.mxu1 }
 0x1c2   :  { %v917_v15 = vcombine.high %v909_v22, %v909_v22  ;;  %v4357_v19 = vmul.f32 %v10795_v24, %v4094_v62  ;;  %v3581_v61 = vadd.f32 %v2385_v54, %v10889_v33  ;;  %v2393_v32 = vrot.slane %v897_v47, %v10774_v56 }
 0x1c3   :  { %4626 = vadd.xlane.f32.xlu1 %v4353_v21  ;;  %v4096_v21 = vmax.f32 %v3840_v63, 0.0  ;;  %v916_v20 = vrot.slane %v902_v3, %v10770_v49  ;;  %v925_v35 = vrot.slane %v909_v22, %v10770_v49  ;;  %v4097_v37 = vmax.f32 %v3841_v6, 0.0  ;;  %v539_v62 = vpop.f32.mrf.mxu1 }
 0x1c4   :  { %4628 = vadd.xlane.f32.xlu0 %v4354_v31  ;;  %v4358_v34 = vmul.f32 %v10795_v24, %v4095_v8  ;;  %v3843_v43 = vadd.f32 %v10785_v13, %v3580_v10  ;;  %v3582_v44 = vadd.f32 %v2389_v7, %v10889_v33  ;;  %v2397_v45 = vrot.slane %v899_v0, %v10774_v56 }
 0x1c5   :  { %v939_v50 = vrot.slane %v917_v15, %v10770_v49  ;;  %v4098_v31 = vmax.f32 %v3842_v18, 0.0  ;;  %v4359_v55 = vmul.f32 %v10795_v24, %v4096_v21  ;;  %v3844_v51 = vadd.f32 %v10785_v13, %v3581_v61 }
 0x1c6   :  { %v3583_v58 = vadd.f32 %v2393_v32, %v10889_v33  ;;  %v2401_v47 = vrot.slane %v901_v14, %v10774_v56  ;;  %v918_v22 = vcombine.high %v916_v20, %v916_v20  ;;  %v947_v16 = vcombine.high %v925_v35, %v925_v35 }
 0x1c7   :  { %4630 = vadd.xlane.f32.xlu1 %v4355_v57  ;;  %v2405_v57 = vrot.slane %v925_v35, %v10774_v56  ;;  %v4360_v63 = vmul.f32 %v10795_v24, %v4097_v37  ;;  %v4099_v54 = vmax.f32 %v3843_v43, 0.0  ;;  %v3845_v0 = vadd.f32 %v10785_v13, %v3582_v44 }
 0x1c8   :  { %4632 = vadd.xlane.f32.xlu0 %v4356_v28  ;;  %v3584_v3 = vadd.f32 %v2397_v45, %v10889_v33  ;;  %v932_v6 = vrot.slane %v916_v20, %v10770_v49  ;;  %v949_v7 = vcombine.high %v939_v50, %v939_v50  ;;  %v2409_v28 = vrot.slane %v939_v50, %v10774_v56  ;;  %v10939_v20 = vpop.f32.mrf.mxu1 }
 0x1c9   :  { %v951_v8 = vcombine.high %v539_v62, %v539_v62  ;;  %v4361_v10 = vmul.f32 %v10795_v24, %v4098_v31  ;;  %v4100_v14 = vmax.f32 %v3844_v51, 0.0  ;;  %v3846_v15 = vadd.f32 %v10785_v13, %v3583_v58 }
 0x1ca   :  { %v3585_v18 = vadd.f32 %v2401_v47, %v10889_v33  ;;  %v958_v21 = vrot.slane %v539_v62, %v10770_v49  ;;  %v3586_v61 = vadd.f32 %v2405_v57, %v10915_v39  ;;  %v2413_v32 = vrot.slane %v947_v16, %v10774_v56  ;;  %v545_v57 = vpop.f32.mrf.mxu1 }
 0x1cb   :  { %4634 = vadd.xlane.f32.xlu1 %v4357_v19  ;;  %v946_v19 = vrot.slane %v918_v22, %v10770_v49  ;;  %v4362_v35 = vmul.f32 %v10795_v24, %v4099_v54  ;;  %v4101_v37 = vmax.f32 %v3845_v0, 0.0  ;;  %v948_v43 = vcombine.high %v932_v6, %v932_v6 }
 0x1cc   :  { %4636 = vadd.xlane.f32.xlu0 %v4358_v34  ;;  %v3847_v34 = vadd.f32 %v10785_v13, %v3584_v3  ;;  %v965_v44 = vrot.slane %v951_v8, %v10770_v49  ;;  %v3587_v33 = vadd.f32 %v2409_v28, %v10915_v39  ;;  %v4363_v45 = vmul.f32 %v10795_v24, %v4100_v14 }
 0x1cd   :  { %v4102_v50 = vmax.f32 %v3846_v15, 0.0  ;;  %v3848_v31 = vadd.f32 %v10785_v13, %v3585_v18  ;;  %v2421_v51 = vrot.slane %v932_v6, %v10774_v56  ;;  %v966_v58 = vcombine.high %v958_v21, %v958_v21 }
 0x1ce   :  { %v10950_v47 = vrot.slane %v958_v21, %v10770_v49  ;;  %v3849_v22 = vadd.f32 %v10785_v13, %v3586_v61  ;;  %v950_v16 = vcombine.high %v946_v19, %v946_v19  ;;  %v4364_v62 = vmul.f32 %v10795_v24, %v4101_v37 }
 0x1cf   :  { %4638 = vadd.xlane.f32.xlu1 %v4359_v55  ;;  %v2417_v55 = vrot.slane %v949_v7, %v10774_v56  ;;  %v3588_v54 = vadd.f32 %v2413_v32, %v10915_v39  ;;  %v967_v0 = vcombine.high %v965_v44, %v965_v44  ;;  %v10956_v3 = vrot.slane %v965_v44, %v10770_v49  ;;  %v10966_v32 = vpop.f32.mrf.mxu1 }
 0x1d0   :  { %4640 = vadd.xlane.f32.xlu0 %v4360_v63  ;;  %v4103_v63 = vmax.f32 %v3847_v34, 0.0  ;;  %v1000_v7 = vcombine.high %v545_v57, %v545_v57  ;;  %v3850_v6 = vadd.f32 %v10785_v13, %v3587_v33  ;;  %v4365_v28 = vmul.f32 %v10795_v24, %v4102_v50 }
 0x1d1   :  { %v4104_v8 = vmax.f32 %v3848_v31, 0.0  ;;  %v2425_v14 = vrot.slane %v946_v19, %v10774_v56  ;;  %v988_v15 = vrot.slane %v966_v58, %v10770_v49  ;;  %v996_v18 = vcombine.high %v10950_v47, %v10950_v47 }
 0x1d2   :  { %v1007_v21 = vrot.slane %v545_v57, %v10770_v49  ;;  %v4105_v61 = vmax.f32 %v3849_v22, 0.0  ;;  %v3851_v37 = vadd.f32 %v10785_v13, %v3588_v54  ;;  %v3590_v34 = vadd.f32 %v2421_v51, %v10915_v39 }
 0x1d3   :  { %4642 = vadd.xlane.f32.xlu1 %v4361_v10  ;;  %v3589_v10 = vadd.f32 %v2417_v55, %v10915_v39  ;;  %v2429_v44 = vrot.slane %v948_v43, %v10774_v56  ;;  %v10973_v19 = vrot.slane %v967_v0, %v10770_v49  ;;  %v997_v33 = vcombine.high %v10956_v3, %v10956_v3 }
 0x1d4   :  { %4644 = vadd.xlane.f32.xlu0 %v4362_v35  ;;  %v4366_v35 = vmul.f32 %v10795_v24, %v4103_v63  ;;  %v4106_v50 = vmax.f32 %v3850_v6, 0.0  ;;  %v4367_v31 = vmul.f32 %v10795_v24, %v4104_v8  ;;  %v3591_v58 = vadd.f32 %v2425_v14, %v10915_v39  ;;  %v549_v63 = vpop.f32.mrf.mxu1 }
 0x1d5   :  { %v3852_v55 = vadd.f32 %v10785_v13, %v3589_v10  ;;  %v2433_v51 = vrot.slane %v950_v16, %v10774_v56  ;;  %v998_v43 = vcombine.high %v988_v15, %v988_v15  ;;  %v2453_v22 = vrot.slane %v10956_v3, %v10774_v56 }
 0x1d6   :  { %v1014_v57 = vrot.slane %v1000_v7, %v10770_v49  ;;  %v4107_v54 = vmax.f32 %v3851_v37, 0.0  ;;  %v3853_v0 = vadd.f32 %v10785_v13, %v3590_v34  ;;  %v3592_v6 = vadd.f32 %v2429_v44, %v10915_v39 }
 0x1d7   :  { %4646 = vadd.xlane.f32.xlu1 %v4363_v45  ;;  %v2437_v45 = vrot.slane %v10950_v47, %v10774_v56  ;;  %v4368_v47 = vmul.f32 %v10795_v24, %v4105_v61  ;;  %v2441_v16 = vrot.slane %v988_v15, %v10774_v56  ;;  %v2445_v8 = vrot.slane %v996_v18, %v10774_v56 }
 0x1d8   :  { %4648 = vadd.xlane.f32.xlu0 %v4364_v62  ;;  %v1015_v62 = vcombine.high %v1007_v21, %v1007_v21  ;;  %v10994_v10 = vrot.slane %v1007_v21, %v10770_v49  ;;  %v4369_v7 = vmul.f32 %v10795_v24, %v4106_v50  ;;  %v4108_v14 = vmax.f32 %v3852_v55, 0.0 }
 0x1d9   :  { %v3854_v61 = vadd.f32 %v10785_v13, %v3591_v58  ;;  %v1016_v37 = vcombine.high %v1014_v57, %v1014_v57  ;;  %v11000_v34 = vrot.slane %v1014_v57, %v10770_v49  ;;  %v1049_v15 = vcombine.high %v549_v63, %v549_v63 }
 0x1da   :  { %v11003_v44 = vrot.slane %v1015_v62, %v10770_v49  ;;  %v4370_v18 = vmul.f32 %v10795_v24, %v4107_v54  ;;  %v4109_v21 = vmax.f32 %v3853_v0, 0.0  ;;  %v3594_v50 = vadd.f32 %v2437_v45, %v10939_v20 }
 0x1db   :  { %4650 = vadd.xlane.f32.xlu1 %v4365_v28  ;;  %v999_v28 = vcombine.high %v10973_v19, %v10973_v19  ;;  %v1045_v55 = vcombine.high %v10994_v10, %v10994_v10  ;;  %v1056_v58 = vrot.slane %v549_v63, %v10770_v49  ;;  %v4371_v57 = vmul.f32 %v10795_v24, %v4108_v14 }
 0x1dc   :  { %4652 = vadd.xlane.f32.xlu0 %v4366_v35  ;;  %v3593_v35 = vadd.f32 %v2433_v51, %v10915_v39  ;;  %v2469_v39 = vrot.slane %v10994_v10, %v10774_v56  ;;  %v3595_v51 = vadd.f32 %v2441_v16, %v10939_v20  ;;  %v4110_v62 = vmax.f32 %v3854_v61, 0.0  ;;  %v11026_v16 = vpop.f32.mrf.mxu1 }
 0x1dd   :  { %v2449_v54 = vrot.slane %v998_v43, %v10774_v56  ;;  %v11018_v45 = vrot.slane %v1016_v37, %v10770_v49  ;;  %v3857_v43 = vadd.f32 %v10785_v13, %v3594_v50  ;;  %v3596_v61 = vadd.f32 %v2445_v8, %v10939_v20 }
 0x1de   :  { %v1063_v37 = vrot.slane %v1049_v15, %v10770_v49  ;;  %v2457_v25 = vrot.slane %v10973_v19, %v10774_v56  ;;  %v4373_v26 = vmul.f32 %v10795_v24, %v4110_v62  ;;  %v11040_v8 = vrot.slane %v1045_v55, %v10774_v56 }
 0x1df   :  { %4654 = vadd.xlane.f32.xlu1 %v4367_v31  ;;  %v3855_v31 = vadd.f32 %v10785_v13, %v3592_v6  ;;  %v1047_v6 = vcombine.high %v11003_v44, %v11003_v44  ;;  %v3597_v50 = vadd.f32 %v2449_v54, %v10939_v20  ;;  %v11043_v0 = vrot.slane %v1056_v58, %v10770_v49 }
 0x1e0   :  { %4656 = vadd.xlane.f32.xlu0 %v4368_v47  ;;  %v3856_v47 = vadd.f32 %v10785_v13, %v3593_v35  ;;  %v2473_v35 = vrot.slane %v11003_v44, %v10774_v56  ;;  %v3598_v55 = vadd.f32 %v2453_v22, %v10939_v20  ;;  %v1065_v54 = vcombine.high %v1063_v37, %v1063_v37 }
 0x1e1   :  { %v4111_v14 = vmax.f32 %v3855_v31, 0.0  ;;  %v555_v31 = vpop.f32.mrf.mxu1  ;;  %v2465_v3 = vrot.slane %v999_v28, %v10774_v56  ;;  %v1048_v22 = vcombine.high %v11018_v45, %v11018_v45  ;;  %v3604_v44 = vadd.f32 %v11040_v8, %v10966_v32 }
 0x1e2   :  { %v1098_v15 = vcombine.high %v555_v31, %v555_v31  ;;  %v11078_v19 = vrot.slane %v1065_v54, %v10770_v49  ;;  %v3603_v10 = vadd.f32 %v2473_v35, %v10966_v32 }
 0x1e3   :  { %4658 = vadd.xlane.f32.xlu1 %v4369_v7  ;;  %v4372_v7 = vmul.f32 %v10795_v24, %v4109_v21  ;;  %v3858_v21 = vadd.f32 %v10785_v13, %v3595_v51  ;;  %v4374_v62 = vmul.f32 %v10795_v24, %v4111_v14  ;;  %v3859_v51 = vadd.f32 %v10785_v13, %v3596_v61 }
 0x1e4   :  { %4660 = vadd.xlane.f32.xlu0 %v4370_v18  ;;  %v1064_v18 = vcombine.high %v1056_v58, %v1056_v58  ;;  %v11056_v58 = vrot.slane %v1063_v37, %v10770_v49  ;;  %v1094_v61 = vcombine.high %v11043_v0, %v11043_v0  ;;  %v1105_v37 = vrot.slane %v555_v31, %v10770_v49 }
 0x1e5   :  { %v4114_v14 = vmax.f32 %v3858_v21, 0.0  ;;  %v4115_v21 = vmax.f32 %v3859_v51, 0.0 }
 0x1e6   :  { %v11059_v63 = vrot.slane %v1064_v18, %v10770_v49  ;;  %v1113_v28 = vcombine.high %v1105_v37, %v1105_v37 }
 0x1e7   :  { %4662 = vadd.xlane.f32.xlu1 %v4371_v57  ;;  %v4112_v57 = vmax.f32 %v3856_v47, 0.0  ;;  %v4113_v47 = vmax.f32 %v3857_v43, 0.0  ;;  %v3860_v43 = vadd.f32 %v10785_v13, %v3597_v50  ;;  %v3861_v50 = vadd.f32 %v10785_v13, %v3598_v55 }
 0x1e8   :  { %4664 = vadd.xlane.f32.xlu0 %v4372_v7  ;;  %v2461_v7 = vrot.slane %v997_v33, %v10774_v56  ;;  %v3599_v33 = vadd.f32 %v2457_v25, %v10939_v20  ;;  %v3601_v55 = vadd.f32 %v2465_v3, %v10939_v20  ;;  %v11107_v3 = vrot.slane %v1105_v37, %v10770_v49 }
 0x1e9   :  { %v4376_v18 = vmul.f32 %v10795_v24, %v4113_v47  ;;  %v11088_v47 = vpop.f32.mrf.mxu1  ;;  %v4116_v51 = vmax.f32 %v3860_v43, 0.0 }
 0x1ea   :  { %v3600_v25 = vadd.f32 %v2461_v7, %v10939_v20  ;;  %v3862_v31 = vadd.f32 %v10785_v13, %v3599_v33  ;;  %v4117_v7 = vmax.f32 %v3861_v50, 0.0  ;;  %v3864_v50 = vadd.f32 %v10785_v13, %v3601_v55 }
 0x1eb   :  { %4666 = vadd.xlane.f32.xlu1 %v4373_v26  ;;  %v4375_v26 = vmul.f32 %v10795_v24, %v4112_v57  ;;  %v1112_v57 = vrot.slane %v1098_v15, %v10770_v49  ;;  %v4377_v15 = vmul.f32 %v10795_v24, %v4114_v14  ;;  %v3602_v14 = vadd.f32 %v2469_v39, %v10966_v32 }
 0x1ec   :  { %4668 = vadd.xlane.f32.xlu0 %v4374_v62  ;;  %v3863_v33 = vadd.f32 %v10785_v13, %v3600_v25  ;;  %v4379_v25 = vmul.f32 %v10795_v24, %v4116_v51  ;;  %v2481_v39 = vrot.slane %v1047_v6, %v10774_v56  ;;  %v1143_v6 = vcombine.high %v11107_v3, %v11107_v3 }
 0x1ed   :  { %v1114_v62 = vcombine.high %v1112_v57, %v1112_v57  ;;  %v11120_v37 = vrot.slane %v1112_v57, %v10770_v49  ;;  %v3865_v35 = vadd.f32 %v10785_v13, %v3602_v14  ;;  %v3866_v14 = vadd.f32 %v10785_v13, %v3603_v10 }
 0x1ee   :  { %v4119_v51 = vmax.f32 %v3863_v33, 0.0  ;;  %v3605_v8 = vadd.f32 %v2481_v39, %v10966_v32  ;;  %v2489_v20 = vrot.slane %v11018_v45, %v10774_v56  ;;  %v16960_v10 = vrot.slane %v11000_v34, %v10774_v56 }
 0x1ef   :  { %4670 = vadd.xlane.f32.xlu1 %v4375_v26  ;;  %v11094_v26 = vrot.slane %v1094_v61, %v10774_v56  ;;  %v4118_v61 = vmax.f32 %v3862_v31, 0.0  ;;  %v11123_v31 = vrot.slane %v1113_v28, %v10770_v49  ;;  %v11126_v55 = vrot.slane %v1114_v62, %v10770_v49  ;;  %v11138_v62 = vpop.f32.mrf.mxu0 }
 0x1f0   :  { %4672 = vadd.xlane.f32.xlu0 %v4376_v18  ;;  %v4378_v18 = vmul.f32 %v10795_v24, %v4115_v21  ;;  %v559_v21 = vpop.f32.mrf.mxu1  ;;  %v4121_v43 = vmax.f32 %v3865_v35, 0.0  ;;  %v3606_v39 = vadd.f32 %v16960_v10, %v10966_v32  ;;  %v16961_v57 = vcombine.high %v11000_v34, %v11000_v34 }
 0x1f1   :  { %v1154_v28 = vrot.slane %v559_v21, %v10770_v49  ;;  %v4381_v33 = vmul.f32 %v10795_v24, %v4118_v61  ;;  %v2497_v35 = vrot.slane %v1048_v22, %v10774_v56  ;;  %v4122_v42 = vmax.f32 %v3866_v14, 0.0 }
 0x1f2   :  { %v2493_v54 = vrot.slane %v16961_v57, %v10774_v56  ;;  %v3868_v34 = vadd.f32 %v10785_v13, %v3605_v8  ;;  %v3607_v57 = vadd.f32 %v2489_v20, %v10966_v32  ;;  %v4384_v45 = vmul.f32 %v10795_v24, %v4121_v43 }
 0x1f3   :  { %4674 = vadd.xlane.f32.xlu1 %v4377_v15  ;;  %v1147_v15 = vcombine.high %v559_v21, %v559_v21  ;;  %v11175_v41 = vrot.slane %v1154_v28, %v10770_v49  ;;  %v11181_v14 = vrot.slane %v1143_v6, %v10774_v56  ;;  %v4385_v43 = vmul.f32 %v10795_v24, %v4122_v42 }
 0x1f4   :  { %4676 = vadd.xlane.f32.xlu0 %v4378_v18  ;;  %v4380_v18 = vmul.f32 %v10795_v24, %v4117_v7  ;;  %v4120_v7 = vmax.f32 %v3864_v50, 0.0  ;;  %v3867_v50 = vadd.f32 %v10785_v13, %v3604_v44  ;;  %v338_v44 = vpop.f32.mrf.mxu0 }
 0x1f5   :  { %v1161_v61 = vrot.slane %v1147_v15, %v10770_v49 }
 0x1f6   :  { %v4383_v10 = vmul.f32 %v10795_v24, %v4120_v7  ;;  %v4123_v22 = vmax.f32 %v3867_v50, 0.0  ;;  %v3608_v7 = vadd.f32 %v2493_v54, %v10966_v32  ;;  %v10078_v21 = vpop.f32.mrf.mxu0  ;;  %v4124_v50 = vmax.f32 %v3868_v34, 0.0 }
 0x1f7   :  { %4678 = vadd.xlane.f32.xlu1 %v4379_v25  ;;  %v11140_v25 = vpop.f32.mrf.mxu1  ;;  %v1163_v15 = vcombine.high %v1161_v61, %v1161_v61  ;;  %v11184_v20 = vrot.slane %v1161_v61, %v10770_v49  ;;  %v3870_v54 = vadd.f32 %v10785_v13, %v3607_v57  ;;  %v1192_v61 = vcombine.high %v11175_v41, %v11175_v41 }
 0x1f8   :  { %4680 = vadd.xlane.f32.xlu0 %v4380_v18  ;;  %v4382_v18 = vmul.f32 %v10795_v24, %v4119_v51  ;;  %v1162_v51 = vcombine.high %v1154_v28, %v1154_v28  ;;  %v3609_v28 = vadd.f32 %v2497_v35, %v10966_v32  ;;  %v3871_v42 = vadd.f32 %v10785_v13, %v3608_v7 }
 0x1f9   :  { %v11196_v6 = vrot.slane %v1163_v15, %v10770_v49  ;;  %v16984_v5 = vcombine.high %v11184_v20, %v11184_v20 }
 0x1fa   :  { %v11187_v8 = vrot.slane %v1162_v51, %v10770_v49  ;;  %v4386_v51 = vmul.f32 %v10795_v24, %v4123_v22 }
 0x1fb   :  { %4682 = vadd.xlane.f32.xlu1 %v4381_v33  ;;  %v565_v33 = vpop.f32.mrf.mxu1 }
 0x1fc   :  { %4684 = vadd.xlane.f32.xlu0 %v4382_v18  ;;  %v1196_v38 = vcombine.high %v565_v33, %v565_v33  ;;  %v3869_v18 = vadd.f32 %v10785_v13, %v3606_v39  ;;  %v11233_v39 = vrot.slane %v1192_v61, %v10774_v56 }
 0x1fd   :  { %v11218_v7 = vpop.f32.mrf.mxu1 }
 0x1fe   :  { %v1210_v32 = vrot.slane %v1196_v38, %v10770_v49  ;;  %v4125_v35 = vmax.f32 %v3869_v18, 0.0  ;;  %v16963_v38 = vrot.slane %v11059_v63, %v10774_v56  ;;  %v341_v18 = vpop.f32.mrf.mxu0 }
 0x1ff   :  { %4686 = vadd.xlane.f32.xlu1 %v4383_v10  ;;  %v11191_v10 = vrot.slane %v565_v33, %v10770_v49  ;;  %v16962_v33 = vrot.slane %v11043_v0, %v10774_v56  ;;  %v4387_v0 = vmul.f32 %v10795_v24, %v4124_v50  ;;  %v569_v30 = vpop.f32.mrf.mxu1 }
 0x200   :  { %4688 = vadd.xlane.f32.xlu0 %v4384_v45  ;;  %v3872_v45 = vadd.f32 %v10785_v13, %v3609_v28  ;;  %v3611_v22 = vadd.f32 %v16963_v38, %v11026_v16  ;;  %v10451_v28 = vld [vmem:[%s16693_s3] ss:$0 sm:$0xff] }
 0x201   :  { %v3610_v15 = vadd.f32 %v16962_v33, %v11026_v16  ;;  %v16964_v33 = vcombine.high %v11059_v63, %v11059_v63  ;;  %v11228_v57 = vadd.f32 %v10451_v28, %v338_v44  ;;  %v4388_v63 = vmul.f32 %v10795_v24, %v4125_v35 }
 0x202   :  { %v11241_v44 = vadd.f32 %v10451_v28, %v341_v18  ;;  %v1211_v61 = vcombine.high %v11191_v10, %v11191_v10  ;;  %v4128_v36 = vmax.f32 %v3872_v45, 0.0  ;;  %v3874_v50 = vadd.f32 %v10785_v13, %v3611_v22 }
 0x203   :  { %4690 = vadd.xlane.f32.xlu1 %v4385_v43  ;;  %v4126_v43 = vmax.f32 %v3870_v54, 0.0  ;;  %v2513_v34 = vrot.slane %v16964_v33, %v10774_v56  ;;  %16965 = vst [vmem:[#allocation28_spill] sm:$0xff] %v11228_v57  ;;  %v3612_v54 = vadd.f32 %v11094_v26, %v11026_v16  ;;  %v3873_v33 = vadd.f32 %v10785_v13, %v3610_v15 }
 0x204   :  { %4692 = vadd.xlane.f32.xlu0 %v4386_v51  ;;  %v4127_v51 = vmax.f32 %v3871_v42, 0.0  ;;  %16966 = vst [vmem:[#allocation29_spill] sm:$0xff] %v11241_v44  ;;  %v2521_v42 = vrot.slane %v11078_v19, %v10774_v56  ;;  %v381_v15 = vpack.c.bf16 %v11241_v44, %v11228_v57  ;;  %v1212_v18 = vcombine.high %v1210_v32, %v1210_v32 }
 0x205   :  { %v4389_v26 = vmul.f32 %v10795_v24, %v4126_v43  ;;  %v3613_v35 = vadd.f32 %v2513_v34, %v11026_v16  ;;  %v11259_v45 = vrot.slane %v1210_v32, %v10770_v49  ;;  %v3875_v22 = vadd.f32 %v10785_v13, %v3612_v54 }
 0x206   :  { %v4390_v43 = vmul.f32 %v10795_v24, %v4127_v51  ;;  %v4129_v34 = vmax.f32 %v3873_v33, 0.0  ;;  %v16968_v44 = vcombine.high %v11056_v58, %v11056_v58  ;;  %634 = vmatmul.mubr.bf16.gmra.mxu1 %v381_v15  ;;  %v1245_v57 = vcombine.high %v569_v30, %v569_v30  ;;  %v11281_v33 = vld [vmem:[%s16695_s5] ss:$0 sm:$0xff] }
 0x207   :  { %4694 = vadd.xlane.f32.xlu1 %v4387_v0  ;;  %v11256_v0 = vrot.slane %v11191_v10, %v10770_v49  ;;  %v4130_v32 = vmax.f32 %v3874_v50, 0.0  ;;  %v11272_v29 = vadd.f32 %v10451_v28, %v11138_v62  ;;  %v11274_v13 = vadd.f32 %v10451_v28, %v10078_v21 }
 0x208   :  { %4696 = vadd.xlane.f32.xlu0 %v4388_v63  ;;  %v16967_v63 = vrot.slane %v11056_v58, %v10774_v56  ;;  %v2525_v10 = vrot.slane %v16968_v44, %v10774_v56  ;;  %v16971_v54 = vmov 0   ;;  %v4391_v51 = vmul.f32 %v10795_v24, %v4128_v36 }
 0x209   :  { %16969 = vst [vmem:[#allocation30_spill] sm:$0xff] %v11272_v29  ;;  %16970 = vst [vmem:[#allocation31_spill] sm:$0xff] %v11274_v13  ;;  %643 = vmatprep.mubr.bf16.mxu1 %v16971_v54  ;;  %v3876_v58 = vadd.f32 %v11281_v33, %v3613_v35  ;;  %v3615_v44 = vadd.f32 %v2521_v42, %v11026_v16  ;;  %v16972_v62 = vcombine.high %v11078_v19, %v11078_v19 }
 0x20a   :  { %v3614_v38 = vadd.f32 %v16967_v63, %v11026_v16  ;;  %v11290_v28 = vrot.slane %v1211_v61, %v10770_v49  ;;  %v11293_v50 = vrot.slane %v1212_v18, %v10770_v49  ;;  %v1241_v36 = vcombine.high %v11256_v0, %v11256_v0 }
 0x20b   :  { %4698 = vadd.xlane.f32.xlu1 %v4389_v26  ;;  %v2529_v21 = vrot.slane %v16972_v62, %v10774_v56  ;;  %v11302_v26 = vld [vmem:[%s16696_s6] ss:$0 sm:$0xff]  ;;  %v4131_v35 = vmax.f32 %v3875_v22, 0.0  ;;  %v3616_v42 = vadd.f32 %v2525_v10, %v11026_v16  ;;  %v1252_v18 = vrot.slane %v569_v30, %v10770_v49 }
 0x20c   :  { %4700 = vadd.xlane.f32.xlu0 %v4390_v43  ;;  %v4392_v19 = vmul.f32 %v11302_v26, %v4129_v34  ;;  %v3877_v61 = vadd.f32 %v11281_v33, %v3614_v38  ;;  %v1259_v43 = vrot.slane %v1245_v57, %v10770_v49  ;;  %v382_v63 = vpack.c.bf16 %v11274_v13, %v11272_v29  ;;  %v11347_v34 = vpop.f32.mrf.mxu1 }
 0x20d   :  { %v4132_v62 = vmax.f32 %v3876_v58, 0.0  ;;  %v3878_v22 = vadd.f32 %v11281_v33, %v3615_v44  ;;  %v3617_v38 = vadd.f32 %v2529_v21, %v11026_v16  ;;  %v16973_v57 = vrot.slane %v11107_v3, %v10774_v56 }
 0x20e   :  { %v4394_v16 = vmul.f32 %v11302_v26, %v4131_v35  ;;  %v4133_v58 = vmax.f32 %v3877_v61, 0.0  ;;  %v3879_v44 = vadd.f32 %v11281_v33, %v3616_v42  ;;  %v11331_v21 = vrot.slane %v1241_v36, %v10774_v56  ;;  %644 = vmatmul.mubr.bf16.gmra.mxu1 %v382_v63 }
 0x20f   :  { %4702 = vadd.xlane.f32.xlu1 %v4391_v51  ;;  %v4393_v51 = vmul.f32 %v11302_v26, %v4130_v32  ;;  %v1260_v10 = vcombine.high %v1252_v18, %v1252_v18  ;;  %v1261_v24 = vcombine.high %v1259_v43, %v1259_v43  ;;  %v16974_v30 = vrot.slane %v11123_v31, %v10774_v56 }
 0x210   :  { %4704 = vadd.xlane.f32.xlu0 %v4392_v19  ;;  %v3618_v19 = vadd.f32 %v16973_v57, %v11088_v47  ;;  %v4395_v57 = vmul.f32 %v11302_v26, %v4132_v62  ;;  %v3880_v35 = vadd.f32 %v11281_v33, %v3617_v38  ;;  %v16975_v61 = vcombine.high %v11123_v31, %v11123_v31 }
 0x211   :  { %v3619_v3 = vadd.f32 %v16974_v30, %v11088_v47  ;;  %653 = vmatprep.mubr.bf16.mxu1 %v16971_v54  ;;  %v11345_v42 = vrot.slane %v1252_v18, %v10770_v49  ;;  %v2553_v62 = vrot.slane %v11126_v55, %v10774_v56  ;;  %v4396_v31 = vmul.f32 %v11302_v26, %v4133_v58 }
 0x212   :  { %v2545_v36 = vrot.slane %v16975_v61, %v10774_v56  ;;  %v3881_v63 = vadd.f32 %v11281_v33, %v3618_v19  ;;  %v4135_v30 = vmax.f32 %v3879_v44, 0.0  ;;  %v3620_v18 = vadd.f32 %v11181_v14, %v11088_v47 }
 0x213   :  { %4706 = vadd.xlane.f32.xlu1 %v4393_v51  ;;  %v4134_v51 = vmax.f32 %v3878_v22, 0.0  ;;  %v16976_v22 = vcombine.high %v11120_v37, %v11120_v37  ;;  %v11364_v61 = vrot.slane %v1259_v43, %v10770_v49  ;;  %v11367_v32 = vrot.slane %v1260_v10, %v10770_v49 }
 0x214   :  { %4708 = vadd.xlane.f32.xlu0 %v4394_v16  ;;  %v16977_v16 = vcombine.high %v11126_v55, %v11126_v55  ;;  %v16978_v58 = vrot.slane %v11120_v37, %v10774_v56  ;;  %v4136_v15 = vmax.f32 %v3880_v35, 0.0  ;;  %v3621_v55 = vadd.f32 %v2545_v36, %v11088_v47 }
 0x215   :  { %v2557_v38 = vrot.slane %v16976_v22, %v10774_v56  ;;  %v3882_v22 = vadd.f32 %v11281_v33, %v3619_v3  ;;  %v4397_v14 = vmul.f32 %v11302_v26, %v4134_v51  ;;  %v11377_v43 = vrot.slane %v1261_v24, %v10770_v49 }
 0x216   :  { %v2561_v19 = vrot.slane %v16977_v16, %v10774_v56  ;;  %v3622_v44 = vadd.f32 %v16978_v58, %v11088_v47  ;;  %v4137_v10 = vmax.f32 %v3881_v63, 0.0  ;;  %v3623_v13 = vadd.f32 %v2553_v62, %v11088_v47 }
 0x217   :  { %4710 = vadd.xlane.f32.xlu1 %v4395_v57  ;;  %v575_v57 = vpop.f32.mrf.mxu1  ;;  %v3624_v3 = vadd.f32 %v2557_v38, %v11088_v47  ;;  %v4398_v37 = vmul.f32 %v11302_v26, %v4135_v30  ;;  %v3883_v58 = vadd.f32 %v11281_v33, %v3620_v18  ;;  %v1290_v35 = vcombine.high %v11345_v42, %v11345_v42 }
 0x218   :  { %4712 = vadd.xlane.f32.xlu0 %v4396_v31  ;;  %v1294_v16 = vcombine.high %v575_v57, %v575_v57  ;;  %v3625_v31 = vadd.f32 %v2561_v19, %v11088_v47  ;;  %v1301_v51 = vrot.slane %v575_v57, %v10770_v49  ;;  %v3885_v63 = vadd.f32 %v11281_v33, %v3622_v44 }
 0x219   :  { %v4399_v62 = vmul.f32 %v11302_v26, %v4136_v15  ;;  %v4138_v38 = vmax.f32 %v3882_v22, 0.0  ;;  %v3884_v30 = vadd.f32 %v11281_v33, %v3621_v55  ;;  %v3886_v57 = vadd.f32 %v11281_v33, %v3623_v13  ;;  %v11401_v24 = vpop.f32.mrf.mxu1 }
 0x21a   :  { %v1308_v47 = vrot.slane %v1294_v16, %v10770_v49  ;;  %v4400_v15 = vmul.f32 %v11302_v26, %v4137_v10  ;;  %v4139_v22 = vmax.f32 %v3883_v58, 0.0  ;;  %v3888_v44 = vadd.f32 %v11281_v33, %v3625_v31 }
 0x21b   :  { %4714 = vadd.xlane.f32.xlu1 %v4397_v14  ;;  %v3887_v14 = vadd.f32 %v11281_v33, %v3624_v3  ;;  %v1309_v55 = vcombine.high %v1301_v51, %v1301_v51  ;;  %v4141_v19 = vmax.f32 %v3885_v63, 0.0  ;;  %v11410_v13 = vrot.slane %v1301_v51, %v10770_v49  ;;  %v579_v51 = vpop.f32.mrf.mxu1 }
 0x21c   :  { %4716 = vadd.xlane.f32.xlu0 %v4398_v37  ;;  %v4401_v3 = vmul.f32 %v11302_v26, %v4138_v38  ;;  %v1310_v18 = vcombine.high %v1308_v47, %v1308_v47  ;;  %v16979_v10 = vrot.slane %v11175_v41, %v10774_v56  ;;  %v11418_v31 = vrot.slane %v1290_v35, %v10774_v56 }
 0x21d   :  { %v4142_v16 = vmax.f32 %v3886_v57, 0.0  ;;  %v4143_v36 = vmax.f32 %v3887_v14, 0.0  ;;  %v11421_v63 = vrot.slane %v1308_v47, %v10770_v49  ;;  %v11427_v38 = vstv %s16697_s7 }
 0x21e   :  { %v3626_v58 = vadd.f32 %v16979_v10, %v11140_v25  ;;  %v11430_v41 = vrot.slane %v1309_v55, %v10770_v49  ;;  %v4404_v35 = vmul.f32 %v11302_v26, %v4141_v19  ;;  %v1339_v47 = vcombine.high %v11410_v13, %v11410_v13 }
 0x21f   :  { %4718 = vadd.xlane.f32.xlu1 %v4399_v62  ;;  %v4140_v62 = vmax.f32 %v3884_v30, 0.0  ;;  %v4144_v30 = vmax.f32 %v3888_v44, 0.0  ;;  %v16980_v14 = vrot.slane %v11187_v8, %v10774_v56  ;;  %v11443_v44 = vrot.slane %v1310_v18, %v10770_v49 }
 0x220   :  { %4720 = vadd.xlane.f32.xlu0 %v4400_v15  ;;  %v4402_v15 = vmul.f32 %v11302_v26, %v4139_v22  ;;  %v3889_v55 = vadd.f32 %v11281_v33, %v3626_v58  ;;  %v16982_v19 = vcombine.high %v11187_v8, %v11187_v8  ;;  %v4405_v29 = vmul.f32 %v11302_v26, %v4142_v16 }
 0x221   :  { %v3627_v22 = vadd.f32 %v16980_v14, %v11140_v25  ;;  %v4403_v10 = vmul.f32 %v11302_v26, %v4140_v62  ;;  %16981 = vst [vmem:[#allocation32_spill] sm:$0xff] %v11443_v44  ;;  %v4406_v27 = vmul.f32 %v11302_v26, %v4143_v36  ;;  %v1340_v14 = vcombine.high %v11421_v63, %v11421_v63  ;;  %v11455_v62 = vpop.f32.mrf.mxu1 }
 0x222   :  { %v2577_v37 = vrot.slane %v16982_v19, %v10774_v56  ;;  %v4407_v18 = vmul.f32 %v11302_v26, %v4144_v30  ;;  %v1341_v58 = vcombine.high %v11430_v41, %v11430_v41  ;;  %v3628_v16 = vadd.f32 %v11233_v39, %v11140_v25 }
 0x223   :  { %4722 = vadd.xlane.f32.xlu1 %v4401_v3  ;;  %v1343_v3 = vcombine.high %v579_v51, %v579_v51  ;;  %v2585_v19 = vrot.slane %v11196_v6, %v10774_v56 }
 0x224   :  { %4724 = vadd.xlane.f32.xlu0 %v4402_v15  ;;  %v1350_v15 = vrot.slane %v579_v51, %v10770_v49  ;;  %v11469_v51 = vrot.slane %v1339_v47, %v10774_v56  ;;  %v3629_v12 = vadd.f32 %v2577_v37, %v11140_v25  ;;  %v3891_v8 = vadd.f32 %v11281_v33, %v3628_v16 }
 0x225   :  { %v1357_v30 = vrot.slane %v1343_v3, %v10770_v49  ;;  %v585_v3 = vpop.f32.mrf.mxu1  ;;  %v16983_v37 = vrot.slane %v11184_v20, %v10774_v56  ;;  %v2589_v47 = vrot.slane %v16984_v5, %v10774_v56  ;;  %v3631_v5 = vadd.f32 %v2585_v19, %v11140_v25 }
 0x226   :  { %v1358_v11 = vcombine.high %v1350_v15, %v1350_v15  ;;  %v1392_v9 = vcombine.high %v585_v3, %v585_v3  ;;  %v3892_v1 = vadd.f32 %v11281_v33, %v3629_v12  ;;  %v16986_v20 = vcombine.high %v11196_v6, %v11196_v6 }
 0x227   :  { %4726 = vadd.xlane.f32.xlu1 %v4403_v10  ;;  %v3890_v10 = vadd.f32 %v11281_v33, %v3627_v22  ;;  %v4145_v22 = vmax.f32 %v3889_v55, 0.0  ;;  %v3630_v39 = vadd.f32 %v16983_v37, %v11140_v25  ;;  %v11497_v55 = vrot.slane %v1340_v14, %v10774_v56 }
 0x228   :  { %4728 = vadd.xlane.f32.xlu0 %v4404_v35  ;;  %v11485_v35 = vrot.slane %v1350_v15, %v10770_v49  ;;  %v11502_v16 = vrot.slane %v1357_v30, %v10770_v49  ;;  %v11507_v37 = vrot.slane %v1341_v58, %v10774_v56  ;;  %v2593_v14 = vrot.slane %v16986_v20, %v10774_v56 }
 0x229   :  { %v11433_v57 = vpop.xlane.xlu0 %4592  ;;  %16985 = vst [vmem:[#allocation33_spill] sm:$0xff] %v11497_v55  ;;  %v4146_v4 = vmax.f32 %v3890_v10, 0.0  ;;  %v4408_v10 = vmul.f32 %v11302_v26, %v4145_v22  ;;  %v1399_v58 = vrot.slane %v585_v3, %v10770_v49  ;;  %v4147_v60 = vmax.f32 %v3891_v8, 0.0 }
 0x22a   :  { %v1406_v12 = vrot.slane %v1392_v9, %v10770_v49  ;;  %v3893_v19 = vadd.f32 %v11281_v33, %v3630_v39  ;;  %v3632_v59 = vadd.f32 %v2589_v47, %v11140_v25  ;;  %v4148_v8 = vmax.f32 %v3892_v1, 0.0  ;;  %v11549_v1 = vpop.f32.mrf.mxu1 }
 0x22b   :  { %4730 = vadd.xlane.f32.xlu1 %v4405_v29  ;;  %v1359_v29 = vcombine.high %v1357_v30, %v1357_v30  ;;  %v11517_v30 = vrot.slane %v1358_v11, %v10770_v49  ;;  %v4409_v6 = vmul.f32 %v11302_v26, %v4146_v4  ;;  %v1389_v11 = vcombine.high %v11502_v16, %v11502_v16 }
 0x22c   :  { %v11473_v23 = vpop.xlane.xlu1 %4596  ;;  %4732 = vadd.xlane.f32.xlu0 %v4406_v27  ;;  %v1388_v27 = vcombine.high %v11485_v35, %v11485_v35  ;;  %v3894_v4 = vadd.f32 %v11281_v33, %v3631_v5  ;;  %v3633_v39 = vadd.f32 %v2593_v14, %v11140_v25  ;;  %v4410_v53 = vmul.f32 %v11302_v26, %v4147_v60 }
 0x22d   :  { %v11464_v36 = vpop.xlane.xlu0 %4594  ;;  %v11527_v22 = vrot.slane %v1359_v29, %v10770_v49  ;;  %v1390_v47 = vcombine.high %v11517_v30, %v11517_v30  ;;  %v1408_v52 = vcombine.high %v1406_v12, %v1406_v12  ;;  %v4149_v9 = vmax.f32 %v3893_v19, 0.0  ;;  %16988 = vst [vmem:[#allocation35_spill] sm:$0xff] %v11549_v1 }
 0x22e   :  { %v11546_v20 = vrot.slane %v1388_v27, %v10774_v56  ;;  %v3895_v5 = vadd.f32 %v11281_v33, %v3632_v59  ;;  %v11555_v14 = vrot.slane %v1399_v58, %v10770_v49  ;;  %v11558_v29 = vrot.slane %v1406_v12, %v10770_v49 }
 0x22f   :  { %4734 = vadd.xlane.f32.xlu1 %v4407_v18  ;;  %16987 = vst [vmem:[#allocation34_spill] sm:$0xff] %v11527_v22  ;;  %v16991_v60 = vrot.slane %v11256_v0, %v10774_v56  ;;  %v4150_v46 = vmax.f32 %v3894_v4, 0.0  ;;  %v3896_v25 = vadd.f32 %v11281_v33, %v3633_v39  ;;  %v11575_v48 = vrot.slane %v1390_v47, %v10774_v56 }
 0x230   :  { %v11504_v2 = vpop.xlane.xlu1 %4598  ;;  %4736 = vadd.xlane.f32.xlu0 %v4408_v10  ;;  %v1407_v10 = vcombine.high %v1399_v58, %v1399_v58  ;;  %16989 = vst [vmem:[#allocation36_spill] sm:$0xff] %v11555_v14  ;;  %16990 = vst [vmem:[#allocation37_spill] sm:$0xff] %v11558_v29  ;;  %v16992_v58 = vrot.slane %v11290_v28, %v10774_v56  ;;  %v11586_v4 = vrot.slane %v1408_v52, %v10770_v49 }
 0x231   :  { %v11499_v15 = vpop.xlane.xlu0 %4600  ;;  %v3634_v19 = vadd.f32 %v16991_v60, %v11218_v7  ;;  %v4412_v39 = vmul.f32 %v11302_v26, %v4149_v9  ;;  %v589_v60 = vpop.f32.mrf.mxu1  ;;  %v1437_v40 = vcombine.high %v11555_v14, %v11555_v14  ;;  %v3636_v52 = vadd.f32 %v11331_v21, %v11218_v7 }
 0x232   :  { %v3635_v12 = vadd.f32 %v16992_v58, %v11218_v7  ;;  %16995 = vst [vmem:[#allocation40_spill] sm:$0xff] %v11586_v4  ;;  %v4151_v58 = vmax.f32 %v3895_v5, 0.0  ;;  %v4413_v9 = vmul.f32 %v11302_v26, %v4150_v46  ;;  %v16996_v1 = vcombine.high %v11290_v28, %v11290_v28 }
 0x233   :  { %4738 = vadd.xlane.f32.xlu1 %v4409_v6  ;;  %v4411_v6 = vmul.f32 %v11302_v26, %v4148_v8  ;;  %v11583_v8 = vrot.slane %v1407_v10, %v10770_v49  ;;  %v3897_v47 = vadd.f32 %v11281_v33, %v3634_v19  ;;  %v4152_v19 = vmax.f32 %v3896_v25, 0.0 }
 0x234   :  { %v11535_v18 = vpop.xlane.xlu1 %4602  ;;  %4740 = vadd.xlane.f32.xlu0 %v4410_v53  ;;  %v11580_v53 = vrot.slane %v1389_v11, %v10774_v56  ;;  %v1438_v11 = vcombine.high %v11558_v29, %v11558_v29  ;;  %v5106_v10 = vadd.f32 %v11427_v38, %v11433_v57  ;;  %v1441_v21 = vcombine.high %v589_v60, %v589_v60 }
 0x235   :  { %v11533_v3 = vpop.xlane.xlu0 %4604  ;;  %16994 = vst [vmem:[#allocation39_spill] sm:$0xff] %v11583_v8  ;;  %v1439_v46 = vcombine.high %v11583_v8, %v11583_v8  ;;  %v4153_v28 = vmax.f32 %v3897_v47, 0.0  ;;  %v11621_v57 = vrot.slane %v1437_v40, %v10774_v56  ;;  %v3899_v14 = vadd.f32 %v11281_v33, %v3636_v52 }
 0x236   :  { %16993 = vst [vmem:[#allocation38_spill] sm:$0xff] %v11580_v53  ;;  %v2609_v53 = vrot.slane %v16996_v1, %v10774_v56  ;;  %v4415_v29 = vmul.f32 %v11302_v26, %v4152_v19  ;;  %v5618_v40 = vmul.f32 0.01, %v5106_v10  ;;  %v1455_v1 = vrot.slane %v1441_v21, %v10770_v49 }
 0x237   :  { %4742 = vadd.xlane.f32.xlu1 %v4411_v6  ;;  %v3898_v6 = vadd.f32 %v11281_v33, %v3635_v12  ;;  %v4414_v12 = vmul.f32 %v11302_v26, %v4151_v58  ;;  %16997 = vst [vmem:[#allocation41_spill] sm:$0xff] %v11621_v57  ;;  %v16998_v58 = vrot.slane %v11259_v45, %v10774_v56  ;;  %vm5362_vm2 = vcmp.ge.f32.partialorder %v5106_v10, 0.0 }
 0x238   :  { %v11567_v59 = vpop.xlane.xlu1 %4606  ;;  %4744 = vadd.xlane.f32.xlu0 %v4412_v39  ;;  %v1448_v39 = vrot.slane %v589_v60, %v10770_v49  ;;  %v3637_v60 = vadd.f32 %v2609_v53, %v11218_v7  ;;  %v4416_v19 = vmul.f32 %v11302_v26, %v4153_v28  ;;  %v11647_v21 = vrot.slane %v1438_v11, %v10774_v56 }
 0x239   :  { %v11560_v27 = vpop.xlane.xlu0 %4608  ;;  %v4154_v25 = vmax.f32 %v3898_v6, 0.0  ;;  %v3638_v47 = vadd.f32 %v16998_v58, %v11218_v7  ;;  %v4155_v6 = vmax.f32 %v3899_v14, 0.0  ;;  %v5107_v58 = vadd.f32 %v11427_v38, %v11464_v36 }
 0x23a   :  { %v1456_v52 = vcombine.high %v1448_v39, %v1448_v39  ;;  %v11636_v53 = vrot.slane %v1448_v39, %v10770_v49  ;;  %v3900_v57 = vadd.f32 %v11281_v33, %v3637_v60  ;;  %17000 = vst [vmem:[#allocation43_spill] sm:$0xff] %v11647_v21  ;;  %v11651_v22 = vrot.slane %v1439_v46, %v10774_v56 }
 0x23b   :  { %4746 = vadd.xlane.f32.xlu1 %v4413_v9  ;;  %v2617_v9 = vrot.slane %v11293_v50, %v10774_v56  ;;  %v3901_v39 = vadd.f32 %v11281_v33, %v3638_v47  ;;  %v11657_v36 = vsel %vm5362_vm2, %v5106_v10, %v5618_v40  ;;  %v1457_v44 = vcombine.high %v1455_v1, %v1455_v1 }
 0x23c   :  { %v11601_v5 = vpop.xlane.xlu1 %4610  ;;  %4748 = vadd.xlane.f32.xlu0 %v4414_v12  ;;  %16999 = vst [vmem:[#allocation42_spill] sm:$0xff] %v11636_v53  ;;  %17001 = vst [vmem:[#allocation44_spill] sm:$0xff] %v11651_v22  ;;  %v4156_v28 = vmax.f32 %v3900_v57, 0.0  ;;  %v11660_v8 = vrot.slane %v1455_v1, %v10770_v49  ;;  %v11663_v11 = vrot.slane %v1456_v52, %v10770_v49  ;;  %vm5363_vm3 = vcmp.ge.f32.partialorder %v5107_v58, 0.0 }
 0x23d   :  { %v11596_v0 = vpop.xlane.xlu0 %4612  ;;  %v3639_v60 = vadd.f32 %v2617_v9, %v11218_v7  ;;  %v1486_v46 = vcombine.high %v11636_v53, %v11636_v53  ;;  %v4157_v47 = vmax.f32 %v3901_v39, 0.0  ;;  %v17002_v1 = vcombine.high %v11259_v45, %v11259_v45 }
 0x23e   :  { %v17003_v52 = vrot.slane %v11345_v42, %v10774_v56  ;;  %v4419_v39 = vmul.f32 %v11302_v26, %v4156_v28  ;;  %v5108_v21 = vadd.f32 %v11427_v38, %v11473_v23  ;;  %v11689_v45 = vrot.slane %v1457_v44, %v10770_v49 }
 0x23f   :  { %4750 = vadd.xlane.f32.xlu1 %v4415_v29  ;;  %v4417_v29 = vmul.f32 %v11302_v26, %v4154_v25  ;;  %v4418_v25 = vmul.f32 %v11302_v26, %v4155_v6  ;;  %v3902_v57 = vadd.f32 %v11281_v33, %v3639_v60  ;;  %v2621_v40 = vrot.slane %v17002_v1, %v10774_v56 }
 0x240   :  { %v11626_v55 = vpop.xlane.xlu1 %4614  ;;  %4752 = vadd.xlane.f32.xlu0 %v4416_v19  ;;  %v5619_v19 = vmul.f32 0.01, %v5107_v58  ;;  %v1488_v28 = vcombine.high %v11663_v11, %v11663_v11  ;;  %v4420_v23 = vmul.f32 %v11302_v26, %v4157_v47  ;;  %v5109_v44 = vadd.f32 %v11427_v38, %v11504_v2 }
 0x241   :  { %v11638_v12 = vpop.xlane.xlu0 %4616  ;;  %v4158_v10 = vmax.f32 %v3902_v57, 0.0  ;;  %v3640_v42 = vadd.f32 %v2621_v40, %v11218_v7  ;;  %v17006_v2 = vcombine.high %v11367_v32, %v11367_v32  ;;  %vm5364_vm6 = vcmp.ge.f32.partialorder %v5108_v21, 0.0 }
 0x242   :  { %v5875_v57 = vsel %vm5363_vm3, %v5107_v58, %v5619_v19  ;;  %v17005_v58 = vcombine.high %v11293_v50, %v11293_v50  ;;  %v5621_v4 = vmul.f32 0.01, %v5109_v44  ;;  %vm5365_vm8 = vcmp.ge.f32.partialorder %v5109_v44, 0.0 }
 0x243   :  { %4754 = vadd.xlane.f32.xlu1 %v4417_v29  ;;  %v3642_v29 = vadd.f32 %v17003_v52, %v11347_v34  ;;  %v3903_v40 = vadd.f32 %v11281_v33, %v3640_v42  ;;  %v4421_v52 = vmul.f32 %v11302_v26, %v4158_v10  ;;  %v2641_v19 = vrot.slane %v17006_v2, %v10774_v56 }
 0x244   :  { %v11654_v14 = vpop.xlane.xlu1 %4618  ;;  %4756 = vadd.xlane.f32.xlu0 %v4418_v25  ;;  %v17004_v25 = vrot.slane %v11367_v32, %v10774_v56  ;;  %v2625_v47 = vrot.slane %v17005_v58, %v10774_v56  ;;  %v5620_v42 = vmul.f32 0.01, %v5108_v21  ;;  %v6491_v2 = vrot.slane %v5875_v57, %v10724_v17 }
 0x245   :  { %v11671_v9 = vpop.xlane.xlu0 %4620  ;;  %v3905_v1 = vadd.f32 %v11281_v33, %v3642_v29 }
 0x246   :  { %v3641_v32 = vadd.f32 %v2625_v47, %v11218_v7  ;;  %v5876_v53 = vsel %vm5364_vm6, %v5108_v21, %v5620_v42  ;;  %v11738_v7 = vrot.slane %v1488_v28, %v10774_v56 }
 0x247   :  { %4758 = vadd.xlane.f32.xlu1 %v4419_v39  ;;  %v4161_v6 = vmax.f32 %v3905_v1, 0.0  ;;  %v3643_v39 = vadd.f32 %v17004_v25, %v11347_v34  ;;  %v4159_v1 = vmax.f32 %v3903_v40, 0.0  ;;  %v11723_v25 = vrot.slane %v1486_v46, %v10774_v56 }
 0x248   :  { %v11684_v60 = vpop.xlane.xlu1 %4622  ;;  %4760 = vadd.xlane.f32.xlu0 %v4420_v23  ;;  %v5110_v23 = vadd.f32 %v11427_v38, %v11499_v15  ;;  %v3904_v15 = vadd.f32 %v11281_v33, %v3641_v32  ;;  %v3645_v46 = vadd.f32 %v2641_v19, %v11347_v34 }
 0x249   :  { %v11703_v29 = vpop.xlane.xlu0 %4624  ;;  %v3906_v58 = vadd.f32 %v11281_v33, %v3643_v39  ;;  %v4422_v22 = vmul.f32 %v11302_v26, %v4159_v1  ;;  %v4424_v40 = vmul.f32 %v11302_v26, %v4161_v6  ;;  %v2649_v6 = vrot.slane %v11377_v43, %v10774_v56 }
 0x24a   :  { %vm5366_vm9 = vcmp.ge.f32.partialorder %v5110_v23, 0.0  ;;  %v5622_v39 = vmul.f32 0.01, %v5110_v23  ;;  %v3908_v28 = vadd.f32 %v11281_v33, %v3645_v46  ;;  %v6495_v1 = vrot.slane %v5876_v53, %v10724_v17 }
 0x24b   :  { %4762 = vadd.xlane.f32.xlu1 %v4421_v52  ;;  %v4162_v10 = vmax.f32 %v3906_v58, 0.0  ;;  %v3644_v52 = vadd.f32 %v11418_v31, %v11347_v34  ;;  %v4160_v31 = vmax.f32 %v3904_v15, 0.0  ;;  %v3647_v42 = vadd.f32 %v2649_v6, %v11347_v34 }
 0x24c   :  { %v11725_v50 = vpop.xlane.xlu1 %4626  ;;  %4764 = vadd.xlane.f32.xlu0 %v4422_v22  ;;  %v17007_v58 = vrot.slane %v11657_v36, %v10724_v17  ;;  %v5112_v15 = vadd.f32 %v11427_v38, %v11533_v3  ;;  %v11765_v53 = vsel %vm5366_vm9, %v5110_v23, %v5622_v39  ;;  %v5111_v36 = vadd.f32 %v11427_v38, %v11535_v18 }
 0x24d   :  { %v11740_v57 = vpop.xlane.xlu0 %4628  ;;  %v4425_v21 = vmul.f32 %v11302_v26, %v4162_v10  ;;  %v3907_v22 = vadd.f32 %v11281_v33, %v3644_v52  ;;  %v4423_v46 = vmul.f32 %v11302_v26, %v4160_v31  ;;  %v4164_v52 = vmax.f32 %v3908_v28, 0.0  ;;  %17008 = vst [vmem:[#allocation45_spill] sm:$0xff] %v11765_v53 }
 0x24e   :  { %v7509_v32 = vsel %vm7508_vm4, %v6491_v2, %v17007_v58  ;;  %v3910_v6 = vadd.f32 %v11281_v33, %v3647_v42  ;;  %v17009_v31 = vcombine.high %v11660_v8, %v11660_v8  ;;  %v5116_v39 = vadd.f32 %v11427_v38, %v11596_v0 }
 0x24f   :  { %4768 = vadd.xlane.f32.xlu1 %v4424_v40  ;;  %v5877_v40 = vsel %vm5365_vm8, %v5109_v44, %v5621_v4  ;;  %v4163_v47 = vmax.f32 %v3907_v22, 0.0  ;;  %v5115_v4 = vadd.f32 %v11427_v38, %v11601_v5  ;;  %v7511_v2 = vsel %vm7510_vm5, %v6495_v1, %v7509_v32 }
 0x250   :  { %v11746_v19 = vpop.xlane.xlu1 %4630  ;;  %4770 = vadd.xlane.f32.xlu0 %v4425_v21  ;;  %v6499_v44 = vrot.slane %v5877_v40, %v10724_v17  ;;  %v11779_v21 = vrot.slane %v17009_v31, %v10774_v56  ;;  %v4427_v18 = vmul.f32 %v11302_v26, %v4164_v52  ;;  %v5114_v5 = vadd.f32 %v11427_v38, %v11560_v27 }
 0x251   :  { %v11760_v10 = vpop.xlane.xlu0 %4632  ;;  %v4166_v28 = vmax.f32 %v3910_v6, 0.0  ;;  %v17010_v22 = vrot.slane %v11364_v61, %v10774_v56  ;;  %v5624_v58 = vmul.f32 0.01, %v5112_v15  ;;  %v5113_v32 = vadd.f32 %v11427_v38, %v11567_v59 }
 0x252   :  { %v4426_v27 = vmul.f32 %v11302_v26, %v4163_v47  ;;  %vm5367_vm10 = vcmp.ge.f32.partialorder %v5111_v36, 0.0  ;;  %v5623_v0 = vmul.f32 0.01, %v5111_v36  ;;  %vm5368_vm11 = vcmp.ge.f32.partialorder %v5112_v15, 0.0 }
 0x253   :  { %4766 = vadd.xlane.f32.xlu1 %v4423_v46  ;;  %v3646_v42 = vadd.f32 %v17010_v22, %v11347_v34  ;;  %v5627_v46 = vmul.f32 0.01, %v5115_v4  ;;  %vm5371_vm12 = vcmp.ge.f32.partialorder %v5115_v4, 0.0  ;;  %v4429_v6 = vmul.f32 %v11302_v26, %v4166_v28 }
 0x254   :  { %v11781_v23 = vpop.xlane.xlu1 %4634  ;;  %4774 = vadd.xlane.f32.xlu0 %v4427_v18  ;;  %v17011_v59 = vrot.slane %v11410_v13, %v10774_v56  ;;  %v11808_v22 = vsel %vm7512_vm7, %v6499_v44, %v7511_v2  ;;  %vm5370_vm13 = vcmp.ge.f32.partialorder %v5114_v5, 0.0  ;;  %v5626_v47 = vmul.f32 0.01, %v5114_v5 }
 0x255   :  { %v11796_v40 = vpop.xlane.xlu0 %4636  ;;  %v3909_v31 = vadd.f32 %v11281_v33, %v3646_v42  ;;  %17012 = vst [vmem:[#allocation46_spill] sm:$0xff] %v11808_v22  ;;  %v5628_v1 = vmul.f32 0.01, %v5116_v39  ;;  %v5625_v3 = vmul.f32 0.01, %v5113_v32  ;;  %vm5372_vm14 = vcmp.ge.f32.partialorder %v5116_v39, 0.0 }
 0x256   :  { %v3650_v18 = vadd.f32 %v17011_v59, %v11401_v24  ;;  %v5883_v42 = vsel %vm5371_vm12, %v5115_v4, %v5627_v46  ;;  %v5117_v13 = vadd.f32 %v11427_v38, %v11626_v55  ;;  %v17013_v44 = vcombine.high %v11364_v61, %v11364_v61 }
 0x257   :  { %4772 = vadd.xlane.f32.xlu1 %v4426_v27  ;;  %v4165_v53 = vmax.f32 %v3909_v31, 0.0  ;;  %v17014_v59 = vcombine.high %v11377_v43, %v11377_v43  ;;  %v11825_v22 = vsel %vm5367_vm10, %v5111_v36, %v5623_v0  ;;  %v11828_v31 = vsel %vm5368_vm11, %v5112_v15, %v5624_v58 }
 0x258   :  { %v11799_v52 = vpop.xlane.xlu1 %4638  ;;  %4778 = vadd.xlane.f32.xlu0 %v4429_v6  ;;  %v3913_v28 = vadd.f32 %v11281_v33, %v3650_v18  ;;  %v2653_v2 = vrot.slane %v17013_v44, %v10774_v56  ;;  %17015 = vst [vmem:[#allocation47_spill] sm:$0xff] %v11825_v22  ;;  %17016 = vst [vmem:[#allocation48_spill] sm:$0xff] %v11828_v31  ;;  %vm5369_vm15 = vcmp.ge.f32.partialorder %v5113_v32, 0.0  ;;  %vm5373_vm0 = vcmp.ge.f32.partialorder %v5117_v13, 0.0 }
 0x259   :  { %v11810_v27 = vpop.xlane.xlu0 %4640  ;;  %v2657_v6 = vrot.slane %v17014_v59, %v10774_v56  ;;  %v4428_v4 = vmul.f32 %v11302_v26, %v4165_v53  ;;  %v5882_v46 = vsel %vm5370_vm13, %v5114_v5, %v5626_v47  ;;  %v5884_v61 = vsel %vm5372_vm14, %v5116_v39, %v5628_v1 }
 0x25a   :  { %v5118_v18 = vadd.f32 %v11427_v38, %v11638_v12  ;;  %v4169_v44 = vmax.f32 %v3913_v28, 0.0  ;;  %v6523_v43 = vrot.slane %v5883_v42, %v10724_v17  ;;  %v3648_v15 = vadd.f32 %v2653_v2, %v11347_v34 }
 0x25b   :  { %4776 = vadd.xlane.f32.xlu1 %v4428_v4  ;;  %v3649_v58 = vadd.f32 %v2657_v6, %v11347_v34  ;;  %v17017_v53 = vrot.slane %v11430_v41, %v10774_v56  ;;  %v11847_v39 = vsel %vm5369_vm15, %v5113_v32, %v5625_v3  ;;  %v5629_v12 = vmul.f32 0.01, %v5117_v13 }
 0x25c   :  { %v11831_v55 = vpop.xlane.xlu1 %4642  ;;  %17018 = vst [vmem:[#allocation49_spill] sm:$0xff] %v11847_v39  ;;  %v5119_v1 = vadd.f32 %v11427_v38, %v11654_v14  ;;  %v6519_v47 = vrot.slane %v5882_v46, %v10724_v17  ;;  %v4432_v28 = vmul.f32 %v11302_v26, %v4169_v44  ;;  %v3911_v34 = vadd.f32 %v11281_v33, %v3648_v15 }
 0x25d   :  { %v11837_v36 = vpop.xlane.xlu0 %4644  ;;  %v3651_v0 = vadd.f32 %v17017_v53, %v11401_v24  ;;  %v6527_v41 = vrot.slane %v5884_v61, %v10724_v17  ;;  %v5123_v2 = vadd.f32 %v11427_v38, %v11725_v50  ;;  %v3912_v3 = vadd.f32 %v11281_v33, %v3649_v58 }
 0x25e   :  { %v7522_v14 = vsel %vm7508_vm4, %v6523_v43, %v6519_v47  ;;  %vm5374_vm2 = vcmp.ge.f32.partialorder %v5118_v18, 0.0  ;;  %v5630_v59 = vmul.f32 0.01, %v5118_v18  ;;  %4784 = vadd.xlane.f32.xlu0 %v4432_v28  ;;  %v4167_v6 = vmax.f32 %v3911_v34, 0.0 }
 0x25f   :  { %v3914_v32 = vadd.f32 %v11281_v33, %v3651_v0  ;;  %v5885_v46 = vsel %vm5373_vm0, %v5117_v13, %v5629_v12  ;;  %vm5375_vm3 = vcmp.ge.f32.partialorder %v5119_v1, 0.0  ;;  %v5631_v44 = vmul.f32 0.01, %v5119_v1 }
 0x260   :  { %v11854_v42 = vpop.xlane.xlu1 %4646  ;;  %v4168_v15 = vmax.f32 %v3912_v3, 0.0  ;;  %v5120_v61 = vadd.f32 %v11427_v38, %v11671_v9  ;;  %v5122_v50 = vadd.f32 %v11427_v38, %v11703_v29  ;;  %v4430_v58 = vmul.f32 %v11302_v26, %v4167_v6  ;;  %v11884_v3 = vpop.f32.mrf.mxu0 }
 0x261   :  { %v11862_v4 = vpop.xlane.xlu0 %4648  ;;  %v4170_v53 = vmax.f32 %v3914_v32, 0.0  ;;  %v5635_v47 = vmul.f32 0.01, %v5123_v2  ;;  %v5124_v13 = vadd.f32 %v11427_v38, %v11740_v57  ;;  %v7523_v28 = vsel %vm7510_vm5, %v6527_v41, %v7522_v14 }
 0x262   :  { %v4431_v12 = vmul.f32 %v11302_v26, %v4168_v15  ;;  %v11880_v29 = vsel %vm5374_vm2, %v5118_v18, %v5630_v59  ;;  %vm5379_vm6 = vcmp.ge.f32.partialorder %v5123_v2, 0.0  ;;  %4780 = vadd.xlane.f32.xlu1 %v4430_v58  ;;  %v6531_v32 = vrot.slane %v5885_v46, %v10724_v17  ;;  %v354_v9 = vpop.f32.mrf.mxu0 }
 0x263   :  { %17019 = vst [vmem:[#allocation50_spill] sm:$0xff] %v11880_v29  ;;  %v11888_v57 = vsel %vm5375_vm3, %v5119_v1, %v5631_v44  ;;  %v3652_v6 = vadd.f32 %v11469_v51, %v11401_v24  ;;  %v17021_v18 = vrot.slane %v11517_v30, %v10774_v56  ;;  %vm5376_vm8 = vcmp.ge.f32.partialorder %v5120_v61, 0.0 }
 0x264   :  { %v11869_v43 = vpop.xlane.xlu1 %4650  ;;  %17020 = vst [vmem:[#allocation51_spill] sm:$0xff] %v11888_v57  ;;  %4782 = vadd.xlane.f32.xlu0 %v4431_v12  ;;  %v5632_v14 = vmul.f32 0.01, %v5120_v61  ;;  %v5634_v59 = vmul.f32 0.01, %v5122_v50  ;;  %v4433_v15 = vmul.f32 %v11302_v26, %v4170_v53  ;;  %vm5378_vm9 = vcmp.ge.f32.partialorder %v5122_v50, 0.0 }
 0x265   :  { %v11882_v34 = vpop.xlane.xlu0 %4652  ;;  %v3659_v41 = vadd.f32 %v17021_v18, %v11455_v62  ;;  %v5891_v46 = vsel %vm5379_vm6, %v5123_v2, %v5635_v47  ;;  %v5636_v1 = vmul.f32 0.01, %v5124_v13  ;;  %v3915_v44 = vadd.f32 %v11281_v33, %v3652_v6 }
 0x266   :  { %vm5380_vm10 = vcmp.ge.f32.partialorder %v5124_v13, 0.0  ;;  %v5125_v51 = vadd.f32 %v11427_v38, %v11746_v19  ;;  %4786 = vadd.xlane.f32.xlu1 %v4433_v15  ;;  %v17022_v12 = vrot.slane %v11421_v63, %v10774_v56  ;;  %v11910_v2 = vsel %vm7512_vm7, %v6531_v32, %v7523_v28 }
 0x267   :  { %v3922_v30 = vadd.f32 %v11281_v33, %v3659_v41  ;;  %17023 = vst [vmem:[#allocation52_spill] sm:$0xff] %v11910_v2  ;;  %v5121_v19 = vadd.f32 %v11427_v38, %v11684_v60  ;;  %v4171_v6 = vmax.f32 %v3915_v44, 0.0  ;;  %v11919_v15 = vsel %vm5376_vm8, %v5120_v61, %v5632_v14  ;;  %v10082_v14 = vpop.f32.mrf.mxu0 }
 0x268   :  { %v11897_v58 = vpop.xlane.xlu1 %4654  ;;  %v3654_v18 = vadd.f32 %v17022_v12, %v11401_v24  ;;  %17024 = vst [vmem:[#allocation53_spill] sm:$0xff] %v11919_v15  ;;  %v5890_v63 = vsel %vm5378_vm9, %v5122_v50, %v5634_v59  ;;  %v6555_v28 = vrot.slane %v5891_v46, %v10724_v17  ;;  %v5892_v32 = vsel %vm5380_vm10, %v5124_v13, %v5636_v1 }
 0x269   :  { %v11907_v53 = vpop.xlane.xlu0 %4656  ;;  %v4178_v12 = vmax.f32 %v3922_v30, 0.0  ;;  %v4434_v47 = vmul.f32 %v11302_v26, %v4171_v6  ;;  %v5637_v44 = vmul.f32 0.01, %v5125_v51  ;;  %v5126_v41 = vadd.f32 %v11427_v38, %v11760_v10  ;;  %v357_v0 = vpop.f32.mrf.mxu0 }
 0x26a   :  { %v3917_v60 = vadd.f32 %v11281_v33, %v3654_v18  ;;  %v3660_v50 = vadd.f32 %v11546_v20, %v11455_v62  ;;  %v6551_v46 = vrot.slane %v5890_v63, %v10724_v17  ;;  %vm5381_vm11 = vcmp.ge.f32.partialorder %v5125_v51, 0.0 }
 0x26b   :  { %v4441_v61 = vmul.f32 %v11302_v26, %v4178_v12  ;;  %v5127_v13 = vadd.f32 %v11427_v38, %v11781_v23  ;;  %4788 = vadd.xlane.f32.xlu0 %v4434_v47  ;;  %vm5377_vm12 = vcmp.ge.f32.partialorder %v5121_v19, 0.0  ;;  %v5633_v30 = vmul.f32 0.01, %v5121_v19 }
 0x26c   :  { %v11922_v5 = vpop.xlane.xlu1 %4658  ;;  %v4173_v1 = vmax.f32 %v3917_v60, 0.0  ;;  %v3923_v10 = vadd.f32 %v11281_v33, %v3660_v50  ;;  %v17025_v20 = vrot.slane %v11485_v35, %v10774_v56  ;;  %v7529_v12 = vsel %vm7508_vm4, %v6555_v28, %v6551_v46  ;;  %v10454_v28 = vld [vmem:[%s16693_s3] ss:$0 sm:$0xff] }
 0x26d   :  { %v11933_v59 = vpop.xlane.xlu0 %4660  ;;  %4802 = vadd.xlane.f32.xlu1 %v4441_v61  ;;  %v6559_v23 = vrot.slane %v5892_v32, %v10724_v17  ;;  %v5893_v60 = vsel %vm5381_vm11, %v5125_v51, %v5637_v44  ;;  %vm5382_vm13 = vcmp.ge.f32.partialorder %v5126_v41, 0.0  ;;  %v5638_v61 = vmul.f32 0.01, %v5126_v41 }
 0x26e   :  { %v3658_v18 = vadd.f32 %v17025_v20, %v11455_v62  ;;  %v4436_v47 = vmul.f32 %v11302_v26, %v4173_v1  ;;  %v4179_v50 = vmax.f32 %v3923_v10, 0.0  ;;  %v5639_v35 = vmul.f32 0.01, %v5127_v13 }
 0x26f   :  { %v5131_v20 = vadd.f32 %v11427_v38, %v11831_v55  ;;  %v11957_v46 = vadd.f32 %v10454_v28, %v354_v9  ;;  %vm5383_vm14 = vcmp.ge.f32.partialorder %v5127_v13, 0.0  ;;  %v5130_v51 = vadd.f32 %v11427_v38, %v11810_v27 }
 0x270   :  { %v11943_v6 = vpop.xlane.xlu1 %4662  ;;  %4792 = vadd.xlane.f32.xlu0 %v4436_v47  ;;  %v3921_v32 = vadd.f32 %v11281_v33, %v3658_v18  ;;  %v4442_v44 = vmul.f32 %v11302_v26, %v4179_v50  ;;  %v17027_v1 = vrot.slane %v11502_v16, %v10774_v56  ;;  %v11970_v47 = vsel %vm5377_vm12, %v5121_v19, %v5633_v30  ;;  %v11984_v16 = vld [vmem:[%s16695_s5] ss:$0 sm:$0xff] }
 0x271   :  { %v11950_v57 = vpop.xlane.xlu0 %4664  ;;  %17026 = vst [vmem:[#allocation54_spill] sm:$0xff] %v11957_v46  ;;  %17028 = vst [vmem:[#allocation55_spill] sm:$0xff] %v11970_v47  ;;  %v5128_v9 = vadd.f32 %v11427_v38, %v11796_v40  ;;  %v11974_v18 = vadd.f32 %v10454_v28, %v357_v0  ;;  %v7530_v27 = vsel %vm7510_vm5, %v6559_v23, %v7529_v12  ;;  %v5643_v0 = vmul.f32 0.01, %v5131_v20  ;;  %v11995_v12 = vld [vmem:[%s16696_s6] ss:$0 sm:$0xff] }
 0x272   :  { %v3662_v55 = vadd.f32 %v17027_v1, %v11455_v62  ;;  %v4177_v33 = vmax.f32 %v3921_v32, 0.0  ;;  %v6563_v26 = vrot.slane %v5893_v60, %v10724_v17  ;;  %v11979_v50 = vsel %vm5382_vm13, %v5126_v41, %v5638_v61  ;;  %4804 = vadd.xlane.f32.xlu1 %v4442_v44 }
 0x273   :  { %17029 = vst [vmem:[#allocation56_spill] sm:$0xff] %v11974_v18  ;;  %17030 = vst [vmem:[#allocation57_spill] sm:$0xff] %v11979_v50  ;;  %v11990_v40 = vsel %vm5383_vm14, %v5127_v13, %v5639_v35  ;;  %v383_v23 = vpack.c.bf16 %v11974_v18, %v11957_v46  ;;  %v5642_v60 = vmul.f32 0.01, %v5130_v51  ;;  %vm5387_vm15 = vcmp.ge.f32.partialorder %v5131_v20, 0.0 }
 0x274   :  { %v11967_v10 = vpop.xlane.xlu1 %4666  ;;  %v3925_v19 = vadd.f32 %v11984_v16, %v3662_v55  ;;  %17031 = vst [vmem:[#allocation58_spill] sm:$0xff] %v11990_v40  ;;  %v4440_v41 = vmul.f32 %v11995_v12, %v4177_v33  ;;  %v5132_v61 = vadd.f32 %v11427_v38, %v11837_v36  ;;  %vm5384_vm0 = vcmp.ge.f32.partialorder %v5128_v9, 0.0 }
 0x275   :  { %v11987_v30 = vpop.xlane.xlu0 %4668  ;;  %v5640_v13 = vmul.f32 0.01, %v5128_v9  ;;  %v5129_v35 = vadd.f32 %v11427_v38, %v11799_v52  ;;  %vm5386_vm2 = vcmp.ge.f32.partialorder %v5130_v51, 0.0  ;;  %v12007_v1 = vadd.f32 %v10454_v28, %v11884_v3  ;;  %654 = vmatmul.mubr.bf16.gmra.mxu1 %v383_v23 }
 0x276   :  { %v4181_v32 = vmax.f32 %v3925_v19, 0.0  ;;  %4800 = vadd.xlane.f32.xlu0 %v4440_v41  ;;  %v12009_v55 = vadd.f32 %v10454_v28, %v10082_v14  ;;  %v3653_v36 = vadd.f32 %v11507_v37, %v11401_v24  ;;  %v12019_v52 = vsel %vm7512_vm7, %v6563_v26, %v7530_v27  ;;  %663 = vmatprep.mubr.bf16.mxu1 %v16971_v54 }
 0x277   :  { %17032 = vst [vmem:[#allocation59_spill] sm:$0xff] %v12007_v1  ;;  %17034 = vst [vmem:[#allocation61_spill] sm:$0xff] %v12019_v52  ;;  %v5899_v41 = vsel %vm5387_vm15, %v5131_v20, %v5643_v0  ;;  %v5133_v3 = vadd.f32 %v11427_v38, %v11854_v42  ;;  %v5898_v37 = vsel %vm5386_vm2, %v5130_v51, %v5642_v60  ;;  %v5644_v28 = vmul.f32 0.01, %v5132_v61 }
 0x278   :  { %v12002_v44 = vpop.xlane.xlu1 %4670  ;;  %17033 = vst [vmem:[#allocation60_spill] sm:$0xff] %v12009_v55  ;;  %v4444_v33 = vmul.f32 %v11995_v12, %v4181_v32  ;;  %v3916_v23 = vadd.f32 %v11984_v16, %v3653_v36  ;;  %v12033_v20 = vsel %vm5384_vm0, %v5128_v9, %v5640_v13  ;;  %v5641_v26 = vmul.f32 0.01, %v5129_v35 }
 0x279   :  { %v12014_v19 = vpop.xlane.xlu0 %4672  ;;  %17035 = vst [vmem:[#allocation62_spill] sm:$0xff] %v12033_v20  ;;  %vm5388_vm3 = vcmp.ge.f32.partialorder %v5132_v61, 0.0  ;;  %v6587_v54 = vrot.slane %v5899_v41, %v10724_v17  ;;  %v5139_v42 = vadd.f32 %v11427_v38, %v11922_v5  ;;  %v384_v51 = vpack.c.bf16 %v12009_v55, %v12007_v1 }
 0x27a   :  { %4808 = vadd.xlane.f32.xlu1 %v4444_v33  ;;  %v4172_v0 = vmax.f32 %v3916_v23, 0.0  ;;  %vm5385_vm6 = vcmp.ge.f32.partialorder %v5129_v35, 0.0  ;;  %v6583_v33 = vrot.slane %v5898_v37, %v10724_v17  ;;  %vm5389_vm8 = vcmp.ge.f32.partialorder %v5133_v3, 0.0 }
 0x27b   :  { %v5645_v36 = vmul.f32 0.01, %v5133_v3  ;;  %v5900_v9 = vsel %vm5388_vm3, %v5132_v61, %v5644_v28  ;;  %v5138_v13 = vadd.f32 %v11427_v38, %v11907_v53  ;;  %v3661_v5 = vadd.f32 %v11575_v48, %v11455_v62  ;;  %v17036_v61 = vld [vmem:[#allocation32_spill] sm:$0xff] }
 0x27c   :  { %v12028_v32 = vpop.xlane.xlu1 %4674  ;;  %v4435_v41 = vmul.f32 %v11995_v12, %v4172_v0  ;;  %v5134_v14 = vadd.f32 %v11427_v38, %v11862_v4  ;;  %v5140_v37 = vadd.f32 %v11427_v38, %v11933_v59  ;;  %v17037_v53 = vrot.slane %v17036_v61, %v10774_v56 }
 0x27d   :  { %v12040_v60 = vpop.xlane.xlu0 %4676  ;;  %v12060_v0 = vsel %vm5385_vm6, %v5129_v35, %v5641_v26  ;;  %v7536_v48 = vsel %vm7508_vm4, %v6587_v54, %v6583_v33  ;;  %v5651_v63 = vmul.f32 0.01, %v5139_v42  ;;  %v3924_v55 = vadd.f32 %v11984_v16, %v3661_v5  ;;  %664 = vmatmul.mubr.bf16.gmra.mxu1 %v384_v51 }
 0x27e   :  { %v3655_v28 = vadd.f32 %v17037_v53, %v11401_v24  ;;  %17038 = vst [vmem:[#allocation32_spill] sm:$0xff] %v12060_v0  ;;  %4790 = vadd.xlane.f32.xlu0 %v4435_v41  ;;  %v6591_v4 = vrot.slane %v5900_v9, %v10724_v17  ;;  %v5901_v59 = vsel %vm5389_vm8, %v5133_v3, %v5645_v36  ;;  %vm5395_vm9 = vcmp.ge.f32.partialorder %v5139_v42, 0.0 }
 0x27f   :  { %v5135_v1 = vadd.f32 %v11427_v38, %v11869_v43  ;;  %v5136_v35 = vadd.f32 %v11427_v38, %v11882_v34  ;;  %v5650_v26 = vmul.f32 0.01, %v5138_v13  ;;  %v4180_v54 = vmax.f32 %v3924_v55, 0.0  ;;  %v12080_v34 = vpop.f32.mrf.mxu1 }
 0x280   :  { %v12048_v27 = vpop.xlane.xlu1 %4678  ;;  %v3918_v33 = vadd.f32 %v11984_v16, %v3655_v28  ;;  %vm5390_vm10 = vcmp.ge.f32.partialorder %v5134_v14, 0.0  ;;  %vm5394_vm11 = vcmp.ge.f32.partialorder %v5138_v13, 0.0  ;;  %vm5396_vm12 = vcmp.ge.f32.partialorder %v5140_v37, 0.0 }
 0x281   :  { %v12064_v23 = vpop.xlane.xlu0 %4680  ;;  %v5652_v51 = vmul.f32 0.01, %v5140_v37  ;;  %v5907_v9 = vsel %vm5395_vm9, %v5139_v42, %v5651_v63  ;;  %v5141_v3 = vadd.f32 %v11427_v38, %v11943_v6  ;;  %v4443_v43 = vmul.f32 %v11995_v12, %v4180_v54 }
 0x282   :  { %v4174_v36 = vmax.f32 %v3918_v33, 0.0  ;;  %v7537_v55 = vsel %vm7510_vm5, %v6591_v4, %v7536_v48  ;;  %v6595_v53 = vrot.slane %v5901_v59, %v10724_v17  ;;  %v5646_v28 = vmul.f32 0.01, %v5134_v14  ;;  %v595_v4 = vpop.f32.mrf.mxu1 }
 0x283   :  { %v5647_v18 = vmul.f32 0.01, %v5135_v1  ;;  %v5648_v46 = vmul.f32 0.01, %v5136_v35  ;;  %v5137_v63 = vadd.f32 %v11427_v38, %v11897_v58  ;;  %v5906_v42 = vsel %vm5394_vm11, %v5138_v13, %v5650_v26  ;;  %4806 = vadd.xlane.f32.xlu1 %v4443_v43  ;;  %v17039_v58 = vld [vmem:[#allocation34_spill] sm:$0xff] }
 0x284   :  { %v12073_v41 = vpop.xlane.xlu1 %4682  ;;  %v4437_v6 = vmul.f32 %v11995_v12, %v4174_v36  ;;  %vm5391_vm13 = vcmp.ge.f32.partialorder %v5135_v1, 0.0  ;;  %vm5392_vm14 = vcmp.ge.f32.partialorder %v5136_v35, 0.0  ;;  %v6619_v33 = vrot.slane %v5907_v9, %v10724_v17 }
 0x285   :  { %v12078_v5 = vpop.xlane.xlu0 %4684  ;;  %v5908_v48 = vsel %vm5396_vm12, %v5140_v37, %v5652_v51  ;;  %v5653_v59 = vmul.f32 0.01, %v5141_v3  ;;  %v1490_v20 = vcombine.high %v595_v4, %v595_v4  ;;  %v1497_v40 = vrot.slane %v595_v4, %v10770_v49  ;;  %v17042_v37 = vld [vmem:[#allocation33_spill] sm:$0xff] }
 0x286   :  { %4794 = vadd.xlane.f32.xlu0 %v4437_v6  ;;  %v17040_v13 = vrot.slane %v17039_v58, %v10774_v56  ;;  %v12099_v36 = vsel %vm5390_vm10, %v5134_v14, %v5646_v28  ;;  %v6615_v9 = vrot.slane %v5906_v42, %v10724_v17  ;;  %vm5397_vm15 = vcmp.ge.f32.partialorder %v5141_v3, 0.0 }
 0x287   :  { %17041 = vst [vmem:[#allocation34_spill] sm:$0xff] %v12099_v36  ;;  %v3656_v51 = vadd.f32 %v17042_v37, %v11401_v24  ;;  %v12104_v50 = vsel %vm5391_vm13, %v5135_v1, %v5647_v18  ;;  %v12106_v4 = vsel %vm5392_vm14, %v5136_v35, %v5648_v46  ;;  %vm5393_vm0 = vcmp.ge.f32.partialorder %v5137_v63, 0.0  ;;  %v12115_v18 = vpop.f32.mrf.mxu1 }
 0x288   :  { %v12087_v54 = vpop.xlane.xlu1 %4686  ;;  %v3663_v26 = vadd.f32 %v17040_v13, %v11455_v62  ;;  %17043 = vst [vmem:[#allocation33_spill] sm:$0xff] %v12104_v50  ;;  %17044 = vst [vmem:[#allocation63_spill] sm:$0xff] %v12106_v4  ;;  %v5649_v13 = vmul.f32 0.01, %v5137_v63  ;;  %v7543_v47 = vsel %vm7508_vm4, %v6619_v33, %v6615_v9  ;;  %v6623_v14 = vrot.slane %v5908_v48, %v10724_v17 }
 0x289   :  { %v12096_v43 = vpop.xlane.xlu0 %4688  ;;  %v3919_v28 = vadd.f32 %v11984_v16, %v3656_v51  ;;  %v5909_v42 = vsel %vm5397_vm15, %v5141_v3, %v5653_v59  ;;  %v1504_v15 = vrot.slane %v1490_v20, %v10770_v49  ;;  %v1505_v37 = vcombine.high %v1497_v40, %v1497_v40 }
 0x28a   :  { %v3926_v6 = vadd.f32 %v11984_v16, %v3663_v26  ;;  %v12122_v26 = vsel %vm7512_vm7, %v6595_v53, %v7537_v55  ;;  %v12131_v48 = vrot.slane %v1497_v40, %v10770_v49  ;;  %v5142_v59 = vadd.f32 %v11427_v38, %v11950_v57 }
 0x28b   :  { %17045 = vst [vmem:[#allocation64_spill] sm:$0xff] %v12122_v26  ;;  %v12139_v55 = vsel %vm5393_vm0, %v5137_v63, %v5649_v13  ;;  %v7544_v53 = vsel %vm7510_vm5, %v6623_v14, %v7543_v47  ;;  %v4175_v3 = vmax.f32 %v3919_v28, 0.0  ;;  %v1506_v33 = vcombine.high %v1504_v15, %v1504_v15  ;;  %v17047_v14 = vld [vmem:[#allocation38_spill] sm:$0xff]  ;;  %v17054_v26 = vld [vmem:[#allocation36_spill] sm:$0xff] }
 0x28c   :  { %v12109_v52 = vpop.xlane.xlu1 %4690  ;;  %v4182_v46 = vmax.f32 %v3926_v6, 0.0  ;;  %17046 = vst [vmem:[#allocation65_spill] sm:$0xff] %v12139_v55  ;;  %v6627_v6 = vrot.slane %v5909_v42, %v10724_v17  ;;  %v12144_v20 = vrot.slane %v1504_v15, %v10770_v49  ;;  %v12147_v40 = vrot.slane %v1505_v37, %v10770_v49 }
 0x28d   :  { %v12117_v1 = vpop.xlane.xlu0 %4692  ;;  %v5143_v57 = vadd.f32 %v11427_v38, %v11967_v10  ;;  %v4438_v13 = vmul.f32 %v11995_v12, %v4175_v3  ;;  %v3664_v28 = vadd.f32 %v17047_v14, %v11455_v62  ;;  %v1535_v42 = vcombine.high %v12131_v48, %v12131_v48 }
 0x28e   :  { %v4445_v9 = vmul.f32 %v11995_v12, %v4182_v46  ;;  %v599_v46 = vpop.f32.mrf.mxu1  ;;  %v5654_v37 = vmul.f32 0.01, %v5142_v59  ;;  %v17048_v10 = vcombine.high %v17036_v61, %v17036_v61  ;;  %vm5398_vm2 = vcmp.ge.f32.partialorder %v5142_v59, 0.0 }
 0x28f   :  { %v1539_v63 = vcombine.high %v599_v46, %v599_v46  ;;  %v1546_v47 = vrot.slane %v599_v46, %v10770_v49  ;;  %v12168_v46 = vsel %vm7512_vm7, %v6627_v6, %v7544_v53  ;;  %4796 = vadd.xlane.f32.xlu0 %v4438_v13  ;;  %v3927_v14 = vadd.f32 %v11984_v16, %v3664_v28 }
 0x290   :  { %v12136_v51 = vpop.xlane.xlu1 %4694  ;;  %4810 = vadd.xlane.f32.xlu1 %v4445_v9  ;;  %v2689_v9 = vrot.slane %v17048_v10, %v10774_v56  ;;  %17049 = vst [vmem:[#allocation38_spill] sm:$0xff] %v12168_v46  ;;  %v12174_v15 = vrot.slane %v1506_v33, %v10770_v49  ;;  %v1536_v55 = vcombine.high %v12144_v20, %v12144_v20  ;;  %v5655_v6 = vmul.f32 0.01, %v5143_v57 }
 0x291   :  { %v12151_v35 = vpop.xlane.xlu0 %4696  ;;  %v1537_v61 = vcombine.high %v12147_v40, %v12147_v40  ;;  %v1553_v3 = vrot.slane %v1539_v63, %v10770_v49  ;;  %v1554_v46 = vcombine.high %v1546_v47, %v1546_v47  ;;  %v4183_v13 = vmax.f32 %v3927_v14, 0.0  ;;  %v17053_v14 = vld [vmem:[#allocation35_spill] sm:$0xff] }
 0x292   :  { %17050 = vst [vmem:[#allocation66_spill] sm:$0xff] %v12174_v15  ;;  %v3657_v10 = vadd.f32 %v2689_v9, %v11401_v24  ;;  %v12186_v33 = vsel %vm5398_vm2, %v5142_v59, %v5654_v37  ;;  %vm5399_vm3 = vcmp.ge.f32.partialorder %v5143_v57, 0.0  ;;  %v12190_v50 = vadd.f32 %v11427_v38, %v11987_v30 }
 0x293   :  { %17051 = vst [vmem:[#allocation67_spill] sm:$0xff] %v12186_v33  ;;  %v12195_v24 = vrot.slane %v1546_v47, %v10770_v49  ;;  %v4446_v9 = vmul.f32 %v11995_v12, %v4183_v13  ;;  %v17055_v28 = vrot.slane %v17054_v26, %v10774_v56  ;;  %v12206_v30 = vrot.slane %v1535_v42, %v10774_v56 }
 0x294   :  { %v12165_v4 = vpop.xlane.xlu1 %4698  ;;  %v3920_v63 = vadd.f32 %v11984_v16, %v3657_v10  ;;  %v12209_v0 = vrot.slane %v1537_v61, %v10774_v56  ;;  %v12215_v10 = vsel %vm5399_vm3, %v5143_v57, %v5655_v6  ;;  %v1555_v29 = vcombine.high %v1553_v3, %v1553_v3 }
 0x295   :  { %v12181_v53 = vpop.xlane.xlu0 %4700  ;;  %v3666_v59 = vadd.f32 %v17055_v28, %v17053_v14  ;;  %17057 = vst [vmem:[#allocation36_spill] sm:$0xff] %v12215_v10  ;;  %v12218_v26 = vrot.slane %v1554_v46, %v10770_v49  ;;  %v12220_v28 = vpop.f32.mrf.mxu1  ;;  %4812 = vadd.xlane.f32.xlu1 %v4446_v9  ;;  %v12225_v61 = vrot.slane %v1536_v55, %v10774_v56  ;;  %vm5400_vm6 = vcmp.ge.f32.partialorder %v12190_v50, 0.0 }
 0x296   :  { %17056 = vst [vmem:[#allocation35_spill] sm:$0xff] %v12209_v0  ;;  %v4176_v37 = vmax.f32 %v3920_v63, 0.0  ;;  %v12230_v57 = vrot.slane %v1553_v3, %v10770_v49  ;;  %v1584_v46 = vcombine.high %v12195_v24, %v12195_v24  ;;  %v17059_v3 = vld [vmem:[#allocation39_spill] sm:$0xff]  ;;  %v17061_v2 = vcombine.high %v17039_v58, %v17039_v58 }
 0x297   :  { %17058 = vst [vmem:[#allocation69_spill] sm:$0xff] %v12225_v61  ;;  %v3929_v63 = vadd.f32 %v11984_v16, %v3666_v59  ;;  %v17060_v42 = vrot.slane %v17059_v3, %v10774_v56  ;;  %v12254_v59 = vrot.slane %v1555_v29, %v10770_v49  ;;  %v5145_v55 = vadd.f32 %v11427_v38, %v12002_v44  ;;  %v605_v47 = vpop.f32.mrf.mxu1 }
 0x298   :  { %v12192_v36 = vpop.xlane.xlu1 %4702  ;;  %v4439_v9 = vmul.f32 %v11995_v12, %v4176_v37  ;;  %v2721_v39 = vrot.slane %v17061_v2, %v10774_v56  ;;  %v1586_v37 = vcombine.high %v12218_v26, %v12218_v26  ;;  %v1588_v10 = vcombine.high %v605_v47, %v605_v47 }
 0x299   :  { %17052 = vst [vmem:[#allocation68_spill] sm:$0xff] %v12192_v36  ;;  %v12213_v13 = vpop.xlane.xlu0 %4704  ;;  %v3667_v33 = vadd.f32 %v17060_v42, %v17053_v14  ;;  %17062 = vst [vmem:[#allocation39_spill] sm:$0xff] %v12254_v59  ;;  %v4185_v3 = vmax.f32 %v3929_v63, 0.0  ;;  %v1585_v42 = vcombine.high %v12230_v57, %v12230_v57  ;;  %v17063_v29 = vrot.slane %v11663_v11, %v10774_v56 }
 0x29a   :  { %4798 = vadd.xlane.f32.xlu0 %v4439_v9  ;;  %v12272_v44 = vrot.slane %v1584_v46, %v10774_v56  ;;  %v3665_v63 = vadd.f32 %v2721_v39, %v11455_v62  ;;  %v5656_v15 = vmul.f32 0.01, %v12190_v50  ;;  %v1595_v11 = vrot.slane %v605_v47, %v10770_v49 }
 0x29b   :  { %v3930_v2 = vadd.f32 %v11984_v16, %v3667_v33  ;;  %v3675_v58 = vadd.f32 %v17063_v29, %v12080_v34  ;;  %v4448_v9 = vmul.f32 %v11995_v12, %v4185_v3  ;;  %v12285_v46 = vrot.slane %v1586_v37, %v10774_v56 }
 0x29c   :  { %v12232_v6 = vpop.xlane.xlu1 %4706  ;;  %v5657_v0 = vmul.f32 0.01, %v5145_v55  ;;  %v3928_v62 = vadd.f32 %v11984_v16, %v3665_v63  ;;  %vm5401_vm8 = vcmp.ge.f32.partialorder %v5145_v55, 0.0  ;;  %v1602_v39 = vrot.slane %v1588_v10, %v10770_v49 }
 0x29d   :  { %v12251_v31 = vpop.xlane.xlu0 %4708  ;;  %v4186_v29 = vmax.f32 %v3930_v2, 0.0  ;;  %4816 = vadd.xlane.f32.xlu1 %v4448_v9  ;;  %v3938_v47 = vadd.f32 %v11984_v16, %v3675_v58  ;;  %v5146_v37 = vadd.f32 %v11427_v38, %v12014_v19  ;;  %v17066_v9 = vld [vmem:[#allocation41_spill] sm:$0xff]  ;;  %v12302_v10 = vsel %vm5400_vm6, %v12190_v50, %v5656_v15 }
 0x29e   :  { %v4184_v61 = vmax.f32 %v3928_v62, 0.0  ;;  %17067 = vst [vmem:[#allocation41_spill] sm:$0xff] %v12302_v10  ;;  %v1603_v63 = vcombine.high %v1595_v11, %v1595_v11  ;;  %v12305_v58 = vrot.slane %v1595_v11, %v10770_v49  ;;  %v12312_v19 = vsel %vm5401_vm8, %v5145_v55, %v5657_v0 }
 0x29f   :  { %v4449_v3 = vmul.f32 %v11995_v12, %v4186_v29  ;;  %v12307_v29 = vpop.f32.mrf.mxu1  ;;  %v4194_v33 = vmax.f32 %v3938_v47, 0.0  ;;  %17071 = vst [vmem:[#allocation75_spill] sm:$0xff] %v12312_v19  ;;  %v3676_v50 = vadd.f32 %v11723_v25, %v12080_v34  ;;  %v12319_v15 = vrot.slane %v1585_v42, %v10774_v56 }
 0x2a0   :  { %v12267_v22 = vpop.xlane.xlu1 %4710  ;;  %17068 = vst [vmem:[#allocation72_spill] sm:$0xff] %v12305_v58  ;;  %17069 = vst [vmem:[#allocation73_spill] sm:$0xff] %v12307_v29  ;;  %v4447_v62 = vmul.f32 %v11995_v12, %v4184_v61  ;;  %v1604_v11 = vcombine.high %v1602_v39, %v1602_v39  ;;  %vm5402_vm9 = vcmp.ge.f32.partialorder %v5146_v37, 0.0  ;;  %v5147_v42 = vadd.f32 %v11427_v38, %v12028_v32 }
 0x2a1   :  { %v12280_v36 = vpop.xlane.xlu0 %4712  ;;  %4818 = vadd.xlane.f32.xlu0 %v4449_v3  ;;  %17072 = vst [vmem:[#allocation76_spill] sm:$0xff] %v12319_v15  ;;  %v4457_v29 = vmul.f32 %v11995_v12, %v4194_v33  ;;  %v17073_v3 = vld [vmem:[#allocation37_spill] sm:$0xff]  ;;  %v609_v33 = vpop.f32.mrf.mxu1  ;;  %v17079_v32 = vrot.slane %v11660_v8, %v10774_v56  ;;  %v5658_v10 = vmul.f32 0.01, %v5146_v37 }
 0x2a2   :  { %17064 = vst [vmem:[#allocation70_spill] sm:$0xff] %v12280_v36  ;;  %v3668_v36 = vadd.f32 %v17066_v9, %v17053_v14  ;;  %v17074_v47 = vrot.slane %v17073_v3, %v10774_v56  ;;  %4814 = vadd.xlane.f32.xlu1 %v4447_v62  ;;  %v3939_v3 = vadd.f32 %v11984_v16, %v3676_v50  ;;  %vm5403_vm10 = vcmp.ge.f32.partialorder %v5147_v42, 0.0 }
 0x2a3   :  { %v1633_v62 = vcombine.high %v12305_v58, %v12305_v58  ;;  %v3678_v55 = vadd.f32 %v17079_v32, %v12080_v34  ;;  %v1644_v8 = vrot.slane %v609_v33, %v10770_v49 }
 0x2a4   :  { %v12291_v2 = vpop.xlane.xlu1 %4714  ;;  %v3931_v9 = vadd.f32 %v11984_v16, %v3668_v36  ;;  %v12331_v36 = vrot.slane %v1602_v39, %v10770_v49  ;;  %v12342_v39 = vrot.slane %v1603_v63, %v10770_v49  ;;  %v4195_v50 = vmax.f32 %v3939_v3, 0.0 }
 0x2a5   :  { %17065 = vst [vmem:[#allocation71_spill] sm:$0xff] %v12291_v2  ;;  %v12309_v59 = vpop.xlane.xlu0 %4716  ;;  %4834 = vadd.xlane.f32.xlu0 %v4457_v29  ;;  %v12352_v29 = vrot.slane %v1604_v11, %v10770_v49  ;;  %v5659_v11 = vmul.f32 0.01, %v5147_v42 }
 0x2a6   :  { %17070 = vst [vmem:[#allocation74_spill] sm:$0xff] %v12309_v59  ;;  %v3670_v59 = vadd.f32 %v17074_v47, %v17053_v14  ;;  %17076 = vst [vmem:[#allocation77_spill] sm:$0xff] %v12331_v36  ;;  %v4187_v25 = vmax.f32 %v3931_v9, 0.0  ;;  %v1634_v19 = vcombine.high %v12331_v36, %v12331_v36  ;;  %v4458_v32 = vmul.f32 %v11995_v12, %v4195_v50 }
 0x2a7   :  { %17078 = vst [vmem:[#allocation79_spill] sm:$0xff] %v12342_v39  ;;  %17080 = vst [vmem:[#allocation80_spill] sm:$0xff] %v12352_v29  ;;  %v12382_v36 = vrot.slane %v1633_v62, %v10774_v56  ;;  %v5148_v50 = vadd.f32 %v11427_v38, %v12040_v60  ;;  %v12402_v60 = vrot.slane %v1644_v8, %v10770_v49 }
 0x2a8   :  { %v12326_v0 = vpop.xlane.xlu1 %4718  ;;  %v3933_v47 = vadd.f32 %v11984_v16, %v3670_v59  ;;  %v4450_v9 = vmul.f32 %v11995_v12, %v4187_v25  ;;  %v1637_v25 = vcombine.high %v609_v33, %v609_v33  ;;  %v17081_v59 = vld [vmem:[#allocation42_spill] sm:$0xff] }
 0x2a9   :  { %17075 = vst [vmem:[#allocation37_spill] sm:$0xff] %v12326_v0  ;;  %v12339_v15 = vpop.xlane.xlu0 %4720  ;;  %v3941_v0 = vadd.f32 %v11984_v16, %v3678_v55  ;;  %v17082_v3 = vrot.slane %v17081_v59, %v10774_v56  ;;  %v3677_v55 = vadd.f32 %v11738_v7, %v12080_v34  ;;  %4836 = vadd.xlane.f32.xlu0 %v4458_v32  ;;  %17084 = vst [vmem:[#allocation81_spill] sm:$0xff] %v12382_v36 }
 0x2aa   :  { %17077 = vst [vmem:[#allocation78_spill] sm:$0xff] %v12339_v15  ;;  %v4189_v61 = vmax.f32 %v3933_v47, 0.0  ;;  %4820 = vadd.xlane.f32.xlu1 %v4450_v9  ;;  %v1635_v9 = vcombine.high %v12342_v39, %v12342_v39  ;;  %v1651_v7 = vrot.slane %v1637_v25, %v10770_v49  ;;  %17087 = vst [vmem:[#allocation82_spill] sm:$0xff] %v12402_v60  ;;  %vm5404_vm11 = vcmp.ge.f32.partialorder %v5148_v50, 0.0 }
 0x2ab   :  { %v3674_v47 = vadd.f32 %v17082_v3, %v12080_v34  ;;  %v4197_v15 = vmax.f32 %v3941_v0, 0.0  ;;  %v5914_v0 = vsel %vm5402_vm9, %v5146_v37, %v5658_v10  ;;  %v5660_v37 = vmul.f32 0.01, %v5148_v50 }
 0x2ac   :  { %v12356_v63 = vpop.xlane.xlu1 %4722  ;;  %v4452_v2 = vmul.f32 %v11995_v12, %v4189_v61  ;;  %v3940_v61 = vadd.f32 %v11984_v16, %v3677_v55 }
 0x2ad   :  { %v12368_v58 = vpop.xlane.xlu0 %4724  ;;  %v3937_v59 = vadd.f32 %v11984_v16, %v3674_v47  ;;  %v4460_v33 = vmul.f32 %v11995_v12, %v4197_v15 }
 0x2ae   :  { %17083 = vst [vmem:[#allocation42_spill] sm:$0xff] %v12368_v58  ;;  %4824 = vadd.xlane.f32.xlu1 %v4452_v2  ;;  %v5915_v58 = vsel %vm5403_vm10, %v5147_v42, %v5659_v11  ;;  %v4196_v10 = vmax.f32 %v3940_v61, 0.0  ;;  %v17085_v2 = vld [vmem:[#allocation44_spill] sm:$0xff]  ;;  %v12399_v42 = vrot.slane %v1634_v19, %v10774_v56  ;;  %v1652_v11 = vcombine.high %v1644_v8, %v1644_v8 }
 0x2af   :  { %v4193_v32 = vmax.f32 %v3937_v59, 0.0  ;;  %v3669_v25 = vadd.f32 %v17085_v2, %v17053_v14  ;;  %4840 = vadd.xlane.f32.xlu0 %v4460_v33  ;;  %v12408_v59 = vrot.slane %v1635_v9, %v10774_v56  ;;  %v6647_v61 = vrot.slane %v5914_v0, %v10724_v17 }
 0x2b0   :  { %v12379_v3 = vpop.xlane.xlu1 %4726  ;;  %17086 = vst [vmem:[#allocation44_spill] sm:$0xff] %v12399_v42  ;;  %v6651_v62 = vrot.slane %v5915_v58, %v10724_v17  ;;  %v1653_v19 = vcombine.high %v1651_v7, %v1651_v7  ;;  %v4459_v8 = vmul.f32 %v11995_v12, %v4196_v10  ;;  %v17089_v33 = vrot.slane %v11689_v45, %v10774_v56 }
 0x2b1   :  { %v12390_v47 = vpop.xlane.xlu0 %4728  ;;  %v4456_v15 = vmul.f32 %v11995_v12, %v4193_v32  ;;  %17088 = vst [vmem:[#allocation83_spill] sm:$0xff] %v12408_v59  ;;  %v3932_v2 = vadd.f32 %v11984_v16, %v3669_v25  ;;  %v12421_v9 = vrot.slane %v1651_v7, %v10770_v49  ;;  %v5149_v58 = vadd.f32 %v11427_v38, %v12048_v27 }
 0x2b2   :  { %v3679_v32 = vadd.f32 %v17089_v33, %v12080_v34  ;;  %v12426_v25 = vrot.slane %v1652_v11, %v10770_v49  ;;  %v1682_v10 = vcombine.high %v12402_v60, %v12402_v60  ;;  %v17091_v33 = vld [vmem:[#allocation40_spill] sm:$0xff]  ;;  %v7550_v36 = vsel %vm7508_vm4, %v6651_v62, %v6647_v61 }
 0x2b3   :  { %4832 = vadd.xlane.f32.xlu1 %v4456_v15  ;;  %v4188_v0 = vmax.f32 %v3932_v2, 0.0  ;;  %4838 = vadd.xlane.f32.xlu0 %v4459_v8  ;;  %v17092_v29 = vrot.slane %v17091_v33, %v10774_v56  ;;  %v3680_v2 = vadd.f32 %v11779_v21, %v12080_v34  ;;  %v5916_v8 = vsel %vm5404_vm11, %v5148_v50, %v5660_v37 }
 0x2b4   :  { %v12405_v55 = vpop.xlane.xlu1 %4730  ;;  %v3942_v15 = vadd.f32 %v11984_v16, %v3679_v32  ;;  %v5150_v32 = vadd.f32 %v11427_v38, %v12064_v23  ;;  %v1683_v62 = vcombine.high %v12421_v9, %v12421_v9  ;;  %v5661_v61 = vmul.f32 0.01, %v5149_v58  ;;  %v17094_v23 = vld [vmem:[#allocation43_spill] sm:$0xff] }
 0x2b5   :  { %v12418_v42 = vpop.xlane.xlu0 %4732  ;;  %v3671_v7 = vadd.f32 %v17092_v29, %v17053_v14  ;;  %v4451_v11 = vmul.f32 %v11995_v12, %v4188_v0  ;;  %v3943_v0 = vadd.f32 %v11984_v16, %v3680_v2  ;;  %vm5405_vm12 = vcmp.ge.f32.partialorder %v5149_v58, 0.0 }
 0x2b6   :  { %17090 = vst [vmem:[#allocation84_spill] sm:$0xff] %v12418_v42  ;;  %v4198_v39 = vmax.f32 %v3942_v15, 0.0  ;;  %v3672_v37 = vadd.f32 %v17094_v23, %v17053_v14  ;;  %v5662_v23 = vmul.f32 0.01, %v5150_v32  ;;  %vm5406_vm13 = vcmp.ge.f32.partialorder %v5150_v32, 0.0 }
 0x2b7   :  { %v3934_v42 = vadd.f32 %v11984_v16, %v3671_v7  ;;  %4822 = vadd.xlane.f32.xlu1 %v4451_v11  ;;  %v6655_v7 = vrot.slane %v5916_v8, %v10724_v17  ;;  %v4199_v27 = vmax.f32 %v3943_v0, 0.0  ;;  %v17095_v11 = vrot.slane %v12131_v48, %v10774_v56 }
 0x2b8   :  { %v12435_v59 = vpop.xlane.xlu1 %4734  ;;  %v4461_v21 = vmul.f32 %v11995_v12, %v4198_v39  ;;  %v1684_v39 = vcombine.high %v12426_v25, %v12426_v25  ;;  %v5917_v0 = vsel %vm5405_vm12, %v5149_v58, %v5661_v61  ;;  %v3935_v48 = vadd.f32 %v11984_v16, %v3672_v37 }
 0x2b9   :  { %17093 = vst [vmem:[#allocation40_spill] sm:$0xff] %v12435_v59  ;;  %v12446_v29 = vpop.xlane.xlu0 %4736  ;;  %v12449_v59 = vrot.slane %v1653_v19, %v10770_v49  ;;  %v4190_v50 = vmax.f32 %v3934_v42, 0.0  ;;  %v5151_v19 = vadd.f32 %v11427_v38, %v12073_v41  ;;  %v3682_v2 = vadd.f32 %v17095_v11, %v12115_v18 }
 0x2ba   :  { %4842 = vadd.xlane.f32.xlu0 %v4461_v21  ;;  %v12474_v41 = vrot.slane %v1682_v10, %v10774_v56  ;;  %v4462_v42 = vmul.f32 %v11995_v12, %v4199_v27  ;;  %v7551_v58 = vsel %vm7510_vm5, %v6655_v7, %v7550_v36  ;;  %v4191_v61 = vmax.f32 %v3935_v48, 0.0 }
 0x2bb   :  { %v4453_v60 = vmul.f32 %v11995_v12, %v4190_v50  ;;  %v3945_v21 = vadd.f32 %v11984_v16, %v3682_v2  ;;  %v17097_v50 = vcombine.high %v17091_v33, %v17091_v33  ;;  %vm5407_vm14 = vcmp.ge.f32.partialorder %v5151_v19, 0.0 }
 0x2bc   :  { %v12457_v15 = vpop.xlane.xlu1 %4738  ;;  %v12492_v11 = vsel %vm5406_vm13, %v5150_v32, %v5662_v23  ;;  %v5663_v27 = vmul.f32 0.01, %v5151_v19  ;;  %v5152_v33 = vadd.f32 %v11427_v38, %v12078_v5  ;;  %v4454_v10 = vmul.f32 %v11995_v12, %v4191_v61 }
 0x2bd   :  { %v12471_v8 = vpop.xlane.xlu0 %4740  ;;  %4826 = vadd.xlane.f32.xlu1 %v4453_v60  ;;  %v6659_v60 = vrot.slane %v5917_v0, %v10724_v17  ;;  %17098 = vst [vmem:[#allocation85_spill] sm:$0xff] %v12492_v11  ;;  %v4201_v2 = vmax.f32 %v3945_v21, 0.0  ;;  %v12501_v7 = vrot.slane %v1684_v39, %v10774_v56  ;;  %v5155_v32 = vadd.f32 %v11427_v38, %v12109_v52  ;;  %v17139_v11 = vld [vmem:[#allocation84_spill] sm:$0xff] }
 0x2be   :  { %17096 = vst [vmem:[#allocation43_spill] sm:$0xff] %v12471_v8  ;;  %v2753_v8 = vrot.slane %v17097_v50, %v10774_v56  ;;  %4844 = vadd.xlane.f32.xlu0 %v4462_v42  ;;  %v5154_v50 = vadd.f32 %v11427_v38, %v12096_v43  ;;  %v17099_v42 = vcombine.high %v11689_v45, %v11689_v45  ;;  %vm5408_vm15 = vcmp.ge.f32.partialorder %v5152_v33, 0.0 }
 0x2bf   :  { %v4464_v23 = vmul.f32 %v11995_v12, %v4201_v2  ;;  %v12524_v45 = vsel %vm5407_vm14, %v5151_v19, %v5663_v27  ;;  %v5664_v61 = vmul.f32 0.01, %v5152_v33  ;;  %vm5411_vm2 = vcmp.ge.f32.partialorder %v5155_v32, 0.0 }
 0x2c0   :  { %v12489_v37 = vpop.xlane.xlu1 %4742  ;;  %v3673_v36 = vadd.f32 %v2753_v8, %v17053_v14  ;;  %v2785_v5 = vrot.slane %v17099_v42, %v10774_v56  ;;  %v12515_v14 = vrot.slane %v1683_v62, %v10774_v56  ;;  %v12521_v8 = vsel %vm7512_vm7, %v6659_v60, %v7551_v58  ;;  %17101 = vst [vmem:[#allocation87_spill] sm:$0xff] %v12524_v45 }
 0x2c1   :  { %v12510_v0 = vpop.xlane.xlu0 %4744  ;;  %4828 = vadd.xlane.f32.xlu1 %v4454_v10  ;;  %17100 = vst [vmem:[#allocation86_spill] sm:$0xff] %v12521_v8  ;;  %v17102_v62 = vrot.slane %v12147_v40, %v10774_v56  ;;  %v5666_v2 = vmul.f32 0.01, %v5154_v50  ;;  %v5156_v58 = vadd.f32 %v11427_v38, %v12117_v1  ;;  %vm5410_vm0 = vcmp.ge.f32.partialorder %v5154_v50, 0.0 }
 0x2c2   :  { %v3936_v52 = vadd.f32 %v11984_v16, %v3673_v36  ;;  %4848 = vadd.xlane.f32.xlu0 %v4464_v23  ;;  %v3681_v48 = vadd.f32 %v2785_v5, %v12080_v34  ;;  %v5667_v36 = vmul.f32 0.01, %v5155_v32  ;;  %v3684_v40 = vadd.f32 %v12206_v30, %v12115_v18 }
 0x2c3   :  { %v3683_v21 = vadd.f32 %v17102_v62, %v12115_v18  ;;  %v5153_v27 = vadd.f32 %v11427_v38, %v12087_v54  ;;  %v5157_v23 = vadd.f32 %v11427_v38, %v12136_v51  ;;  %v12549_v62 = vsel %vm5408_vm15, %v5152_v33, %v5664_v61 }
 0x2c4   :  { %v4192_v10 = vmax.f32 %v3936_v52, 0.0  ;;  %v12531_v42 = vpop.xlane.xlu1 %4746  ;;  %v3944_v19 = vadd.f32 %v11984_v16, %v3681_v48  ;;  %17103 = vst [vmem:[#allocation88_spill] sm:$0xff] %v12549_v62  ;;  %v17104_v54 = vrot.slane %v12218_v26, %v10774_v56  ;;  %v5923_v51 = vsel %vm5411_vm2, %v5155_v32, %v5667_v36 }
 0x2c5   :  { %v3946_v60 = vadd.f32 %v11984_v16, %v3683_v21  ;;  %v12544_v1 = vpop.xlane.xlu0 %4748  ;;  %v3947_v21 = vadd.f32 %v11984_v16, %v3684_v40  ;;  %vm5412_vm3 = vcmp.ge.f32.partialorder %v5156_v58, 0.0  ;;  %v5669_v40 = vmul.f32 0.01, %v5157_v23 }
 0x2c6   :  { %v4455_v34 = vmul.f32 %v11995_v12, %v4192_v10  ;;  %v4200_v5 = vmax.f32 %v3944_v19, 0.0  ;;  %v3691_v30 = vadd.f32 %v17104_v54, %v12220_v28  ;;  %v5922_v10 = vsel %vm5410_vm0, %v5154_v50, %v5666_v2 }
 0x2c7   :  { %v4202_v52 = vmax.f32 %v3946_v60, 0.0  ;;  %v5668_v19 = vmul.f32 0.01, %v5156_v58  ;;  %v4203_v48 = vmax.f32 %v3947_v21, 0.0  ;;  %v17105_v26 = vrot.slane %v12144_v20, %v10774_v56 }
 0x2c8   :  { %4830 = vadd.xlane.f32.xlu1 %v4455_v34  ;;  %v4463_v60 = vmul.f32 %v11995_v12, %v4200_v5  ;;  %v3954_v33 = vadd.f32 %v11984_v16, %v3691_v30  ;;  %v12559_v61 = vpop.xlane.xlu1 %4750  ;;  %v5665_v34 = vmul.f32 0.01, %v5153_v27  ;;  %v3692_v32 = vadd.f32 %v12272_v44, %v12220_v28 }
 0x2c9   :  { %v4465_v39 = vmul.f32 %v11995_v12, %v4202_v52  ;;  %v3686_v50 = vadd.f32 %v17105_v26, %v12115_v18  ;;  %vm5409_vm6 = vcmp.ge.f32.partialorder %v5153_v27, 0.0  ;;  %v6683_v2 = vrot.slane %v5923_v51, %v10724_v17  ;;  %v12572_v30 = vpop.xlane.xlu0 %4752 }
 0x2ca   :  { %4846 = vadd.xlane.f32.xlu0 %v4463_v60  ;;  %vm5413_vm8 = vcmp.ge.f32.partialorder %v5157_v23, 0.0  ;;  %v4210_v36 = vmax.f32 %v3954_v33, 0.0  ;;  %v6679_v5 = vrot.slane %v5922_v10, %v10724_v17  ;;  %v5924_v52 = vsel %vm5412_vm3, %v5156_v58, %v5668_v19 }
 0x2cb   :  { %v4466_v21 = vmul.f32 %v11995_v12, %v4203_v48  ;;  %v3949_v54 = vadd.f32 %v11984_v16, %v3686_v50  ;;  %v5158_v20 = vadd.f32 %v11427_v38, %v12151_v35  ;;  %v5163_v44 = vadd.f32 %v11427_v38, %v12232_v6 }
 0x2cc   :  { %4850 = vadd.xlane.f32.xlu1 %v4465_v39  ;;  %v4473_v51 = vmul.f32 %v11995_v12, %v4210_v36  ;;  %v3955_v39 = vadd.f32 %v11984_v16, %v3692_v32  ;;  %v12580_v60 = vsel %vm5409_vm6, %v5153_v27, %v5665_v34  ;;  %v12582_v10 = vsel %vm5413_vm8, %v5157_v23, %v5669_v40  ;;  %v12595_v34 = vpop.xlane.xlu1 %4754 }
 0x2cd   :  { %17106 = vst [vmem:[#allocation89_spill] sm:$0xff] %v12580_v60  ;;  %v4205_v58 = vmax.f32 %v3949_v54, 0.0  ;;  %v17107_v48 = vrot.slane %v12195_v24, %v10774_v56  ;;  %v7557_v35 = vsel %vm7508_vm4, %v6683_v2, %v6679_v5  ;;  %v5162_v6 = vadd.f32 %v11427_v38, %v12213_v13 }
 0x2ce   :  { %4852 = vadd.xlane.f32.xlu0 %v4466_v21  ;;  %v4211_v33 = vmax.f32 %v3955_v39, 0.0  ;;  %v17108_v27 = vrot.slane %v12230_v57, %v10774_v56  ;;  %v6687_v40 = vrot.slane %v5924_v52, %v10724_v17  ;;  %v5164_v24 = vadd.f32 %v11427_v38, %v12251_v31  ;;  %v12608_v31 = vpop.xlane.xlu0 %4756 }
 0x2cf   :  { %v3690_v19 = vadd.f32 %v17107_v48, %v12220_v28  ;;  %v4468_v26 = vmul.f32 %v11995_v12, %v4205_v58  ;;  %v6691_v13 = vrot.slane %v12582_v10, %v10724_v17  ;;  %vm5414_vm9 = vcmp.ge.f32.partialorder %v5158_v20, 0.0 }
 0x2d0   :  { %4866 = vadd.xlane.f32.xlu1 %v4473_v51  ;;  %v3694_v23 = vadd.f32 %v17108_v27, %v12220_v28  ;;  %v5675_v32 = vmul.f32 0.01, %v5163_v44  ;;  %v4474_v2 = vmul.f32 %v11995_v12, %v4211_v33  ;;  %v5159_v57 = vadd.f32 %v11427_v38, %v12165_v4  ;;  %v17109_v51 = vld [vmem:[#allocation35_spill] sm:$0xff] }
 0x2d1   :  { %v3953_v50 = vadd.f32 %v11984_v16, %v3690_v19  ;;  %vm5419_vm10 = vcmp.ge.f32.partialorder %v5163_v44, 0.0  ;;  %v5160_v52 = vadd.f32 %v11427_v38, %v12181_v53  ;;  %v5674_v21 = vmul.f32 0.01, %v5162_v6  ;;  %v12619_v53 = vpop.xlane.xlu1 %4758 }
 0x2d2   :  { %4856 = vadd.xlane.f32.xlu0 %v4468_v26  ;;  %v3957_v5 = vadd.f32 %v11984_v16, %v3694_v23  ;;  %v5165_v54 = vadd.f32 %v11427_v38, %v12267_v22  ;;  %v3685_v39 = vadd.f32 %v17109_v51, %v12115_v18  ;;  %vm5418_vm11 = vcmp.ge.f32.partialorder %v5162_v6, 0.0  ;;  %v17110_v23 = vld [vmem:[#allocation68_spill] sm:$0xff] }
 0x2d3   :  { %v4209_v36 = vmax.f32 %v3953_v50, 0.0  ;;  %v5676_v4 = vmul.f32 0.01, %v5164_v24  ;;  %v7558_v48 = vsel %vm7510_vm5, %v6687_v40, %v7557_v35  ;;  %v5670_v19 = vmul.f32 0.01, %v5158_v20 }
 0x2d4   :  { %4868 = vadd.xlane.f32.xlu1 %v4474_v2  ;;  %v4213_v58 = vmax.f32 %v3957_v5, 0.0  ;;  %v5931_v33 = vsel %vm5419_vm10, %v5163_v44, %v5675_v32  ;;  %vm5420_vm12 = vcmp.ge.f32.partialorder %v5164_v24, 0.0  ;;  %v5671_v27 = vmul.f32 0.01, %v5159_v57  ;;  %v12627_v5 = vpop.xlane.xlu0 %4760 }
 0x2d5   :  { %v4472_v10 = vmul.f32 %v11995_v12, %v4209_v36  ;;  %v5161_v22 = vadd.f32 %v11427_v38, %v17110_v23  ;;  %v3948_v50 = vadd.f32 %v11984_v16, %v3685_v39  ;;  %vm5415_vm13 = vcmp.ge.f32.partialorder %v5159_v57, 0.0  ;;  %v12644_v23 = vpop.xlane.xlu1 %4762 }
 0x2d6   :  { %v4476_v26 = vmul.f32 %v11995_v12, %v4213_v58  ;;  %v5672_v2 = vmul.f32 0.01, %v5160_v52  ;;  %v5930_v36 = vsel %vm5418_vm11, %v5162_v6, %v5674_v21  ;;  %v5677_v35 = vmul.f32 0.01, %v5165_v54 }
 0x2d7   :  { %4864 = vadd.xlane.f32.xlu0 %v4472_v10  ;;  %v6715_v40 = vrot.slane %v5931_v33, %v10724_v17  ;;  %v5932_v44 = vsel %vm5420_vm12, %v5164_v24, %v5676_v4  ;;  %vm5421_vm14 = vcmp.ge.f32.partialorder %v5165_v54, 0.0  ;;  %v4204_v32 = vmax.f32 %v3948_v50, 0.0  ;;  %v17124_v10 = vld [vmem:[#allocation37_spill] sm:$0xff] }
 0x2d8   :  { %4872 = vadd.xlane.f32.xlu1 %v4476_v26  ;;  %v12634_v16 = vsel %vm5414_vm9, %v5158_v20, %v5670_v19  ;;  %vm5416_vm15 = vcmp.ge.f32.partialorder %v5160_v52, 0.0  ;;  %v12636_v6 = vsel %vm5415_vm13, %v5159_v57, %v5671_v27  ;;  %v5673_v21 = vmul.f32 0.01, %v5161_v22 }
 0x2d9   :  { %17111 = vst [vmem:[#allocation35_spill] sm:$0xff] %v12634_v16  ;;  %17112 = vst [vmem:[#allocation68_spill] sm:$0xff] %v12636_v6  ;;  %v6711_v24 = vrot.slane %v5930_v36, %v10724_v17  ;;  %v4467_v39 = vmul.f32 %v11995_v12, %v4204_v32  ;;  %v12641_v4 = vsel %vm7512_vm7, %v6691_v13, %v7558_v48  ;;  %vm5417_vm0 = vcmp.ge.f32.partialorder %v5161_v22, 0.0  ;;  %v17119_v36 = vld [vmem:[#allocation78_spill] sm:$0xff] }
 0x2da   :  { %17113 = vst [vmem:[#allocation90_spill] sm:$0xff] %v12641_v4  ;;  %v6719_v58 = vrot.slane %v5932_v44, %v10724_v17  ;;  %v5933_v33 = vsel %vm5421_vm14, %v5165_v54, %v5677_v35  ;;  %v12646_v26 = vsel %vm5416_vm15, %v5160_v52, %v5672_v2  ;;  %v5171_v57 = vadd.f32 %v11427_v38, %v12356_v63  ;;  %v17115_v54 = vld [vmem:[#allocation70_spill] sm:$0xff]  ;;  %v12674_v44 = vpop.xlane.xlu0 %4764 }
 0x2db   :  { %17114 = vst [vmem:[#allocation91_spill] sm:$0xff] %v12646_v26  ;;  %v7564_v20 = vsel %vm7508_vm4, %v6715_v40, %v6711_v24  ;;  %4854 = vadd.xlane.f32.xlu0 %v4467_v39  ;;  %v3693_v12 = vadd.f32 %v12285_v46, %v12220_v28  ;;  %v5166_v19 = vadd.f32 %v11427_v38, %v17115_v54  ;;  %v17116_v52 = vld [vmem:[#allocation66_spill] sm:$0xff] }
 0x2dc   :  { %v17117_v27 = vrot.slane %v17116_v52, %v10774_v56  ;;  %v12663_v2 = vsel %vm5417_vm0, %v5161_v22, %v5673_v21  ;;  %v6723_v63 = vrot.slane %v5933_v33, %v10724_v17  ;;  %v5170_v46 = vadd.f32 %v11427_v38, %v17119_v36  ;;  %v12671_v35 = vld [vmem:[%s16695_s5] ss:$0 sm:$0xff]  ;;  %v17120_v21 = vld [vmem:[#allocation71_spill] sm:$0xff] }
 0x2dd   :  { %17118 = vst [vmem:[#allocation70_spill] sm:$0xff] %v12663_v2  ;;  %v3956_v40 = vadd.f32 %v12671_v35, %v3693_v12  ;;  %v7565_v22 = vsel %vm7510_vm5, %v6719_v58, %v7564_v20  ;;  %v5167_v24 = vadd.f32 %v11427_v38, %v17120_v21  ;;  %v17121_v39 = vld [vmem:[#allocation42_spill] sm:$0xff]  ;;  %v5683_v36 = vmul.f32 0.01, %v5171_v57  ;;  %v12688_v58 = vpop.xlane.xlu1 %4768  ;;  %v12690_v20 = vpop.f32.mrf.mxu1 }
 0x2de   :  { %v3687_v50 = vadd.f32 %v17117_v27, %v12115_v18  ;;  %v5172_v33 = vadd.f32 %v11427_v38, %v17121_v39  ;;  %v17122_v54 = vld [vmem:[#allocation74_spill] sm:$0xff]  ;;  %vm5422_vm2 = vcmp.ge.f32.partialorder %v5166_v19, 0.0  ;;  %v5678_v32 = vmul.f32 0.01, %v5166_v19 }
 0x2df   :  { %v5168_v27 = vadd.f32 %v11427_v38, %v17122_v54  ;;  %v4212_v48 = vmax.f32 %v3956_v40, 0.0  ;;  %vm5427_vm3 = vcmp.ge.f32.partialorder %v5171_v57, 0.0  ;;  %v12693_v21 = vsel %vm7512_vm7, %v6723_v63, %v7565_v22  ;;  %v12698_v40 = vld [vmem:[%s16696_s6] ss:$0 sm:$0xff]  ;;  %v615_v63 = vpop.f32.mrf.mxu1 }
 0x2e0   :  { %v3950_v12 = vadd.f32 %v12671_v35, %v3687_v50  ;;  %17123 = vst [vmem:[#allocation66_spill] sm:$0xff] %v12693_v21  ;;  %v5682_v39 = vmul.f32 0.01, %v5170_v46  ;;  %v5679_v13 = vmul.f32 0.01, %v5167_v24  ;;  %v5169_v51 = vadd.f32 %v11427_v38, %v17124_v10  ;;  %v12704_v21 = vpop.xlane.xlu0 %4770 }
 0x2e1   :  { %v4475_v50 = vmul.f32 %v12698_v40, %v4212_v48  ;;  %vm5426_vm6 = vcmp.ge.f32.partialorder %v5170_v46, 0.0  ;;  %v5684_v43 = vmul.f32 0.01, %v5172_v33  ;;  %v5680_v2 = vmul.f32 0.01, %v5168_v27  ;;  %v12720_v45 = vpop.xlane.xlu1 %4766 }
 0x2e2   :  { %v4206_v54 = vmax.f32 %v3950_v12, 0.0  ;;  %v5939_v26 = vsel %vm5427_vm3, %v5171_v57, %v5683_v36  ;;  %vm5428_vm8 = vcmp.ge.f32.partialorder %v5172_v33, 0.0  ;;  %vm5423_vm9 = vcmp.ge.f32.partialorder %v5167_v24, 0.0  ;;  %v17126_v57 = vld [vmem:[#allocation39_spill] sm:$0xff] }
 0x2e3   :  { %4870 = vadd.xlane.f32.xlu1 %v4475_v50  ;;  %vm5424_vm10 = vcmp.ge.f32.partialorder %v5168_v27, 0.0  ;;  %v5173_v48 = vadd.f32 %v11427_v38, %v12379_v3  ;;  %v1686_v12 = vcombine.high %v615_v63, %v615_v63  ;;  %v12709_v6 = vsel %vm5422_vm2, %v5166_v19, %v5678_v32  ;;  %v17128_v3 = vld [vmem:[#allocation69_spill] sm:$0xff] }
 0x2e4   :  { %v4469_v22 = vmul.f32 %v12698_v40, %v4206_v54  ;;  %17125 = vst [vmem:[#allocation78_spill] sm:$0xff] %v12709_v6  ;;  %v5938_v10 = vsel %vm5426_vm6, %v5170_v46, %v5682_v39  ;;  %v1693_v16 = vrot.slane %v615_v63, %v10770_v49  ;;  %v17127_v36 = vrot.slane %v17126_v57, %v10774_v56 }
 0x2e5   :  { %v5681_v54 = vmul.f32 0.01, %v5169_v51  ;;  %v6747_v4 = vrot.slane %v5939_v26, %v10724_v17  ;;  %v5940_v60 = vsel %vm5428_vm8, %v5172_v33, %v5684_v43  ;;  %v3688_v62 = vadd.f32 %v17128_v3, %v12115_v18 }
 0x2e6   :  { %4858 = vadd.xlane.f32.xlu0 %v4469_v22  ;;  %v3695_v50 = vadd.f32 %v17127_v36, %v12220_v28  ;;  %v12722_v19 = vsel %vm5423_vm9, %v5167_v24, %v5679_v13  ;;  %v12724_v46 = vsel %vm5424_vm10, %v5168_v27, %v5680_v2  ;;  %vm5425_vm11 = vcmp.ge.f32.partialorder %v5169_v51, 0.0  ;;  %v12731_v36 = vpop.f32.mrf.mxu1  ;;  %v12733_v24 = vpop.xlane.xlu0 %4774 }
 0x2e7   :  { %17129 = vst [vmem:[#allocation71_spill] sm:$0xff] %v12722_v19  ;;  %17130 = vst [vmem:[#allocation42_spill] sm:$0xff] %v12724_v46  ;;  %v6743_v39 = vrot.slane %v5938_v10, %v10724_v17  ;;  %v5685_v63 = vmul.f32 0.01, %v5173_v48  ;;  %v1700_v22 = vrot.slane %v1686_v12, %v10770_v49  ;;  %v3951_v26 = vadd.f32 %v12671_v35, %v3688_v62 }
 0x2e8   :  { %v3958_v32 = vadd.f32 %v12671_v35, %v3695_v50  ;;  %v6751_v43 = vrot.slane %v5940_v60, %v10724_v17  ;;  %vm5429_vm12 = vcmp.ge.f32.partialorder %v5173_v48, 0.0  ;;  %v1701_v33 = vcombine.high %v1693_v16, %v1693_v16 }
 0x2e9   :  { %v12739_v10 = vsel %vm5425_vm11, %v5169_v51, %v5681_v54  ;;  %v7571_v12 = vsel %vm7508_vm4, %v6747_v4, %v6743_v39  ;;  %v12745_v60 = vrot.slane %v1693_v16, %v10770_v49  ;;  %v5174_v50 = vadd.f32 %v11427_v38, %v12390_v47  ;;  %v12753_v54 = vpop.xlane.xlu1 %4772 }
 0x2ea   :  { %v4214_v13 = vmax.f32 %v3958_v32, 0.0  ;;  %17131 = vst [vmem:[#allocation74_spill] sm:$0xff] %v12739_v10  ;;  %v5941_v32 = vsel %vm5429_vm12, %v5173_v48, %v5685_v63  ;;  %v1702_v2 = vcombine.high %v1700_v22, %v1700_v22  ;;  %v12751_v6 = vrot.slane %v1700_v22, %v10770_v49  ;;  %17132 = vst [vmem:[#allocation37_spill] sm:$0xff] %v12753_v54 }
 0x2eb   :  { %v4207_v51 = vmax.f32 %v3951_v26, 0.0  ;;  %v7572_v39 = vsel %vm7510_vm5, %v6751_v43, %v7571_v12  ;;  %v12759_v16 = vrot.slane %v1701_v33, %v10770_v49  ;;  %v5175_v47 = vadd.f32 %v11427_v38, %v12405_v55  ;;  %v17133_v26 = vld [vmem:[#allocation76_spill] sm:$0xff] }
 0x2ec   :  { %v4477_v3 = vmul.f32 %v12698_v40, %v4214_v13  ;;  %v619_v13 = vpop.f32.mrf.mxu1  ;;  %v3696_v62 = vadd.f32 %v17133_v26, %v12220_v28  ;;  %v6755_v4 = vrot.slane %v5941_v32, %v10724_v17  ;;  %v1731_v43 = vcombine.high %v12745_v60, %v12745_v60 }
 0x2ed   :  { %v1735_v48 = vcombine.high %v619_v13, %v619_v13  ;;  %v1742_v63 = vrot.slane %v619_v13, %v10770_v49  ;;  %v4470_v22 = vmul.f32 %v12698_v40, %v4207_v51  ;;  %v17134_v55 = vcombine.high %v17116_v52, %v17116_v52  ;;  %v12788_v46 = vpop.xlane.xlu1 %4776 }
 0x2ee   :  { %4874 = vadd.xlane.f32.xlu1 %v4477_v3  ;;  %v12776_v3 = vpop.xlane.xlu0 %4778  ;;  %v12779_v51 = vrot.slane %v1702_v2, %v10770_v49  ;;  %v1732_v13 = vcombine.high %v12751_v6, %v12751_v6  ;;  %v5686_v32 = vmul.f32 0.01, %v5174_v50  ;;  %v3959_v26 = vadd.f32 %v12671_v35, %v3696_v62  ;;  %17137 = vst [vmem:[#allocation76_spill] sm:$0xff] %v12788_v46  ;;  %v17142_v46 = vld [vmem:[#allocation72_spill] sm:$0xff] }
 0x2ef   :  { %v2817_v12 = vrot.slane %v17134_v55, %v10774_v56  ;;  %17135 = vst [vmem:[#allocation39_spill] sm:$0xff] %v12776_v3  ;;  %4860 = vadd.xlane.f32.xlu0 %v4470_v22  ;;  %v1733_v27 = vcombine.high %v12759_v16, %v12759_v16  ;;  %vm5430_vm13 = vcmp.ge.f32.partialorder %v5174_v50, 0.0  ;;  %v5687_v33 = vmul.f32 0.01, %v5175_v47 }
 0x2f0   :  { %17136 = vst [vmem:[#allocation69_spill] sm:$0xff] %v12779_v51  ;;  %vm5431_vm14 = vcmp.ge.f32.partialorder %v5175_v47, 0.0  ;;  %v1749_v55 = vrot.slane %v1735_v48, %v10770_v49  ;;  %v1750_v10 = vcombine.high %v1742_v63, %v1742_v63  ;;  %v4215_v2 = vmax.f32 %v3959_v26, 0.0  ;;  %v17141_v26 = vld [vmem:[#allocation73_spill] sm:$0xff] }
 0x2f1   :  { %v3689_v52 = vadd.f32 %v2817_v12, %v12115_v18  ;;  %v12791_v19 = vsel %vm7512_vm7, %v6755_v4, %v7572_v39  ;;  %v12796_v22 = vrot.slane %v1731_v43, %v10774_v56  ;;  %v5176_v8 = vadd.f32 %v11427_v38, %v17139_v11  ;;  %v12841_v62 = vpop.xlane.xlu1 %4780 }
 0x2f2   :  { %17138 = vst [vmem:[#allocation92_spill] sm:$0xff] %v12791_v19  ;;  %v12800_v18 = vsel %vm5430_vm13, %v5174_v50, %v5686_v32  ;;  %v4478_v48 = vmul.f32 %v12698_v40, %v4215_v2  ;;  %v17143_v4 = vrot.slane %v17142_v46, %v10774_v56  ;;  %v12812_v19 = vsel %vm5431_vm14, %v5175_v47, %v5687_v33  ;;  %v12817_v50 = vpop.xlane.xlu0 %4784 }
 0x2f3   :  { %17140 = vst [vmem:[#allocation84_spill] sm:$0xff] %v12800_v18  ;;  %v3952_v12 = vadd.f32 %v12671_v35, %v3689_v52  ;;  %17144 = vst [vmem:[#allocation73_spill] sm:$0xff] %v12812_v19  ;;  %v12815_v11 = vrot.slane %v1742_v63, %v10770_v49  ;;  %v12820_v32 = vrot.slane %v1733_v27, %v10774_v56  ;;  %v12835_v27 = vpop.f32.mrf.mxu1  ;;  %vm5432_vm15 = vcmp.ge.f32.partialorder %v5176_v8, 0.0  ;;  %v17152_v18 = vld [vmem:[#allocation40_spill] sm:$0xff] }
 0x2f4   :  { %v3698_v39 = vadd.f32 %v17143_v4, %v17141_v26  ;;  %17145 = vst [vmem:[#allocation72_spill] sm:$0xff] %v12817_v50  ;;  %v1751_v52 = vcombine.high %v1749_v55, %v1749_v55  ;;  %v12823_v46 = vrot.slane %v1750_v10, %v10770_v49  ;;  %4876 = vadd.xlane.f32.xlu1 %v4478_v48  ;;  %17147 = vst [vmem:[#allocation94_spill] sm:$0xff] %v12841_v62 }
 0x2f5   :  { %v4208_v2 = vmax.f32 %v3952_v12, 0.0  ;;  %v12828_v47 = vrot.slane %v1732_v13, %v10774_v56  ;;  %v12833_v33 = vrot.slane %v1749_v55, %v10770_v49  ;;  %v1780_v13 = vcombine.high %v12815_v11, %v12815_v11  ;;  %v17148_v55 = vld [vmem:[#allocation79_spill] sm:$0xff]  ;;  %v625_v62 = vpop.f32.mrf.mxu1 }
 0x2f6   :  { %v3961_v12 = vadd.f32 %v12671_v35, %v3698_v39  ;;  %v17149_v4 = vrot.slane %v17148_v55, %v10774_v56  ;;  %v17150_v10 = vcombine.high %v17126_v57, %v17126_v57  ;;  %v12856_v39 = vrot.slane %v1751_v52, %v10770_v49  ;;  %v12871_v51 = vpop.xlane.xlu0 %4782 }
 0x2f7   :  { %17146 = vst [vmem:[#allocation93_spill] sm:$0xff] %v12828_v47  ;;  %v4471_v48 = vmul.f32 %v12698_v40, %v4208_v2  ;;  %v1782_v19 = vcombine.high %v12823_v46, %v12823_v46  ;;  %v5177_v47 = vadd.f32 %v11427_v38, %v17152_v18  ;;  %v1781_v55 = vcombine.high %v12833_v33, %v12833_v33 }
 0x2f8   :  { %v3699_v43 = vadd.f32 %v17149_v4, %v17141_v26  ;;  %v2849_v2 = vrot.slane %v17150_v10, %v10774_v56  ;;  %17151 = vst [vmem:[#allocation79_spill] sm:$0xff] %v12856_v39  ;;  %v4217_v63 = vmax.f32 %v3961_v12, 0.0  ;;  %v17153_v52 = vrot.slane %v12426_v25, %v10774_v56  ;;  %17154 = vst [vmem:[#allocation40_spill] sm:$0xff] %v12871_v51  ;;  %v12897_v25 = vpop.f32.mrf.mxu1 }
 0x2f9   :  { %4862 = vadd.xlane.f32.xlu0 %v4471_v48  ;;  %v5688_v50 = vmul.f32 0.01, %v5176_v8  ;;  %v1784_v18 = vcombine.high %v625_v62, %v625_v62  ;;  %v12876_v3 = vrot.slane %v1780_v13, %v10774_v56  ;;  %v5689_v51 = vmul.f32 0.01, %v5177_v47  ;;  %17158 = vst [vmem:[#allocation98_spill] sm:$0xff] %v12897_v25 }
 0x2fa   :  { %v3962_v57 = vadd.f32 %v12671_v35, %v3699_v43  ;;  %v3707_v10 = vadd.f32 %v17153_v52, %v12690_v20  ;;  %v4480_v48 = vmul.f32 %v12698_v40, %v4217_v63  ;;  %v3697_v12 = vadd.f32 %v2849_v2, %v12220_v28  ;;  %v12887_v28 = vpop.xlane.xlu1 %4786  ;;  %v12906_v13 = vpop.xlane.xlu0 %4788 }
 0x2fb   :  { %v1791_v43 = vrot.slane %v625_v62, %v10770_v49  ;;  %v12884_v52 = vrot.slane %v1782_v19, %v10774_v56  ;;  %17156 = vst [vmem:[#allocation96_spill] sm:$0xff] %v12887_v28  ;;  %vm5433_vm0 = vcmp.ge.f32.partialorder %v5177_v47, 0.0  ;;  %v1798_v19 = vrot.slane %v1784_v18, %v10770_v49 }
 0x2fc   :  { %v4218_v54 = vmax.f32 %v3962_v57, 0.0  ;;  %4880 = vadd.xlane.f32.xlu1 %v4480_v48  ;;  %v3960_v63 = vadd.f32 %v12671_v35, %v3697_v12  ;;  %v3970_v62 = vadd.f32 %v12671_v35, %v3707_v10  ;;  %v12894_v57 = vsel %vm5432_vm15, %v5176_v8, %v5688_v50  ;;  %v17159_v12 = vld [vmem:[#allocation81_spill] sm:$0xff] }
 0x2fd   :  { %17155 = vst [vmem:[#allocation95_spill] sm:$0xff] %v12884_v52  ;;  %17157 = vst [vmem:[#allocation97_spill] sm:$0xff] %v12894_v57  ;;  %v3700_v4 = vadd.f32 %v17159_v12, %v17141_v26  ;;  %v1799_v52 = vcombine.high %v1791_v43, %v1791_v43  ;;  %v12902_v28 = vrot.slane %v1791_v43, %v10770_v49 }
 0x2fe   :  { %v4481_v2 = vmul.f32 %v12698_v40, %v4218_v54  ;;  %v4216_v48 = vmax.f32 %v3960_v63, 0.0  ;;  %v5178_v54 = vadd.f32 %v11427_v38, %v12446_v29  ;;  %v4226_v10 = vmax.f32 %v3970_v62, 0.0  ;;  %v12929_v25 = vpop.xlane.xlu1 %4802 }
 0x2ff   :  { %17160 = vst [vmem:[#allocation81_spill] sm:$0xff] %v12902_v28  ;;  %v12908_v8 = vsel %vm5433_vm0, %v5177_v47, %v5689_v51  ;;  %v3963_v18 = vadd.f32 %v12671_v35, %v3700_v4  ;;  %v3708_v63 = vadd.f32 %v12474_v41, %v12690_v20  ;;  %v12915_v12 = vrot.slane %v1781_v55, %v10774_v56  ;;  %v629_v4 = vpop.f32.mrf.mxu1 }
 0x300   :  { %4882 = vadd.xlane.f32.xlu0 %v4481_v2  ;;  %17161 = vst [vmem:[#allocation99_spill] sm:$0xff] %v12908_v8  ;;  %v4479_v50 = vmul.f32 %v12698_v40, %v4216_v48  ;;  %v4489_v29 = vmul.f32 %v12698_v40, %v4226_v10  ;;  %v17163_v2 = vld [vmem:[#allocation77_spill] sm:$0xff]  ;;  %v1800_v62 = vcombine.high %v1798_v19, %v1798_v19  ;;  %17166 = vst [vmem:[#allocation101_spill] sm:$0xff] %v12929_v25 }
 0x301   :  { %17162 = vst [vmem:[#allocation100_spill] sm:$0xff] %v12915_v12  ;;  %v17164_v51 = vrot.slane %v17163_v2, %v10774_v56  ;;  %v12925_v48 = vrot.slane %v1798_v19, %v10770_v49  ;;  %v5179_v41 = vadd.f32 %v11427_v38, %v12457_v15  ;;  %v4219_v55 = vmax.f32 %v3963_v18, 0.0 }
 0x302   :  { %4878 = vadd.xlane.f32.xlu1 %v4479_v50  ;;  %vm5434_vm2 = vcmp.ge.f32.partialorder %v5178_v54, 0.0  ;;  %v3971_v2 = vadd.f32 %v12671_v35, %v3708_v63  ;;  %v12936_v19 = vrot.slane %v1799_v52, %v10770_v49  ;;  %v1829_v15 = vcombine.high %v12902_v28, %v12902_v28 }
 0x303   :  { %v3702_v47 = vadd.f32 %v17164_v51, %v17141_v26  ;;  %17165 = vst [vmem:[#allocation77_spill] sm:$0xff] %v12925_v48  ;;  %v4482_v50 = vmul.f32 %v12698_v40, %v4219_v55  ;;  %v17168_v18 = vrot.slane %v12421_v9, %v10774_v56  ;;  %v1833_v10 = vcombine.high %v629_v4, %v629_v4 }
 0x304   :  { %4898 = vadd.xlane.f32.xlu0 %v4489_v29  ;;  %17167 = vst [vmem:[#allocation102_spill] sm:$0xff] %v12936_v19  ;;  %v4227_v63 = vmax.f32 %v3971_v2, 0.0  ;;  %v12950_v52 = vrot.slane %v1800_v62, %v10770_v49  ;;  %v1830_v57 = vcombine.high %v12925_v48, %v12925_v48  ;;  %v5691_v55 = vmul.f32 0.01, %v5179_v41  ;;  %v17171_v29 = vld [vmem:[#allocation82_spill] sm:$0xff] }
 0x305   :  { %v3965_v51 = vadd.f32 %v12671_v35, %v3702_v47  ;;  %v3710_v43 = vadd.f32 %v17168_v18, %v12690_v20  ;;  %v12947_v47 = vpop.xlane.xlu0 %4792  ;;  %v5690_v9 = vmul.f32 0.01, %v5178_v54  ;;  %vm5435_vm3 = vcmp.ge.f32.partialorder %v5179_v41, 0.0 }
 0x306   :  { %17169 = vst [vmem:[#allocation103_spill] sm:$0xff] %v12947_v47  ;;  %17170 = vst [vmem:[#allocation104_spill] sm:$0xff] %v12950_v52  ;;  %4884 = vadd.xlane.f32.xlu1 %v4482_v50  ;;  %v4490_v18 = vmul.f32 %v12698_v40, %v4227_v63  ;;  %v17172_v2 = vrot.slane %v17171_v29, %v10774_v56  ;;  %v1840_v28 = vrot.slane %v629_v4, %v10770_v49  ;;  %v12964_v50 = vpop.xlane.xlu1 %4804 }
 0x307   :  { %v4221_v8 = vmax.f32 %v3965_v51, 0.0  ;;  %v3973_v12 = vadd.f32 %v12671_v35, %v3710_v43  ;;  %v3709_v25 = vadd.f32 %v12501_v7, %v12690_v20  ;;  %v1831_v43 = vcombine.high %v12936_v19, %v12936_v19 }
 0x308   :  { %v3706_v51 = vadd.f32 %v17172_v2, %v12690_v20  ;;  %v1847_v39 = vrot.slane %v1833_v10, %v10770_v49  ;;  %4900 = vadd.xlane.f32.xlu0 %v4490_v18  ;;  %v5947_v7 = vsel %vm5435_vm3, %v5179_v41, %v5691_v55  ;;  %v5946_v63 = vsel %vm5434_vm2, %v5178_v54, %v5690_v9  ;;  %v17175_v41 = vld [vmem:[#allocation83_spill] sm:$0xff] }
 0x309   :  { %v4484_v62 = vmul.f32 %v12698_v40, %v4221_v8  ;;  %v4229_v47 = vmax.f32 %v3973_v12, 0.0  ;;  %v12975_v12 = vrot.slane %v1829_v15, %v10774_v56  ;;  %v3972_v4 = vadd.f32 %v12671_v35, %v3709_v25  ;;  %v12982_v48 = vpop.xlane.xlu0 %4800 }
 0x30a   :  { %v3969_v29 = vadd.f32 %v12671_v35, %v3706_v51  ;;  %v1848_v51 = vcombine.high %v1840_v28, %v1840_v28  ;;  %v12985_v8 = vrot.slane %v1840_v28, %v10770_v49  ;;  %v3701_v55 = vadd.f32 %v17175_v41, %v17141_v26  ;;  %v17178_v28 = vld [vmem:[#allocation43_spill] sm:$0xff]  ;;  %v13002_v41 = vpop.xlane.xlu1 %4808 }
 0x30b   :  { %17173 = vst [vmem:[#allocation82_spill] sm:$0xff] %v12975_v12  ;;  %4888 = vadd.xlane.f32.xlu1 %v4484_v62  ;;  %v4492_v10 = vmul.f32 %v12698_v40, %v4229_v47  ;;  %v4228_v15 = vmax.f32 %v3972_v4, 0.0  ;;  %v6779_v62 = vrot.slane %v5947_v7, %v10724_v17  ;;  %v1849_v2 = vcombine.high %v1847_v39, %v1847_v39 }
 0x30c   :  { %v4225_v18 = vmax.f32 %v3969_v29, 0.0  ;;  %17174 = vst [vmem:[#allocation105_spill] sm:$0xff] %v12985_v8  ;;  %v12994_v47 = vrot.slane %v1831_v43, %v10774_v56  ;;  %v12997_v9 = vrot.slane %v1830_v57, %v10774_v56  ;;  %v5180_v29 = vadd.f32 %v11427_v38, %v17178_v28  ;;  %17179 = vst [vmem:[#allocation43_spill] sm:$0xff] %v13002_v41 }
 0x30d   :  { %4904 = vadd.xlane.f32.xlu0 %v4492_v10  ;;  %v3964_v4 = vadd.f32 %v12671_v35, %v3701_v55  ;;  %v6775_v25 = vrot.slane %v5946_v63, %v10724_v17  ;;  %v13006_v7 = vrot.slane %v1847_v39, %v10770_v49  ;;  %v4491_v10 = vmul.f32 %v12698_v40, %v4228_v15  ;;  %v13029_v52 = vpop.xlane.xlu0 %4790 }
 0x30e   :  { %v4488_v54 = vmul.f32 %v12698_v40, %v4225_v18  ;;  %17176 = vst [vmem:[#allocation83_spill] sm:$0xff] %v12994_v47  ;;  %17177 = vst [vmem:[#allocation106_spill] sm:$0xff] %v12997_v9  ;;  %v17180_v57 = vrot.slane %v12449_v59, %v10774_v56  ;;  %v13014_v18 = vrot.slane %v1848_v51, %v10770_v49  ;;  %v5692_v47 = vmul.f32 0.01, %v5180_v29 }
 0x30f   :  { %v1878_v55 = vcombine.high %v12985_v8, %v12985_v8  ;;  %v4220_v28 = vmax.f32 %v3964_v4, 0.0  ;;  %v7578_v39 = vsel %vm7508_vm4, %v6779_v62, %v6775_v25  ;;  %v5181_v63 = vadd.f32 %v11427_v38, %v12489_v37 }
 0x310   :  { %4896 = vadd.xlane.f32.xlu1 %v4488_v54  ;;  %v3711_v43 = vadd.f32 %v17180_v57, %v12690_v20  ;;  %v13022_v54 = vrot.slane %v1849_v2, %v10770_v49  ;;  %v17181_v57 = vld [vmem:[#allocation80_spill] sm:$0xff]  ;;  %v3712_v2 = vadd.f32 %v12515_v14, %v12690_v20  ;;  %vm5436_vm6 = vcmp.ge.f32.partialorder %v5180_v29, 0.0  ;;  %v13046_v14 = vpop.xlane.xlu1 %4806 }
 0x311   :  { %4902 = vadd.xlane.f32.xlu0 %v4491_v10  ;;  %v17182_v51 = vrot.slane %v17181_v57, %v10774_v56  ;;  %17183 = vst [vmem:[#allocation80_spill] sm:$0xff] %v13029_v52  ;;  %v4483_v4 = vmul.f32 %v12698_v40, %v4220_v28  ;;  %v5182_v25 = vadd.f32 %v11427_v38, %v12510_v0  ;;  %v5693_v19 = vmul.f32 0.01, %v5181_v63 }
 0x312   :  { %v3974_v15 = vadd.f32 %v12671_v35, %v3711_v43  ;;  %v1879_v43 = vcombine.high %v13006_v7, %v13006_v7  ;;  %v3975_v28 = vadd.f32 %v12671_v35, %v3712_v2  ;;  %v13049_v8 = vrot.slane %v1878_v55, %v10774_v56 }
 0x313   :  { %v3703_v9 = vadd.f32 %v17182_v51, %v17141_v26  ;;  %v1880_v51 = vcombine.high %v13014_v18, %v13014_v18  ;;  %v5948_v52 = vsel %vm5436_vm6, %v5180_v29, %v5692_v47  ;;  %vm5437_vm8 = vcmp.ge.f32.partialorder %v5181_v63, 0.0 }
 0x314   :  { %v4230_v62 = vmax.f32 %v3974_v15, 0.0  ;;  %4886 = vadd.xlane.f32.xlu1 %v4483_v4  ;;  %v17184_v15 = vld [vmem:[#allocation44_spill] sm:$0xff]  ;;  %v4231_v41 = vmax.f32 %v3975_v28, 0.0  ;;  %v17185_v4 = vrot.slane %v12745_v60, %v10774_v56  ;;  %v5694_v2 = vmul.f32 0.01, %v5182_v25 }
 0x315   :  { %v3966_v10 = vadd.f32 %v12671_v35, %v3703_v9  ;;  %v3704_v12 = vadd.f32 %v17184_v15, %v17141_v26  ;;  %v5183_v55 = vadd.f32 %v11427_v38, %v12531_v42  ;;  %vm5438_vm9 = vcmp.ge.f32.partialorder %v5182_v25, 0.0 }
 0x316   :  { %v4493_v0 = vmul.f32 %v12698_v40, %v4230_v62  ;;  %v3714_v37 = vadd.f32 %v17185_v4, %v12731_v36  ;;  %v6783_v28 = vrot.slane %v5948_v52, %v10724_v17  ;;  %v4494_v15 = vmul.f32 %v12698_v40, %v4231_v41 }
 0x317   :  { %v4222_v9 = vmax.f32 %v3966_v10, 0.0  ;;  %v13061_v10 = vpop.xlane.xlu0 %4794  ;;  %v3967_v60 = vadd.f32 %v12671_v35, %v3704_v12  ;;  %v13076_v4 = vrot.slane %v1880_v51, %v10774_v56  ;;  %v5949_v12 = vsel %vm5437_vm8, %v5181_v63, %v5693_v19 }
 0x318   :  { %4906 = vadd.xlane.f32.xlu0 %v4493_v0  ;;  %v3977_v42 = vadd.f32 %v12671_v35, %v3714_v37  ;;  %v17186_v0 = vcombine.high %v17181_v57, %v17181_v57  ;;  %vm5439_vm10 = vcmp.ge.f32.partialorder %v5183_v55, 0.0  ;;  %v5695_v41 = vmul.f32 0.01, %v5183_v55 }
 0x319   :  { %v4485_v62 = vmul.f32 %v12698_v40, %v4222_v9  ;;  %v4223_v29 = vmax.f32 %v3967_v60, 0.0  ;;  %v13081_v52 = vpop.xlane.xlu1 %4810  ;;  %v5186_v57 = vadd.f32 %v11427_v38, %v12572_v30  ;;  %v5187_v51 = vadd.f32 %v11427_v38, %v12595_v34 }
 0x31a   :  { %v2881_v9 = vrot.slane %v17186_v0, %v10774_v56  ;;  %v4233_v37 = vmax.f32 %v3977_v42, 0.0  ;;  %v13092_v19 = vrot.slane %v1879_v43, %v10774_v56  ;;  %v7579_v63 = vsel %vm7510_vm5, %v6783_v28, %v7578_v39 }
 0x31b   :  { %4890 = vadd.xlane.f32.xlu1 %v4485_v62  ;;  %v13083_v62 = vsel %vm5438_vm9, %v5182_v25, %v5694_v2  ;;  %v4486_v0 = vmul.f32 %v12698_v40, %v4223_v29  ;;  %v17188_v2 = vcombine.high %v12449_v59, %v12449_v59  ;;  %v13100_v30 = vpop.xlane.xlu0 %4796  ;;  %v6787_v34 = vrot.slane %v5949_v12, %v10724_v17 }
 0x31c   :  { %17187 = vst [vmem:[#allocation44_spill] sm:$0xff] %v13083_v62  ;;  %4908 = vadd.xlane.f32.xlu0 %v4494_v15  ;;  %v3705_v47 = vadd.f32 %v2881_v9, %v17141_v26  ;;  %v4496_v25 = vmul.f32 %v12698_v40, %v4233_v37  ;;  %v17189_v39 = vrot.slane %v12759_v16, %v10774_v56  ;;  %vm5442_vm11 = vcmp.ge.f32.partialorder %v5186_v57, 0.0 }
 0x31d   :  { %v2913_v60 = vrot.slane %v17188_v2, %v10774_v56  ;;  %v13111_v28 = vsel %vm5439_vm10, %v5183_v55, %v5695_v41  ;;  %v5184_v59 = vadd.f32 %v11427_v38, %v12544_v1  ;;  %v3716_v42 = vadd.f32 %v12796_v22, %v12731_v36 }
 0x31e   :  { %v3968_v26 = vadd.f32 %v12671_v35, %v3705_v47  ;;  %v3715_v43 = vadd.f32 %v17189_v39, %v12731_v36  ;;  %17190 = vst [vmem:[#allocation107_spill] sm:$0xff] %v13111_v28  ;;  %v5698_v9 = vmul.f32 0.01, %v5186_v57  ;;  %v5699_v47 = vmul.f32 0.01, %v5187_v51  ;;  %v13118_v37 = vpop.xlane.xlu1 %4812 }
 0x31f   :  { %4892 = vadd.xlane.f32.xlu1 %v4486_v0  ;;  %v3713_v15 = vadd.f32 %v2913_v60, %v12690_v20  ;;  %vm5443_vm12 = vcmp.ge.f32.partialorder %v5187_v51, 0.0  ;;  %v5188_v16 = vadd.f32 %v11427_v38, %v12608_v31  ;;  %v13125_v41 = vsel %vm7512_vm7, %v6787_v34, %v7579_v63 }
 0x320   :  { %4912 = vadd.xlane.f32.xlu0 %v4496_v25  ;;  %v4224_v12 = vmax.f32 %v3968_v26, 0.0  ;;  %v3978_v1 = vadd.f32 %v12671_v35, %v3715_v43  ;;  %17191 = vst [vmem:[#allocation108_spill] sm:$0xff] %v13125_v41  ;;  %v5189_v20 = vadd.f32 %v11427_v38, %v12619_v53  ;;  %v3979_v0 = vadd.f32 %v12671_v35, %v3716_v42 }
 0x321   :  { %v3976_v55 = vadd.f32 %v12671_v35, %v3713_v15  ;;  %v5185_v31 = vadd.f32 %v11427_v38, %v12559_v61  ;;  %vm5440_vm13 = vcmp.ge.f32.partialorder %v5184_v59, 0.0  ;;  %v5954_v63 = vsel %vm5442_vm11, %v5186_v57, %v5698_v9 }
 0x322   :  { %v4487_v22 = vmul.f32 %v12698_v40, %v4224_v12  ;;  %v4234_v60 = vmax.f32 %v3978_v1, 0.0  ;;  %v5955_v34 = vsel %vm5443_vm12, %v5187_v51, %v5699_v47  ;;  %v17192_v53 = vrot.slane %v12823_v46, %v10774_v56 }
 0x323   :  { %v4232_v2 = vmax.f32 %v3976_v55, 0.0  ;;  %v13135_v26 = vpop.xlane.xlu0 %4798  ;;  %v5700_v43 = vmul.f32 0.01, %v5188_v16  ;;  %v4235_v42 = vmax.f32 %v3979_v0, 0.0  ;;  %v17193_v61 = vrot.slane %v12751_v6, %v10774_v56 }
 0x324   :  { %4894 = vadd.xlane.f32.xlu1 %v4487_v22  ;;  %v3723_v39 = vadd.f32 %v17192_v53, %v12835_v27  ;;  %vm5444_vm14 = vcmp.ge.f32.partialorder %v5188_v16, 0.0  ;;  %v5701_v55 = vmul.f32 0.01, %v5189_v20  ;;  %v4497_v57 = vmul.f32 %v12698_v40, %v4234_v60 }
 0x325   :  { %v4495_v15 = vmul.f32 %v12698_v40, %v4232_v2  ;;  %v3718_v12 = vadd.f32 %v17193_v61, %v12731_v36  ;;  %v5696_v47 = vmul.f32 0.01, %v5184_v59  ;;  %v5697_v46 = vmul.f32 0.01, %v5185_v31 }
 0x326   :  { %v3986_v51 = vadd.f32 %v12671_v35, %v3723_v39  ;;  %v13149_v9 = vpop.xlane.xlu1 %4816  ;;  %vm5445_vm15 = vcmp.ge.f32.partialorder %v5189_v20, 0.0  ;;  %vm5441_vm0 = vcmp.ge.f32.partialorder %v5185_v31, 0.0  ;;  %v6811_v22 = vrot.slane %v5955_v34, %v10724_v17 }
 0x327   :  { %4910 = vadd.xlane.f32.xlu0 %v4495_v15  ;;  %v3981_v1 = vadd.f32 %v12671_v35, %v3718_v12  ;;  %v3724_v0 = vadd.f32 %v12876_v3, %v12835_v27  ;;  %v6807_v2 = vrot.slane %v5954_v63, %v10724_v17  ;;  %v5956_v60 = vsel %vm5444_vm14, %v5188_v16, %v5700_v43 }
 0x328   :  { %4914 = vadd.xlane.f32.xlu1 %v4497_v57  ;;  %v4242_v6 = vmax.f32 %v3986_v51, 0.0  ;;  %v4498_v53 = vmul.f32 %v12698_v40, %v4235_v42  ;;  %v5957_v15 = vsel %vm5445_vm15, %v5189_v20, %v5701_v55  ;;  %v5190_v12 = vadd.f32 %v11427_v38, %v12627_v5 }
 0x329   :  { %v4237_v39 = vmax.f32 %v3981_v1, 0.0  ;;  %v3987_v57 = vadd.f32 %v12671_v35, %v3724_v0  ;;  %v13165_v51 = vsel %vm5440_vm13, %v5184_v59, %v5696_v47  ;;  %v13167_v3 = vsel %vm5441_vm0, %v5185_v31, %v5697_v46 }
 0x32a   :  { %v13158_v61 = vpop.xlane.xlu0 %4818  ;;  %v4505_v34 = vmul.f32 %v12698_v40, %v4242_v6  ;;  %17194 = vst [vmem:[#allocation109_spill] sm:$0xff] %v13165_v51  ;;  %17195 = vst [vmem:[#allocation110_spill] sm:$0xff] %v13167_v3  ;;  %v5194_v16 = vadd.f32 %v11427_v38, %v12688_v58  ;;  %v17196_v20 = vrot.slane %v12815_v11, %v10774_v56  ;;  %v5702_v1 = vmul.f32 0.01, %v5190_v12 }
 0x32b   :  { %4916 = vadd.xlane.f32.xlu0 %v4498_v53  ;;  %v7585_v5 = vsel %vm7508_vm4, %v6811_v22, %v6807_v2  ;;  %v5195_v43 = vadd.f32 %v11427_v38, %v12704_v21  ;;  %v4243_v42 = vmax.f32 %v3987_v57, 0.0  ;;  %v17197_v59 = vrot.slane %v12833_v33, %v10774_v56  ;;  %v13182_v55 = vpop.xlane.xlu1 %4814 }
 0x32c   :  { %v3722_v63 = vadd.f32 %v17196_v20, %v12835_v27  ;;  %4930 = vadd.xlane.f32.xlu1 %v4505_v34  ;;  %v6815_v58 = vrot.slane %v5956_v60, %v10724_v17  ;;  %v6819_v47 = vrot.slane %v5957_v15, %v10724_v17  ;;  %v4500_v11 = vmul.f32 %v12698_v40, %v4237_v39 }
 0x32d   :  { %v3726_v31 = vadd.f32 %v17197_v59, %v12835_v27  ;;  %v5191_v21 = vadd.f32 %v11427_v38, %v12644_v23  ;;  %v5192_v22 = vadd.f32 %v11427_v38, %v12674_v44  ;;  %v4506_v33 = vmul.f32 %v12698_v40, %v4243_v42 }
 0x32e   :  { %v3985_v46 = vadd.f32 %v12671_v35, %v3722_v63  ;;  %vm5446_vm2 = vcmp.ge.f32.partialorder %v5190_v12, 0.0  ;;  %v5706_v6 = vmul.f32 0.01, %v5194_v16  ;;  %v13194_v60 = vpop.xlane.xlu0 %4834  ;;  %vm5450_vm3 = vcmp.ge.f32.partialorder %v5194_v16, 0.0 }
 0x32f   :  { %4920 = vadd.xlane.f32.xlu0 %v4500_v11  ;;  %v3989_v2 = vadd.f32 %v12671_v35, %v3726_v31  ;;  %v5707_v53 = vmul.f32 0.01, %v5195_v43  ;;  %v5193_v39 = vadd.f32 %v11427_v38, %v12720_v45  ;;  %v5197_v23 = vadd.f32 %v11427_v38, %v12733_v24  ;;  %v17199_v11 = vld [vmem:[#allocation37_spill] sm:$0xff] }
 0x330   :  { %v4241_v0 = vmax.f32 %v3985_v46, 0.0  ;;  %4932 = vadd.xlane.f32.xlu1 %v4506_v33  ;;  %v7586_v44 = vsel %vm7510_vm5, %v6815_v58, %v7585_v5  ;;  %vm5451_vm6 = vcmp.ge.f32.partialorder %v5195_v43, 0.0  ;;  %v13202_v57 = vsel %vm5446_vm2, %v5190_v12, %v5702_v1 }
 0x331   :  { %v4245_v34 = vmax.f32 %v3989_v2, 0.0  ;;  %17198 = vst [vmem:[#allocation111_spill] sm:$0xff] %v13202_v57  ;;  %vm5447_vm8 = vcmp.ge.f32.partialorder %v5191_v21, 0.0  ;;  %v5703_v20 = vmul.f32 0.01, %v5191_v21  ;;  %vm5448_vm9 = vcmp.ge.f32.partialorder %v5192_v22, 0.0 }
 0x332   :  { %v4504_v15 = vmul.f32 %v12698_v40, %v4241_v0  ;;  %v5704_v42 = vmul.f32 0.01, %v5192_v22  ;;  %v5962_v59 = vsel %vm5450_vm3, %v5194_v16, %v5706_v6  ;;  %v3717_v24 = vadd.f32 %v12820_v32, %v12731_v36  ;;  %v13214_v1 = vpop.xlane.xlu0 %4836 }
 0x333   :  { %v13204_v63 = vpop.xlane.xlu1 %4820  ;;  %v4508_v45 = vmul.f32 %v12698_v40, %v4245_v34  ;;  %v5963_v5 = vsel %vm5451_vm6, %v5195_v43, %v5707_v53  ;;  %v5705_v31 = vmul.f32 0.01, %v5193_v39  ;;  %v5709_v58 = vmul.f32 0.01, %v5197_v23 }
 0x334   :  { %4928 = vadd.xlane.f32.xlu0 %v4504_v15  ;;  %v5196_v12 = vadd.f32 %v11427_v38, %v17199_v11  ;;  %vm5449_vm10 = vcmp.ge.f32.partialorder %v5193_v39, 0.0  ;;  %vm5453_vm11 = vcmp.ge.f32.partialorder %v5197_v23, 0.0  ;;  %v3980_v16 = vadd.f32 %v12671_v35, %v3717_v24 }
 0x335   :  { %4936 = vadd.xlane.f32.xlu1 %v4508_v45  ;;  %v13219_v32 = vsel %vm7512_vm7, %v6819_v47, %v7586_v44  ;;  %v13224_v6 = vsel %vm5447_vm8, %v5191_v21, %v5703_v20  ;;  %v13227_v0 = vsel %vm5448_vm9, %v5192_v22, %v5704_v42  ;;  %v6839_v2 = vrot.slane %v5962_v59, %v10724_v17  ;;  %v17205_v44 = vld [vmem:[#allocation39_spill] sm:$0xff]  ;;  %v17206_v21 = vld [vmem:[#allocation96_spill] sm:$0xff] }
 0x336   :  { %17200 = vst [vmem:[#allocation37_spill] sm:$0xff] %v13219_v32  ;;  %17201 = vst [vmem:[#allocation112_spill] sm:$0xff] %v13224_v6  ;;  %v6843_v53 = vrot.slane %v5963_v5, %v10724_v17  ;;  %v4236_v15 = vmax.f32 %v3980_v16, 0.0  ;;  %v13231_v34 = vsel %vm5449_vm10, %v5193_v39, %v5705_v31  ;;  %v13233_v45 = vsel %vm5453_vm11, %v5197_v23, %v5709_v58  ;;  %v17207_v42 = vld [vmem:[#allocation95_spill] sm:$0xff]  ;;  %v17208_v5 = vld [vmem:[#allocation72_spill] sm:$0xff] }
 0x337   :  { %17202 = vst [vmem:[#allocation113_spill] sm:$0xff] %v13227_v0  ;;  %17203 = vst [vmem:[#allocation114_spill] sm:$0xff] %v13231_v34  ;;  %v5708_v47 = vmul.f32 0.01, %v5196_v12  ;;  %v5199_v24 = vadd.f32 %v11427_v38, %v17205_v44  ;;  %v13237_v11 = vpop.xlane.xlu1 %4824  ;;  %vm5452_vm12 = vcmp.ge.f32.partialorder %v5196_v12, 0.0  ;;  %v5203_v22 = vadd.f32 %v11427_v38, %v17206_v21  ;;  %v17209_v58 = vld [vmem:[#allocation69_spill] sm:$0xff] }
 0x338   :  { %17204 = vst [vmem:[#allocation115_spill] sm:$0xff] %v13233_v45  ;;  %v4499_v20 = vmul.f32 %v12698_v40, %v4236_v15  ;;  %v3725_v59 = vadd.f32 %v17207_v42, %v12835_v27  ;;  %v5202_v31 = vadd.f32 %v11427_v38, %v17208_v5  ;;  %v17210_v16 = vrot.slane %v17209_v58, %v10774_v56  ;;  %v13260_v23 = vpop.xlane.xlu0 %4840  ;;  %v17212_v5 = vld [vmem:[#allocation76_spill] sm:$0xff]  ;;  %v17215_v45 = vld [vmem:[#allocation79_spill] sm:$0xff]  ;;  %v17217_v0 = vld [vmem:[#allocation101_spill] sm:$0xff] }
 0x339   :  { %v7592_v21 = vsel %vm7508_vm4, %v6843_v53, %v6839_v2  ;;  %17211 = vst [vmem:[#allocation39_spill] sm:$0xff] %v13260_v23  ;;  %v5964_v43 = vsel %vm5452_vm12, %v5196_v12, %v5708_v47  ;;  %vm5455_vm13 = vcmp.ge.f32.partialorder %v5199_v24, 0.0  ;;  %v5198_v33 = vadd.f32 %v11427_v38, %v17212_v5  ;;  %v13271_v12 = vpop.f32.mrf.mxu1  ;;  %v17214_v47 = vld [vmem:[#allocation40_spill] sm:$0xff] }
 0x33a   :  { %v3719_v44 = vadd.f32 %v17210_v16, %v12731_v36  ;;  %4918 = vadd.xlane.f32.xlu0 %v4499_v20  ;;  %v3988_v39 = vadd.f32 %v12671_v35, %v3725_v59  ;;  %v5711_v46 = vmul.f32 0.01, %v5199_v24  ;;  %v5715_v2 = vmul.f32 0.01, %v5203_v22  ;;  %v17213_v20 = vld [vmem:[#allocation94_spill] sm:$0xff] }
 0x33b   :  { %v5204_v53 = vadd.f32 %v11427_v38, %v12906_v13  ;;  %vm5458_vm14 = vcmp.ge.f32.partialorder %v5202_v31, 0.0  ;;  %v5714_v42 = vmul.f32 0.01, %v5202_v31  ;;  %v5200_v59 = vadd.f32 %v11427_v38, %v17213_v20  ;;  %v635_v3 = vpop.f32.mrf.mxu1 }
 0x33c   :  { %v3982_v16 = vadd.f32 %v12671_v35, %v3719_v44  ;;  %v4244_v15 = vmax.f32 %v3988_v39, 0.0  ;;  %vm5459_vm15 = vcmp.ge.f32.partialorder %v5203_v22, 0.0  ;;  %v13269_v25 = vpop.xlane.xlu1 %4832  ;;  %v5201_v5 = vadd.f32 %v11427_v38, %v17214_v47 }
 0x33d   :  { %v17216_v13 = vrot.slane %v17215_v45, %v10774_v56  ;;  %v6847_v34 = vrot.slane %v5964_v43, %v10724_v17  ;;  %vm5454_vm0 = vcmp.ge.f32.partialorder %v5198_v33, 0.0  ;;  %v5710_v20 = vmul.f32 0.01, %v5198_v33  ;;  %v13300_v62 = vpop.f32.mrf.mxu1 }
 0x33e   :  { %v4507_v44 = vmul.f32 %v12698_v40, %v4244_v15  ;;  %v4238_v29 = vmax.f32 %v3982_v16, 0.0  ;;  %v5211_v6 = vadd.f32 %v11427_v38, %v17217_v0  ;;  %v13284_v57 = vsel %vm5455_vm13, %v5199_v24, %v5711_v46  ;;  %v13287_v16 = vpop.xlane.xlu0 %4838 }
 0x33f   :  { %v3727_v39 = vadd.f32 %v17216_v13, %v12835_v27  ;;  %17218 = vst [vmem:[#allocation96_spill] sm:$0xff] %v13284_v57  ;;  %v5971_v32 = vsel %vm5459_vm15, %v5203_v22, %v5715_v2  ;;  %v5716_v47 = vmul.f32 0.01, %v5204_v53  ;;  %v5970_v13 = vsel %vm5458_vm14, %v5202_v31, %v5714_v42 }
 0x340   :  { %4934 = vadd.xlane.f32.xlu1 %v4507_v44  ;;  %v4501_v15 = vmul.f32 %v12698_v40, %v4238_v29  ;;  %vm5456_vm2 = vcmp.ge.f32.partialorder %v5200_v59, 0.0  ;;  %v5712_v43 = vmul.f32 0.01, %v5200_v59  ;;  %vm5460_vm3 = vcmp.ge.f32.partialorder %v5204_v53, 0.0  ;;  %v17219_v29 = vld [vmem:[#allocation93_spill] sm:$0xff]  ;;  %v13295_v44 = vpop.xlane.xlu1 %4822 }
 0x341   :  { %vm5457_vm6 = vcmp.ge.f32.partialorder %v5201_v5, 0.0  ;;  %v5713_v51 = vmul.f32 0.01, %v5201_v5  ;;  %v1882_v28 = vcombine.high %v635_v3, %v635_v3  ;;  %v3990_v46 = vadd.f32 %v12671_v35, %v3727_v39  ;;  %17220 = vst [vmem:[#allocation95_spill] sm:$0xff] %v13295_v44 }
 0x342   :  { %4922 = vadd.xlane.f32.xlu0 %v4501_v15  ;;  %v6875_v0 = vrot.slane %v5971_v32, %v10724_v17  ;;  %v5723_v24 = vmul.f32 0.01, %v5211_v6  ;;  %v1889_v22 = vrot.slane %v635_v3, %v10770_v49  ;;  %v3720_v2 = vadd.f32 %v17219_v29, %v12731_v36 }
 0x343   :  { %v13298_v31 = vsel %vm7510_vm5, %v6847_v34, %v7592_v21  ;;  %v5972_v42 = vsel %vm5460_vm3, %v5204_v53, %v5716_v47  ;;  %vm5467_vm8 = vcmp.ge.f32.partialorder %v5211_v6, 0.0  ;;  %v4246_v15 = vmax.f32 %v3990_v46, 0.0  ;;  %v13317_v47 = vpop.xlane.xlu0 %4842 }
 0x344   :  { %17221 = vst [vmem:[#allocation72_spill] sm:$0xff] %v13298_v31  ;;  %v13305_v32 = vsel %vm5454_vm0, %v5198_v33, %v5710_v20  ;;  %v6871_v3 = vrot.slane %v5970_v13, %v10724_v17  ;;  %v3983_v29 = vadd.f32 %v12671_v35, %v3720_v2  ;;  %v13310_v41 = vsel %vm5456_vm2, %v5200_v59, %v5712_v43  ;;  %v17226_v59 = vld [vmem:[#allocation103_spill] sm:$0xff] }
 0x345   :  { %17222 = vst [vmem:[#allocation69_spill] sm:$0xff] %v13305_v32  ;;  %17223 = vst [vmem:[#allocation76_spill] sm:$0xff] %v13310_v41  ;;  %v13313_v34 = vsel %vm5457_vm6, %v5201_v5, %v5713_v51  ;;  %v1896_v21 = vrot.slane %v1882_v28, %v10770_v49  ;;  %v4509_v53 = vmul.f32 %v12698_v40, %v4246_v15  ;;  %v639_v5 = vpop.f32.mrf.mxu1  ;;  %v17227_v40 = vld [vmem:[#allocation100_spill] sm:$0xff] }
 0x346   :  { %17224 = vst [vmem:[#allocation94_spill] sm:$0xff] %v13313_v34  ;;  %17225 = vst [vmem:[#allocation40_spill] sm:$0xff] %v13317_v47  ;;  %v7599_v46 = vsel %vm7508_vm4, %v6875_v0, %v6871_v3  ;;  %v6879_v33 = vrot.slane %v5972_v42, %v10724_v17  ;;  %v13321_v20 = vsel %vm5467_vm8, %v5211_v6, %v5723_v24  ;;  %v4239_v28 = vmax.f32 %v3983_v29, 0.0  ;;  %v13336_v2 = vpop.xlane.xlu1 %4826  ;;  %v13344_v29 = vld [vmem:[%s16696_s6] ss:$0 sm:$0xff] }
 0x347   :  { %v1897_v13 = vcombine.high %v1889_v22, %v1889_v22  ;;  %v13324_v35 = vrot.slane %v1889_v22, %v10770_v49  ;;  %v5206_v51 = vadd.f32 %v11427_v38, %v17226_v59  ;;  %4938 = vadd.xlane.f32.xlu1 %v4509_v53  ;;  %v3728_v43 = vadd.f32 %v17227_v40, %v12835_v27 }
 0x348   :  { %v5212_v24 = vadd.f32 %v11427_v38, %v12964_v50  ;;  %v1931_v22 = vcombine.high %v639_v5, %v639_v5  ;;  %17228 = vst [vmem:[#allocation79_spill] sm:$0xff] %v13336_v2  ;;  %v1898_v15 = vcombine.high %v1896_v21, %v1896_v21  ;;  %v1938_v3 = vrot.slane %v639_v5, %v10770_v49 }
 0x349   :  { %v4502_v53 = vmul.f32 %v13344_v29, %v4239_v28  ;;  %v13348_v59 = vsel %vm7510_vm5, %v6879_v33, %v7599_v46  ;;  %v13353_v40 = vrot.slane %v1896_v21, %v10770_v49  ;;  %v13356_v42 = vrot.slane %v1897_v13, %v10770_v49  ;;  %v13365_v46 = vld [vmem:[%s16695_s5] ss:$0 sm:$0xff]  ;;  %v13368_v21 = vpop.xlane.xlu0 %4844 }
 0x34a   :  { %v1927_v5 = vcombine.high %v13324_v35, %v13324_v35  ;;  %vm5462_vm9 = vcmp.ge.f32.partialorder %v5206_v51, 0.0  ;;  %v3991_v33 = vadd.f32 %v13365_v46, %v3728_v43  ;;  %17229 = vst [vmem:[#allocation101_spill] sm:$0xff] %v13368_v21  ;;  %v5718_v28 = vmul.f32 0.01, %v5206_v51  ;;  %v13385_v32 = vpop.xlane.xlu1 %4828 }
 0x34b   :  { %4924 = vadd.xlane.f32.xlu0 %v4502_v53  ;;  %v5724_v13 = vmul.f32 0.01, %v5212_v24  ;;  %v1945_v39 = vrot.slane %v1931_v22, %v10770_v49  ;;  %v17230_v0 = vcombine.high %v17209_v58, %v17209_v58  ;;  %v13376_v53 = vrot.slane %v1898_v15, %v10770_v49  ;;  %17232 = vst [vmem:[#allocation103_spill] sm:$0xff] %v13385_v32  ;;  %v17234_v32 = vld [vmem:[#allocation98_spill] sm:$0xff] }
 0x34c   :  { %vm5468_vm10 = vcmp.ge.f32.partialorder %v5212_v24, 0.0  ;;  %v1946_v50 = vcombine.high %v1938_v3, %v1938_v3  ;;  %v4247_v34 = vmax.f32 %v3991_v33, 0.0  ;;  %v1928_v43 = vcombine.high %v13353_v40, %v13353_v40 }
 0x34d   :  { %v2945_v6 = vrot.slane %v17230_v0, %v10774_v56  ;;  %17231 = vst [vmem:[#allocation93_spill] sm:$0xff] %v13376_v53  ;;  %v1929_v41 = vcombine.high %v13356_v42, %v13356_v42  ;;  %v13388_v58 = vrot.slane %v1927_v5, %v10774_v56  ;;  %v13391_v0 = vrot.slane %v1938_v3, %v10770_v49  ;;  %v13414_v2 = vpop.xlane.xlu0 %4848 }
 0x34e   :  { %v5210_v15 = vadd.f32 %v11427_v38, %v12982_v48  ;;  %v4510_v33 = vmul.f32 %v13344_v29, %v4247_v34  ;;  %v13399_v22 = vsel %vm5462_vm9, %v5206_v51, %v5718_v28  ;;  %v13404_v5 = vrot.slane %v1945_v39, %v10770_v49  ;;  %v17235_v34 = vld [vmem:[#allocation81_spill] sm:$0xff]  ;;  %17237 = vst [vmem:[#allocation98_spill] sm:$0xff] %v13414_v2  ;;  %v17243_v2 = vld [vmem:[#allocation102_spill] sm:$0xff] }
 0x34f   :  { %v3721_v57 = vadd.f32 %v2945_v6, %v12731_v36  ;;  %17233 = vst [vmem:[#allocation100_spill] sm:$0xff] %v13399_v22  ;;  %v13401_v36 = vsel %vm5468_vm10, %v5212_v24, %v5724_v13  ;;  %v1947_v6 = vcombine.high %v1945_v39, %v1945_v39  ;;  %v13407_v3 = vrot.slane %v1946_v50, %v10770_v49 }
 0x350   :  { %4940 = vadd.xlane.f32.xlu1 %v4510_v33  ;;  %v17236_v21 = vrot.slane %v17235_v34, %v10774_v56  ;;  %v13419_v24 = vrot.slane %v1929_v41, %v10774_v56  ;;  %v13424_v50 = vrot.slane %v1928_v43, %v10774_v56  ;;  %vm5466_vm11 = vcmp.ge.f32.partialorder %v5210_v15, 0.0  ;;  %v17242_v41 = vld [vmem:[#allocation43_spill] sm:$0xff] }
 0x351   :  { %v3984_v48 = vadd.f32 %v13365_v46, %v3721_v57  ;;  %v13426_v57 = vpop.f32.mrf.mxu1  ;;  %v13435_v33 = vrot.slane %v1947_v6, %v10770_v49  ;;  %v5722_v34 = vmul.f32 0.01, %v5210_v15  ;;  %v13439_v51 = vpop.xlane.xlu1 %4830  ;;  %v1977_v28 = vcombine.high %v13404_v5, %v13404_v5 }
 0x352   :  { %v3730_v31 = vadd.f32 %v17236_v21, %v17234_v32  ;;  %17238 = vst [vmem:[#allocation81_spill] sm:$0xff] %v13419_v24  ;;  %17239 = vst [vmem:[#allocation116_spill] sm:$0xff] %v13424_v50  ;;  %v1976_v21 = vcombine.high %v13391_v0, %v13391_v0  ;;  %v1978_v39 = vcombine.high %v13407_v3, %v13407_v3 }
 0x353   :  { %v4240_v13 = vmax.f32 %v3984_v48, 0.0  ;;  %17240 = vst [vmem:[#allocation117_spill] sm:$0xff] %v13435_v33  ;;  %17241 = vst [vmem:[#allocation118_spill] sm:$0xff] %v13439_v51  ;;  %v5214_v50 = vadd.f32 %v11427_v38, %v17242_v41  ;;  %v645_v43 = vpop.f32.mrf.mxu1  ;;  %v17244_v51 = vrot.slane %v17243_v2, %v10774_v56  ;;  %v17245_v53 = vcombine.high %v17215_v45, %v17215_v45  ;;  %v13466_v44 = vpop.xlane.xlu0 %4846 }
 0x354   :  { %v3993_v22 = vadd.f32 %v13365_v46, %v3730_v31  ;;  %v1980_v31 = vcombine.high %v645_v43, %v645_v43  ;;  %v17246_v41 = vrot.slane %v13014_v18, %v10774_v56  ;;  %17247 = vst [vmem:[#allocation43_spill] sm:$0xff] %v13466_v44  ;;  %v5978_v18 = vsel %vm5466_vm11, %v5210_v15, %v5722_v34 }
 0x355   :  { %v4503_v48 = vmul.f32 %v13344_v29, %v4240_v13  ;;  %v3731_v47 = vadd.f32 %v17244_v51, %v17234_v32  ;;  %v2977_v24 = vrot.slane %v17245_v53, %v10774_v56  ;;  %v13460_v13 = vrot.slane %v1976_v21, %v10774_v56 }
 0x356   :  { %v4249_v6 = vmax.f32 %v3993_v22, 0.0  ;;  %v3739_v23 = vadd.f32 %v17246_v41, %v13271_v12  ;;  %v1987_v51 = vrot.slane %v645_v43, %v10770_v49  ;;  %v13476_v22 = vrot.slane %v1978_v39, %v10774_v56  ;;  %v17250_v41 = vld [vmem:[#allocation82_spill] sm:$0xff] }
 0x357   :  { %4926 = vadd.xlane.f32.xlu0 %v4503_v48  ;;  %v3994_v45 = vadd.f32 %v13365_v46, %v3731_v47  ;;  %v3729_v53 = vadd.f32 %v2977_v24, %v12835_v27  ;;  %v5726_v2 = vmul.f32 0.01, %v5214_v50  ;;  %v13483_v47 = vpop.xlane.xlu1 %4850  ;;  %vm5470_vm12 = vcmp.ge.f32.partialorder %v5214_v50, 0.0  ;;  %v17249_v24 = vld [vmem:[#allocation80_spill] sm:$0xff] }
 0x358   :  { %v4512_v48 = vmul.f32 %v13344_v29, %v4249_v6  ;;  %17248 = vst [vmem:[#allocation102_spill] sm:$0xff] %v13483_v47  ;;  %v1994_v27 = vrot.slane %v1980_v31, %v10770_v49  ;;  %v5205_v39 = vadd.f32 %v11427_v38, %v17249_v24  ;;  %v4002_v15 = vadd.f32 %v13365_v46, %v3739_v23  ;;  %v13499_v24 = vpop.xlane.xlu0 %4852 }
 0x359   :  { %v4250_v44 = vmax.f32 %v3994_v45, 0.0  ;;  %v3992_v43 = vadd.f32 %v13365_v46, %v3729_v53  ;;  %v1995_v34 = vcombine.high %v1987_v51, %v1987_v51  ;;  %v3732_v45 = vadd.f32 %v17250_v41, %v17234_v32 }
 0x35a   :  { %4944 = vadd.xlane.f32.xlu1 %v4512_v48  ;;  %v13493_v53 = vrot.slane %v1977_v28, %v10774_v56  ;;  %v6903_v47 = vrot.slane %v5978_v18, %v10724_v17  ;;  %v13497_v31 = vrot.slane %v1987_v51, %v10770_v49  ;;  %v4258_v33 = vmax.f32 %v4002_v15, 0.0  ;;  %v13510_v18 = vpop.f32.mrf.mxu1 }
 0x35b   :  { %v4513_v6 = vmul.f32 %v13344_v29, %v4250_v44  ;;  %v4248_v21 = vmax.f32 %v3992_v43, 0.0  ;;  %v13501_v48 = vsel %vm5470_vm12, %v5214_v50, %v5726_v2  ;;  %v3995_v44 = vadd.f32 %v13365_v46, %v3732_v45  ;;  %17255 = vst [vmem:[#allocation121_spill] sm:$0xff] %v13510_v18 }
 0x35c   :  { %17251 = vst [vmem:[#allocation80_spill] sm:$0xff] %v13493_v53  ;;  %17252 = vst [vmem:[#allocation82_spill] sm:$0xff] %v13497_v31  ;;  %v3740_v41 = vadd.f32 %v13049_v8, %v13271_v12  ;;  %v1996_v28 = vcombine.high %v1994_v27, %v1994_v27  ;;  %v13508_v43 = vrot.slane %v1994_v27, %v10770_v49  ;;  %vm5461_vm13 = vcmp.ge.f32.partialorder %v5205_v39, 0.0 }
 0x35d   :  { %17253 = vst [vmem:[#allocation119_spill] sm:$0xff] %v13501_v48  ;;  %4946 = vadd.xlane.f32.xlu0 %v4513_v6  ;;  %v4511_v23 = vmul.f32 %v13344_v29, %v4248_v21  ;;  %v5717_v51 = vmul.f32 0.01, %v5205_v39  ;;  %v13513_v15 = vrot.slane %v1995_v34, %v10770_v49  ;;  %v4521_v50 = vmul.f32 %v13344_v29, %v4258_v33  ;;  %v13517_v6 = vpop.xlane.xlu1 %4866 }
 0x35e   :  { %17254 = vst [vmem:[#allocation120_spill] sm:$0xff] %v13508_v43  ;;  %v4251_v2 = vmax.f32 %v3995_v44, 0.0  ;;  %v4003_v21 = vadd.f32 %v13365_v46, %v3740_v41  ;;  %v17256_v8 = vrot.slane %v13321_v20, %v10724_v17  ;;  %v2025_v34 = vcombine.high %v13497_v31, %v13497_v31 }
 0x35f   :  { %4942 = vadd.xlane.f32.xlu1 %v4511_v23  ;;  %v17257_v23 = vld [vmem:[#allocation77_spill] sm:$0xff]  ;;  %v5213_v41 = vadd.f32 %v11427_v38, %v13046_v14  ;;  %v13541_v45 = vrot.slane %v1996_v28, %v10770_v49 }
 0x360   :  { %v13523_v27 = vsel %vm7508_vm4, %v17256_v8, %v6903_v47  ;;  %v17258_v33 = vrot.slane %v17257_v23, %v10774_v56  ;;  %v4514_v20 = vmul.f32 %v13344_v29, %v4251_v2  ;;  %v4259_v18 = vmax.f32 %v4003_v21, 0.0 }
 0x361   :  { %4962 = vadd.xlane.f32.xlu0 %v4521_v50  ;;  %v17259_v47 = vrot.slane %v13006_v7, %v10774_v56  ;;  %17260 = vst [vmem:[#allocation77_spill] sm:$0xff] %v13541_v45  ;;  %v5973_v23 = vsel %vm5461_vm13, %v5205_v39, %v5717_v51  ;;  %v13547_v50 = vpop.xlane.xlu0 %4856  ;;  %v2026_v2 = vcombine.high %v13508_v43, %v13508_v43  ;;  %vm5469_vm14 = vcmp.ge.f32.partialorder %v5213_v41, 0.0 }
 0x362   :  { %v3734_v44 = vadd.f32 %v17258_v33, %v17234_v32  ;;  %v649_v33 = vpop.f32.mrf.mxu1  ;;  %17261 = vst [vmem:[#allocation122_spill] sm:$0xff] %v13547_v50  ;;  %v2027_v7 = vcombine.high %v13513_v15, %v13513_v15  ;;  %v4522_v28 = vmul.f32 %v13344_v29, %v4259_v18  ;;  %v13558_v39 = vrot.slane %v2025_v34, %v10774_v56 }
 0x363   :  { %v3742_v8 = vadd.f32 %v17259_v47, %v13271_v12  ;;  %4948 = vadd.xlane.f32.xlu1 %v4514_v20  ;;  %v5725_v20 = vmul.f32 0.01, %v5213_v41  ;;  %v2029_v50 = vcombine.high %v649_v33, %v649_v33  ;;  %v2036_v47 = vrot.slane %v649_v33, %v10770_v49 }
 0x364   :  { %v3997_v14 = vadd.f32 %v13365_v46, %v3734_v44  ;;  %17262 = vst [vmem:[#allocation123_spill] sm:$0xff] %v13558_v39  ;;  %v17263_v44 = vld [vmem:[#allocation105_spill] sm:$0xff]  ;;  %v5207_v33 = vadd.f32 %v11427_v38, %v13061_v10 }
 0x365   :  { %v4005_v21 = vadd.f32 %v13365_v46, %v3742_v8  ;;  %v17264_v48 = vrot.slane %v17263_v44, %v10774_v56  ;;  %4964 = vadd.xlane.f32.xlu0 %v4522_v28  ;;  %v13566_v8 = vpop.xlane.xlu1 %4868  ;;  %v3741_v28 = vadd.f32 %v13076_v4, %v13271_v12  ;;  %v13584_v39 = vpop.xlane.xlu0 %4864  ;;  %v2043_v44 = vrot.slane %v2029_v50, %v10770_v49 }
 0x366   :  { %v4253_v51 = vmax.f32 %v3997_v14, 0.0  ;;  %vm5463_vm15 = vcmp.ge.f32.partialorder %v5207_v33, 0.0 }
 0x367   :  { %v3738_v31 = vadd.f32 %v17264_v48, %v13271_v12  ;;  %v4261_v18 = vmax.f32 %v4005_v21, 0.0  ;;  %v6883_v48 = vrot.slane %v5973_v23, %v10724_v17  ;;  %v13578_v21 = vrot.slane %v2027_v7, %v10774_v56  ;;  %v17271_v23 = vld [vmem:[#allocation104_spill] sm:$0xff] }
 0x368   :  { %v4516_v34 = vmul.f32 %v13344_v29, %v4253_v51  ;;  %v4004_v4 = vadd.f32 %v13365_v46, %v3741_v28  ;;  %v2044_v7 = vcombine.high %v2036_v47, %v2036_v47  ;;  %v5719_v28 = vmul.f32 0.01, %v5207_v33 }
 0x369   :  { %v4001_v14 = vadd.f32 %v13365_v46, %v3738_v31  ;;  %v4524_v53 = vmul.f32 %v13344_v29, %v4261_v18  ;;  %17265 = vst [vmem:[#allocation105_spill] sm:$0xff] %v13578_v21  ;;  %v17266_v31 = vld [vmem:[#allocation83_spill] sm:$0xff]  ;;  %v5981_v18 = vsel %vm5469_vm14, %v5213_v41, %v5725_v20  ;;  %v13591_v21 = vrot.slane %v2036_v47, %v10770_v49  ;;  %v13606_v20 = vpop.xlane.xlu1 %4872 }
 0x36a   :  { %4952 = vadd.xlane.f32.xlu1 %v4516_v34  ;;  %v3733_v43 = vadd.f32 %v17266_v31, %v17234_v32  ;;  %v13600_v31 = vsel %vm7512_vm7, %v6883_v48, %v13348_v59  ;;  %v4260_v41 = vmax.f32 %v4004_v4, 0.0  ;;  %v6915_v47 = vrot.slane %v5981_v18, %v10724_v17 }
 0x36b   :  { %v4257_v51 = vmax.f32 %v4001_v14, 0.0  ;;  %4968 = vadd.xlane.f32.xlu0 %v4524_v53  ;;  %v13596_v14 = vrot.slane %v2026_v2, %v10774_v56  ;;  %17268 = vst [vmem:[#allocation124_spill] sm:$0xff] %v13600_v31  ;;  %v17269_v53 = vrot.slane %v13022_v54, %v10774_v56  ;;  %v2045_v2 = vcombine.high %v2043_v44, %v2043_v44 }
 0x36c   :  { %v3996_v34 = vadd.f32 %v13365_v46, %v3733_v43  ;;  %v4523_v59 = vmul.f32 %v13344_v29, %v4260_v41  ;;  %v17270_v4 = vrot.slane %v13401_v36, %v10724_v17  ;;  %v13620_v18 = vrot.slane %v2044_v7, %v10770_v49 }
 0x36d   :  { %v4520_v10 = vmul.f32 %v13344_v29, %v4257_v51  ;;  %17267 = vst [vmem:[#allocation83_spill] sm:$0xff] %v13596_v14  ;;  %v3743_v50 = vadd.f32 %v17269_v53, %v13271_v12  ;;  %v13610_v51 = vrot.slane %v2043_v44, %v10770_v49  ;;  %v13625_v44 = vpop.xlane.xlu0 %4854  ;;  %v17272_v36 = vrot.slane %v17271_v23, %v10774_v56 }
 0x36e   :  { %v4252_v43 = vmax.f32 %v3996_v34, 0.0  ;;  %v7607_v53 = vsel %vm7510_vm5, %v17270_v4, %v13523_v27  ;;  %v3744_v7 = vadd.f32 %v13092_v19, %v13271_v12  ;;  %v5215_v31 = vadd.f32 %v11427_v38, %v13081_v52 }
 0x36f   :  { %4960 = vadd.xlane.f32.xlu1 %v4520_v10  ;;  %v4006_v48 = vadd.f32 %v13365_v46, %v3743_v50  ;;  %v2074_v10 = vcombine.high %v13591_v21, %v13591_v21  ;;  %4966 = vadd.xlane.f32.xlu0 %v4523_v59  ;;  %v3735_v27 = vadd.f32 %v17272_v36, %v17234_v32  ;;  %v17275_v59 = vld [vmem:[#allocation106_spill] sm:$0xff] }
 0x370   :  { %v4515_v34 = vmul.f32 %v13344_v29, %v4252_v43  ;;  %v13636_v4 = vsel %vm7512_vm7, %v6915_v47, %v7607_v53  ;;  %v13639_v43 = vsel %vm5463_vm15, %v5207_v33, %v5719_v28  ;;  %v13646_v41 = vrot.slane %v2045_v2, %v10770_v49  ;;  %v13652_v53 = vpop.xlane.xlu1 %4870 }
 0x371   :  { %v4262_v50 = vmax.f32 %v4006_v48, 0.0  ;;  %17273 = vst [vmem:[#allocation104_spill] sm:$0xff] %v13636_v4  ;;  %17274 = vst [vmem:[#allocation125_spill] sm:$0xff] %v13639_v43  ;;  %v3736_v48 = vadd.f32 %v17275_v59, %v17234_v32  ;;  %v2075_v36 = vcombine.high %v13610_v51, %v13610_v51  ;;  %v3998_v47 = vadd.f32 %v13365_v46, %v3735_v27  ;;  %v13673_v45 = vpop.xlane.xlu0 %4858 }
 0x372   :  { %17276 = vst [vmem:[#allocation106_spill] sm:$0xff] %v13646_v41  ;;  %v2076_v33 = vcombine.high %v13620_v18, %v13620_v18  ;;  %v13659_v28 = vrot.slane %v2074_v10, %v10774_v56  ;;  %v4007_v2 = vadd.f32 %v13365_v46, %v3744_v7  ;;  %v5727_v14 = vmul.f32 0.01, %v5215_v31 }
 0x373   :  { %4950 = vadd.xlane.f32.xlu1 %v4515_v34  ;;  %v4525_v19 = vmul.f32 %v13344_v29, %v4262_v50  ;;  %v5208_v34 = vadd.f32 %v11427_v38, %v13100_v30  ;;  %v5216_v50 = vadd.f32 %v11427_v38, %v13118_v37  ;;  %v4254_v27 = vmax.f32 %v3998_v47, 0.0 }
 0x374   :  { %v3999_v59 = vadd.f32 %v13365_v46, %v3736_v48  ;;  %v4263_v52 = vmax.f32 %v4007_v2, 0.0  ;;  %v17277_v10 = vrot.slane %v13324_v35, %v10774_v56  ;;  %vm5471_vm0 = vcmp.ge.f32.partialorder %v5215_v31, 0.0 }
 0x375   :  { %4970 = vadd.xlane.f32.xlu0 %v4525_v19  ;;  %v4517_v37 = vmul.f32 %v13344_v29, %v4254_v27  ;;  %v13679_v48 = vrot.slane %v2076_v33, %v10774_v56  ;;  %vm5464_vm2 = vcmp.ge.f32.partialorder %v5208_v34, 0.0  ;;  %v5728_v4 = vmul.f32 0.01, %v5216_v50 }
 0x376   :  { %v3746_v7 = vadd.f32 %v17277_v10, %v13300_v62  ;;  %v4255_v19 = vmax.f32 %v3999_v59, 0.0  ;;  %v4526_v2 = vmul.f32 %v13344_v29, %v4263_v52  ;;  %v5720_v10 = vmul.f32 0.01, %v5208_v34 }
 0x377   :  { %4954 = vadd.xlane.f32.xlu1 %v4517_v37  ;;  %v17278_v30 = vcombine.high %v17271_v23, %v17271_v23  ;;  %v13689_v59 = vpop.xlane.xlu1 %4874  ;;  %v13691_v33 = vsel %vm5471_vm0, %v5215_v31, %v5727_v14  ;;  %vm5472_vm3 = vcmp.ge.f32.partialorder %v5216_v50, 0.0  ;;  %v5209_v47 = vadd.f32 %v11427_v38, %v13135_v26 }
 0x378   :  { %v4009_v35 = vadd.f32 %v13365_v46, %v3746_v7  ;;  %17279 = vst [vmem:[#allocation126_spill] sm:$0xff] %v13691_v33  ;;  %v13696_v7 = vrot.slane %v2075_v36, %v10774_v56  ;;  %v5218_v37 = vadd.f32 %v11427_v38, %v13149_v9  ;;  %v4518_v41 = vmul.f32 %v13344_v29, %v4255_v19  ;;  %v17295_v33 = vld [vmem:[#allocation40_spill] sm:$0xff] }
 0x379   :  { %v3009_v27 = vrot.slane %v17278_v30, %v10774_v56  ;;  %4972 = vadd.xlane.f32.xlu0 %v4526_v2  ;;  %v5219_v31 = vadd.f32 %v11427_v38, %v13158_v61  ;;  %v17280_v36 = vcombine.high %v13022_v54, %v13022_v54  ;;  %v13711_v2 = vpop.xlane.xlu0 %4860  ;;  %v13718_v19 = vsel %vm5472_vm3, %v5216_v50, %v5728_v4 }
 0x37a   :  { %v4265_v52 = vmax.f32 %v4009_v35, 0.0  ;;  %17282 = vst [vmem:[#allocation128_spill] sm:$0xff] %v13718_v19  ;;  %vm5465_vm6 = vcmp.ge.f32.partialorder %v5209_v47, 0.0  ;;  %v5721_v35 = vmul.f32 0.01, %v5209_v47  ;;  %v17283_v54 = vrot.slane %v13356_v42, %v10774_v56 }
 0x37b   :  { %v3737_v23 = vadd.f32 %v3009_v27, %v17234_v32  ;;  %v3041_v30 = vrot.slane %v17280_v36, %v10774_v56  ;;  %v13716_v32 = vsel %vm5464_vm2, %v5208_v34, %v5720_v10  ;;  %4956 = vadd.xlane.f32.xlu1 %v4518_v41  ;;  %vm5474_vm8 = vcmp.ge.f32.partialorder %v5218_v37, 0.0 }
 0x37c   :  { %v4528_v26 = vmul.f32 %v13344_v29, %v4265_v52  ;;  %17281 = vst [vmem:[#allocation127_spill] sm:$0xff] %v13716_v32  ;;  %v3747_v52 = vadd.f32 %v17283_v54, %v13300_v62  ;;  %v5730_v36 = vmul.f32 0.01, %v5218_v37  ;;  %v3748_v4 = vadd.f32 %v13388_v58, %v13300_v62 }
 0x37d   :  { %v4000_v61 = vadd.f32 %v13365_v46, %v3737_v23  ;;  %v3745_v27 = vadd.f32 %v3041_v30, %v13271_v12  ;;  %v13728_v34 = vpop.xlane.xlu1 %4876  ;;  %v5731_v41 = vmul.f32 0.01, %v5219_v31  ;;  %v5217_v50 = vadd.f32 %v11427_v38, %v13182_v55 }
 0x37e   :  { %4976 = vadd.xlane.f32.xlu0 %v4528_v26  ;;  %v4010_v12 = vadd.f32 %v13365_v46, %v3747_v52  ;;  %vm5475_vm9 = vcmp.ge.f32.partialorder %v5219_v31, 0.0  ;;  %v5227_v58 = vadd.f32 %v11427_v38, %v13194_v60  ;;  %v4011_v55 = vadd.f32 %v13365_v46, %v3748_v4 }
 0x37f   :  { %v4256_v9 = vmax.f32 %v4000_v61, 0.0  ;;  %v4008_v10 = vadd.f32 %v13365_v46, %v3745_v27  ;;  %v13745_v27 = vsel %vm5465_vm6, %v5209_v47, %v5721_v35  ;;  %v5986_v52 = vsel %vm5474_vm8, %v5218_v37, %v5730_v36 }
 0x380   :  { %v4266_v61 = vmax.f32 %v4010_v12, 0.0  ;;  %17284 = vst [vmem:[#allocation129_spill] sm:$0xff] %v13745_v27  ;;  %v17285_v23 = vrot.slane %v13407_v3, %v10774_v56  ;;  %v17286_v60 = vrot.slane %v13353_v40, %v10774_v56  ;;  %v5987_v12 = vsel %vm5475_vm9, %v5219_v31, %v5731_v41 }
 0x381   :  { %v4519_v26 = vmul.f32 %v13344_v29, %v4256_v9  ;;  %v4264_v30 = vmax.f32 %v4008_v10, 0.0  ;;  %v5729_v4 = vmul.f32 0.01, %v5217_v50  ;;  %v4267_v14 = vmax.f32 %v4011_v55, 0.0 }
 0x382   :  { %v13742_v54 = vpop.xlane.xlu0 %4862  ;;  %v3755_v9 = vadd.f32 %v17285_v23, %v13426_v57  ;;  %v3750_v10 = vadd.f32 %v17286_v60, %v13300_v62  ;;  %vm5473_vm10 = vcmp.ge.f32.partialorder %v5217_v50, 0.0  ;;  %v5220_v47 = vadd.f32 %v11427_v38, %v13204_v63 }
 0x383   :  { %4958 = vadd.xlane.f32.xlu1 %v4519_v26  ;;  %v4527_v42 = vmul.f32 %v13344_v29, %v4264_v30  ;;  %v4529_v37 = vmul.f32 %v13344_v29, %v4266_v61  ;;  %v5739_v40 = vmul.f32 0.01, %v5227_v58  ;;  %v5226_v31 = vadd.f32 %v11427_v38, %v13269_v25 }
 0x384   :  { %v4018_v35 = vadd.f32 %v13365_v46, %v3755_v9  ;;  %v4013_v41 = vadd.f32 %v13365_v46, %v3750_v10  ;;  %v6935_v23 = vrot.slane %v5986_v52, %v10724_v17  ;;  %vm5483_vm11 = vcmp.ge.f32.partialorder %v5227_v58, 0.0 }
 0x385   :  { %v13761_v3 = vpop.xlane.xlu1 %4880  ;;  %4974 = vadd.xlane.f32.xlu0 %v4527_v42  ;;  %v3756_v26 = vadd.f32 %v13460_v13, %v13426_v57  ;;  %v6939_v30 = vrot.slane %v5987_v12, %v10724_v17  ;;  %v13773_v61 = vsel %vm5473_vm10, %v5217_v50, %v5729_v4  ;;  %v4530_v55 = vmul.f32 %v13344_v29, %v4267_v14 }
 0x386   :  { %v4274_v63 = vmax.f32 %v4018_v35, 0.0  ;;  %17287 = vst [vmem:[#allocation130_spill] sm:$0xff] %v13773_v61  ;;  %v4269_v9 = vmax.f32 %v4013_v41, 0.0  ;;  %vm5476_vm12 = vcmp.ge.f32.partialorder %v5220_v47, 0.0  ;;  %v5732_v42 = vmul.f32 0.01, %v5220_v47 }
 0x387   :  { %4978 = vadd.xlane.f32.xlu1 %v4529_v37  ;;  %v4019_v60 = vadd.f32 %v13365_v46, %v3756_v26  ;;  %v5995_v10 = vsel %vm5483_vm11, %v5227_v58, %v5739_v40  ;;  %v5228_v13 = vadd.f32 %v11427_v38, %v13214_v1  ;;  %v5738_v37 = vmul.f32 0.01, %v5226_v31  ;;  %v17290_v41 = vld [vmem:[#allocation95_spill] sm:$0xff] }
 0x388   :  { %v4537_v52 = vmul.f32 %v13344_v29, %v4274_v63  ;;  %v17288_v50 = vrot.slane %v13391_v0, %v10774_v56  ;;  %v5222_v12 = vadd.f32 %v11427_v38, %v13237_v11  ;;  %vm5482_vm13 = vcmp.ge.f32.partialorder %v5226_v31, 0.0 }
 0x389   :  { %v13776_v25 = vpop.xlane.xlu0 %4882  ;;  %4980 = vadd.xlane.f32.xlu0 %v4530_v55  ;;  %v4275_v4 = vmax.f32 %v4019_v60, 0.0  ;;  %v17289_v58 = vrot.slane %v13404_v5, %v10774_v56  ;;  %v5229_v1 = vadd.f32 %v11427_v38, %v13287_v16  ;;  %v5221_v0 = vadd.f32 %v11427_v38, %v17290_v41 }
 0x38a   :  { %v3754_v14 = vadd.f32 %v17288_v50, %v13426_v57  ;;  %v4532_v63 = vmul.f32 %v13344_v29, %v4269_v9  ;;  %v13801_v26 = vsel %vm7508_vm4, %v6939_v30, %v6935_v23  ;;  %v6971_v55 = vrot.slane %v5995_v10, %v10724_v17  ;;  %v17291_v9 = vld [vmem:[#allocation39_spill] sm:$0xff]  ;;  %v17292_v30 = vld [vmem:[#allocation81_spill] sm:$0xff] }
 0x38b   :  { %4994 = vadd.xlane.f32.xlu1 %v4537_v52  ;;  %v3758_v35 = vadd.f32 %v17289_v58, %v13426_v57  ;;  %v13792_v40 = vpop.xlane.xlu1 %4878  ;;  %v5988_v5 = vsel %vm5476_vm12, %v5220_v47, %v5732_v42  ;;  %v4538_v52 = vmul.f32 %v13344_v29, %v4275_v4  ;;  %v5740_v60 = vmul.f32 0.01, %v5228_v13 }
 0x38c   :  { %v4017_v11 = vadd.f32 %v13365_v46, %v3754_v14  ;;  %v5994_v50 = vsel %vm5482_vm13, %v5226_v31, %v5738_v37  ;;  %vm5484_vm14 = vcmp.ge.f32.partialorder %v5228_v13, 0.0  ;;  %vm5478_vm15 = vcmp.ge.f32.partialorder %v5222_v12, 0.0 }
 0x38d   :  { %4984 = vadd.xlane.f32.xlu0 %v4532_v63  ;;  %v4021_v58 = vadd.f32 %v13365_v46, %v3758_v35  ;;  %v13807_v41 = vpop.xlane.xlu0 %4898  ;;  %v5230_v23 = vadd.f32 %v11427_v38, %v17291_v9  ;;  %v3749_v10 = vadd.f32 %v17292_v30, %v13300_v62  ;;  %v5741_v47 = vmul.f32 0.01, %v5229_v1 }
 0x38e   :  { %v4273_v16 = vmax.f32 %v4017_v11, 0.0  ;;  %v5733_v42 = vmul.f32 0.01, %v5221_v0  ;;  %v6967_v37 = vrot.slane %v5994_v50, %v10724_v17  ;;  %vm5485_vm0 = vcmp.ge.f32.partialorder %v5229_v1, 0.0 }
 0x38f   :  { %4996 = vadd.xlane.f32.xlu1 %v4538_v52  ;;  %v4277_v31 = vmax.f32 %v4021_v58, 0.0  ;;  %vm5477_vm2 = vcmp.ge.f32.partialorder %v5221_v0, 0.0  ;;  %v4012_v4 = vadd.f32 %v13365_v46, %v3749_v10  ;;  %v13816_v35 = vpop.xlane.xlu1 %4884  ;;  %v5996_v63 = vsel %vm5484_vm14, %v5228_v13, %v5740_v60  ;;  %v17293_v58 = vld [vmem:[#allocation93_spill] sm:$0xff] }
 0x390   :  { %v4536_v14 = vmul.f32 %v13344_v29, %v4273_v16  ;;  %v5734_v11 = vmul.f32 0.01, %v5222_v12  ;;  %v3757_v9 = vadd.f32 %v13476_v22, %v13426_v57  ;;  %vm5486_vm3 = vcmp.ge.f32.partialorder %v5230_v23, 0.0 }
 0x391   :  { %v4540_v52 = vmul.f32 %v13344_v29, %v4277_v31  ;;  %v5742_v30 = vmul.f32 0.01, %v5230_v23  ;;  %v4268_v16 = vmax.f32 %v4012_v4, 0.0  ;;  %v17294_v50 = vrot.slane %v17293_v58, %v10774_v56  ;;  %v17296_v31 = vld [vmem:[#allocation79_spill] sm:$0xff] }
 0x392   :  { %4992 = vadd.xlane.f32.xlu0 %v4536_v14  ;;  %v5997_v19 = vsel %vm5485_vm0, %v5229_v1, %v5741_v47  ;;  %v5989_v10 = vsel %vm5477_vm2, %v5221_v0, %v5733_v42  ;;  %v5231_v13 = vadd.f32 %v11427_v38, %v17295_v33  ;;  %v4020_v60 = vadd.f32 %v13365_v46, %v3757_v9  ;;  %v13828_v14 = vpop.xlane.xlu0 %4900 }
 0x393   :  { %v3751_v36 = vadd.f32 %v17294_v50, %v13300_v62  ;;  %5000 = vadd.xlane.f32.xlu1 %v4540_v52  ;;  %v7620_v22 = vsel %vm7508_vm4, %v6971_v55, %v6967_v37  ;;  %v5223_v4 = vadd.f32 %v11427_v38, %v17296_v31  ;;  %v4531_v27 = vmul.f32 %v13344_v29, %v4268_v16 }
 0x394   :  { %v6943_v1 = vrot.slane %v5988_v5, %v10724_v17  ;;  %v6975_v0 = vrot.slane %v5996_v63, %v10724_v17  ;;  %v13838_v33 = vsel %vm5478_vm15, %v5222_v12, %v5734_v11  ;;  %v4276_v47 = vmax.f32 %v4020_v60, 0.0  ;;  %v13845_v9 = vpop.xlane.xlu1 %4888  ;;  %v17299_v12 = vld [vmem:[#allocation117_spill] sm:$0xff] }
 0x395   :  { %v4014_v32 = vadd.f32 %v13365_v46, %v3751_v36  ;;  %17297 = vst [vmem:[#allocation95_spill] sm:$0xff] %v13838_v33  ;;  %v13841_v42 = vsel %vm5486_vm3, %v5230_v23, %v5742_v30  ;;  %v6979_v55 = vrot.slane %v5997_v19, %v10724_v17  ;;  %v6947_v37 = vrot.slane %v5989_v10, %v10724_v17  ;;  %v17301_v30 = vld [vmem:[#allocation101_spill] sm:$0xff]  ;;  %v17302_v10 = vld [vmem:[#allocation103_spill] sm:$0xff] }
 0x396   :  { %17298 = vst [vmem:[#allocation39_spill] sm:$0xff] %v13841_v42  ;;  %4982 = vadd.xlane.f32.xlu0 %v4531_v27  ;;  %v7621_v36 = vsel %vm7510_vm5, %v6975_v0, %v7620_v22  ;;  %v5743_v5 = vmul.f32 0.01, %v5231_v13  ;;  %v4539_v63 = vmul.f32 %v13344_v29, %v4276_v47  ;;  %v17300_v11 = vrot.slane %v17299_v12, %v10774_v56  ;;  %v13862_v22 = vpop.xlane.xlu0 %4904 }
 0x397   :  { %v4270_v52 = vmax.f32 %v4014_v32, 0.0  ;;  %vm5487_vm6 = vcmp.ge.f32.partialorder %v5231_v13, 0.0  ;;  %v5735_v23 = vmul.f32 0.01, %v5223_v4  ;;  %v5232_v19 = vadd.f32 %v11427_v38, %v17301_v30 }
 0x398   :  { %v3759_v16 = vadd.f32 %v17300_v11, %v13426_v57  ;;  %v7614_v50 = vsel %vm7510_vm5, %v6943_v1, %v13801_v26  ;;  %vm5479_vm8 = vcmp.ge.f32.partialorder %v5223_v4, 0.0  ;;  %v5224_v60 = vadd.f32 %v11427_v38, %v17302_v10  ;;  %4998 = vadd.xlane.f32.xlu1 %v4539_v63  ;;  %v17307_v63 = vld [vmem:[#allocation102_spill] sm:$0xff] }
 0x399   :  { %v4533_v27 = vmul.f32 %v13344_v29, %v4270_v52  ;;  %v13869_v47 = vsel %vm7512_vm7, %v6979_v55, %v7621_v36  ;;  %v17304_v52 = vld [vmem:[#allocation98_spill] sm:$0xff]  ;;  %v13874_v26 = vsel %vm7512_vm7, %v6947_v37, %v7614_v50  ;;  %v13877_v1 = vsel %vm5487_vm6, %v5231_v13, %v5743_v5  ;;  %v17309_v36 = vld [vmem:[#allocation116_spill] sm:$0xff]  ;;  %v17311_v13 = vld [vmem:[#allocation43_spill] sm:$0xff] }
 0x39a   :  { %17303 = vst [vmem:[#allocation81_spill] sm:$0xff] %v13869_v47  ;;  %v5234_v11 = vadd.f32 %v11427_v38, %v17304_v52  ;;  %17305 = vst [vmem:[#allocation93_spill] sm:$0xff] %v13874_v26  ;;  %v5235_v30 = vadd.f32 %v11427_v38, %v17307_v63  ;;  %v4022_v10 = vadd.f32 %v13365_v46, %v3759_v16  ;;  %vm5488_vm9 = vcmp.ge.f32.partialorder %v5232_v19, 0.0  ;;  %v13886_v52 = vpop.xlane.xlu1 %4896  ;;  %v17310_v37 = vld [vmem:[#allocation118_spill] sm:$0xff]  ;;  %v13898_v47 = vpop.xlane.xlu0 %4902 }
 0x39b   :  { %4986 = vadd.xlane.f32.xlu0 %v4533_v27  ;;  %17306 = vst [vmem:[#allocation40_spill] sm:$0xff] %v13877_v1  ;;  %v13882_v31 = vsel %vm5479_vm8, %v5223_v4, %v5735_v23  ;;  %v5744_v55 = vmul.f32 0.01, %v5232_v19  ;;  %v3752_v0 = vadd.f32 %v17309_v36, %v13300_v62  ;;  %v5736_v27 = vmul.f32 0.01, %v5224_v60  ;;  %v13905_v16 = vpop.f32.mrf.mxu1 }
 0x39c   :  { %17308 = vst [vmem:[#allocation79_spill] sm:$0xff] %v13882_v31  ;;  %v5225_v50 = vadd.f32 %v11427_v38, %v17310_v37  ;;  %v5233_v5 = vadd.f32 %v11427_v38, %v17311_v13  ;;  %v4278_v32 = vmax.f32 %v4022_v10, 0.0  ;;  %vm5480_vm10 = vcmp.ge.f32.partialorder %v5224_v60, 0.0 }
 0x39d   :  { %v5746_v4 = vmul.f32 0.01, %v5234_v11  ;;  %v4015_v23 = vadd.f32 %v13365_v46, %v3752_v0  ;;  %vm5490_vm11 = vcmp.ge.f32.partialorder %v5234_v11, 0.0  ;;  %v5747_v63 = vmul.f32 0.01, %v5235_v30  ;;  %v655_v26 = vpop.f32.mrf.mxu1 }
 0x39e   :  { %v5236_v36 = vadd.f32 %v11427_v38, %v13499_v24  ;;  %v4541_v42 = vmul.f32 %v13344_v29, %v4278_v32  ;;  %v13903_v10 = vsel %vm5488_vm9, %v5232_v19, %v5744_v55  ;;  %vm5491_vm12 = vcmp.ge.f32.partialorder %v5235_v30, 0.0  ;;  %v13912_v31 = vpop.xlane.xlu1 %4886 }
 0x39f   :  { %17312 = vst [vmem:[#allocation117_spill] sm:$0xff] %v13903_v10  ;;  %v4271_v13 = vmax.f32 %v4015_v23, 0.0  ;;  %v13907_v0 = vsel %vm5480_vm10, %v5224_v60, %v5736_v27  ;;  %vm5481_vm13 = vcmp.ge.f32.partialorder %v5225_v50, 0.0  ;;  %v5737_v1 = vmul.f32 0.01, %v5225_v50  ;;  %v17314_v60 = vld [vmem:[#allocation122_spill] sm:$0xff] }
 0x3a0   :  { %17313 = vst [vmem:[#allocation101_spill] sm:$0xff] %v13907_v0  ;;  %v5745_v33 = vmul.f32 0.01, %v5233_v5  ;;  %5002 = vadd.xlane.f32.xlu1 %v4541_v42  ;;  %v6002_v24 = vsel %vm5490_vm11, %v5234_v11, %v5746_v4  ;;  %vm5489_vm14 = vcmp.ge.f32.partialorder %v5233_v5, 0.0  ;;  %v5243_v32 = vadd.f32 %v11427_v38, %v13517_v6  ;;  %v17315_v6 = vld [vmem:[#allocation80_spill] sm:$0xff] }
 0x3a1   :  { %v4534_v37 = vmul.f32 %v13344_v29, %v4271_v13  ;;  %v6003_v55 = vsel %vm5491_vm12, %v5235_v30, %v5747_v63  ;;  %v5748_v23 = vmul.f32 0.01, %v5236_v36  ;;  %v5238_v27 = vadd.f32 %v11427_v38, %v17314_v60  ;;  %v13931_v60 = vpop.xlane.xlu0 %4906 }
 0x3a2   :  { %vm5492_vm15 = vcmp.ge.f32.partialorder %v5236_v36, 0.0  ;;  %v5244_v42 = vadd.f32 %v11427_v38, %v13566_v8  ;;  %v2078_v11 = vcombine.high %v655_v26, %v655_v26  ;;  %v3760_v4 = vadd.f32 %v17315_v6, %v13426_v57 }
 0x3a3   :  { %4988 = vadd.xlane.f32.xlu0 %v4534_v37  ;;  %v6999_v19 = vrot.slane %v6002_v24, %v10724_v17  ;;  %v13926_v30 = vsel %vm5481_vm13, %v5225_v50, %v5737_v1  ;;  %v13929_v63 = vsel %vm5489_vm14, %v5233_v5, %v5745_v33  ;;  %v7003_v8 = vrot.slane %v6003_v55, %v10724_v17 }
 0x3a4   :  { %17316 = vst [vmem:[#allocation103_spill] sm:$0xff] %v13926_v30  ;;  %17317 = vst [vmem:[#allocation98_spill] sm:$0xff] %v13929_v63  ;;  %vm5499_vm0 = vcmp.ge.f32.partialorder %v5243_v32, 0.0  ;;  %v5755_v37 = vmul.f32 0.01, %v5243_v32  ;;  %v4023_v10 = vadd.f32 %v13365_v46, %v3760_v4  ;;  %v6004_v6 = vsel %vm5492_vm15, %v5236_v36, %v5748_v23  ;;  %v13941_v0 = vpop.xlane.xlu1 %4890 }
 0x3a5   :  { %v5750_v61 = vmul.f32 0.01, %v5238_v27  ;;  %v2085_v13 = vrot.slane %v655_v26, %v10770_v49  ;;  %v17318_v1 = vcombine.high %v17293_v58, %v17293_v58  ;;  %vm5494_vm2 = vcmp.ge.f32.partialorder %v5238_v27, 0.0  ;;  %17319 = vst [vmem:[#allocation102_spill] sm:$0xff] %v13941_v0  ;;  %v13947_v26 = vpop.f32.mrf.mxu1  ;;  %v13961_v43 = vpop.xlane.xlu0 %4908 }
 0x3a6   :  { %v5756_v33 = vmul.f32 0.01, %v5244_v42  ;;  %v2092_v5 = vrot.slane %v2078_v11, %v10770_v49  ;;  %v4279_v24 = vmax.f32 %v4023_v10, 0.0  ;;  %vm5500_vm3 = vcmp.ge.f32.partialorder %v5244_v42, 0.0  ;;  %17321 = vst [vmem:[#allocation118_spill] sm:$0xff] %v13961_v43 }
 0x3a7   :  { %v3073_v50 = vrot.slane %v17318_v1, %v10774_v56  ;;  %v5242_v36 = vadd.f32 %v11427_v38, %v13584_v39  ;;  %v7007_v4 = vrot.slane %v6004_v6, %v10724_v17  ;;  %v13954_v10 = vsel %vm5499_vm0, %v5243_v32, %v5755_v37  ;;  %v17322_v32 = vld [vmem:[#allocation121_spill] sm:$0xff]  ;;  %v17323_v37 = vld [vmem:[#allocation82_spill] sm:$0xff] }
 0x3a8   :  { %v4542_v11 = vmul.f32 %v13344_v29, %v4279_v24  ;;  %v7627_v1 = vsel %vm7508_vm4, %v7003_v8, %v6999_v19  ;;  %v13958_v55 = vsel %vm5494_vm2, %v5238_v27, %v5750_v61  ;;  %v2093_v30 = vcombine.high %v2085_v13, %v2085_v13  ;;  %v659_v8 = vpop.f32.mrf.mxu1 }
 0x3a9   :  { %v3753_v23 = vadd.f32 %v3073_v50, %v13300_v62  ;;  %17320 = vst [vmem:[#allocation116_spill] sm:$0xff] %v13958_v55  ;;  %v13963_v62 = vsel %vm5500_vm3, %v5244_v42, %v5756_v33  ;;  %v2094_v50 = vcombine.high %v2092_v5, %v2092_v5  ;;  %v13966_v58 = vrot.slane %v2085_v13, %v10770_v49  ;;  %v14007_v55 = vpop.xlane.xlu0 %4912 }
 0x3aa   :  { %5004 = vadd.xlane.f32.xlu1 %v4542_v11  ;;  %v17324_v6 = vrot.slane %v17323_v37, %v10774_v56  ;;  %v7035_v61 = vrot.slane %v13954_v10, %v10724_v17  ;;  %v13975_v19 = vrot.slane %v2092_v5, %v10770_v49  ;;  %v5754_v27 = vmul.f32 0.01, %v5242_v36  ;;  %v13982_v11 = vpop.xlane.xlu1 %4892  ;;  %17329 = vst [vmem:[#allocation121_spill] sm:$0xff] %v14007_v55 }
 0x3ab   :  { %v4016_v39 = vadd.f32 %v13365_v46, %v3753_v23  ;;  %v13978_v33 = vsel %vm7510_vm5, %v7007_v4, %v7627_v1  ;;  %vm5498_vm6 = vcmp.ge.f32.partialorder %v5242_v36, 0.0  ;;  %v5246_v13 = vadd.f32 %v11427_v38, %v13606_v20  ;;  %17326 = vst [vmem:[#allocation122_spill] sm:$0xff] %v13982_v11 }
 0x3ac   :  { %v3762_v24 = vadd.f32 %v17324_v6, %v17322_v32  ;;  %17325 = vst [vmem:[#allocation43_spill] sm:$0xff] %v13975_v19  ;;  %v2127_v23 = vcombine.high %v659_v8, %v659_v8  ;;  %v13989_v10 = vrot.slane %v2093_v30, %v10770_v49  ;;  %v13993_v4 = vrot.slane %v2094_v50, %v10770_v49 }
 0x3ad   :  { %v4272_v42 = vmax.f32 %v4016_v39, 0.0  ;;  %v2123_v20 = vcombine.high %v13966_v58, %v13966_v58  ;;  %v2134_v1 = vrot.slane %v659_v8, %v10770_v49  ;;  %v2124_v37 = vcombine.high %v13975_v19, %v13975_v19 }
 0x3ae   :  { %17327 = vst [vmem:[#allocation80_spill] sm:$0xff] %v13993_v4  ;;  %v4025_v6 = vadd.f32 %v13365_v46, %v3762_v24  ;;  %v6010_v30 = vsel %vm5498_vm6, %v5242_v36, %v5754_v27  ;;  %v17328_v50 = vrot.slane %v13513_v15, %v10774_v56  ;;  %v5758_v63 = vmul.f32 0.01, %v5246_v13 }
 0x3af   :  { %v4535_v39 = vmul.f32 %v13344_v29, %v4272_v42  ;;  %v2141_v8 = vrot.slane %v2127_v23, %v10770_v49  ;;  %v5237_v24 = vadd.f32 %v11427_v38, %v13625_v44  ;;  %v2125_v43 = vcombine.high %v13989_v10, %v13989_v10  ;;  %v14023_v44 = vpop.xlane.xlu1 %4894 }
 0x3b0   :  { %v3763_v42 = vadd.f32 %v17328_v50, %v17322_v32  ;;  %v4281_v11 = vmax.f32 %v4025_v6, 0.0  ;;  %vm5502_vm8 = vcmp.ge.f32.partialorder %v5246_v13, 0.0  ;;  %v14020_v50 = vrot.slane %v2134_v1, %v10770_v49  ;;  %17330 = vst [vmem:[#allocation82_spill] sm:$0xff] %v14023_v44 }
 0x3b1   :  { %4990 = vadd.xlane.f32.xlu0 %v4535_v39  ;;  %v2142_v39 = vcombine.high %v2134_v1, %v2134_v1  ;;  %v7031_v5 = vrot.slane %v6010_v30, %v10724_v17  ;;  %v14034_v1 = vsel %vm5502_vm8, %v5246_v13, %v5758_v63  ;;  %v2143_v55 = vcombine.high %v2141_v8, %v2141_v8 }
 0x3b2   :  { %v4026_v27 = vadd.f32 %v13365_v46, %v3763_v42  ;;  %v4544_v23 = vmul.f32 %v13344_v29, %v4281_v11  ;;  %v17331_v46 = vcombine.high %v17299_v12, %v17299_v12  ;;  %17332 = vst [vmem:[#allocation131_spill] sm:$0xff] %v14034_v1  ;;  %v5749_v29 = vmul.f32 0.01, %v5237_v24  ;;  %v14045_v12 = vld [vmem:[%s16696_s6] ss:$0 sm:$0xff] }
 0x3b3   :  { %v14037_v11 = vrot.slane %v2123_v20, %v10774_v56  ;;  %v14040_v6 = vrot.slane %v2141_v8, %v10770_v49  ;;  %vm5493_vm9 = vcmp.ge.f32.partialorder %v5237_v24, 0.0  ;;  %v14051_v63 = vrot.slane %v2125_v43, %v10774_v56 }
 0x3b4   :  { %v4282_v36 = vmax.f32 %v4026_v27, 0.0  ;;  %v3105_v42 = vrot.slane %v17331_v46, %v10774_v56  ;;  %5008 = vadd.xlane.f32.xlu1 %v4544_v23  ;;  %v14048_v27 = vpop.xlane.xlu0 %4910  ;;  %v14054_v13 = vrot.slane %v2124_v37, %v10774_v56  ;;  %v14057_v20 = vrot.slane %v2142_v39, %v10770_v49  ;;  %v14061_v23 = vpop.f32.mrf.mxu1 }
 0x3b5   :  { %17333 = vst [vmem:[#allocation132_spill] sm:$0xff] %v14048_v27  ;;  %v2172_v8 = vcombine.high %v14020_v50, %v14020_v50  ;;  %v14064_v46 = vsel %vm7508_vm4, %v7035_v61, %v7031_v5  ;;  %v5245_v43 = vadd.f32 %v11427_v38, %v13652_v53  ;;  %v14072_v39 = vrot.slane %v2143_v55, %v10770_v49 }
 0x3b6   :  { %v4545_v30 = vmul.f32 %v14045_v12, %v4282_v36  ;;  %17334 = vst [vmem:[#allocation133_spill] sm:$0xff] %v14054_v13  ;;  %v3761_v37 = vadd.f32 %v3105_v42, %v13426_v57  ;;  %v6005_v13 = vsel %vm5493_vm9, %v5237_v24, %v5749_v29  ;;  %v17335_v61 = vrot.slane %v13620_v18, %v10774_v56  ;;  %v14081_v36 = vpop.xlane.xlu1 %4914  ;;  %v14088_v57 = vld [vmem:[%s16695_s5] ss:$0 sm:$0xff]  ;;  %v17337_v42 = vld [vmem:[#allocation123_spill] sm:$0xff]  ;;  %v665_v15 = vpop.f32.mrf.mxu1 }
 0x3b7   :  { %17336 = vst [vmem:[#allocation134_spill] sm:$0xff] %v14081_v36  ;;  %v2173_v53 = vcombine.high %v14040_v6, %v14040_v6  ;;  %v3764_v24 = vadd.f32 %v17337_v42, %v17322_v32  ;;  %v3772_v29 = vadd.f32 %v13659_v28, %v13905_v16  ;;  %v2174_v18 = vcombine.high %v14057_v20, %v14057_v20 }
 0x3b8   :  { %5010 = vadd.xlane.f32.xlu0 %v4545_v30  ;;  %v3771_v5 = vadd.f32 %v17335_v61, %v13905_v16  ;;  %v4024_v55 = vadd.f32 %v14088_v57, %v3761_v37  ;;  %v14100_v61 = vrot.slane %v2172_v8, %v10774_v56  ;;  %v5757_v27 = vmul.f32 0.01, %v5245_v43  ;;  %v14104_v36 = vpop.xlane.xlu0 %4916 }
 0x3b9   :  { %v2176_v37 = vcombine.high %v665_v15, %v665_v15  ;;  %v4027_v42 = vadd.f32 %v14088_v57, %v3764_v24  ;;  %17338 = vst [vmem:[#allocation123_spill] sm:$0xff] %v14104_v36  ;;  %vm5501_vm10 = vcmp.ge.f32.partialorder %v5245_v43, 0.0  ;;  %v2183_v28 = vrot.slane %v665_v15, %v10770_v49 }
 0x3ba   :  { %v4034_v1 = vadd.f32 %v14088_v57, %v3771_v5  ;;  %v4280_v4 = vmax.f32 %v4024_v55, 0.0  ;;  %v4035_v19 = vadd.f32 %v14088_v57, %v3772_v29  ;;  %v7011_v30 = vrot.slane %v6005_v13, %v10724_v17 }
 0x3bb   :  { %v4283_v0 = vmax.f32 %v4027_v42, 0.0  ;;  %v5239_v24 = vadd.f32 %v11427_v38, %v13673_v45  ;;  %v14120_v29 = vrot.slane %v2174_v18, %v10774_v56  ;;  %v6013_v8 = vsel %vm5501_vm10, %v5245_v43, %v5757_v27 }
 0x3bc   :  { %v4290_v44 = vmax.f32 %v4034_v1, 0.0  ;;  %v4543_v5 = vmul.f32 %v14045_v12, %v4280_v4  ;;  %v4291_v15 = vmax.f32 %v4035_v19, 0.0  ;;  %v14117_v1 = vpop.xlane.xlu1 %4930  ;;  %v2190_v13 = vrot.slane %v2176_v37, %v10770_v49  ;;  %v17340_v4 = vld [vmem:[#allocation120_spill] sm:$0xff] }
 0x3bd   :  { %17339 = vst [vmem:[#allocation135_spill] sm:$0xff] %v14117_v1  ;;  %v17341_v42 = vrot.slane %v17340_v4, %v10774_v56  ;;  %v2191_v19 = vcombine.high %v2183_v28, %v2183_v28  ;;  %v14132_v1 = vpop.f32.mrf.mxu1  ;;  %v17343_v27 = vrot.slane %v13610_v51, %v10774_v56  ;;  %v14139_v18 = vrot.slane %v2183_v28, %v10770_v49 }
 0x3be   :  { %v4553_v36 = vmul.f32 %v14045_v12, %v4290_v44  ;;  %5006 = vadd.xlane.f32.xlu1 %v4543_v5  ;;  %v14130_v44 = vrot.slane %v2173_v53, %v10774_v56  ;;  %17342 = vst [vmem:[#allocation120_spill] sm:$0xff] %v14132_v1  ;;  %v4546_v37 = vmul.f32 %v14045_v12, %v4283_v0  ;;  %v5751_v45 = vmul.f32 0.01, %v5239_v24 }
 0x3bf   :  { %v3766_v55 = vadd.f32 %v17341_v42, %v17322_v32  ;;  %v3774_v43 = vadd.f32 %v17343_v27, %v13905_v16  ;;  %17344 = vst [vmem:[#allocation136_spill] sm:$0xff] %v14139_v18  ;;  %v17345_v53 = vrot.slane %v13591_v21, %v10774_v56  ;;  %v14147_v42 = vpop.xlane.xlu0 %4920  ;;  %v4554_v51 = vmul.f32 %v14045_v12, %v4291_v15 }
 0x3c0   :  { %5026 = vadd.xlane.f32.xlu0 %v4553_v36  ;;  %v7043_v36 = vrot.slane %v6013_v8, %v10724_v17  ;;  %v2192_v28 = vcombine.high %v2190_v13, %v2190_v13  ;;  %vm5495_vm11 = vcmp.ge.f32.partialorder %v5239_v24, 0.0  ;;  %v14155_v1 = vsel %vm7512_vm7, %v7011_v30, %v13978_v33 }
 0x3c1   :  { %v4029_v5 = vadd.f32 %v14088_v57, %v3766_v55  ;;  %v3770_v4 = vadd.f32 %v17345_v53, %v13905_v16  ;;  %v4037_v27 = vadd.f32 %v14088_v57, %v3774_v43  ;;  %17346 = vst [vmem:[#allocation137_spill] sm:$0xff] %v14155_v1  ;;  %v14158_v21 = vrot.slane %v2190_v13, %v10770_v49  ;;  %v669_v53 = vpop.f32.mrf.mxu1  ;;  %v14163_v43 = vpop.xlane.xlu1 %4932 }
 0x3c2   :  { %5012 = vadd.xlane.f32.xlu1 %v4546_v37  ;;  %v14161_v8 = vrot.slane %v2191_v19, %v10770_v49  ;;  %v17348_v37 = vrot.slane %v13963_v62, %v10724_v17  ;;  %v2221_v33 = vcombine.high %v14139_v18, %v14139_v18  ;;  %v14183_v62 = vrot.slane %v2192_v28, %v10770_v49 }
 0x3c3   :  { %v4285_v0 = vmax.f32 %v4029_v5, 0.0  ;;  %v4033_v55 = vadd.f32 %v14088_v57, %v3770_v4  ;;  %17347 = vst [vmem:[#allocation138_spill] sm:$0xff] %v14158_v21  ;;  %v4293_v15 = vmax.f32 %v4037_v27, 0.0  ;;  %vm7514_vm14 = vcmask 1044484  }
 0x3c4   :  { %5028 = vadd.xlane.f32.xlu0 %v4554_v51  ;;  %v7635_v5 = vsel %vm7510_vm5, %v17348_v37, %v14064_v46  ;;  %v14179_v51 = vsel %vm5495_vm11, %v5239_v24, %v5751_v45  ;;  %17351 = vst [vmem:[#allocation141_spill] sm:$0xff] %v14183_v62  ;;  %v5247_v46 = vadd.f32 %v11427_v38, %v13689_v59  ;;  %v17352_v45 = vld [vmem:[#allocation105_spill] sm:$0xff]  ;;  %vm7516_vm15 = vcmask 1045509  }
 0x3c5   :  { %v4548_v30 = vmul.f32 %v14045_v12, %v4285_v0  ;;  %v4289_v13 = vmax.f32 %v4033_v55, 0.0  ;;  %v14174_v19 = vsel %vm7512_vm7, %v7043_v36, %v7635_v5  ;;  %17350 = vst [vmem:[#allocation140_spill] sm:$0xff] %v14179_v51  ;;  %v4556_v27 = vmul.f32 %v14045_v12, %v4293_v15  ;;  %v14189_v0 = vpop.xlane.xlu0 %4928  ;;  %v17353_v15 = vld [vmem:[#allocation106_spill] sm:$0xff]  ;;  %v14214_v18 = vpop.xlane.xlu1 %4936 }
 0x3c6   :  { %17349 = vst [vmem:[#allocation139_spill] sm:$0xff] %v14174_v19  ;;  %v2225_v37 = vcombine.high %v669_v53, %v669_v53  ;;  %v3773_v36 = vadd.f32 %v13679_v48, %v13905_v16  ;;  %v2222_v55 = vcombine.high %v14158_v21, %v14158_v21  ;;  %v2223_v24 = vcombine.high %v14161_v8, %v14161_v8 }
 0x3c7   :  { %5016 = vadd.xlane.f32.xlu1 %v4548_v30  ;;  %v3765_v28 = vadd.f32 %v17352_v45, %v17322_v32  ;;  %v17354_v59 = vrot.slane %v17353_v15, %v10774_v56  ;;  %v2232_v30 = vrot.slane %v669_v53, %v10770_v49  ;;  %v4552_v4 = vmul.f32 %v14045_v12, %v4289_v13 }
 0x3c8   :  { %5032 = vadd.xlane.f32.xlu0 %v4556_v27  ;;  %v4036_v19 = vadd.f32 %v14088_v57, %v3773_v36  ;;  %v14207_v1 = vrot.slane %v2221_v33, %v10774_v56  ;;  %v5240_v45 = vadd.f32 %v11427_v38, %v13711_v2  ;;  %17356 = vst [vmem:[#allocation106_spill] sm:$0xff] %v14214_v18  ;;  %v5759_v48 = vmul.f32 0.01, %v5247_v46 }
 0x3c9   :  { %v3775_v5 = vadd.f32 %v17354_v59, %v13905_v16  ;;  %v4028_v59 = vadd.f32 %v14088_v57, %v3765_v28  ;;  %v2239_v53 = vrot.slane %v2225_v37, %v10770_v49  ;;  %vm5503_vm12 = vcmp.ge.f32.partialorder %v5247_v46, 0.0  ;;  %v14226_v37 = vpop.xlane.xlu0 %4918 }
 0x3ca   :  { %17355 = vst [vmem:[#allocation105_spill] sm:$0xff] %v14207_v1  ;;  %v4292_v13 = vmax.f32 %v4036_v19, 0.0  ;;  %v14223_v2 = vrot.slane %v2222_v55, %v10774_v56  ;;  %v2240_v28 = vcombine.high %v2232_v30, %v2232_v30  ;;  %17358 = vst [vmem:[#allocation143_spill] sm:$0xff] %v14226_v37  ;;  %v14229_v19 = vrot.slane %v2232_v30, %v10770_v49  ;;  %v14249_v37 = vpop.xlane.xlu1 %4934 }
 0x3cb   :  { %5024 = vadd.xlane.f32.xlu1 %v4552_v4  ;;  %v4038_v36 = vadd.f32 %v14088_v57, %v3775_v5  ;;  %v4284_v21 = vmax.f32 %v4028_v59, 0.0  ;;  %v17359_v5 = vld [vmem:[#allocation77_spill] sm:$0xff]  ;;  %v3776_v55 = vadd.f32 %v13696_v7, %v13905_v16  ;;  %v14238_v59 = vsel %vm5503_vm12, %v5247_v46, %v5759_v48 }
 0x3cc   :  { %17357 = vst [vmem:[#allocation142_spill] sm:$0xff] %v14223_v2  ;;  %v4555_v1 = vmul.f32 %v14045_v12, %v4292_v13  ;;  %v17360_v33 = vrot.slane %v17359_v5, %v10774_v56  ;;  %17361 = vst [vmem:[#allocation77_spill] sm:$0xff] %v14238_v59  ;;  %v2241_v2 = vcombine.high %v2239_v53, %v2239_v53  ;;  %v5752_v13 = vmul.f32 0.01, %v5240_v45 }
 0x3cd   :  { %v4294_v18 = vmax.f32 %v4038_v36, 0.0  ;;  %v4547_v4 = vmul.f32 %v14045_v12, %v4284_v21  ;;  %v17362_v36 = vld [vmem:[#allocation83_spill] sm:$0xff]  ;;  %v14243_v30 = vrot.slane %v2223_v24, %v10774_v56  ;;  %v14246_v21 = vrot.slane %v2239_v53, %v10770_v49  ;;  %v14260_v24 = vld [vmem:[%s16691_s1] sm:$0xff]  }
 0x3ce   :  { %v3767_v27 = vadd.f32 %v17360_v33, %v17322_v32  ;;  %5030 = vadd.xlane.f32.xlu0 %v4555_v1  ;;  %v3768_v62 = vadd.f32 %v17362_v36, %v17322_v32  ;;  %vm5496_vm13 = vcmp.ge.f32.partialorder %v5240_v45, 0.0  ;;  %v14252_v7 = vrot.slane %v2240_v28, %v10770_v49  ;;  %17365 = vst [vmem:[#allocation145_spill] sm:$0xff] %v14260_v24 }
 0x3cf   :  { %17363 = vst [vmem:[#allocation83_spill] sm:$0xff] %v14243_v30  ;;  %17364 = vst [vmem:[#allocation144_spill] sm:$0xff] %v14246_v21  ;;  %5014 = vadd.xlane.f32.xlu1 %v4547_v4  ;;  %v4557_v1 = vmul.f32 %v14045_v12, %v4294_v18  ;;  %v4039_v46 = vadd.f32 %v14088_v57, %v3776_v55  ;;  %v2270_v28 = vcombine.high %v14229_v19, %v14229_v19  ;;  %v14275_v30 = vpop.xlane.xlu0 %4922  ;;  %vm7518_vm0 = vcmask 1046534  }
 0x3d0   :  { %v4030_v33 = vadd.f32 %v14088_v57, %v3767_v27  ;;  %v4031_v48 = vadd.f32 %v14088_v57, %v3768_v62  ;;  %v14269_v18 = vrot.slane %v2241_v2, %v10770_v49  ;;  %v14273_v55 = vsel %vm5496_vm13, %v5240_v45, %v5752_v13 }
 0x3d1   :  { %17366 = vst [vmem:[#allocation146_spill] sm:$0xff] %v14273_v55  ;;  %v4295_v36 = vmax.f32 %v4039_v46, 0.0  ;;  %v2271_v53 = vcombine.high %v14246_v21, %v14246_v21  ;;  %v2272_v49 = vcombine.high %v14252_v7, %v14252_v7  ;;  %v5248_v45 = vadd.f32 %v11427_v38, %v13728_v34  ;;  %v17367_v34 = vld [vmem:[#allocation46_spill] sm:$0xff] }
 0x3d2   :  { %v4286_v4 = vmax.f32 %v4030_v33, 0.0  ;;  %5034 = vadd.xlane.f32.xlu0 %v4557_v1  ;;  %v4287_v59 = vmax.f32 %v4031_v48, 0.0  ;;  %v16855_v33 = vunpack.c.l.bf16 %v14260_v24  ;;  %v14291_v46 = vrot.slane %v2270_v28, %v10774_v56  ;;  %v14293_v48 = vpop.xlane.xlu1 %4938  ;;  %v17370_v28 = vld [vmem:[#allocation47_spill] sm:$0xff] }
 0x3d3   :  { %v4558_v13 = vmul.f32 %v14045_v12, %v4295_v36  ;;  %v5250_v2 = vadd.f32 %v11427_v38, %v13761_v3  ;;  %v17368_v36 = vld [vmem:[#allocation45_spill] sm:$0xff]  ;;  %v17371_v51 = vrot.slane %v17370_v28, %v10724_v17  ;;  %vm7520_vm3 = vcmask 1047559  }
 0x3d4   :  { %v4549_v27 = vmul.f32 %v14045_v12, %v4286_v4  ;;  %v5241_v4 = vadd.f32 %v11427_v38, %v13742_v54  ;;  %v17369_v62 = vrot.slane %v17368_v36, %v10724_v17  ;;  %vm6194_vm2 = vcmp.eq.f32.partialorder %v16855_v33, 0.0 }
 0x3d5   :  { %v5760_v3 = vmul.f32 0.01, %v5248_v45  ;;  %vm7803_vm6 = vcmask 64512   ;;  %vm5504_vm8 = vcmp.ge.f32.partialorder %v5248_v45, 0.0  ;;  %v14339_v28 = vrot.slane %v2271_v53, %v10774_v56 }
 0x3d6   :  { %5018 = vadd.xlane.f32.xlu1 %v4549_v27  ;;  %5036 = vadd.xlane.f32.xlu0 %v4558_v13  ;;  %v7515_v1 = vsel %vm7514_vm14, %v17369_v62, %v17367_v34  ;;  %v4550_v27 = vmul.f32 %v14045_v12, %v4287_v59  ;;  %v17372_v13 = vld [vmem:[#allocation48_spill] sm:$0xff]  ;;  %v17374_v59 = vcombine.high %v17359_v5, %v17359_v5  ;;  %v14319_v34 = vpop.xlane.xlu0 %4924  ;;  %v5762_v5 = vmul.f32 0.01, %v5250_v2 }
 0x3d7   :  { %v7517_v54 = vsel %vm7516_vm15, %v17371_v51, %v7515_v1  ;;  %v17373_v21 = vrot.slane %v17372_v13, %v10724_v17  ;;  %v17375_v51 = vld [vmem:[#allocation49_spill] sm:$0xff]  ;;  %17379 = vst [vmem:[#allocation45_spill] sm:$0xff] %v14339_v28  ;;  %vm5497_vm9 = vcmp.ge.f32.partialorder %v5241_v4, 0.0  ;;  %vm5506_vm10 = vcmp.ge.f32.partialorder %v5250_v2, 0.0 }
 0x3d8   :  { %v3137_v62 = vrot.slane %v17374_v59, %v10774_v56  ;;  %v17376_v1 = vrot.slane %v17375_v51, %v10724_v17  ;;  %v5753_v51 = vmul.f32 0.01, %v5241_v4  ;;  %v16858_v59 = vunpack.c.h.bf16 %v14260_v24 }
 0x3d9   :  { %v7519_v36 = vsel %vm7518_vm0, %v17373_v21, %v7517_v54  ;;  %v17377_v21 = vcombine.high %v17353_v15, %v17353_v15 }
 0x3da   :  { %5020 = vadd.xlane.f32.xlu1 %v4550_v27  ;;  %v7521_v13 = vsel %vm7520_vm3, %v17376_v1, %v7519_v36  ;;  %v3769_v27 = vadd.f32 %v3137_v62, %v17322_v32  ;;  %v14344_v1 = vpop.xlane.xlu1 %4940  ;;  %v17381_v32 = vrot.slane %v13989_v10, %v10774_v56  ;;  %v5251_v62 = vadd.f32 %v11427_v38, %v13776_v25  ;;  %v17389_v25 = vld [vmem:[#allocation53_spill] sm:$0xff] }
 0x3db   :  { %v3169_v54 = vrot.slane %v17377_v21, %v10774_v56  ;;  %v14335_v33 = vsel %vm6194_vm2, -1e+09, %v7521_v13  ;;  %v14346_v21 = vsel %vm5504_vm8, %v5248_v45, %v5760_v3  ;;  %v5249_v45 = vadd.f32 %v11427_v38, %v13792_v40 }
 0x3dc   :  { %17378 = vst [vmem:[#allocation46_spill] sm:$0xff] %v14335_v33  ;;  %v7804_v36 = vsel %vm7803_vm6, %v14335_v33, -inf  ;;  %17380 = vst [vmem:[#allocation47_spill] sm:$0xff] %v14346_v21  ;;  %v4032_v13 = vadd.f32 %v14088_v57, %v3769_v27  ;;  %v3779_v53 = vadd.f32 %v17381_v32, %v13947_v26  ;;  %v17382_v27 = vrot.slane %v13966_v58, %v10774_v56 }
 0x3dd   :  { %v3777_v15 = vadd.f32 %v3169_v54, %v13905_v16  ;;  %7805 = vmax.xlane.f32.xlu0 %v7804_v36  ;;  %v14366_v32 = vrot.slane %v2272_v49, %v10774_v56  ;;  %v14371_v40 = vsel %vm5497_vm9, %v5241_v4, %v5753_v51  ;;  %v5763_v58 = vmul.f32 0.01, %v5251_v62  ;;  %v17384_v4 = vld [vmem:[#allocation52_spill] sm:$0xff] }
 0x3de   :  { %v4288_v3 = vmax.f32 %v4032_v13, 0.0  ;;  %v4042_v54 = vadd.f32 %v14088_v57, %v3779_v53  ;;  %v3778_v36 = vadd.f32 %v17382_v27, %v13947_v26  ;;  %17383 = vst [vmem:[#allocation48_spill] sm:$0xff] %v14371_v40  ;;  %v14373_v13 = vsel %vm5506_vm10, %v5250_v2, %v5762_v5  ;;  %v17385_v2 = vld [vmem:[#allocation50_spill] sm:$0xff] }
 0x3df   :  { %v4040_v16 = vadd.f32 %v14088_v57, %v3777_v15  ;;  %v5259_v27 = vadd.f32 %v11427_v38, %v13807_v41  ;;  %vm5507_vm11 = vcmp.ge.f32.partialorder %v5251_v62, 0.0  ;;  %vm5505_vm12 = vcmp.ge.f32.partialorder %v5249_v45, 0.0 }
 0x3e0   :  { %v14363_v10 = vpop.xlane.xlu0 %4926  ;;  %v4551_v53 = vmul.f32 %v14045_v12, %v4288_v3  ;;  %v4298_v55 = vmax.f32 %v4042_v54, 0.0  ;;  %v4041_v33 = vadd.f32 %v14088_v57, %v3778_v36  ;;  %v17386_v5 = vrot.slane %v17385_v2, %v10724_v17  ;;  %v17387_v54 = vld [vmem:[#allocation51_spill] sm:$0xff] }
 0x3e1   :  { %v4296_v15 = vmax.f32 %v4040_v16, 0.0  ;;  %v5761_v16 = vmul.f32 0.01, %v5249_v45  ;;  %v5252_v3 = vadd.f32 %v11427_v38, %v13816_v35  ;;  %vm6195_vm13 = vcmp.eq.f32.partialorder %v16858_v59, 0.0 }
 0x3e2   :  { %5022 = vadd.xlane.f32.xlu1 %v4551_v53  ;;  %v7525_v51 = vsel %vm7514_vm14, %v17386_v5, %v17384_v4  ;;  %v4297_v41 = vmax.f32 %v4041_v33, 0.0  ;;  %v17388_v36 = vrot.slane %v17387_v54, %v10724_v17  ;;  %v4561_v2 = vmul.f32 %v14045_v12, %v4298_v55  ;;  %v14409_v5 = vld [vmem:[%s16691_s1 + $0x8] sm:$0xff]  }
 0x3e3   :  { %v4559_v49 = vmul.f32 %v14045_v12, %v4296_v15  ;;  %v14380_v28 = vpop.xlane.xlu1 %4944  ;;  %v17390_v4 = vrot.slane %v17389_v25, %v10724_v17  ;;  %v17391_v33 = vrot.slane %v14020_v50, %v10774_v56  ;;  %17392 = vst [vmem:[#allocation49_spill] sm:$0xff] %v14409_v5  ;;  %v7063_v55 = vrot.slane %v14373_v13, %v10724_v17 }
 0x3e4   :  { %v7526_v15 = vsel %vm7516_vm15, %v17388_v36, %v7525_v51  ;;  %v6019_v54 = vsel %vm5507_vm11, %v5251_v62, %v5763_v58  ;;  %v4560_v25 = vmul.f32 %v14045_v12, %v4297_v41  ;;  %v17393_v36 = vld [vmem:[#allocation55_spill] sm:$0xff]  ;;  %vm5515_vm2 = vcmp.ge.f32.partialorder %v5259_v27, 0.0 }
 0x3e5   :  { %5038 = vadd.xlane.f32.xlu0 %v4559_v49  ;;  %v7527_v35 = vsel %vm7518_vm0, %v17390_v4, %v7526_v15  ;;  %v3786_v49 = vadd.f32 %v17391_v33, %v14061_v23  ;;  %v17394_v15 = vrot.slane %v17393_v36, %v10724_v17  ;;  %v14422_v4 = vsel %vm5505_vm12, %v5249_v45, %v5761_v16 }
 0x3e6   :  { %v14411_v51 = vpop.xlane.xlu0 %4946  ;;  %17395 = vst [vmem:[#allocation52_spill] sm:$0xff] %v14422_v4  ;;  %v5771_v33 = vmul.f32 0.01, %v5259_v27  ;;  %5042 = vadd.xlane.f32.xlu1 %v4561_v2  ;;  %v5764_v13 = vmul.f32 0.01, %v5252_v3  ;;  %v17397_v62 = vrot.slane %v14057_v20, %v10774_v56  ;;  %vm5508_vm8 = vcmp.ge.f32.partialorder %v5252_v3, 0.0 }
 0x3e7   :  { %v7528_v50 = vsel %vm7520_vm3, %v17394_v15, %v7527_v35  ;;  %v4049_v53 = vadd.f32 %v14088_v57, %v3786_v49  ;;  %v5260_v45 = vadd.f32 %v11427_v38, %v13828_v14  ;;  %v5258_v16 = vadd.f32 %v11427_v38, %v13886_v52 }
 0x3e8   :  { %v14424_v59 = vsel %vm6195_vm13, -1e+09, %v7528_v50  ;;  %v3787_v58 = vadd.f32 %v17397_v62, %v14061_v23  ;;  %v14432_v35 = vpop.xlane.xlu1 %4942  ;;  %v14446_v50 = vsel %vm5515_vm2, %v5259_v27, %v5771_v33  ;;  %v5254_v14 = vadd.f32 %v11427_v38, %v13845_v9  ;;  %v17399_v62 = vld [vmem:[#allocation57_spill] sm:$0xff] }
 0x3e9   :  { %17396 = vst [vmem:[#allocation50_spill] sm:$0xff] %v14424_v59  ;;  %5040 = vadd.xlane.f32.xlu0 %v4560_v25  ;;  %v4305_v2 = vmax.f32 %v4049_v53, 0.0  ;;  %v7067_v25 = vrot.slane %v6019_v54, %v10724_v17  ;;  %v7807_v36 = vsel %vm7803_vm6, %v14424_v59, -inf  ;;  %v17398_v53 = vld [vmem:[#allocation61_spill] sm:$0xff]  ;;  %v17400_v54 = vrot.slane %v17399_v62, %v10724_v17 }
 0x3ea   :  { %v14438_v49 = vpop.xlane.xlu0 %4962  ;;  %v4050_v15 = vadd.f32 %v14088_v57, %v3787_v58  ;;  %7808 = vmax.xlane.f32.xlu1 %v7807_v36  ;;  %v6020_v20 = vsel %vm5508_vm8, %v5252_v3, %v5764_v13  ;;  %v17401_v4 = vunpack.c.l.bf16 %v14409_v5  ;;  %v17402_v58 = vld [vmem:[#allocation58_spill] sm:$0xff]  ;;  %v5772_v9 = vmul.f32 0.01, %v5260_v45  ;;  %v17455_v59 = vld [vmem:[#allocation85_spill] sm:$0xff] }
 0x3eb   :  { %v4568_v52 = vmul.f32 %v14045_v12, %v4305_v2  ;;  %v7532_v41 = vsel %vm7514_vm14, %v17400_v54, %v17398_v53  ;;  %v17403_v27 = vrot.slane %v17402_v58, %v10724_v17  ;;  %v5770_v36 = vmul.f32 0.01, %v5258_v16  ;;  %v17404_v2 = vld [vmem:[#allocation62_spill] sm:$0xff] }
 0x3ec   :  { %v4306_v24 = vmax.f32 %v4050_v15, 0.0  ;;  %vm6196_vm9 = vcmp.eq.f32.partialorder %v17401_v4, 0.0  ;;  %v17405_v21 = vrot.slane %v17404_v2, %v10724_v17  ;;  %v3788_v3 = vadd.f32 %v14100_v61, %v14061_v23  ;;  %v17406_v4 = vld [vmem:[#allocation32_spill] sm:$0xff] }
 0x3ed   :  { %v7533_v33 = vsel %vm7516_vm15, %v17403_v27, %v7532_v41  ;;  %5056 = vadd.xlane.f32.xlu0 %v4568_v52  ;;  %vm5514_vm10 = vcmp.ge.f32.partialorder %v5258_v16, 0.0  ;;  %v17407_v15 = vrot.slane %v17406_v4, %v10724_v17  ;;  %v3780_v41 = vadd.f32 %v14037_v11, %v13947_v26  ;;  %v14475_v52 = vpop.xlane.xlu1 %4948 }
 0x3ee   :  { %v7534_v62 = vsel %vm7518_vm0, %v17405_v21, %v7533_v33  ;;  %v4569_v13 = vmul.f32 %v14045_v12, %v4306_v24  ;;  %vm5516_vm11 = vcmp.ge.f32.partialorder %v5260_v45, 0.0  ;;  %v5262_v21 = vadd.f32 %v11427_v38, %v13862_v22  ;;  %v14483_v24 = vpop.xlane.xlu0 %4964 }
 0x3ef   :  { %v7535_v53 = vsel %vm7520_vm3, %v17407_v15, %v7534_v62  ;;  %v5261_v61 = vadd.f32 %v11427_v38, %v13898_v47  ;;  %v7641_v58 = vsel %vm7508_vm4, %v7067_v25, %v7063_v55  ;;  %v7099_v27 = vrot.slane %v14446_v50, %v10724_v17 }
 0x3f0   :  { %v14481_v54 = vsel %vm6196_vm9, -1e+09, %v7535_v53  ;;  %5058 = vadd.xlane.f32.xlu1 %v4569_v13  ;;  %v4051_v33 = vadd.f32 %v14088_v57, %v3788_v3  ;;  %v7071_v22 = vrot.slane %v6020_v20, %v10724_v17  ;;  %v6026_v2 = vsel %vm5514_vm10, %v5258_v16, %v5770_v36 }
 0x3f1   :  { %17408 = vst [vmem:[#allocation51_spill] sm:$0xff] %v14481_v54  ;;  %v7810_v11 = vsel %vm7803_vm6, %v14481_v54, -inf  ;;  %v4043_v47 = vadd.f32 %v14088_v57, %v3780_v41  ;;  %v3789_v62 = vadd.f32 %v14120_v29, %v14061_v23  ;;  %v6028_v55 = vsel %vm5516_vm11, %v5260_v45, %v5772_v9 }
 0x3f2   :  { %7811 = vmax.xlane.f32.xlu0 %v7810_v11  ;;  %vm5510_vm12 = vcmp.ge.f32.partialorder %v5254_v14, 0.0  ;;  %v5766_v25 = vmul.f32 0.01, %v5254_v14  ;;  %v4307_v50 = vmax.f32 %v4051_v33, 0.0  ;;  %vm5518_vm13 = vcmp.ge.f32.partialorder %v5262_v21, 0.0 }
 0x3f3   :  { %v5773_v13 = vmul.f32 0.01, %v5261_v61  ;;  %v5253_v4 = vadd.f32 %v11427_v38, %v13912_v31  ;;  %v4299_v3 = vmax.f32 %v4043_v47, 0.0  ;;  %v7095_v20 = vrot.slane %v6026_v2, %v10724_v17  ;;  %v14501_v15 = vpop.xlane.xlu1 %4952 }
 0x3f4   :  { %vm5517_vm2 = vcmp.ge.f32.partialorder %v5261_v61, 0.0  ;;  %v4570_v16 = vmul.f32 %v14045_v12, %v4307_v50  ;;  %v4052_v36 = vadd.f32 %v14088_v57, %v3789_v62  ;;  %v14504_v29 = vsel %vm7510_vm5, %v7071_v22, %v7641_v58  ;;  %v14510_v53 = vpop.xlane.xlu0 %4968  ;;  %v17410_v62 = vld [vmem:[#allocation64_spill] sm:$0xff] }
 0x3f5   :  { %v7103_v45 = vrot.slane %v6028_v55, %v10724_v17  ;;  %v4562_v9 = vmul.f32 %v14045_v12, %v4299_v3  ;;  %v3781_v31 = vadd.f32 %v14051_v63, %v13947_v26  ;;  %v14513_v41 = vsel %vm5510_vm12, %v5254_v14, %v5766_v25  ;;  %v17411_v55 = vld [vmem:[#allocation34_spill] sm:$0xff] }
 0x3f6   :  { %17409 = vst [vmem:[#allocation53_spill] sm:$0xff] %v14513_v41  ;;  %v5774_v11 = vmul.f32 0.01, %v5262_v21  ;;  %5060 = vadd.xlane.f32.xlu1 %v4570_v16  ;;  %v4308_v33 = vmax.f32 %v4052_v36, 0.0  ;;  %v16863_v2 = vunpack.c.h.bf16 %v14409_v5  ;;  %v6029_v47 = vsel %vm5517_vm2, %v5261_v61, %v5773_v13  ;;  %v17413_v16 = vld [vmem:[#allocation102_spill] sm:$0xff]  ;;  %v17414_v36 = vld [vmem:[#allocation33_spill] sm:$0xff] }
 0x3f7   :  { %v5765_v58 = vmul.f32 0.01, %v5253_v4  ;;  %5044 = vadd.xlane.f32.xlu0 %v4562_v9  ;;  %v4044_v22 = vadd.f32 %v14088_v57, %v3781_v31  ;;  %v17412_v50 = vrot.slane %v17411_v55, %v10724_v17  ;;  %v7648_v3 = vsel %vm7508_vm4, %v7099_v27, %v7095_v20 }
 0x3f8   :  { %vm5509_vm8 = vcmp.ge.f32.partialorder %v5253_v4, 0.0  ;;  %v5263_v14 = vadd.f32 %v11427_v38, %v13931_v60  ;;  %v4571_v25 = vmul.f32 %v14045_v12, %v4308_v33  ;;  %v5255_v61 = vadd.f32 %v11427_v38, %v17413_v16  ;;  %v17417_v60 = vld [vmem:[#allocation63_spill] sm:$0xff]  ;;  %v14546_v16 = vpop.xlane.xlu1 %4960 }
 0x3f9   :  { %v7539_v63 = vsel %vm7514_vm14, %v17412_v50, %v17410_v62  ;;  %v4300_v13 = vmax.f32 %v4044_v22, 0.0  ;;  %vm6197_vm9 = vcmp.eq.f32.partialorder %v16863_v2, 0.0  ;;  %v17415_v9 = vrot.slane %v17414_v36, %v10724_v17  ;;  %v17419_v22 = vld [vmem:[#allocation43_spill] sm:$0xff] }
 0x3fa   :  { %v14535_v27 = vsel %vm5518_vm13, %v5262_v21, %v5774_v11  ;;  %v7107_v20 = vrot.slane %v6029_v47, %v10724_v17  ;;  %5062 = vadd.xlane.f32.xlu1 %v4571_v25  ;;  %v17418_v33 = vrot.slane %v17417_v60, %v10724_v17  ;;  %v17420_v55 = vrot.slane %v17419_v22, %v10774_v56  ;;  %v17421_v11 = vld [vmem:[#allocation65_spill] sm:$0xff] }
 0x3fb   :  { %v7540_v31 = vsel %vm7516_vm15, %v17415_v9, %v7539_v63  ;;  %17416 = vst [vmem:[#allocation55_spill] sm:$0xff] %v14535_v27  ;;  %v7649_v63 = vsel %vm7510_vm5, %v7103_v45, %v7648_v3  ;;  %v6021_v36 = vsel %vm5509_vm8, %v5253_v4, %v5765_v58  ;;  %v4563_v21 = vmul.f32 %v14045_v12, %v4300_v13  ;;  %v14554_v9 = vpop.xlane.xlu0 %4966  ;;  %v14566_v4 = vld [vmem:[%s16691_s1 + $0x10] sm:$0xff]   ;;  %v17426_v3 = vld [vmem:[#allocation118_spill] sm:$0xff] }
 0x3fc   :  { %v7541_v62 = vsel %vm7518_vm0, %v17418_v33, %v7540_v31  ;;  %v3782_v50 = vadd.f32 %v17420_v55, %v13947_v26  ;;  %v17422_v47 = vrot.slane %v17421_v11, %v10724_v17  ;;  %v5775_v31 = vmul.f32 0.01, %v5263_v14  ;;  %17425 = vst [vmem:[#allocation57_spill] sm:$0xff] %v14566_v4  ;;  %v14590_v5 = vpop.xlane.xlu1 %4950 }
 0x3fd   :  { %v17424_v22 = vrot.slane %v14040_v6, %v10774_v56  ;;  %vm5519_vm10 = vcmp.ge.f32.partialorder %v5263_v14, 0.0  ;;  %v5767_v58 = vmul.f32 0.01, %v5255_v61  ;;  %v5264_v13 = vadd.f32 %v11427_v38, %v17426_v3  ;;  %5046 = vadd.xlane.f32.xlu0 %v4563_v21  ;;  %v17428_v21 = vld [vmem:[#allocation67_spill] sm:$0xff] }
 0x3fe   :  { %v7542_v25 = vsel %vm7520_vm3, %v17422_v47, %v7541_v62  ;;  %v4045_v33 = vadd.f32 %v14088_v57, %v3782_v50  ;;  %vm5511_vm11 = vcmp.ge.f32.partialorder %v5255_v61, 0.0  ;;  %v7075_v47 = vrot.slane %v6021_v36, %v10724_v17 }
 0x3ff   :  { %v14556_v60 = vsel %vm6197_vm9, -1e+09, %v7542_v25  ;;  %v3790_v45 = vadd.f32 %v17424_v22, %v14061_v23  ;;  %v16867_v25 = vunpack.c.l.bf16 %v14566_v4  ;;  %v17427_v22 = vld [vmem:[#allocation38_spill] sm:$0xff]  ;;  %v17429_v3 = vrot.slane %v17428_v21, %v10724_v17  ;;  %v17439_v21 = vld [vmem:[#allocation41_spill] sm:$0xff] }
 0x400   :  { %17423 = vst [vmem:[#allocation61_spill] sm:$0xff] %v14556_v60  ;;  %v7813_v62 = vsel %vm7803_vm6, %v14556_v60, -inf  ;;  %v4301_v6 = vmax.f32 %v4045_v33, 0.0  ;;  %v14585_v55 = vsel %vm7512_vm7, %v7107_v20, %v7649_v63  ;;  %v14592_v11 = vsel %vm5511_vm11, %v5255_v61, %v5767_v58  ;;  %v14604_v63 = vpop.xlane.xlu0 %4970  ;;  %v14648_v27 = vpop.xlane.xlu1 %4954 }
 0x401   :  { %7814 = vmax.xlane.f32.xlu1 %v7813_v62  ;;  %v4053_v50 = vadd.f32 %v14088_v57, %v3790_v45  ;;  %v7546_v2 = vsel %vm7514_vm14, %v17429_v3, %v17427_v22  ;;  %17430 = vst [vmem:[#allocation58_spill] sm:$0xff] %v14585_v55  ;;  %v14587_v62 = vsel %vm5519_vm10, %v5263_v14, %v5775_v31  ;;  %17432 = vst [vmem:[#allocation32_spill] sm:$0xff] %v14592_v11  ;;  %v17435_v22 = vld [vmem:[#allocation36_spill] sm:$0xff]  ;;  %v17437_v31 = vld [vmem:[#allocation122_spill] sm:$0xff] }
 0x402   :  { %17431 = vst [vmem:[#allocation62_spill] sm:$0xff] %v14587_v62  ;;  %v4564_v33 = vmul.f32 %v14045_v12, %v4301_v6  ;;  %v5776_v36 = vmul.f32 0.01, %v5264_v13  ;;  %vm14596_vm12 = vcmp.eq.f32.partialorder %v16867_v25, 0.0  ;;  %v17436_v20 = vrot.slane %v17435_v22, %v10724_v17 }
 0x403   :  { %v4309_v45 = vmax.f32 %v4053_v50, 0.0  ;;  %v5256_v6 = vadd.f32 %v11427_v38, %v17437_v31  ;;  %v17438_v50 = vld [vmem:[#allocation121_spill] sm:$0xff]  ;;  %v17440_v3 = vrot.slane %v17439_v21, %v10724_v17  ;;  %v14617_v22 = vsel %vm7512_vm7, %v7075_v47, %v14504_v29  ;;  %v17445_v21 = vld [vmem:[#allocation82_spill] sm:$0xff] }
 0x404   :  { %v7547_v14 = vsel %vm7516_vm15, %v17436_v20, %v7546_v2  ;;  %v5266_v61 = vadd.f32 %v11427_v38, %v17438_v50  ;;  %5048 = vadd.xlane.f32.xlu0 %v4564_v33  ;;  %17441 = vst [vmem:[#allocation64_spill] sm:$0xff] %v14617_v22  ;;  %vm5520_vm13 = vcmp.ge.f32.partialorder %v5264_v13, 0.0  ;;  %v17442_v2 = vld [vmem:[#allocation75_spill] sm:$0xff]  ;;  %v17444_v33 = vrot.slane %v14072_v39, %v10774_v56  ;;  %v14653_v55 = vpop.xlane.xlu0 %4972 }
 0x405   :  { %v4572_v58 = vmul.f32 %v14045_v12, %v4309_v45  ;;  %v7548_v25 = vsel %vm7518_vm0, %v17440_v3, %v7547_v14  ;;  %v17443_v20 = vrot.slane %v17442_v2, %v10724_v17  ;;  %v5257_v29 = vadd.f32 %v11427_v38, %v17445_v21 }
 0x406   :  { %v3791_v45 = vadd.f32 %v17444_v33, %v14061_v23  ;;  %v17448_v33 = vld [vmem:[#allocation80_spill] sm:$0xff]  ;;  %v14646_v62 = vsel %vm5520_vm13, %v5264_v13, %v5776_v36  ;;  %vm5512_vm2 = vcmp.ge.f32.partialorder %v5256_v6, 0.0  ;;  %vm5522_vm8 = vcmp.ge.f32.partialorder %v5266_v61, 0.0  ;;  %v17452_v36 = vld [vmem:[#allocation133_spill] sm:$0xff] }
 0x407   :  { %v7549_v31 = vsel %vm7520_vm3, %v17443_v20, %v7548_v25  ;;  %5064 = vadd.xlane.f32.xlu1 %v4572_v58  ;;  %v17447_v25 = vld [vmem:[#allocation134_spill] sm:$0xff]  ;;  %v17449_v50 = vrot.slane %v17448_v33, %v10774_v56  ;;  %17450 = vst [vmem:[#allocation102_spill] sm:$0xff] %v14646_v62  ;;  %v5768_v58 = vmul.f32 0.01, %v5256_v6  ;;  %vm5513_vm9 = vcmp.ge.f32.partialorder %v5257_v29, 0.0 }
 0x408   :  { %v14635_v47 = vsel %vm14596_vm12, -1e+09, %v7549_v31  ;;  %v5267_v3 = vadd.f32 %v11427_v38, %v17447_v25  ;;  %v4054_v20 = vadd.f32 %v14088_v57, %v3791_v45  ;;  %v5778_v31 = vmul.f32 0.01, %v5266_v61  ;;  %v17454_v62 = vld [vmem:[#allocation86_spill] sm:$0xff] }
 0x409   :  { %17446 = vst [vmem:[#allocation34_spill] sm:$0xff] %v14635_v47  ;;  %v7816_v2 = vsel %vm7803_vm6, %v14635_v47, -inf  ;;  %v3783_v14 = vadd.f32 %v17449_v50, %v13947_v26  ;;  %v3792_v45 = vadd.f32 %v14130_v44, %v14061_v23  ;;  %v5769_v47 = vmul.f32 0.01, %v5257_v29  ;;  %v17451_v50 = vld [vmem:[#allocation132_spill] sm:$0xff]  ;;  %v17453_v44 = vld [vmem:[#allocation123_spill] sm:$0xff] }
 0x40a   :  { %7817 = vmax.xlane.f32.xlu0 %v7816_v2  ;;  %v4310_v21 = vmax.f32 %v4054_v20, 0.0  ;;  %v5265_v13 = vadd.f32 %v11427_v38, %v17451_v50  ;;  %v3784_v11 = vadd.f32 %v17452_v36, %v13947_v26  ;;  %v5779_v2 = vmul.f32 0.01, %v5267_v3 }
 0x40b   :  { %v4046_v25 = vadd.f32 %v14088_v57, %v3783_v14  ;;  %v4055_v20 = vadd.f32 %v14088_v57, %v3792_v45  ;;  %vm5523_vm10 = vcmp.ge.f32.partialorder %v5267_v3, 0.0  ;;  %v5268_v40 = vadd.f32 %v11427_v38, %v17453_v44 }
 0x40c   :  { %v4573_v41 = vmul.f32 %v14045_v12, %v4310_v21  ;;  %v4047_v60 = vadd.f32 %v14088_v57, %v3784_v11  ;;  %v14667_v50 = vsel %vm5512_vm2, %v5256_v6, %v5768_v58  ;;  %v6034_v36 = vsel %vm5522_vm8, %v5266_v61, %v5778_v31  ;;  %v14680_v6 = vpop.xlane.xlu1 %4956  ;;  %v14683_v58 = vpop.xlane.xlu0 %4976 }
 0x40d   :  { %v4302_v22 = vmax.f32 %v4046_v25, 0.0  ;;  %v4311_v25 = vmax.f32 %v4055_v20, 0.0  ;;  %v14672_v45 = vsel %vm5513_vm9, %v5257_v29, %v5769_v47  ;;  %v16877_v14 = vunpack.c.h.bf16 %v14566_v4 }
 0x40e   :  { %5066 = vadd.xlane.f32.xlu1 %v4573_v41  ;;  %v4303_v54 = vmax.f32 %v4047_v60, 0.0  ;;  %v17456_v44 = vrot.slane %v17455_v59, %v10724_v17  ;;  %vm5521_vm11 = vcmp.ge.f32.partialorder %v5265_v13, 0.0  ;;  %v5777_v61 = vmul.f32 0.01, %v5265_v13  ;;  %v17457_v60 = vld [vmem:[#allocation135_spill] sm:$0xff] }
 0x40f   :  { %v4565_v21 = vmul.f32 %v14045_v12, %v4302_v22  ;;  %v6035_v41 = vsel %vm5523_vm10, %v5267_v3, %v5779_v2  ;;  %v4574_v22 = vmul.f32 %v14045_v12, %v4311_v25  ;;  %v5780_v29 = vmul.f32 0.01, %v5268_v40  ;;  %v17458_v59 = vld [vmem:[#allocation87_spill] sm:$0xff]  ;;  %v17460_v2 = vld [vmem:[#allocation88_spill] sm:$0xff] }
 0x410   :  { %v7553_v11 = vsel %vm7514_vm14, %v17456_v44, %v17454_v62  ;;  %v5275_v47 = vadd.f32 %v11427_v38, %v17457_v60  ;;  %vm6199_vm12 = vcmp.eq.f32.partialorder %v16877_v14, 0.0  ;;  %v17459_v62 = vrot.slane %v17458_v59, %v10724_v17  ;;  %v14729_v14 = vpop.xlane.xlu1 %4958 }
 0x411   :  { %5050 = vadd.xlane.f32.xlu0 %v4565_v21  ;;  %vm5524_vm13 = vcmp.ge.f32.partialorder %v5268_v40, 0.0  ;;  %v4566_v3 = vmul.f32 %v14045_v12, %v4303_v54  ;;  %v17461_v20 = vrot.slane %v17460_v2, %v10724_v17  ;;  %v17462_v25 = vcombine.high %v17448_v33, %v17448_v33 }
 0x412   :  { %v7554_v31 = vsel %vm7516_vm15, %v17459_v62, %v7553_v11  ;;  %5068 = vadd.xlane.f32.xlu1 %v4574_v22  ;;  %v7127_v59 = vrot.slane %v6034_v36, %v10724_v17  ;;  %v7131_v11 = vrot.slane %v6035_v41, %v10724_v17  ;;  %v17463_v22 = vld [vmem:[#allocation89_spill] sm:$0xff]  ;;  %v14718_v2 = vsel %vm5521_vm11, %v5265_v13, %v5777_v61 }
 0x413   :  { %v7555_v21 = vsel %vm7518_vm0, %v17461_v20, %v7554_v31  ;;  %v3201_v44 = vrot.slane %v17462_v25, %v10774_v56  ;;  %v17464_v54 = vrot.slane %v17463_v22, %v10724_v17  ;;  %v14713_v31 = vld [vmem:[%s16691_s1 + $0x18] sm:$0xff]   ;;  %17466 = vst [vmem:[#allocation63_spill] sm:$0xff] %v14718_v2  ;;  %v6036_v20 = vsel %vm5524_vm13, %v5268_v40, %v5780_v29  ;;  %v14735_v40 = vpop.xlane.xlu0 %4974 }
 0x414   :  { %17465 = vst [vmem:[#allocation33_spill] sm:$0xff] %v14713_v31  ;;  %v5787_v25 = vmul.f32 0.01, %v5275_v47  ;;  %v17468_v22 = vcombine.high %v14072_v39, %v14072_v39  ;;  %vm5531_vm2 = vcmp.ge.f32.partialorder %v5275_v47, 0.0  ;;  %v5270_v13 = vadd.f32 %v11427_v38, %v14147_v42 }
 0x415   :  { %v7556_v62 = vsel %vm7520_vm3, %v17464_v54, %v7555_v21  ;;  %5052 = vadd.xlane.f32.xlu0 %v4566_v3  ;;  %v3785_v41 = vadd.f32 %v3201_v44, %v13947_v26  ;;  %v16878_v26 = vunpack.c.l.bf16 %v14713_v31  ;;  %v7655_v3 = vsel %vm7508_vm4, %v7131_v11, %v7127_v59 }
 0x416   :  { %v14720_v36 = vsel %vm6199_vm12, -1e+09, %v7556_v62  ;;  %v3233_v54 = vrot.slane %v17468_v22, %v10774_v56  ;;  %v5276_v39 = vadd.f32 %v11427_v38, %v14163_v43  ;;  %v7135_v62 = vrot.slane %v6036_v20, %v10724_v17  ;;  %v17470_v22 = vld [vmem:[#allocation35_spill] sm:$0xff] }
 0x417   :  { %17467 = vst [vmem:[#allocation43_spill] sm:$0xff] %v14720_v36  ;;  %v7819_v21 = vsel %vm7803_vm6, %v14720_v36, -inf  ;;  %v4048_v61 = vadd.f32 %v14088_v57, %v3785_v41  ;;  %v5274_v42 = vadd.f32 %v11427_v38, %v14189_v0  ;;  %v17471_v33 = vrot.slane %v17470_v22, %v10724_v17  ;;  %v17478_v22 = vld [vmem:[#allocation120_spill] sm:$0xff] }
 0x418   :  { %7820 = vmax.xlane.f32.xlu1 %v7819_v21  ;;  %v3793_v44 = vadd.f32 %v3233_v54, %v14061_v23  ;;  %v17469_v21 = vld [vmem:[#allocation90_spill] sm:$0xff]  ;;  %v14751_v29 = vsel %vm5531_vm2, %v5275_v47, %v5787_v25  ;;  %vm6200_vm8 = vcmp.eq.f32.partialorder %v16878_v26, 0.0  ;;  %v17472_v23 = vld [vmem:[#allocation68_spill] sm:$0xff]  ;;  %vm5526_vm9 = vcmp.ge.f32.partialorder %v5270_v13, 0.0  ;;  %v17474_v54 = vld [vmem:[#allocation91_spill] sm:$0xff]  ;;  %v14773_v26 = vpop.xlane.xlu1 %4978 }
 0x419   :  { %v4304_v41 = vmax.f32 %v4048_v61, 0.0  ;;  %v7560_v60 = vsel %vm7514_vm14, %v17471_v33, %v17469_v21  ;;  %v17473_v43 = vrot.slane %v17472_v23, %v10724_v17  ;;  %v5782_v0 = vmul.f32 0.01, %v5270_v13  ;;  %v17476_v25 = vld [vmem:[#allocation70_spill] sm:$0xff]  ;;  %v17479_v23 = vld [vmem:[#allocation136_spill] sm:$0xff] }
 0x41a   :  { %v4056_v59 = vadd.f32 %v14088_v57, %v3793_v44  ;;  %v17475_v61 = vrot.slane %v17474_v54, %v10724_v17  ;;  %vm5532_vm10 = vcmp.ge.f32.partialorder %v5276_v39, 0.0  ;;  %v17477_v44 = vrot.slane %v17476_v25, %v10724_v17  ;;  %v17483_v25 = vld [vmem:[#allocation143_spill] sm:$0xff] }
 0x41b   :  { %v7561_v11 = vsel %vm7516_vm15, %v17473_v43, %v7560_v60  ;;  %v4567_v20 = vmul.f32 %v14045_v12, %v4304_v41  ;;  %v17480_v60 = vrot.slane %v17479_v23, %v10774_v56  ;;  %v14775_v41 = vpop.f32.mrf.mxu1  ;;  %v5788_v4 = vmul.f32 0.01, %v5276_v39 }
 0x41c   :  { %v7562_v47 = vsel %vm7518_vm0, %v17475_v61, %v7561_v11  ;;  %v4312_v33 = vmax.f32 %v4056_v59, 0.0  ;;  %v5786_v54 = vmul.f32 0.01, %v5274_v42  ;;  %v17482_v59 = vrot.slane %v14161_v8, %v10774_v56 }
 0x41d   :  { %v7563_v21 = vsel %vm7520_vm3, %v17477_v44, %v7562_v47  ;;  %v3794_v43 = vadd.f32 %v17480_v60, %v17478_v22  ;;  %5054 = vadd.xlane.f32.xlu0 %v4567_v20  ;;  %v14783_v47 = vpop.xlane.xlu0 %4980  ;;  %vm5530_vm11 = vcmp.ge.f32.partialorder %v5274_v42, 0.0  ;;  %v5269_v44 = vadd.f32 %v11427_v38, %v17483_v25 }
 0x41e   :  { %v14777_v11 = vsel %vm6200_vm8, -1e+09, %v7563_v21  ;;  %v3795_v61 = vadd.f32 %v17482_v59, %v17478_v22  ;;  %v4575_v23 = vmul.f32 %v14045_v12, %v4312_v33  ;;  %v14790_v36 = vsel %vm7510_vm5, %v7135_v62, %v7655_v3  ;;  %v17484_v59 = vld [vmem:[#allocation106_spill] sm:$0xff] }
 0x41f   :  { %17481 = vst [vmem:[#allocation65_spill] sm:$0xff] %v14777_v11  ;;  %v4057_v60 = vadd.f32 %v14088_v57, %v3794_v43  ;;  %v7163_v20 = vrot.slane %v14751_v29, %v10724_v17  ;;  %v14795_v21 = vsel %vm5526_vm9, %v5270_v13, %v5782_v0  ;;  %v5278_v2 = vadd.f32 %v11427_v38, %v17484_v59 }
 0x420   :  { %v4058_v8 = vadd.f32 %v14088_v57, %v3795_v61  ;;  %5070 = vadd.xlane.f32.xlu1 %v4575_v23  ;;  %v7822_v33 = vsel %vm7803_vm6, %v14777_v11, -inf  ;;  %v17485_v3 = vrot.slane %v14229_v19, %v10774_v56  ;;  %v14807_v29 = vsel %vm5532_vm10, %v5276_v39, %v5788_v4 }
 0x421   :  { %v4313_v25 = vmax.f32 %v4057_v60, 0.0  ;;  %v6042_v13 = vsel %vm5530_vm11, %v5274_v42, %v5786_v54  ;;  %7823 = vmax.xlane.f32.xlu0 %v7822_v33  ;;  %v17486_v43 = vrot.slane %v14252_v7, %v10774_v56  ;;  %v5781_v23 = vmul.f32 0.01, %v5269_v44  ;;  %v14824_v42 = vpop.xlane.xlu0 %4984 }
 0x422   :  { %v3802_v62 = vadd.f32 %v17485_v3, %v14775_v41  ;;  %v4314_v0 = vmax.f32 %v4058_v8, 0.0  ;;  %v5277_v60 = vadd.f32 %v11427_v38, %v14249_v37  ;;  %v14817_v3 = vpop.xlane.xlu1 %4994  ;;  %vm5525_vm12 = vcmp.ge.f32.partialorder %v5269_v44, 0.0 }
 0x423   :  { %v3803_v61 = vadd.f32 %v17486_v43, %v14775_v41  ;;  %v4576_v59 = vmul.f32 %v14045_v12, %v4313_v25  ;;  %v5271_v39 = vadd.f32 %v11427_v38, %v14275_v30  ;;  %v7167_v37 = vrot.slane %v14807_v29, %v10724_v17  ;;  %v17487_v43 = vld [vmem:[#allocation66_spill] sm:$0xff] }
 0x424   :  { %v4065_v19 = vadd.f32 %v14088_v57, %v3802_v62  ;;  %v4577_v7 = vmul.f32 %v14045_v12, %v4314_v0  ;;  %vm5534_vm13 = vcmp.ge.f32.partialorder %v5278_v2, 0.0  ;;  %v7159_v33 = vrot.slane %v6042_v13, %v10724_v17  ;;  %v17488_v30 = vld [vmem:[#allocation78_spill] sm:$0xff] }
 0x425   :  { %5072 = vadd.xlane.f32.xlu1 %v4576_v59  ;;  %v4066_v8 = vadd.f32 %v14088_v57, %v3803_v61  ;;  %v5790_v25 = vmul.f32 0.01, %v5278_v2  ;;  %v16884_v62 = vunpack.c.h.bf16 %v14713_v31  ;;  %v17489_v12 = vrot.slane %v17488_v30, %v10724_v17  ;;  %v14839_v29 = vld [vmem:[%s16696_s6] ss:$0 sm:$0xff] }
 0x426   :  { %v4321_v54 = vmax.f32 %v4065_v19, 0.0  ;;  %5074 = vadd.xlane.f32.xlu0 %v4577_v7  ;;  %v6037_v4 = vsel %vm5525_vm12, %v5269_v44, %v5781_v23  ;;  %v5789_v11 = vmul.f32 0.01, %v5277_v60  ;;  %vm5533_vm2 = vcmp.ge.f32.partialorder %v5277_v60, 0.0  ;;  %v17492_v19 = vld [vmem:[#allocation71_spill] sm:$0xff] }
 0x427   :  { %v7567_v0 = vsel %vm7514_vm14, %v17489_v12, %v17487_v43  ;;  %v4322_v13 = vmax.f32 %v4066_v8, 0.0  ;;  %v5783_v61 = vmul.f32 0.01, %v5271_v39  ;;  %vm14844_vm8 = vcmp.eq.f32.partialorder %v16884_v62, 0.0  ;;  %v17494_v43 = vld [vmem:[#allocation42_spill] sm:$0xff]  ;;  %v14859_v12 = vpop.xlane.xlu1 %4996 }
 0x428   :  { %v4584_v57 = vmul.f32 %v14839_v29, %v4321_v54  ;;  %v17493_v44 = vrot.slane %v17492_v19, %v10724_v17  ;;  %vm5527_vm9 = vcmp.ge.f32.partialorder %v5271_v39, 0.0  ;;  %v17495_v54 = vrot.slane %v17494_v43, %v10724_v17 }
 0x429   :  { %v4585_v7 = vmul.f32 %v14839_v29, %v4322_v13  ;;  %v3804_v30 = vadd.f32 %v14291_v46, %v14775_v41  ;;  %v14862_v62 = vsel %vm5534_vm13, %v5278_v2, %v5790_v25  ;;  %v7139_v19 = vrot.slane %v6037_v4, %v10724_v17  ;;  %v14876_v46 = vpop.xlane.xlu0 %4992 }
 0x42a   :  { %v7568_v23 = vsel %vm7516_vm15, %v17493_v44, %v7567_v0  ;;  %5088 = vadd.xlane.f32.xlu1 %v4584_v57  ;;  %17496 = vst [vmem:[#allocation118_spill] sm:$0xff] %v14862_v62  ;;  %v17497_v0 = vld [vmem:[#allocation74_spill] sm:$0xff]  ;;  %v17499_v44 = vld [vmem:[#allocation105_spill] sm:$0xff]  ;;  %v7662_v2 = vsel %vm7508_vm4, %v7163_v20, %v7159_v33  ;;  %v6045_v25 = vsel %vm5533_vm2, %v5277_v60, %v5789_v11 }
 0x42b   :  { %v7569_v8 = vsel %vm7518_vm0, %v17495_v54, %v7568_v23  ;;  %v17498_v57 = vrot.slane %v17497_v0, %v10724_v17  ;;  %v3796_v43 = vadd.f32 %v17499_v44, %v17478_v22  ;;  %v14874_v23 = vld [vmem:[%s16691_s1 + $0x20] sm:$0xff]   ;;  %5090 = vadd.xlane.f32.xlu0 %v4585_v7  ;;  %v14891_v0 = vsel %vm5527_vm9, %v5271_v39, %v5783_v61  ;;  %v17503_v61 = vld [vmem:[#allocation92_spill] sm:$0xff] }
 0x42c   :  { %17500 = vst [vmem:[#allocation38_spill] sm:$0xff] %v14874_v23  ;;  %v14887_v54 = vld [vmem:[%s16695_s5] ss:$0 sm:$0xff]  ;;  %17502 = vst [vmem:[#allocation36_spill] sm:$0xff] %v14891_v0  ;;  %v5279_v20 = vadd.f32 %v11427_v38, %v14293_v48  ;;  %v5272_v11 = vadd.f32 %v11427_v38, %v14319_v34  ;;  %v14905_v39 = vsel %vm7512_vm7, %v7139_v19, %v14790_v36  ;;  %v14919_v19 = vpop.xlane.xlu1 %5000 }
 0x42d   :  { %v7570_v13 = vsel %vm7520_vm3, %v17498_v57, %v7569_v8  ;;  %v4067_v8 = vadd.f32 %v14887_v54, %v3804_v30  ;;  %v4059_v7 = vadd.f32 %v14887_v54, %v3796_v43  ;;  %v16885_v30 = vunpack.c.l.bf16 %v14874_v23  ;;  %v17504_v57 = vld [vmem:[#allocation84_spill] sm:$0xff] }
 0x42e   :  { %v14882_v4 = vsel %vm14844_vm8, -1e+09, %v7570_v13  ;;  %v7171_v48 = vrot.slane %v6045_v25, %v10724_v17  ;;  %v7663_v34 = vsel %vm7510_vm5, %v7167_v37, %v7662_v2  ;;  %v17505_v13 = vrot.slane %v17504_v57, %v10724_v17  ;;  %v17506_v37 = vld [vmem:[#allocation73_spill] sm:$0xff]  ;;  %v14927_v57 = vpop.xlane.xlu0 %4982 }
 0x42f   :  { %17501 = vst [vmem:[#allocation67_spill] sm:$0xff] %v14882_v4  ;;  %v7825_v60 = vsel %vm7803_vm6, %v14882_v4, -inf  ;;  %v4323_v59 = vmax.f32 %v4067_v8, 0.0  ;;  %v5280_v43 = vadd.f32 %v11427_v38, %v14344_v1  ;;  %v4315_v36 = vmax.f32 %v4059_v7, 0.0 }
 0x430   :  { %7826 = vmax.xlane.f32.xlu1 %v7825_v60  ;;  %v7574_v44 = vsel %vm7514_vm14, %v17505_v13, %v17503_v61  ;;  %v5791_v25 = vmul.f32 0.01, %v5279_v20  ;;  %v5784_v33 = vmul.f32 0.01, %v5272_v11  ;;  %vm6202_vm10 = vcmp.eq.f32.partialorder %v16885_v30, 0.0  ;;  %v17508_v13 = vld [vmem:[#allocation97_spill] sm:$0xff] }
 0x431   :  { %v4586_v60 = vmul.f32 %v14839_v29, %v4323_v59  ;;  %v17507_v2 = vrot.slane %v17506_v37, %v10724_v17  ;;  %v5273_v1 = vadd.f32 %v11427_v38, %v14363_v10  ;;  %v5283_v59 = vadd.f32 %v11427_v38, %v14411_v51  ;;  %v17510_v37 = vld [vmem:[#allocation99_spill] sm:$0xff] }
 0x432   :  { %v4578_v7 = vmul.f32 %v14839_v29, %v4315_v36  ;;  %v17509_v8 = vrot.slane %v17508_v13, %v10724_v17  ;;  %vm5535_vm11 = vcmp.ge.f32.partialorder %v5279_v20, 0.0  ;;  %vm5528_vm12 = vcmp.ge.f32.partialorder %v5272_v11, 0.0  ;;  %v17512_v10 = vld [vmem:[#allocation83_spill] sm:$0xff] }
 0x433   :  { %v7575_v61 = vsel %vm7516_vm15, %v17507_v2, %v7574_v44  ;;  %5092 = vadd.xlane.f32.xlu0 %v4586_v60  ;;  %v17511_v44 = vrot.slane %v17510_v37, %v10724_v17  ;;  %v3797_v31 = vadd.f32 %v17512_v10, %v17478_v22  ;;  %v5792_v4 = vmul.f32 0.01, %v5280_v43 }
 0x434   :  { %v7576_v30 = vsel %vm7518_vm0, %v17509_v8, %v7575_v61  ;;  %v5282_v51 = vadd.f32 %v11427_v38, %v14380_v28  ;;  %5076 = vadd.xlane.f32.xlu1 %v4578_v7  ;;  %v3805_v8 = vadd.f32 %v14366_v32, %v14775_v41  ;;  %v14951_v36 = vsel %vm7512_vm7, %v7171_v48, %v7663_v34  ;;  %v14963_v34 = vpop.xlane.xlu0 %4986 }
 0x435   :  { %v7577_v2 = vsel %vm7520_vm3, %v17511_v44, %v7576_v30  ;;  %17514 = vst [vmem:[#allocation121_spill] sm:$0xff] %v14951_v36  ;;  %vm5536_vm13 = vcmp.ge.f32.partialorder %v5280_v43, 0.0  ;;  %v4060_v61 = vadd.f32 %v14887_v54, %v3797_v31  ;;  %v14956_v13 = vsel %vm5535_vm11, %v5279_v20, %v5791_v25  ;;  %v14960_v44 = vpop.xlane.xlu1 %4998  ;;  %v17518_v31 = vld [vmem:[#allocation138_spill] sm:$0xff] }
 0x436   :  { %v14946_v60 = vsel %vm6202_vm10, -1e+09, %v7577_v2  ;;  %17515 = vst [vmem:[#allocation41_spill] sm:$0xff] %v14956_v13  ;;  %v14958_v37 = vsel %vm5528_vm12, %v5272_v11, %v5784_v33  ;;  %v5785_v28 = vmul.f32 0.01, %v5273_v1  ;;  %vm5529_vm2 = vcmp.ge.f32.partialorder %v5273_v1, 0.0 }
 0x437   :  { %17513 = vst [vmem:[#allocation122_spill] sm:$0xff] %v14946_v60  ;;  %v7828_v30 = vsel %vm7803_vm6, %v14946_v60, -inf  ;;  %17516 = vst [vmem:[#allocation75_spill] sm:$0xff] %v14958_v37  ;;  %v5795_v7 = vmul.f32 0.01, %v5283_v59  ;;  %vm5539_vm8 = vcmp.ge.f32.partialorder %v5283_v59, 0.0  ;;  %v4068_v48 = vadd.f32 %v14887_v54, %v3805_v8 }
 0x438   :  { %7829 = vmax.xlane.f32.xlu0 %v7828_v30  ;;  %v4316_v32 = vmax.f32 %v4060_v61, 0.0  ;;  %v14965_v2 = vsel %vm5536_vm13, %v5280_v43, %v5792_v4  ;;  %v5794_v10 = vmul.f32 0.01, %v5282_v51  ;;  %v17519_v20 = vrot.slane %v17518_v31, %v10774_v56  ;;  %v17520_v33 = vld [vmem:[#allocation144_spill] sm:$0xff] }
 0x439   :  { %17517 = vst [vmem:[#allocation82_spill] sm:$0xff] %v14965_v2  ;;  %v17521_v25 = vrot.slane %v17520_v33, %v10774_v56  ;;  %vm5538_vm9 = vcmp.ge.f32.partialorder %v5282_v51, 0.0  ;;  %v4324_v60 = vmax.f32 %v4068_v48, 0.0  ;;  %v14980_v43 = vsel %vm5529_vm2, %v5273_v1, %v5785_v28  ;;  %v17523_v1 = vld [vmem:[#allocation108_spill] sm:$0xff]  ;;  %v17537_v2 = vld [vmem:[#allocation37_spill] sm:$0xff] }
 0x43a   :  { %v3798_v11 = vadd.f32 %v17519_v20, %v17478_v22  ;;  %v4579_v8 = vmul.f32 %v14839_v29, %v4316_v32  ;;  %17522 = vst [vmem:[#allocation134_spill] sm:$0xff] %v14980_v43  ;;  %v6051_v62 = vsel %vm5539_vm8, %v5283_v59, %v5795_v7  ;;  %v16891_v61 = vunpack.c.h.bf16 %v14874_v23  ;;  %v17524_v28 = vld [vmem:[#allocation44_spill] sm:$0xff] }
 0x43b   :  { %v3806_v30 = vadd.f32 %v17521_v25, %v14775_v41  ;;  %v4587_v33 = vmul.f32 %v14839_v29, %v4324_v60  ;;  %v6050_v32 = vsel %vm5538_vm9, %v5282_v51, %v5794_v10  ;;  %v5281_v48 = vadd.f32 %v11427_v38, %v14432_v35  ;;  %v15002_v35 = vpop.xlane.xlu0 %4988  ;;  %v17540_v37 = vld [vmem:[#allocation112_spill] sm:$0xff] }
 0x43c   :  { %v4061_v31 = vadd.f32 %v14887_v54, %v3798_v11  ;;  %5078 = vadd.xlane.f32.xlu1 %v4579_v8  ;;  %v17525_v59 = vrot.slane %v17524_v28, %v10724_v17  ;;  %v14995_v11 = vpop.xlane.xlu1 %5002  ;;  %v5291_v51 = vadd.f32 %v11427_v38, %v14438_v49  ;;  %v5284_v8 = vadd.f32 %v11427_v38, %v14475_v52 }
 0x43d   :  { %v4069_v25 = vadd.f32 %v14887_v54, %v3806_v30  ;;  %v7195_v30 = vrot.slane %v6051_v62, %v10724_v17  ;;  %5094 = vadd.xlane.f32.xlu0 %v4587_v33  ;;  %vm6203_vm10 = vcmp.eq.f32.partialorder %v16891_v61, 0.0  ;;  %v5292_v49 = vadd.f32 %v11427_v38, %v14483_v24  ;;  %v17530_v61 = vld [vmem:[#allocation110_spill] sm:$0xff] }
 0x43e   :  { %v4317_v4 = vmax.f32 %v4061_v31, 0.0  ;;  %v7581_v7 = vsel %vm7514_vm14, %v17525_v59, %v17523_v1  ;;  %v17526_v1 = vld [vmem:[#allocation107_spill] sm:$0xff]  ;;  %v7191_v59 = vrot.slane %v6050_v32, %v10724_v17  ;;  %vm5537_vm11 = vcmp.ge.f32.partialorder %v5281_v48, 0.0 }
 0x43f   :  { %v4325_v10 = vmax.f32 %v4069_v25, 0.0  ;;  %v17527_v28 = vrot.slane %v17526_v1, %v10724_v17  ;;  %v17528_v25 = vld [vmem:[#allocation109_spill] sm:$0xff]  ;;  %v5793_v20 = vmul.f32 0.01, %v5281_v48  ;;  %v17531_v1 = vrot.slane %v17530_v61, %v10724_v17 }
 0x440   :  { %v4580_v31 = vmul.f32 %v14839_v29, %v4317_v4  ;;  %v17529_v52 = vrot.slane %v17528_v25, %v10724_v17  ;;  %v17532_v32 = vrot.slane %v14269_v18, %v10774_v56  ;;  %vm5547_vm12 = vcmp.ge.f32.partialorder %v5291_v51, 0.0 }
 0x441   :  { %v7582_v62 = vsel %vm7516_vm15, %v17527_v28, %v7581_v7  ;;  %v4588_v33 = vmul.f32 %v14839_v29, %v4325_v10  ;;  %v15030_v10 = vsel %vm7508_vm4, %v7195_v30, %v7191_v59  ;;  %v5290_v28 = vadd.f32 %v11427_v38, %v14546_v16  ;;  %v15046_v59 = vpop.xlane.xlu1 %5004 }
 0x442   :  { %v7583_v4 = vsel %vm7518_vm0, %v17529_v52, %v7582_v62  ;;  %5080 = vadd.xlane.f32.xlu1 %v4580_v31  ;;  %v3807_v24 = vadd.f32 %v17532_v32, %v14775_v41  ;;  %v17534_v31 = vld [vmem:[#allocation141_spill] sm:$0xff]  ;;  %v15043_v52 = vld [vmem:[%s16691_s1 + $0x28] sm:$0xff]   ;;  %vm5540_vm13 = vcmp.ge.f32.partialorder %v5284_v8, 0.0  ;;  %v5796_v16 = vmul.f32 0.01, %v5284_v8  ;;  %v15051_v32 = vpop.xlane.xlu0 %4990 }
 0x443   :  { %v7584_v7 = vsel %vm7520_vm3, %v17531_v1, %v7583_v4  ;;  %5096 = vadd.xlane.f32.xlu0 %v4588_v33  ;;  %v17535_v61 = vrot.slane %v17534_v31, %v10774_v56  ;;  %17536 = vst [vmem:[#allocation132_spill] sm:$0xff] %v15043_v52  ;;  %v5803_v4 = vmul.f32 0.01, %v5291_v51  ;;  %v5804_v33 = vmul.f32 0.01, %v5292_v49 }
 0x444   :  { %v15034_v62 = vsel %vm6203_vm10, -1e+09, %v7584_v7  ;;  %v4070_v30 = vadd.f32 %v14887_v54, %v3807_v24  ;;  %v16900_v23 = vunpack.c.l.bf16 %v15043_v52  ;;  %v17538_v24 = vld [vmem:[#allocation111_spill] sm:$0xff]  ;;  %vm5548_vm2 = vcmp.ge.f32.partialorder %v5292_v49, 0.0 }
 0x445   :  { %17533 = vst [vmem:[#allocation80_spill] sm:$0xff] %v15034_v62  ;;  %v3799_v25 = vadd.f32 %v17535_v61, %v17478_v22  ;;  %v7831_v1 = vsel %vm7803_vm6, %v15034_v62, -inf  ;;  %v5286_v61 = vadd.f32 %v11427_v38, %v14501_v15  ;;  %v17539_v13 = vrot.slane %v17538_v24, %v10724_v17 }
 0x446   :  { %7832 = vmax.xlane.f32.xlu1 %v7831_v1  ;;  %v4326_v60 = vmax.f32 %v4070_v30, 0.0  ;;  %v5802_v43 = vmul.f32 0.01, %v5290_v28  ;;  %v15066_v15 = vsel %vm5537_vm11, %v5281_v48, %v5793_v20  ;;  %vm5546_vm8 = vcmp.ge.f32.partialorder %v5290_v28, 0.0 }
 0x447   :  { %v4062_v7 = vadd.f32 %v14887_v54, %v3799_v25  ;;  %v7588_v36 = vsel %vm7514_vm14, %v17539_v13, %v17537_v2  ;;  %v17541_v25 = vrot.slane %v17540_v37, %v10724_v17  ;;  %vm6204_vm9 = vcmp.eq.f32.partialorder %v16900_v23, 0.0 }
 0x448   :  { %v4589_v30 = vmul.f32 %v14839_v29, %v4326_v60  ;;  %v6059_v1 = vsel %vm5547_vm12, %v5291_v51, %v5803_v4  ;;  %v15073_v13 = vsel %vm5540_vm13, %v5284_v8, %v5796_v16  ;;  %v15080_v20 = vsel %vm5548_vm2, %v5292_v49, %v5804_v33  ;;  %v17544_v60 = vld [vmem:[#allocation114_spill] sm:$0xff]  ;;  %v15088_v4 = vpop.xlane.xlu1 %5008  ;;  %v17548_v49 = vld [vmem:[#allocation45_spill] sm:$0xff] }
 0x449   :  { %v4318_v62 = vmax.f32 %v4062_v7, 0.0  ;;  %v7589_v0 = vsel %vm7516_vm15, %v17541_v25, %v7588_v36  ;;  %v17542_v7 = vld [vmem:[#allocation113_spill] sm:$0xff]  ;;  %v5798_v48 = vmul.f32 0.01, %v5286_v61  ;;  %v17545_v24 = vrot.slane %v17544_v60, %v10724_v17  ;;  %v17546_v51 = vld [vmem:[#allocation142_spill] sm:$0xff] }
 0x44a   :  { %v17543_v37 = vrot.slane %v17542_v7, %v10724_v17  ;;  %5098 = vadd.xlane.f32.xlu0 %v4589_v30  ;;  %v3800_v8 = vadd.f32 %v17546_v51, %v17478_v22  ;;  %v5293_v16 = vadd.f32 %v11427_v38, %v14554_v9  ;;  %v3808_v33 = vadd.f32 %v17548_v49, %v14775_v41  ;;  %v15096_v30 = vpop.xlane.xlu0 %5010 }
 0x44b   :  { %v4581_v2 = vmul.f32 %v14839_v29, %v4318_v62  ;;  %v6058_v62 = vsel %vm5546_vm8, %v5290_v28, %v5802_v43  ;;  %vm5542_vm10 = vcmp.ge.f32.partialorder %v5286_v61, 0.0  ;;  %v7199_v43 = vrot.slane %v15073_v13, %v10724_v17 }
 0x44c   :  { %v7590_v36 = vsel %vm7518_vm0, %v17543_v37, %v7589_v0  ;;  %v7227_v37 = vrot.slane %v6059_v1, %v10724_v17  ;;  %v5294_v9 = vadd.f32 %v11427_v38, %v14510_v53  ;;  %v7231_v60 = vrot.slane %v15080_v20, %v10724_v17 }
 0x44d   :  { %v7591_v25 = vsel %vm7520_vm3, %v17545_v24, %v7590_v36  ;;  %5082 = vadd.xlane.f32.xlu1 %v4581_v2  ;;  %v4063_v36 = vadd.f32 %v14887_v54, %v3800_v8  ;;  %v4071_v2 = vadd.f32 %v14887_v54, %v3808_v33  ;;  %v7223_v24 = vrot.slane %v6058_v62, %v10724_v17 }
 0x44e   :  { %v15092_v0 = vsel %vm6204_vm9, -1e+09, %v7591_v25  ;;  %v17549_v25 = vcombine.high %v17534_v31, %v17534_v31  ;;  %v15116_v8 = vsel %vm5542_vm10, %v5286_v61, %v5798_v48  ;;  %v5805_v53 = vmul.f32 0.01, %v5293_v16 }
 0x44f   :  { %17547 = vst [vmem:[#allocation133_spill] sm:$0xff] %v15092_v0  ;;  %v7834_v28 = vsel %vm7803_vm6, %v15092_v0, -inf  ;;  %v4319_v1 = vmax.f32 %v4063_v36, 0.0  ;;  %v4327_v49 = vmax.f32 %v4071_v2, 0.0  ;;  %v17550_v33 = vcombine.high %v14269_v18, %v14269_v18  ;;  %v15130_v2 = vpop.xlane.xlu0 %5026 }
 0x450   :  { %7835 = vmax.xlane.f32.xlu0 %v7834_v28  ;;  %v3265_v51 = vrot.slane %v17549_v25, %v10774_v56  ;;  %vm5549_vm11 = vcmp.ge.f32.partialorder %v5293_v16, 0.0  ;;  %v5285_v20 = vadd.f32 %v11427_v38, %v14590_v5  ;;  %v15126_v28 = vpop.xlane.xlu1 %5006  ;;  %vm5550_vm12 = vcmp.ge.f32.partialorder %v5294_v9, 0.0  ;;  %v17552_v25 = vld [vmem:[#allocation115_spill] sm:$0xff] }
 0x451   :  { %v3297_v23 = vrot.slane %v17550_v33, %v10774_v56  ;;  %v4582_v62 = vmul.f32 %v14839_v29, %v4319_v1  ;;  %v5806_v31 = vmul.f32 0.01, %v5294_v9  ;;  %v4590_v61 = vmul.f32 %v14839_v29, %v4327_v49  ;;  %v17551_v1 = vld [vmem:[#allocation72_spill] sm:$0xff] }
 0x452   :  { %v3801_v36 = vadd.f32 %v3265_v51, %v17478_v22  ;;  %v7676_v56 = vsel %vm7508_vm4, %v7227_v37, %v7223_v24  ;;  %v16902_v5 = vunpack.c.h.bf16 %v15043_v52  ;;  %v17553_v22 = vrot.slane %v17552_v25, %v10724_v17 }
 0x453   :  { %v3809_v48 = vadd.f32 %v3297_v23, %v14775_v41  ;;  %5084 = vadd.xlane.f32.xlu1 %v4582_v62  ;;  %v6061_v33 = vsel %vm5549_vm11, %v5293_v16, %v5805_v53  ;;  %v5295_v49 = vadd.f32 %v11427_v38, %v14604_v63  ;;  %v17554_v23 = vld [vmem:[#allocation69_spill] sm:$0xff]  ;;  %vm5541_vm13 = vcmp.ge.f32.partialorder %v5285_v20, 0.0 }
 0x454   :  { %v4064_v18 = vadd.f32 %v14887_v54, %v3801_v36  ;;  %v7594_v51 = vsel %vm7512_vm7, %v17553_v22, %v17551_v1  ;;  %5100 = vadd.xlane.f32.xlu0 %v4590_v61  ;;  %v17555_v37 = vrot.slane %v17554_v23, %v10724_v17  ;;  %v5797_v62 = vmul.f32 0.01, %v5285_v20  ;;  %v15149_v7 = vpop.xlane.xlu1 %5012  ;;  %v17559_v22 = vld [vmem:[#allocation76_spill] sm:$0xff] }
 0x455   :  { %v4072_v41 = vadd.f32 %v14887_v54, %v3809_v48  ;;  %v5287_v36 = vadd.f32 %v11427_v38, %v14648_v27  ;;  %v5296_v16 = vadd.f32 %v11427_v38, %v14653_v55  ;;  %vm6205_vm2 = vcmp.eq.f32.partialorder %v16902_v5, 0.0  ;;  %v17556_v54 = vld [vmem:[#allocation96_spill] sm:$0xff]  ;;  %v15164_v27 = vpop.xlane.xlu0 %5028 }
 0x456   :  { %v7595_v24 = vsel %vm7514_vm14, %v17555_v37, %v7594_v51  ;;  %v4320_v25 = vmax.f32 %v4064_v18, 0.0  ;;  %v17557_v53 = vrot.slane %v17556_v54, %v10724_v17  ;;  %v15162_v48 = vld [vmem:[%s16691_s1 + $0x30] sm:$0xff]   ;;  %v15167_v18 = vsel %vm5550_vm12, %v5294_v9, %v5806_v31 }
 0x457   :  { %v4328_v63 = vmax.f32 %v4072_v41, 0.0  ;;  %17558 = vst [vmem:[#allocation123_spill] sm:$0xff] %v15162_v48  ;;  %v7235_v55 = vrot.slane %v6061_v33, %v10724_v17  ;;  %v17560_v51 = vrot.slane %v17559_v22, %v10724_v17  ;;  %v7677_v23 = vsel %vm7510_vm5, %v7231_v60, %v7676_v56  ;;  %v17565_v56 = vld [vmem:[#allocation100_spill] sm:$0xff] }
 0x458   :  { %v7596_v61 = vsel %vm7516_vm15, %v17557_v53, %v7595_v24  ;;  %v4583_v1 = vmul.f32 %v14839_v29, %v4320_v25  ;;  %vm5551_vm8 = vcmp.ge.f32.partialorder %v5295_v49, 0.0  ;;  %v17561_v24 = vld [vmem:[#allocation94_spill] sm:$0xff]  ;;  %v6053_v31 = vsel %vm5541_vm13, %v5285_v20, %v5797_v62  ;;  %v15185_v22 = vpop.xlane.xlu1 %5016 }
 0x459   :  { %v7597_v41 = vsel %vm7518_vm0, %v17560_v51, %v7596_v61  ;;  %v4591_v37 = vmul.f32 %v14839_v29, %v4328_v63  ;;  %v17562_v54 = vrot.slane %v17561_v24, %v10724_v17  ;;  %v5807_v33 = vmul.f32 0.01, %v5295_v49  ;;  %v17564_v29 = vld [vmem:[#allocation124_spill] sm:$0xff]  ;;  %v15204_v24 = vpop.xlane.xlu0 %5032 }
 0x45a   :  { %5086 = vadd.xlane.f32.xlu1 %v4583_v1  ;;  %v16901_v53 = vunpack.c.l.bf16 %v15162_v48  ;;  %vm5543_vm9 = vcmp.ge.f32.partialorder %v5287_v36, 0.0  ;;  %v5799_v60 = vmul.f32 0.01, %v5287_v36  ;;  %vm5552_vm10 = vcmp.ge.f32.partialorder %v5296_v16, 0.0  ;;  %v17569_v1 = vld [vmem:[#allocation125_spill] sm:$0xff] }
 0x45b   :  { %v7598_v9 = vsel %vm7520_vm3, %v17562_v54, %v7597_v41  ;;  %5102 = vadd.xlane.f32.xlu0 %v4591_v37  ;;  %v17566_v63 = vrot.slane %v17565_v56, %v10724_v17  ;;  %v5808_v51 = vmul.f32 0.01, %v5296_v16  ;;  %v5298_v20 = vadd.f32 %v11427_v38, %v14683_v58 }
 0x45c   :  { %v15182_v25 = vsel %vm6205_vm2, -1e+09, %v7598_v9  ;;  %vm15196_vm11 = vcmp.eq.f32.partialorder %v16901_v53, 0.0  ;;  %v17570_v41 = vrot.slane %v17569_v1, %v10724_v17  ;;  %v5288_v54 = vadd.f32 %v11427_v38, %v14680_v6  ;;  %v17573_v1 = vld [vmem:[#allocation129_spill] sm:$0xff]  ;;  %v15229_v53 = vpop.xlane.xlu1 %5024 }
 0x45d   :  { %17563 = vst [vmem:[#allocation86_spill] sm:$0xff] %v15182_v25  ;;  %v7602_v61 = vsel %vm7514_vm14, %v17566_v63, %v17564_v29  ;;  %v5299_v9 = vadd.f32 %v11427_v38, %v14773_v26  ;;  %v7837_v58 = vsel %vm7803_vm6, %v15182_v25, -inf  ;;  %v17571_v29 = vld [vmem:[#allocation127_spill] sm:$0xff]  ;;  %v7203_v13 = vrot.slane %v6053_v31, %v10724_v17  ;;  %v17588_v25 = vld [vmem:[#allocation126_spill] sm:$0xff] }
 0x45e   :  { %v7603_v37 = vsel %vm7516_vm15, %v17570_v41, %v7602_v61  ;;  %v17572_v56 = vrot.slane %v17571_v29, %v10724_v17  ;;  %v7670_v61 = vsel %vm7510_vm5, %v7199_v43, %v15030_v10  ;;  %7838 = vmax.xlane.f32.xlu1 %v7837_v58  ;;  %v17574_v41 = vrot.slane %v17573_v1, %v10724_v17 }
 0x45f   :  { %v15236_v10 = vsel %vm5551_vm8, %v5295_v49, %v5807_v33  ;;  %v15243_v58 = vsel %vm5543_vm9, %v5287_v36, %v5799_v60  ;;  %vm5554_vm12 = vcmp.ge.f32.partialorder %v5298_v20, 0.0  ;;  %v5811_v31 = vmul.f32 0.01, %v5299_v9 }
 0x460   :  { %v7604_v63 = vsel %vm7518_vm0, %v17572_v56, %v7603_v37  ;;  %v15232_v37 = vsel %vm7512_vm7, %v7235_v55, %v7677_v23  ;;  %v15246_v56 = vsel %vm5552_vm10, %v5296_v16, %v5808_v51  ;;  %v5300_v55 = vadd.f32 %v11427_v38, %v14783_v47  ;;  %v15256_v16 = vpop.xlane.xlu0 %5030 }
 0x461   :  { %v7605_v29 = vsel %vm7520_vm3, %v17574_v41, %v7604_v63  ;;  %v5810_v63 = vmul.f32 0.01, %v5298_v20  ;;  %v5800_v23 = vmul.f32 0.01, %v5288_v54  ;;  %vm5544_vm13 = vcmp.ge.f32.partialorder %v5288_v54, 0.0 }
 0x462   :  { %v15240_v43 = vsel %vm15196_vm11, -1e+09, %v7605_v29  ;;  %v5289_v33 = vadd.f32 %v11427_v38, %v14729_v14  ;;  %v5297_v36 = vadd.f32 %v11427_v38, %v14735_v40  ;;  %vm5555_vm2 = vcmp.ge.f32.partialorder %v5299_v9, 0.0  ;;  %v15271_v29 = vpop.xlane.xlu1 %5014 }
 0x463   :  { %17575 = vst [vmem:[#allocation85_spill] sm:$0xff] %v15240_v43  ;;  %v7840_v49 = vsel %vm7803_vm6, %v15240_v43, -inf  ;;  %v15259_v60 = vsel %vm7512_vm7, %v7203_v13, %v7670_v61  ;;  %v5306_v62 = vadd.f32 %v11427_v38, %v14876_v46  ;;  %v6066_v40 = vsel %vm5554_vm12, %v5298_v20, %v5810_v63 }
 0x464   :  { %7841 = vmax.xlane.f32.xlu1 %v7840_v49  ;;  %v5812_v1 = vmul.f32 0.01, %v5300_v55  ;;  %v5307_v41 = vadd.f32 %v11427_v38, %v14817_v3  ;;  %v15273_v61 = vsel %vm5544_vm13, %v5288_v54, %v5800_v23  ;;  %v6067_v13 = vsel %vm5555_vm2, %v5299_v9, %v5811_v31  ;;  %v15279_v20 = vpop.xlane.xlu0 %5034 }
 0x465   :  { %vm5556_vm8 = vcmp.ge.f32.partialorder %v5300_v55, 0.0  ;;  %v5302_v49 = vadd.f32 %v11427_v38, %v14824_v42  ;;  %vm5545_vm9 = vcmp.ge.f32.partialorder %v5289_v33, 0.0  ;;  %v5801_v5 = vmul.f32 0.01, %v5289_v33 }
 0x466   :  { %v5809_v46 = vmul.f32 0.01, %v5297_v36  ;;  %v5301_v14 = vadd.f32 %v11427_v38, %v14927_v57  ;;  %v7255_v63 = vrot.slane %v6066_v40, %v10724_v17  ;;  %vm5553_vm10 = vcmp.ge.f32.partialorder %v5297_v36, 0.0  ;;  %v15294_v51 = vpop.xlane.xlu1 %5018 }
 0x467   :  { %v5308_v3 = vadd.f32 %v11427_v38, %v14859_v12  ;;  %v5818_v54 = vmul.f32 0.01, %v5306_v62  ;;  %v7259_v9 = vrot.slane %v6067_v13, %v10724_v17  ;;  %v6068_v23 = vsel %vm5556_vm8, %v5300_v55, %v5812_v1 }
 0x468   :  { %v5819_v31 = vmul.f32 0.01, %v5307_v41  ;;  %vm5562_vm11 = vcmp.ge.f32.partialorder %v5306_v62, 0.0  ;;  %vm5563_vm12 = vcmp.ge.f32.partialorder %v5307_v41, 0.0  ;;  %v5814_v42 = vmul.f32 0.01, %v5302_v49  ;;  %v15298_v6 = vpop.xlane.xlu0 %5036 }
 0x469   :  { %v5310_v47 = vadd.f32 %v11427_v38, %v14919_v19  ;;  %v5309_v57 = vadd.f32 %v11427_v38, %v14960_v44  ;;  %v15290_v40 = vsel %vm5545_vm9, %v5289_v33, %v5801_v5  ;;  %v15292_v26 = vsel %vm5553_vm10, %v5297_v36, %v5809_v46 }
 0x46a   :  { %vm5558_vm13 = vcmp.ge.f32.partialorder %v5302_v49, 0.0  ;;  %v5813_v12 = vmul.f32 0.01, %v5301_v14  ;;  %v5820_v55 = vmul.f32 0.01, %v5308_v3  ;;  %v6074_v1 = vsel %vm5562_vm11, %v5306_v62, %v5818_v54 }
 0x46b   :  { %vm5557_vm2 = vcmp.ge.f32.partialorder %v5301_v14, 0.0  ;;  %v5303_v13 = vadd.f32 %v11427_v38, %v14963_v34  ;;  %v7683_v19 = vsel %vm7508_vm4, %v7259_v9, %v7255_v63  ;;  %v7263_v44 = vrot.slane %v6068_v23, %v10724_v17 }
 0x46c   :  { %v6075_v5 = vsel %vm5563_vm12, %v5307_v41, %v5819_v31  ;;  %vm5564_vm8 = vcmp.ge.f32.partialorder %v5308_v3, 0.0  ;;  %v15303_v33 = vsel %vm5558_vm13, %v5302_v49, %v5814_v42  ;;  %vm5566_vm9 = vcmp.ge.f32.partialorder %v5310_v47, 0.0 }
 0x46d   :  { %v5822_v36 = vmul.f32 0.01, %v5310_v47  ;;  %v5821_v46 = vmul.f32 0.01, %v5309_v57  ;;  %v7287_v62 = vrot.slane %v6074_v1, %v10724_v17  ;;  %v6069_v54 = vsel %vm5557_vm2, %v5301_v14, %v5813_v12  ;;  %v15316_v14 = vpop.xlane.xlu1 %5020 }
 0x46e   :  { %vm5565_vm10 = vcmp.ge.f32.partialorder %v5309_v57, 0.0  ;;  %v5311_v34 = vadd.f32 %v11427_v38, %v14995_v11  ;;  %v6076_v41 = vsel %vm5564_vm8, %v5308_v3, %v5820_v55  ;;  %v5815_v23 = vmul.f32 0.01, %v5303_v13  ;;  %v7806_v55 = vpop.xlane.xlu0 %7805 }
 0x46f   :  { %v7684_v31 = vsel %vm7510_vm5, %v7263_v44, %v7683_v19  ;;  %v7291_v42 = vrot.slane %v6075_v5, %v10724_v17  ;;  %vm5559_vm11 = vcmp.ge.f32.partialorder %v5303_v13, 0.0  ;;  %v15321_v12 = vsel %vm5566_vm9, %v5310_v47, %v5822_v36 }
 0x470   :  { %17576 = vst [vmem:[#allocation135_spill] sm:$0xff] %v15321_v12  ;;  %v7267_v1 = vrot.slane %v6069_v54, %v10724_v17  ;;  %v6077_v3 = vsel %vm5565_vm10, %v5309_v57, %v5821_v46  ;;  %v7295_v9 = vrot.slane %v6076_v41, %v10724_v17  ;;  %v5823_v19 = vmul.f32 0.01, %v5311_v34 }
 0x471   :  { %v7690_v49 = vsel %vm7508_vm4, %v7291_v42, %v7287_v62  ;;  %v5304_v44 = vadd.f32 %v11427_v38, %v15002_v35  ;;  %v15328_v5 = vsel %vm5559_vm11, %v5303_v13, %v5815_v23  ;;  %vm5567_vm12 = vcmp.ge.f32.partialorder %v5311_v34, 0.0 }
 0x472   :  { %v5312_v11 = vadd.f32 %v11427_v38, %v15046_v59  ;;  %v5305_v47 = vadd.f32 %v11427_v38, %v15051_v32  ;;  %v7299_v36 = vrot.slane %v6077_v3, %v10724_v17  ;;  %v5314_v46 = vadd.f32 %v11427_v38, %v15088_v4  ;;  %v17577_v32 = vld [vmem:[#allocation46_spill] sm:$0xff] }
 0x473   :  { %v5315_v35 = vadd.f32 %v11427_v38, %v15096_v30  ;;  %v15342_v13 = vsel %vm7512_vm7, %v7267_v1, %v7684_v31  ;;  %v7691_v62 = vsel %vm7510_vm5, %v7295_v9, %v7690_v49  ;;  %v5313_v59 = vadd.f32 %v11427_v38, %v15126_v28  ;;  %v15354_v30 = vpop.xlane.xlu1 %5022  ;;  %v15356_v9 = vpop.xlane.xlu0 %5038 }
 0x474   :  { %v7900_v54 = vsub.f32 %v17577_v32, %v7806_v55  ;;  %v15350_v23 = vsel %vm5567_vm12, %v5311_v34, %v5823_v19  ;;  %v5816_v42 = vmul.f32 0.01, %v5304_v44  ;;  %v5323_v4 = vadd.f32 %v11427_v38, %v15130_v2 }
 0x475   :  { %17578 = vst [vmem:[#allocation87_spill] sm:$0xff] %v15350_v23  ;;  %vm5560_vm13 = vcmp.ge.f32.partialorder %v5304_v44, 0.0  ;;  %vm5568_vm2 = vcmp.ge.f32.partialorder %v5312_v11, 0.0  ;;  %v5824_v31 = vmul.f32 0.01, %v5312_v11  ;;  %vm5561_vm8 = vcmp.ge.f32.partialorder %v5305_v47, 0.0 }
 0x476   :  { %v15359_v28 = vsel %vm7512_vm7, %v7299_v36, %v7691_v62  ;;  %v5817_v49 = vmul.f32 0.01, %v5305_v47  ;;  %v5826_v1 = vmul.f32 0.01, %v5314_v46  ;;  %v5827_v3 = vmul.f32 0.01, %v5315_v35 }
 0x477   :  { %17579 = vst [vmem:[#allocation88_spill] sm:$0xff] %v15359_v28  ;;  %vm5570_vm9 = vcmp.ge.f32.partialorder %v5314_v46, 0.0  ;;  %vm5571_vm10 = vcmp.ge.f32.partialorder %v5315_v35, 0.0  ;;  %v5825_v34 = vmul.f32 0.01, %v5313_v59  ;;  %v15363_v19 = vsel %vm5560_vm13, %v5304_v44, %v5816_v42  ;;  %v5043_v57 = vpop.xlane.xlu1 %5042  ;;  %v5041_v62 = vpop.xlane.xlu0 %5040  ;;  %v17590_v23 = vld [vmem:[#allocation128_spill] sm:$0xff] }
 0x478   :  { %v7932_v55 = vmul.f32 1.442695, %v7900_v54  ;;  %vm5569_vm11 = vcmp.ge.f32.partialorder %v5313_v59, 0.0  ;;  %v5835_v32 = vmul.f32 0.01, %v5323_v4  ;;  %v15366_v41 = vsel %vm5568_vm2, %v5312_v11, %v5824_v31  ;;  %v17585_v31 = vld [vmem:[#allocation119_spill] sm:$0xff] }
 0x479   :  { %17580 = vst [vmem:[#allocation89_spill] sm:$0xff] %v15366_v41  ;;  %vm5579_vm12 = vcmp.ge.f32.partialorder %v5323_v4, 0.0  ;;  %v5331_v36 = vadd.f32 %v11427_v38, %v5043_v57  ;;  %v15370_v63 = vsel %vm5561_vm8, %v5305_v47, %v5817_v49  ;;  %v6082_v54 = vsel %vm5570_vm9, %v5314_v46, %v5826_v1 }
 0x47a   :  { %10323 = vpow2.f32 %v7932_v55  ;;  %v6083_v52 = vsel %vm5571_vm10, %v5315_v35, %v5827_v3  ;;  %v15374_v44 = vadd.f32 %v11427_v38, %v15149_v7  ;;  %v15376_v42 = vsel %vm5569_vm11, %v5313_v59, %v5825_v34 }
 0x47b   :  { %17581 = vst [vmem:[#allocation90_spill] sm:$0xff] %v15376_v42  ;;  %vm5587_vm13 = vcmp.ge.f32.partialorder %v5331_v36, 0.0  ;;  %v5843_v2 = vmul.f32 0.01, %v5331_v36  ;;  %v5330_v11 = vadd.f32 %v11427_v38, %v5041_v62  ;;  %v15383_v47 = vsel %vm5579_vm12, %v5323_v4, %v5835_v32  ;;  %v7809_v7 = vpop.xlane.xlu1 %7808  ;;  %v17582_v4 = vld [vmem:[#allocation50_spill] sm:$0xff]  ;;  %v5057_v32 = vpop.xlane.xlu0 %5056 }
 0x47c   :  { %v15387_v46 = vadd.f32 %v11427_v38, %v15164_v27  ;;  %v7319_v59 = vrot.slane %v6082_v54, %v10724_v17  ;;  %v7323_v49 = vrot.slane %v6083_v52, %v10724_v17  ;;  %v7901_v55 = vsub.f32 %v17582_v4, %v7809_v7 }
 0x47d   :  { %vm5586_vm2 = vcmp.ge.f32.partialorder %v5330_v11, 0.0  ;;  %v6099_v3 = vsel %vm5587_vm13, %v5331_v36, %v5843_v2  ;;  %v5842_v34 = vmul.f32 0.01, %v5330_v11  ;;  %vm5572_vm8 = vcmp.ge.f32.partialorder %v15374_v44, 0.0  ;;  %v15406_v2 = vld [vmem:[%s16691_s1 + $0x38] sm:$0xff]  }
 0x47e   :  { %v5828_v62 = vmul.f32 0.01, %v15374_v44  ;;  %v5338_v54 = vadd.f32 %v11427_v38, %v5057_v32  ;;  %vm5580_vm9 = vcmp.ge.f32.partialorder %v15387_v46, 0.0  ;;  %v7934_v57 = vmul.f32 1.442695, %v7901_v55  ;;  %17583 = vst [vmem:[#allocation35_spill] sm:$0xff] %v15406_v2 }
 0x47f   :  { %v6098_v52 = vsel %vm5586_vm2, %v5330_v11, %v5842_v34  ;;  %v7387_v36 = vrot.slane %v6099_v3, %v10724_v17  ;;  %v5059_v35 = vpop.xlane.xlu1 %5058  ;;  %v5836_v32 = vmul.f32 0.01, %v15387_v46  ;;  %v7812_v34 = vpop.xlane.xlu0 %7811  ;;  %v17584_v55 = vld [vmem:[#allocation104_spill] sm:$0xff]  ;;  %v17586_v27 = vrot.slane %v17585_v31, %v10724_v17  ;;  %v17587_v3 = vld [vmem:[#allocation51_spill] sm:$0xff] }
 0x480   :  { %v7383_v7 = vrot.slane %v6098_v52, %v10724_v17  ;;  %vm5594_vm10 = vcmp.ge.f32.partialorder %v5338_v54, 0.0  ;;  %v5850_v4 = vmul.f32 0.01, %v5338_v54  ;;  %10325 = vpow2.f32 %v7934_v57 }
 0x481   :  { %v5339_v11 = vadd.f32 %v11427_v38, %v5059_v35  ;;  %v7609_v1 = vsel %vm7514_vm14, %v17586_v27, %v17584_v55  ;;  %v7902_v52 = vsub.f32 %v17587_v3, %v7812_v34  ;;  %v17589_v0 = vrot.slane %v17588_v25, %v10724_v17  ;;  %v17595_v25 = vld [vmem:[#allocation130_spill] sm:$0xff] }
 0x482   :  { %v15418_v43 = vsel %vm7508_vm4, %v7387_v36, %v7383_v7  ;;  %v16911_v57 = vunpack.c.l.bf16 %v15406_v2  ;;  %v6106_v35 = vsel %vm5594_vm10, %v5338_v54, %v5850_v4  ;;  %v17591_v31 = vrot.slane %v17590_v23, %v10724_v17  ;;  %v17597_v54 = vld [vmem:[#allocation93_spill] sm:$0xff]  ;;  %v17598_v4 = vld [vmem:[#allocation95_spill] sm:$0xff] }
 0x483   :  { %v7610_v42 = vsel %vm7516_vm15, %v17589_v0, %v7609_v1  ;;  %vm5595_vm11 = vcmp.ge.f32.partialorder %v5339_v11, 0.0  ;;  %v5851_v41 = vmul.f32 0.01, %v5339_v11  ;;  %v7936_v55 = vmul.f32 1.442695, %v7902_v52 }
 0x484   :  { %v7611_v27 = vsel %vm7518_vm0, %v17591_v31, %v7610_v42  ;;  %v17592_v36 = vunpack.c.h.bf16 %v15162_v48  ;;  %v17596_v0 = vrot.slane %v17595_v25, %v10724_v17  ;;  %v17599_v34 = vrot.slane %v17598_v4, %v10724_v17 }
 0x485   :  { %v15448_v42 = vsel %vm7508_vm4, %v7323_v49, %v7319_v59  ;;  %v15452_v52 = vadd.f32 %v11427_v38, %v15185_v22  ;;  %v6107_v31 = vsel %vm5595_vm11, %v5339_v11, %v5851_v41  ;;  %10327 = vpow2.f32 %v7936_v55  ;;  %v15467_v41 = vpop.xlane.xlu0 %5044 }
 0x486   :  { %vm15432_vm12 = vcmp.eq.f32.partialorder %v17592_v36, 0.0  ;;  %v7612_v1 = vsel %vm7520_vm3, %v17596_v0, %v7611_v27  ;;  %v7616_v23 = vsel %vm7514_vm14, %v17599_v34, %v17597_v54  ;;  %v17601_v36 = vld [vmem:[#allocation79_spill] sm:$0xff]  ;;  %v7415_v0 = vrot.slane %v6106_v35, %v10724_v17  ;;  %v5061_v54 = vpop.xlane.xlu1 %5060  ;;  %v17604_v35 = vld [vmem:[#allocation101_spill] sm:$0xff] }
 0x487   :  { %v15445_v3 = vpop.eup %10323  ;;  %v17602_v25 = vrot.slane %v17601_v36, %v10724_v17  ;;  %v7419_v4 = vrot.slane %v6107_v31, %v10724_v17  ;;  %v15464_v49 = vadd.f32 %v11427_v38, %v15204_v24  ;;  %v5340_v22 = vadd.f32 %v11427_v38, %v5061_v54  ;;  %v17606_v31 = vld [vmem:[#allocation103_spill] sm:$0xff] }
 0x488   :  { %17600 = vst [vmem:[#allocation68_spill] sm:$0xff] %v15445_v3  ;;  %v7996_v59 = vsel %vm7803_vm6, %v15445_v3, 0.0  ;;  %v15471_v11 = vsel %vm15432_vm12, -1e+09, %v7612_v1  ;;  %v17605_v55 = vrot.slane %v17604_v35, %v10724_v17  ;;  %vm6208_vm13 = vcmp.eq.f32.partialorder %v16911_v57, 0.0 }
 0x489   :  { %v7617_v27 = vsel %vm7516_vm15, %v17602_v25, %v7616_v23  ;;  %7997 = vadd.xlane.f32.xlu0 %v7996_v59  ;;  %17603 = vst [vmem:[#allocation91_spill] sm:$0xff] %v15471_v11  ;;  %v5322_v23 = vadd.f32 %v11427_v38, %v15229_v53  ;;  %v7718_v24 = vsel %vm7508_vm4, %v7419_v4, %v7415_v0  ;;  %vm5596_vm2 = vcmp.ge.f32.partialorder %v5340_v22, 0.0 }
 0x48a   :  { %v7618_v34 = vsel %vm7518_vm0, %v17605_v55, %v7617_v27  ;;  %v17607_v36 = vrot.slane %v17606_v31, %v10724_v17  ;;  %v15489_v1 = vsel %vm5572_vm8, %v15374_v44, %v5828_v62  ;;  %v5852_v25 = vmul.f32 0.01, %v5340_v22  ;;  %v15501_v4 = vpop.xlane.xlu1 %5062  ;;  %v17608_v44 = vld [vmem:[#allocation81_spill] sm:$0xff]  ;;  %v17609_v62 = vld [vmem:[#allocation39_spill] sm:$0xff] }
 0x48b   :  { %v16912_v27 = vunpack.c.h.bf16 %v15406_v2  ;;  %v15495_v53 = vsel %vm5580_vm9, %v15387_v46, %v5836_v32  ;;  %v15499_v0 = vadd.f32 %v11427_v38, %v15256_v16  ;;  %v7843_v54 = vsel %vm7803_vm6, %v15471_v11, -inf  ;;  %v15513_v46 = vld [vmem:[%s16691_s1 + $0x40] sm:$0xff]   ;;  %v17629_v11 = vld [vmem:[#allocation131_spill] sm:$0xff] }
 0x48c   :  { %v7619_v7 = vsel %vm7520_vm3, %v17607_v36, %v7618_v34  ;;  %v17610_v59 = vrot.slane %v17609_v62, %v10724_v17  ;;  %17611 = vst [vmem:[#allocation70_spill] sm:$0xff] %v15513_v46  ;;  %v15517_v16 = vadd.f32 %v11427_v38, %v15271_v29  ;;  %v6108_v32 = vsel %vm5596_vm2, %v5340_v22, %v5852_v25  ;;  %v17613_v34 = vld [vmem:[#allocation40_spill] sm:$0xff] }
 0x48d   :  { %7844 = vmax.xlane.f32.xlu0 %v7843_v54  ;;  %v15519_v55 = vsel %vm6208_vm13, -1e+09, %v7619_v7  ;;  %v17614_v31 = vrot.slane %v17613_v34, %v10724_v17  ;;  %vm5574_vm8 = vcmp.ge.f32.partialorder %v15452_v52, 0.0  ;;  %v7423_v62 = vrot.slane %v6108_v32, %v10724_v17  ;;  %v15533_v7 = vpop.xlane.xlu0 %5046  ;;  %v15546_v57 = vpop.eup %10325  ;;  %v17639_v54 = vld [vmem:[#allocation48_spill] sm:$0xff] }
 0x48e   :  { %v7623_v35 = vsel %vm7514_vm14, %v17610_v59, %v17608_v44  ;;  %17612 = vst [vmem:[#allocation120_spill] sm:$0xff] %v15519_v55  ;;  %v17615_v59 = vld [vmem:[#allocation117_spill] sm:$0xff]  ;;  %v5834_v25 = vmul.f32 0.01, %v5322_v23  ;;  %vm15537_vm9 = vcmp.eq.f32.partialorder %v16912_v27, 0.0  ;;  %17621 = vst [vmem:[#allocation136_spill] sm:$0xff] %v15546_v57  ;;  %v17630_v12 = vrot.slane %v17629_v11, %v10724_v17 }
 0x48f   :  { %v7624_v36 = vsel %vm7516_vm15, %v17614_v31, %v7623_v35  ;;  %v17616_v29 = vrot.slane %v17615_v59, %v10724_v17  ;;  %v17619_v35 = vld [vmem:[#allocation98_spill] sm:$0xff]  ;;  %v7815_v59 = vpop.xlane.xlu1 %7814  ;;  %v17622_v27 = vld [vmem:[#allocation137_spill] sm:$0xff]  ;;  %v17623_v44 = vld [vmem:[#allocation116_spill] sm:$0xff]  ;;  %v7999_v32 = vsel %vm7803_vm6, %v15546_v57, 0.0  ;;  %vm5578_vm10 = vcmp.ge.f32.partialorder %v5322_v23, 0.0 }
 0x490   :  { %v17620_v34 = vrot.slane %v17619_v35, %v10724_v17  ;;  %v17624_v2 = vrot.slane %v17623_v44, %v10724_v17  ;;  %v16923_v35 = vunpack.c.h.bf16 %v15513_v46  ;;  %8000 = vadd.xlane.f32.xlu1 %v7999_v32  ;;  %v5837_v28 = vmul.f32 0.01, %v15499_v0 }
 0x491   :  { %v7625_v22 = vsel %vm7518_vm0, %v17616_v29, %v7624_v36  ;;  %v15549_v36 = vsel %vm7510_vm5, %v7423_v62, %v7718_v24  ;;  %v7846_v29 = vsel %vm7803_vm6, %v15519_v55, -inf  ;;  %v17626_v24 = vld [vmem:[#allocation140_spill] sm:$0xff]  ;;  %v17628_v55 = vld [vmem:[#allocation139_spill] sm:$0xff]  ;;  %vm5582_vm13 = vcmp.ge.f32.partialorder %v15464_v49, 0.0 }
 0x492   :  { %v7626_v31 = vsel %vm7520_vm3, %v17620_v34, %v7625_v22  ;;  %v7630_v48 = vsel %vm7514_vm14, %v17624_v2, %v17622_v27  ;;  %v17625_v22 = vld [vmem:[#allocation61_spill] sm:$0xff]  ;;  %7847 = vmax.xlane.f32.xlu0 %v7846_v29  ;;  %v17627_v62 = vrot.slane %v17626_v24, %v10724_v17  ;;  %v7637_v44 = vsel %vm7514_vm14, %v17630_v12, %v17628_v55  ;;  %v15574_v2 = vld [vmem:[%s16691_s1 + $0x48] sm:$0xff]  }
 0x493   :  { %v7903_v34 = vsub.f32 %v17625_v22, %v7815_v59  ;;  %17631 = vst [vmem:[#allocation143_spill] sm:$0xff] %v15574_v2  ;;  %v15578_v27 = vsel %vm15537_vm9, -1e+09, %v7626_v31  ;;  %v17632_v59 = vld [vmem:[#allocation146_spill] sm:$0xff]  ;;  %v17634_v22 = vld [vmem:[#allocation77_spill] sm:$0xff]  ;;  %v17636_v24 = vunpack.c.l.bf16 %v15513_v46  ;;  %v17640_v31 = vrot.slane %v17639_v54, %v10724_v17 }
 0x494   :  { %v7631_v3 = vsel %vm7516_vm15, %v17627_v62, %v7630_v48  ;;  %v17633_v48 = vrot.slane %v17632_v59, %v10724_v17  ;;  %v17635_v11 = vrot.slane %v17634_v22, %v10724_v17  ;;  %v17641_v59 = vld [vmem:[#allocation47_spill] sm:$0xff]  ;;  %v5830_v22 = vmul.f32 0.01, %v15452_v52  ;;  %v17648_v46 = vld [vmem:[#allocation53_spill] sm:$0xff] }
 0x495   :  { %v7938_v55 = vmul.f32 1.442695, %v7903_v34  ;;  %vm15590_vm11 = vcmp.eq.f32.partialorder %v17636_v24, 0.0  ;;  %vm15607_vm12 = vcmp.eq.f32.partialorder %v16923_v35, 0.0  ;;  %v16926_v54 = vunpack.c.l.bf16 %v15574_v2 }
 0x496   :  { %v7632_v29 = vsel %vm7518_vm0, %v17633_v48, %v7631_v3  ;;  %v7638_v12 = vsel %vm7516_vm15, %v17635_v11, %v7637_v44  ;;  %v17642_v3 = vrot.slane %v17641_v59, %v10724_v17  ;;  %v15603_v44 = vpop.xlane.xlu0 %5048  ;;  %v17645_v11 = vld [vmem:[#allocation52_spill] sm:$0xff]  ;;  %v7849_v59 = vsel %vm7803_vm6, %v15578_v27, -inf }
 0x497   :  { %v7633_v32 = vsel %vm7520_vm3, %v17640_v31, %v7632_v29  ;;  %v17646_v24 = vrot.slane %v17645_v11, %v10724_v17  ;;  %v15616_v31 = vpop.eup %10327  ;;  %10329 = vpow2.f32 %v7938_v55  ;;  %v17649_v35 = vrot.slane %v17648_v46, %v10724_v17  ;;  %7850 = vmax.xlane.f32.xlu1 %v7849_v59  ;;  %v15638_v46 = vpop.xlane.xlu1 %5064 }
 0x498   :  { %v7639_v48 = vsel %vm7518_vm0, %v17642_v3, %v7638_v12  ;;  %v6090_v12 = vsel %vm5578_vm10, %v5322_v23, %v5834_v25  ;;  %v17647_v3 = vld [vmem:[#allocation64_spill] sm:$0xff]  ;;  %v15630_v11 = vsel %vm15590_vm11, -1e+09, %v7633_v32  ;;  %vm5581_vm2 = vcmp.ge.f32.partialorder %v15499_v0, 0.0 }
 0x499   :  { %v7640_v29 = vsel %vm7520_vm3, %v17646_v24, %v7639_v48  ;;  %v7644_v57 = vsel %vm7514_vm14, %v17649_v35, %v17647_v3  ;;  %v8002_v48 = vsel %vm7803_vm6, %v15616_v31, 0.0  ;;  %v17650_v23 = vld [vmem:[#allocation32_spill] sm:$0xff]  ;;  %v17652_v62 = vrot.slane %v14667_v50, %v10724_v17 }
 0x49a   :  { %v17651_v25 = vrot.slane %v17650_v23, %v10724_v17  ;;  %8003 = vadd.xlane.f32.xlu0 %v8002_v48  ;;  %v15642_v35 = vsel %vm15607_vm12, -1e+09, %v7640_v29  ;;  %v5838_v24 = vmul.f32 0.01, %v15464_v49  ;;  %v7818_v59 = vpop.xlane.xlu0 %7817  ;;  %vm6212_vm9 = vcmp.eq.f32.partialorder %v16926_v54, 0.0  ;;  %v17654_v48 = vld [vmem:[#allocation34_spill] sm:$0xff] }
 0x49b   :  { %v17653_v3 = vrot.slane %v14672_v45, %v10724_v17  ;;  %v15659_v29 = vsel %vm5574_vm8, %v15452_v52, %v5830_v22  ;;  %v5829_v50 = vmul.f32 0.01, %v15517_v16  ;;  %v7904_v23 = vsub.f32 %v17654_v48, %v7818_v59  ;;  %v17667_v54 = vld [vmem:[#allocation36_spill] sm:$0xff] }
 0x49c   :  { %v7645_v55 = vsel %vm7516_vm15, %v17651_v25, %v7644_v57  ;;  %v7351_v57 = vrot.slane %v6090_v12, %v10724_v17  ;;  %v7852_v12 = vsel %vm7803_vm6, %v15630_v11, -inf  ;;  %v6093_v25 = vsel %vm5581_vm2, %v15499_v0, %v5837_v28 }
 0x49d   :  { %v7646_v32 = vsel %vm7518_vm0, %v17652_v62, %v7645_v55  ;;  %vm5573_vm10 = vcmp.ge.f32.partialorder %v15517_v16, 0.0  ;;  %v5327_v45 = vadd.f32 %v11427_v38, %v15279_v20  ;;  %7853 = vmax.xlane.f32.xlu1 %v7852_v12  ;;  %v7855_v55 = vsel %vm7803_vm6, %v15642_v35, -inf }
 0x49e   :  { %v7647_v34 = vsel %vm7520_vm3, %v17653_v3, %v7646_v32  ;;  %v7359_v52 = vrot.slane %v15495_v53, %v10724_v17  ;;  %v5319_v22 = vadd.f32 %v11427_v38, %v15294_v51  ;;  %v7940_v62 = vmul.f32 1.442695, %v7904_v23  ;;  %7856 = vmax.xlane.f32.xlu0 %v7855_v55  ;;  %v15713_v55 = vpop.xlane.xlu0 %5050 }
 0x49f   :  { %v15675_v32 = vsel %vm6212_vm9, -1e+09, %v7647_v34  ;;  %v17655_v28 = vrot.slane %v15489_v1, %v10724_v17  ;;  %v15687_v53 = vsel %vm5582_vm13, %v15464_v49, %v5838_v24  ;;  %v17656_v51 = vrot.slane %v15383_v47, %v10724_v17  ;;  %v15695_v1 = vpop.xlane.xlu1 %5066  ;;  %v17657_v24 = vld [vmem:[#allocation58_spill] sm:$0xff]  ;;  %v17658_v47 = vld [vmem:[#allocation55_spill] sm:$0xff] }
 0x4a0   :  { %v7363_v3 = vrot.slane %v6093_v25, %v10724_v17  ;;  %v6085_v34 = vsel %vm5573_vm10, %v15517_v16, %v5829_v50  ;;  %10331 = vpow2.f32 %v7940_v62  ;;  %v5839_v48 = vmul.f32 0.01, %v5327_v45  ;;  %v15710_v16 = vld [vmem:[%s16691_s1 + $0x50] sm:$0xff]  }
 0x4a1   :  { %v7698_v20 = vsel %vm7510_vm5, %v17655_v28, %v15448_v42  ;;  %v7704_v59 = vsel %vm7508_vm4, %v17656_v51, %v7351_v57  ;;  %v16925_v42 = vunpack.c.h.bf16 %v15574_v2  ;;  %v5328_v23 = vadd.f32 %v11427_v38, %v15298_v6  ;;  %v17660_v6 = vld [vmem:[#allocation62_spill] sm:$0xff] }
 0x4a2   :  { %v7858_v49 = vsel %vm7803_vm6, %v15675_v32, -inf  ;;  %v17659_v57 = vrot.slane %v17658_v47, %v10724_v17  ;;  %v7705_v50 = vsel %vm7510_vm5, %v7359_v52, %v7704_v59  ;;  %vm5583_vm8 = vcmp.ge.f32.partialorder %v5327_v45, 0.0  ;;  %v17662_v47 = vld [vmem:[#allocation102_spill] sm:$0xff] }
 0x4a3   :  { %v5831_v25 = vmul.f32 0.01, %v5319_v22  ;;  %7859 = vmax.xlane.f32.xlu0 %v7858_v49  ;;  %v17661_v62 = vrot.slane %v17660_v6, %v10724_v17  ;;  %v7331_v51 = vrot.slane %v6085_v34, %v10724_v17  ;;  %vm5575_vm11 = vcmp.ge.f32.partialorder %v5319_v22, 0.0 }
 0x4a4   :  { %v7651_v12 = vsel %vm7514_vm14, %v17659_v57, %v17657_v24  ;;  %v15722_v24 = vadd.f32 %v11427_v38, %v15316_v14  ;;  %v17663_v52 = vrot.slane %v17662_v47, %v10724_v17  ;;  %v15730_v57 = vpop.xlane.xlu1 %5068  ;;  %vm6213_vm12 = vcmp.eq.f32.partialorder %v16925_v42, 0.0 }
 0x4a5   :  { %v7652_v28 = vsel %vm7516_vm15, %v17661_v62, %v7651_v12  ;;  %v17664_v12 = vld [vmem:[#allocation63_spill] sm:$0xff]  ;;  %v16927_v14 = vunpack.c.l.bf16 %v15710_v16  ;;  %v15739_v62 = vpop.eup %10329  ;;  %v15742_v47 = vsel %vm7512_vm7, %v7363_v3, %v7705_v50  ;;  %vm5584_vm13 = vcmp.ge.f32.partialorder %v5328_v23, 0.0 }
 0x4a6   :  { %v7653_v59 = vsel %vm7518_vm0, %v17663_v52, %v7652_v28  ;;  %v17665_v34 = vrot.slane %v17664_v12, %v10724_v17  ;;  %v15745_v28 = vsel %vm5583_vm8, %v5327_v45, %v5839_v48  ;;  %v17666_v52 = vrot.slane %v14795_v21, %v10724_v17 }
 0x4a7   :  { %v15752_v12 = vsel %vm5575_vm11, %v5319_v22, %v5831_v25  ;;  %v17668_v3 = vrot.slane %v17667_v54, %v10724_v17  ;;  %v15761_v45 = vsel %vm7512_vm7, %v7331_v51, %v7698_v20  ;;  %vm5576_vm2 = vcmp.ge.f32.partialorder %v15722_v24, 0.0  ;;  %v17671_v20 = vld [vmem:[#allocation134_spill] sm:$0xff] }
 0x4a8   :  { %v7654_v6 = vsel %vm7520_vm3, %v17665_v34, %v7653_v59  ;;  %v7658_v42 = vsel %vm7514_vm14, %v17666_v52, %v14905_v39  ;;  %v5840_v59 = vmul.f32 0.01, %v5328_v23  ;;  %v8005_v34 = vsel %vm7803_vm6, %v15739_v62, 0.0  ;;  %v17669_v39 = vld [vmem:[#allocation75_spill] sm:$0xff]  ;;  %v15772_v52 = vpop.xlane.xlu0 %5052  ;;  %v7821_v54 = vpop.xlane.xlu1 %7820  ;;  %v17675_v25 = vld [vmem:[#allocation118_spill] sm:$0xff] }
 0x4a9   :  { %v7659_v50 = vsel %vm7516_vm15, %v17668_v3, %v7658_v42  ;;  %8006 = vadd.xlane.f32.xlu1 %v8005_v34  ;;  %v15764_v21 = vsel %vm6213_vm12, -1e+09, %v7654_v6  ;;  %v17670_v22 = vrot.slane %v17669_v39, %v10724_v17  ;;  %vm6214_vm9 = vcmp.eq.f32.partialorder %v16927_v14, 0.0 }
 0x4aa   :  { %v17672_v42 = vrot.slane %v17671_v20, %v10724_v17  ;;  %v5832_v3 = vmul.f32 0.01, %v15722_v24  ;;  %v17676_v49 = vrot.slane %v17675_v25, %v10724_v17  ;;  %v15793_v20 = vld [vmem:[%s16691_s1 + $0x58] sm:$0xff]   ;;  %v5333_v6 = vadd.f32 %v11427_v38, %v15533_v7 }
 0x4ab   :  { %v7660_v48 = vsel %vm7518_vm0, %v17670_v22, %v7659_v50  ;;  %v17673_v50 = vld [vmem:[#allocation43_spill] sm:$0xff]  ;;  %v17674_v22 = vld [vmem:[#allocation121_spill] sm:$0xff]  ;;  %v17681_v2 = vunpack.c.h.bf16 %v15710_v16  ;;  %v5329_v7 = vadd.f32 %v11427_v38, %v15356_v9 }
 0x4ac   :  { %v7661_v51 = vsel %vm7520_vm3, %v17672_v42, %v7660_v48  ;;  %v7905_v39 = vsub.f32 %v17673_v50, %v7821_v54  ;;  %v7665_v14 = vsel %vm7514_vm14, %v17676_v49, %v17674_v22  ;;  %v15796_v48 = vsel %vm5584_vm13, %v5328_v23, %v5840_v59  ;;  %v17677_v50 = vld [vmem:[#allocation41_spill] sm:$0xff]  ;;  %v17679_v23 = vld [vmem:[#allocation82_spill] sm:$0xff] }
 0x4ad   :  { %v5332_v42 = vadd.f32 %v11427_v38, %v15467_v41  ;;  %v7861_v54 = vsel %vm7803_vm6, %v15764_v21, -inf  ;;  %v17678_v34 = vrot.slane %v17677_v50, %v10724_v17  ;;  %v5341_v49 = vadd.f32 %v11427_v38, %v15501_v4 }
 0x4ae   :  { %v7942_v22 = vmul.f32 1.442695, %v7905_v39  ;;  %7862 = vmax.xlane.f32.xlu1 %v7861_v54  ;;  %v15808_v0 = vsel %vm6214_vm9, -1e+09, %v7661_v51  ;;  %v17680_v59 = vrot.slane %v17679_v23, %v10724_v17  ;;  %vm15818_vm10 = vcmp.eq.f32.partialorder %v17681_v2, 0.0 }
 0x4af   :  { %v7666_v25 = vsel %vm7516_vm15, %v17678_v34, %v7665_v14  ;;  %v17684_v4 = vrot.slane %v15066_v15, %v10724_v17  ;;  %v16930_v51 = vunpack.c.l.bf16 %v15793_v20  ;;  %v15827_v34 = vpop.eup %10331  ;;  %v5321_v39 = vadd.f32 %v11427_v38, %v15354_v30 }
 0x4b0   :  { %v7667_v41 = vsel %vm7518_vm0, %v17680_v59, %v7666_v25  ;;  %10333 = vpow2.f32 %v7942_v22  ;;  %v17685_v2 = vrot.slane %v15116_v8, %v10724_v17  ;;  %v5844_v15 = vmul.f32 0.01, %v5332_v42  ;;  %v15838_v25 = vpop.xlane.xlu0 %5054 }
 0x4b1   :  { %v7668_v14 = vsel %vm7520_vm3, %v17684_v4, %v7667_v41  ;;  %v8008_v23 = vsel %vm7803_vm6, %v15827_v34, 0.0  ;;  %v7864_v59 = vsel %vm7803_vm6, %v15808_v0, -inf  ;;  %v17686_v30 = vrot.slane %v15243_v58, %v10724_v17 }
 0x4b2   :  { %v7672_v54 = vsel %vm7514_vm14, %v17685_v2, %v15259_v60  ;;  %vm5588_vm8 = vcmp.ge.f32.partialorder %v5332_v42, 0.0  ;;  %v5853_v22 = vmul.f32 0.01, %v5341_v49  ;;  %8009 = vadd.xlane.f32.xlu0 %v8008_v23  ;;  %7865 = vmax.xlane.f32.xlu1 %v7864_v59  ;;  %v15850_v8 = vsel %vm15818_vm10, -1e+09, %v7668_v14  ;;  %v15871_v23 = vpop.xlane.xlu1 %5070 }
 0x4b3   :  { %v7673_v9 = vsel %vm7516_vm15, %v17686_v30, %v7672_v54  ;;  %v17687_v60 = vrot.slane %v15273_v61, %v10724_v17  ;;  %vm5597_vm11 = vcmp.ge.f32.partialorder %v5341_v49, 0.0  ;;  %v5845_v4 = vmul.f32 0.01, %v5333_v6 }
 0x4b4   :  { %vm15858_vm12 = vcmp.eq.f32.partialorder %v16930_v51, 0.0  ;;  %v17690_v2 = vrot.slane %v15290_v40, %v10724_v17  ;;  %v15869_v14 = vsel %vm5576_vm2, %v15722_v24, %v5832_v3  ;;  %v5833_v61 = vmul.f32 0.01, %v5321_v39  ;;  %v7824_v30 = vpop.xlane.xlu0 %7823 }
 0x4b5   :  { %v7674_v41 = vsel %vm7518_vm0, %v17687_v60, %v7673_v9  ;;  %v5841_v54 = vmul.f32 0.01, %v5329_v7  ;;  %vm5589_vm13 = vcmp.ge.f32.partialorder %v5333_v6, 0.0  ;;  %vm5577_vm9 = vcmp.ge.f32.partialorder %v5321_v39, 0.0 }
 0x4b6   :  { %v7675_v50 = vsel %vm7520_vm3, %v17690_v2, %v7674_v41  ;;  %vm5585_vm10 = vcmp.ge.f32.partialorder %v5329_v7, 0.0  ;;  %v6100_v59 = vsel %vm5588_vm8, %v5332_v42, %v5844_v15  ;;  %v7867_v40 = vsel %vm7803_vm6, %v15850_v8, -inf  ;;  %v17691_v41 = vld [vmem:[#allocation65_spill] sm:$0xff] }
 0x4b7   :  { %v6109_v9 = vsel %vm5597_vm11, %v5341_v49, %v5853_v22  ;;  %v5334_v60 = vadd.f32 %v11427_v38, %v15603_v44  ;;  %v7906_v24 = vsub.f32 %v17691_v41, %v7824_v30  ;;  %7868 = vmax.xlane.f32.xlu0 %v7867_v40  ;;  %v15881_v3 = vsel %vm15858_vm12, -1e+09, %v7675_v50  ;;  %v15893_v40 = vpop.xlane.xlu1 %5072 }
 0x4b8   :  { %v7343_v42 = vrot.slane %v15869_v14, %v10724_v17  ;;  %v6101_v15 = vsel %vm5589_vm13, %v5333_v6, %v5845_v4  ;;  %v5342_v49 = vadd.f32 %v11427_v38, %v15638_v46  ;;  %v15889_v22 = vsel %vm5577_vm9, %v5321_v39, %v5833_v61  ;;  %v15898_v51 = vpop.xlane.xlu0 %5074 }
 0x4b9   :  { %v15891_v44 = vsel %vm5585_vm10, %v5329_v7, %v5841_v54  ;;  %v7944_v30 = vmul.f32 1.442695, %v7906_v24  ;;  %v16931_v58 = vunpack.c.h.bf16 %v15793_v20  ;;  %v7391_v50 = vrot.slane %v6100_v59, %v10724_v17  ;;  %v15910_v7 = vld [vmem:[%s16691_s1 + $0x60] sm:$0xff]  }
 0x4ba   :  { %v7427_v41 = vrot.slane %v6109_v9, %v10724_v17  ;;  %v7870_v6 = vsel %vm7803_vm6, %v15881_v3, -inf  ;;  %v17692_v46 = vrot.slane %v15167_v18, %v10724_v17  ;;  %v7395_v4 = vrot.slane %v6101_v15, %v10724_v17 }
 0x4bb   :  { %v5846_v61 = vmul.f32 0.01, %v5334_v60  ;;  %10335 = vpow2.f32 %v7944_v30  ;;  %7871 = vmax.xlane.f32.xlu0 %v7870_v6  ;;  %v17693_v54 = vrot.slane %v15236_v10, %v10724_v17  ;;  %vm5590_vm2 = vcmp.ge.f32.partialorder %v5334_v60, 0.0  ;;  %v15923_v15 = vpop.xlane.xlu1 %5088 }
 0x4bc   :  { %v7679_v39 = vsel %vm7514_vm14, %v17692_v46, %v15232_v37  ;;  %vm5598_vm8 = vcmp.ge.f32.partialorder %v5342_v49, 0.0  ;;  %v5854_v18 = vmul.f32 0.01, %v5342_v49  ;;  %v17694_v37 = vrot.slane %v15246_v56, %v10724_v17 }
 0x4bd   :  { %v7680_v59 = vsel %vm7516_vm15, %v17693_v54, %v7679_v39  ;;  %v5343_v24 = vadd.f32 %v11427_v38, %v15695_v1  ;;  %vm15927_vm11 = vcmp.eq.f32.partialorder %v16931_v58, 0.0  ;;  %v17697_v10 = vrot.slane %v15292_v26, %v10724_v17  ;;  %v15936_v46 = vpop.eup %10333 }
 0x4be   :  { %v7681_v9 = vsel %vm7518_vm0, %v17694_v37, %v7680_v59  ;;  %v16932_v56 = vunpack.c.l.bf16 %v15910_v7  ;;  %v7347_v1 = vrot.slane %v15889_v22, %v10724_v17  ;;  %v5335_v54 = vadd.f32 %v11427_v38, %v15713_v55 }
 0x4bf   :  { %v7682_v6 = vsel %vm7520_vm3, %v17697_v10, %v7681_v9  ;;  %v17698_v59 = vrot.slane %v15303_v33, %v10724_v17  ;;  %v7712_v37 = vsel %vm7510_vm5, %v7391_v50, %v15418_v43  ;;  %v15951_v9 = vsel %vm5590_vm2, %v5334_v60, %v5846_v61  ;;  %v15953_v10 = vpop.xlane.xlu0 %5090 }
 0x4c0   :  { %v8011_v58 = vsel %vm7803_vm6, %v15936_v46, 0.0  ;;  %v17699_v39 = vrot.slane %v15328_v5, %v10724_v17  ;;  %v15963_v33 = vsel %vm7512_vm7, %v7427_v41, %v15549_v36  ;;  %v15970_v43 = vsel %vm15927_vm11, -1e+09, %v7682_v6 }
 0x4c1   :  { %v7686_v26 = vsel %vm7514_vm14, %v17698_v59, %v15342_v13  ;;  %v15966_v13 = vsel %vm5598_vm8, %v5342_v49, %v5854_v18  ;;  %8012 = vadd.xlane.f32.xlu1 %v8011_v58  ;;  %v17700_v60 = vrot.slane %v15363_v19, %v10724_v17  ;;  %v15977_v5 = vsel %vm7512_vm7, %v7395_v4, %v7712_v37  ;;  %v17702_v18 = vld [vmem:[#allocation67_spill] sm:$0xff]  ;;  %v17716_v58 = vld [vmem:[#allocation122_spill] sm:$0xff] }
 0x4c2   :  { %v7687_v55 = vsel %vm7516_vm15, %v17699_v39, %v7686_v26  ;;  %v5855_v61 = vmul.f32 0.01, %v5343_v24  ;;  %v7827_v39 = vpop.xlane.xlu1 %7826  ;;  %vm6218_vm12 = vcmp.eq.f32.partialorder %v16932_v56, 0.0  ;;  %v17701_v36 = vrot.slane %v15370_v63, %v10724_v17  ;;  %v15996_v63 = vld [vmem:[%s16691_s1 + $0x68] sm:$0xff]  }
 0x4c3   :  { %v7688_v50 = vsel %vm7518_vm0, %v17700_v60, %v7687_v55  ;;  %vm5599_vm13 = vcmp.ge.f32.partialorder %v5343_v24, 0.0  ;;  %v5847_v19 = vmul.f32 0.01, %v5335_v54  ;;  %v16933_v41 = vunpack.c.h.bf16 %v15910_v7  ;;  %v17703_v55 = vld [vmem:[#allocation88_spill] sm:$0xff]  ;;  %v17704_v60 = vld [vmem:[#allocation135_spill] sm:$0xff]  ;;  %v16013_v4 = vpop.xlane.xlu0 %5092 }
 0x4c4   :  { %v7689_v49 = vsel %vm7520_vm3, %v17701_v36, %v7688_v50  ;;  %vm5591_vm9 = vcmp.ge.f32.partialorder %v5335_v54, 0.0  ;;  %v7907_v30 = vsub.f32 %v17702_v18, %v7827_v39  ;;  %v7873_v6 = vsel %vm7803_vm6, %v15970_v43, -inf }
 0x4c5   :  { %v5344_v59 = vadd.f32 %v11427_v38, %v15730_v57  ;;  %v5336_v26 = vadd.f32 %v11427_v38, %v15772_v52  ;;  %7874 = vmax.xlane.f32.xlu1 %v7873_v6  ;;  %v16002_v37 = vsel %vm6218_vm12, -1e+09, %v7689_v49  ;;  %v17705_v50 = vrot.slane %v17704_v60, %v10724_v17  ;;  %v17706_v57 = vld [vmem:[#allocation87_spill] sm:$0xff] }
 0x4c6   :  { %v16009_v36 = vsel %vm5599_vm13, %v5343_v24, %v5855_v61  ;;  %v5337_v18 = vadd.f32 %v11427_v38, %v15838_v25  ;;  %v7946_v56 = vmul.f32 1.442695, %v7907_v30  ;;  %v17707_v52 = vrot.slane %v17706_v57, %v10724_v17  ;;  %v17710_v24 = vld [vmem:[#allocation89_spill] sm:$0xff] }
 0x4c7   :  { %v7693_v39 = vsel %vm7514_vm14, %v17705_v50, %v17703_v55  ;;  %v16019_v6 = vsel %vm5591_vm9, %v5335_v54, %v5847_v19  ;;  %vm16023_vm10 = vcmp.eq.f32.partialorder %v16933_v41, 0.0  ;;  %v17711_v61 = vrot.slane %v17710_v24, %v10724_v17  ;;  %v17712_v19 = vld [vmem:[#allocation90_spill] sm:$0xff]  ;;  %v7830_v41 = vpop.xlane.xlu0 %7829 }
 0x4c8   :  { %v7694_v49 = vsel %vm7516_vm15, %v17707_v52, %v7693_v39  ;;  %v9943_v30 = vunpack.c.l.bf16 %v15996_v63  ;;  %v5345_v55 = vadd.f32 %v11427_v38, %v15871_v23  ;;  %10337 = vpow2.f32 %v7946_v56  ;;  %v16040_v57 = vpop.eup %10335 }
 0x4c9   :  { %v7695_v25 = vsel %vm7518_vm0, %v17711_v61, %v7694_v49  ;;  %v7876_v54 = vsel %vm7803_vm6, %v16002_v37, -inf  ;;  %v17713_v50 = vrot.slane %v17712_v19, %v10724_v17  ;;  %vm5600_vm2 = vcmp.ge.f32.partialorder %v5344_v59, 0.0  ;;  %v16042_v49 = vpop.xlane.xlu1 %5076 }
 0x4ca   :  { %v5856_v52 = vmul.f32 0.01, %v5344_v59  ;;  %vm5592_vm8 = vcmp.ge.f32.partialorder %v5336_v26, 0.0  ;;  %7877 = vmax.xlane.f32.xlu1 %v7876_v54  ;;  %v17714_v23 = vrot.slane %v15659_v29, %v10724_v17  ;;  %v5848_v24 = vmul.f32 0.01, %v5336_v26 }
 0x4cb   :  { %v7696_v39 = vsel %vm7520_vm3, %v17713_v50, %v7695_v25  ;;  %v5849_v61 = vmul.f32 0.01, %v5337_v18  ;;  %v8014_v25 = vsel %vm7803_vm6, %v16040_v57, 0.0  ;;  %v17715_v19 = vrot.slane %v15752_v12, %v10724_v17 }
 0x4cc   :  { %v7700_v56 = vsel %vm7514_vm14, %v17714_v23, %v15761_v45  ;;  %v7908_v2 = vsub.f32 %v17716_v58, %v7830_v41  ;;  %8015 = vadd.xlane.f32.xlu0 %v8014_v25  ;;  %v16058_v54 = vsel %vm16023_vm10, -1e+09, %v7696_v39  ;;  %vm16062_vm11 = vcmp.eq.f32.partialorder %v9943_v30, 0.0 }
 0x4cd   :  { %v7701_v50 = vsel %vm7516_vm15, %v17715_v19, %v7700_v56  ;;  %v5857_v45 = vmul.f32 0.01, %v5345_v55  ;;  %v5346_v58 = vadd.f32 %v11427_v38, %v15893_v40  ;;  %vm5593_vm12 = vcmp.ge.f32.partialorder %v5337_v18, 0.0 }
 0x4ce   :  { %v7702_v12 = vsel %vm7518_vm0, %v7343_v42, %v7701_v50  ;;  %vm5601_vm13 = vcmp.ge.f32.partialorder %v5345_v55, 0.0  ;;  %v5347_v60 = vadd.f32 %v11427_v38, %v15898_v51  ;;  %v7948_v39 = vmul.f32 1.442695, %v7908_v2  ;;  %v16090_v2 = vpop.xlane.xlu1 %5078 }
 0x4cf   :  { %v7703_v41 = vsel %vm7520_vm3, %v7347_v1, %v7702_v12  ;;  %vm16934_vm9 = vmmov 0   ;;  %v17719_v23 = vmov 0.0   ;;  %v7435_v14 = vrot.slane %v16009_v36, %v10724_v17 }
 0x4d0   :  { %10085 = vmatprep.mubr.msk.bf16.mxu0 %vm16934_vm9, %v17719_v23  ;;  %10157 = vmatprep.mubr.msk.bf16.mxu1 %vm16934_vm9, %v17719_v23  ;;  %v7403_v42 = vrot.slane %v16019_v6, %v10724_v17  ;;  %v6112_v22 = vsel %vm5600_vm2, %v5344_v59, %v5856_v52  ;;  %v7879_v40 = vsel %vm7803_vm6, %v16058_v54, -inf  ;;  %v6104_v51 = vsel %vm5592_vm8, %v5336_v26, %v5848_v24  ;;  %v16107_v24 = vld [vmem:[%s16691_s1 + $0x70] sm:$0xff]  }
 0x4d1   :  { %10339 = vpow2.f32 %v7948_v39  ;;  %7880 = vmax.xlane.f32.xlu0 %v7879_v40  ;;  %v16094_v1 = vsel %vm16062_vm11, -1e+09, %v7703_v41  ;;  %v9944_v36 = vunpack.c.h.bf16 %v15996_v63  ;;  %v6105_v56 = vsel %vm5593_vm12, %v5337_v18, %v5849_v61  ;;  %v16111_v18 = vpop.xlane.xlu0 %5094 }
 0x4d2   :  { %v6113_v6 = vsel %vm5601_vm13, %v5345_v55, %v5857_v45  ;;  %v5858_v59 = vmul.f32 0.01, %v5346_v58  ;;  %v17720_v52 = vrot.slane %v15687_v53, %v10724_v17  ;;  %vm5602_vm10 = vcmp.ge.f32.partialorder %v5346_v58, 0.0 }
 0x4d3   :  { %v5859_v25 = vmul.f32 0.01, %v5347_v60  ;;  %v5354_v19 = vadd.f32 %v11427_v38, %v15923_v15  ;;  %v17721_v55 = vrot.slane %v15745_v28, %v10724_v17  ;;  %v7407_v53 = vrot.slane %v6104_v51, %v10724_v17 }
 0x4d4   :  { %v7707_v26 = vsel %vm7514_vm14, %v17720_v52, %v15742_v47  ;;  %vm5603_vm2 = vcmp.ge.f32.partialorder %v5347_v60, 0.0  ;;  %v7882_v47 = vsel %vm7803_vm6, %v16094_v1, -inf  ;;  %v17722_v50 = vrot.slane %v15796_v48, %v10724_v17 }
 0x4d5   :  { %v7708_v61 = vsel %vm7516_vm15, %v17721_v55, %v7707_v26  ;;  %v5355_v15 = vadd.f32 %v11427_v38, %v15953_v10  ;;  %7883 = vmax.xlane.f32.xlu0 %v7882_v47  ;;  %vm6221_vm8 = vcmp.eq.f32.partialorder %v9944_v36, 0.0  ;;  %v17723_v28 = vrot.slane %v15891_v44, %v10724_v17  ;;  %v5081_v10 = vpop.xlane.xlu1 %5080  ;;  %v16137_v51 = vpop.eup %10337 }
 0x4d6   :  { %v7709_v29 = vsel %vm7518_vm0, %v17722_v50, %v7708_v61  ;;  %v9947_v45 = vunpack.c.l.bf16 %v16107_v24  ;;  %v7439_v41 = vrot.slane %v6112_v22, %v10724_v17  ;;  %v7411_v48 = vrot.slane %v6105_v56, %v10724_v17  ;;  %v5097_v22 = vpop.xlane.xlu0 %5096 }
 0x4d7   :  { %v7710_v12 = vsel %vm7520_vm3, %v17723_v28, %v7709_v29  ;;  %v7443_v39 = vrot.slane %v6113_v6, %v10724_v17  ;;  %v6114_v40 = vsel %vm5602_vm10, %v5346_v58, %v5858_v59  ;;  %v6115_v52 = vsel %vm5603_vm2, %v5347_v60, %v5859_v25  ;;  %v17728_v29 = vld [vmem:[#allocation80_spill] sm:$0xff] }
 0x4d8   :  { %v5866_v26 = vmul.f32 0.01, %v5354_v19  ;;  %v17724_v44 = vrot.slane %v15951_v9, %v10724_v17  ;;  %v9948_v61 = vunpack.c.h.bf16 %v16107_v24  ;;  %v8017_v56 = vsel %vm7803_vm6, %v16137_v51, 0.0 }
 0x4d9   :  { %v16147_v6 = vsel %vm6221_vm8, -1e+09, %v7710_v12  ;;  %v17725_v60 = vrot.slane %v15966_v13, %v10724_v17  ;;  %v5867_v25 = vmul.f32 0.01, %v5355_v15  ;;  %8018 = vadd.xlane.f32.xlu1 %v8017_v56  ;;  %vm16157_vm11 = vcmp.eq.f32.partialorder %v9947_v45, 0.0  ;;  %v7833_v50 = vpop.xlane.xlu1 %7832 }
 0x4da   :  { %v7714_v55 = vsel %vm7514_vm14, %v17724_v44, %v15977_v5  ;;  %vm5611_vm12 = vcmp.ge.f32.partialorder %v5355_v15, 0.0  ;;  %vm5610_vm13 = vcmp.ge.f32.partialorder %v5354_v19, 0.0  ;;  %v7909_v28 = vsub.f32 %v17728_v29, %v7833_v50 }
 0x4db   :  { %v7715_v58 = vsel %vm7516_vm15, %v7403_v42, %v7714_v55  ;;  %v7721_v59 = vsel %vm7514_vm14, %v17725_v60, %v15963_v33  ;;  %v5356_v42 = vadd.f32 %v11427_v38, %v16013_v4  ;;  %vm6223_vm10 = vcmp.eq.f32.partialorder %v9948_v61, 0.0 }
 0x4dc   :  { %v7716_v5 = vsel %vm7518_vm0, %v7407_v53, %v7715_v58  ;;  %v7722_v47 = vsel %vm7516_vm15, %v7435_v14, %v7721_v59  ;;  %v7447_v53 = vrot.slane %v6114_v40, %v10724_v17  ;;  %v7451_v14 = vrot.slane %v6115_v52, %v10724_v17  ;;  %v5099_v52 = vpop.xlane.xlu0 %5098 }
 0x4dd   :  { %v7717_v13 = vsel %vm7520_vm3, %v7411_v48, %v7716_v5  ;;  %v7723_v33 = vsel %vm7518_vm0, %v7439_v41, %v7722_v47  ;;  %v7885_v4 = vsel %vm7803_vm6, %v16147_v6, -inf  ;;  %v6123_v44 = vsel %vm5611_vm12, %v5355_v15, %v5867_v25  ;;  %v5083_v25 = vpop.xlane.xlu1 %5082  ;;  %v16203_v47 = vld [vmem:[%s16691_s1 + $0x78] sm:$0xff]   ;;  %s10491_s1 = smov [#allocation3]  }
 0x4de   :  { %v7724_v12 = vsel %vm7520_vm3, %v7443_v39, %v7723_v33  ;;  %v5348_v48 = vadd.f32 %v11427_v38, %v16042_v49  ;;  %v7950_v41 = vmul.f32 1.442695, %v7909_v28  ;;  %7886 = vmax.xlane.f32.xlu1 %v7885_v4  ;;  %v16179_v55 = vsel %vm16157_vm11, -1e+09, %v7717_v13  ;;  %v16181_v56 = vpop.eup %10339  ;;  %s9794_s12 = sshll.u32 %s10491_s1, 4  ;;  %s9795_s12 = int_to_ptr.vmem [resolvable:$true] %s9794_s12 }
 0x4df   :  { %v6122_v39 = vsel %vm5610_vm13, %v5354_v19, %v5866_v26  ;;  %v5868_v58 = vmul.f32 0.01, %v5356_v42  ;;  %v5349_v40 = vadd.f32 %v11427_v38, %v16090_v2  ;;  %v16185_v60 = vsel %vm6223_vm10, -1e+09, %v7724_v12  ;;  %v17729_v12 = vld [vmem:[#allocation133_spill] sm:$0xff]  ;;  %s10465_s4 = scalar_lea.vmem %s9795_s12, 4096  ;;  %p10470_p1 = scmp.lt.s32.totalorder %s9795_s12, %s9795_s12 }
 0x4e0   :  { %vm5612_vm2 = vcmp.ge.f32.partialorder %v5356_v42, 0.0  ;;  %10341 = vpow2.f32 %v7950_v41  ;;  %v8020_v49 = vsel %vm7803_vm6, %v16181_v56, 0.0  ;;  %v16190_v15 = vsel %vm7508_vm4, %v7451_v14, %v7447_v53  ;;  %v7836_v29 = vpop.xlane.xlu0 %7835  ;;  %p10466_p0 = scmp.ne.s32.totalorder %s9795_s12, %s10465_s4  ;;  %p10471_p2 = scmp.lt.s32.totalorder %s10465_s4, %s10465_s4 }
 0x4e1   :  { %v7483_v59 = vrot.slane %v6123_v44, %v10724_v17  ;;  %8021 = vadd.xlane.f32.xlu0 %v8020_v49  ;;  %v7888_v19 = vsel %vm7803_vm6, %v16179_v55, -inf  ;;  %v7479_v2 = vrot.slane %v6122_v39, %v10724_v17  ;;  %v5860_v26 = vmul.f32 0.01, %v5348_v48 }
 0x4e2   :  { %v5357_v9 = vadd.f32 %v11427_v38, %v16111_v18  ;;  %7889 = vmax.xlane.f32.xlu1 %v7888_v19  ;;  %v7891_v5 = vsel %vm7803_vm6, %v16185_v60, -inf  ;;  %v6124_v50 = vsel %vm5612_vm2, %v5356_v42, %v5868_v58  ;;  %vm5604_vm8 = vcmp.ge.f32.partialorder %v5348_v48, 0.0  ;;  %p10472_p3 = por %p10471_p2, %p10470_p1 }
 0x4e3   :  { %v5861_v13 = vmul.f32 0.01, %v5349_v40  ;;  %v5350_v33 = vadd.f32 %v11427_v38, %v5081_v10  ;;  %vm5605_vm11 = vcmp.ge.f32.partialorder %v5349_v40, 0.0  ;;  %v5358_v28 = vadd.f32 %v11427_v38, %v5097_v22 }
 0x4e4   :  { %v5351_v18 = vadd.f32 %v11427_v38, %v5083_v25  ;;  %v7910_v53 = vsub.f32 %v17729_v12, %v7836_v29  ;;  %v7732_v14 = vsel %vm7508_vm4, %v7483_v59, %v7479_v2  ;;  %v5359_v4 = vadd.f32 %v11427_v38, %v5099_v52  ;;  %v5085_v25 = vpop.xlane.xlu1 %5084  ;;  %v5101_v2 = vpop.xlane.xlu0 %5100  ;;  %p10473_p4 = pnand %p10472_p3, %p10466_p0 }
 0x4e5   :  { %7892 = vmax.xlane.f32.xlu0 %v7891_v5  ;;  %v16936_v44 = vunpack.c.l.bf16 %v16203_v47  ;;  %v16937_v42 = vunpack.c.h.bf16 %v16203_v47  ;;  %v7487_v41 = vrot.slane %v6124_v50, %v10724_v17  ;;  %v6116_v10 = vsel %vm5604_vm8, %v5348_v48, %v5860_v26 }
 0x4e6   :  { %v5869_v39 = vmul.f32 0.01, %v5357_v9  ;;  %v7952_v58 = vmul.f32 1.442695, %v7910_v53  ;;  %v6117_v49 = vsel %vm5605_vm11, %v5349_v40, %v5861_v13  ;;  %vm5613_vm12 = vcmp.ge.f32.partialorder %v5357_v9, 0.0 }
 0x4e7   :  { %vm5606_vm13 = vcmp.ge.f32.partialorder %v5350_v33, 0.0  ;;  %v5862_v22 = vmul.f32 0.01, %v5350_v33  ;;  %vm5614_vm10 = vcmp.ge.f32.partialorder %v5358_v28, 0.0  ;;  %v5870_v19 = vmul.f32 0.01, %v5358_v28 }
 0x4e8   :  { %v5863_v59 = vmul.f32 0.01, %v5351_v18  ;;  %v5352_v52 = vadd.f32 %v11427_v38, %v5085_v25  ;;  %v5871_v5 = vmul.f32 0.01, %v5359_v4  ;;  %vm5607_vm4 = vcmp.ge.f32.partialorder %v5351_v18, 0.0 }
 0x4e9   :  { %10343 = vpow2.f32 %v7952_v58  ;;  %v5360_v29 = vadd.f32 %v11427_v38, %v5101_v2  ;;  %v6125_v50 = vsel %vm5613_vm12, %v5357_v9, %v5869_v39  ;;  %vm5615_vm2 = vcmp.ge.f32.partialorder %v5359_v4, 0.0 }
 0x4ea   :  { %vm5608_vm8 = vcmp.ge.f32.partialorder %v5352_v52, 0.0  ;;  %v5864_v48 = vmul.f32 0.01, %v5352_v52  ;;  %v7455_v40 = vrot.slane %v6116_v10, %v10724_v17  ;;  %v6118_v26 = vsel %vm5606_vm13, %v5350_v33, %v5862_v22 }
 0x4eb   :  { %vm5616_vm11 = vcmp.ge.f32.partialorder %v5360_v29, 0.0  ;;  %v5872_v13 = vmul.f32 0.01, %v5360_v29  ;;  %vm16220_vm9 = vcmp.eq.f32.partialorder %v16936_v44, 0.0  ;;  %v7733_v53 = vsel %vm7510_vm5, %v7487_v41, %v7732_v14  ;;  %v5087_v44 = vpop.xlane.xlu1 %5086 }
 0x4ec   :  { %v6126_v58 = vsel %vm5614_vm10, %v5358_v28, %v5870_v19  ;;  %v6119_v9 = vsel %vm5607_vm4, %v5351_v18, %v5863_v59  ;;  %vm16228_vm12 = vcmp.eq.f32.partialorder %v16937_v42, 0.0  ;;  %v7459_v10 = vrot.slane %v6117_v49, %v10724_v17  ;;  %v5103_v18 = vpop.xlane.xlu0 %5102 }
 0x4ed   :  { %v16232_v33 = vpop.eup %10341  ;;  %v7491_v22 = vrot.slane %v6125_v50, %v10724_v17  ;;  %v6127_v25 = vsel %vm5615_vm2, %v5359_v4, %v5871_v5  ;;  %v6120_v2 = vsel %vm5608_vm8, %v5352_v52, %v5864_v48  ;;  %v7463_v14 = vrot.slane %v6118_v26, %v10724_v17 }
 0x4ee   :  { %v6128_v41 = vsel %vm5616_vm11, %v5360_v29, %v5872_v13  ;;  %v5353_v28 = vadd.f32 %v11427_v38, %v5087_v44  ;;  %v8023_v19 = vsel %vm7803_vm6, %v16232_v33, 0.0  ;;  %v7726_v59 = vsel %vm7510_vm5, %v7455_v40, %v16190_v15  ;;  %v17734_v13 = vld [vmem:[#allocation86_spill] sm:$0xff] }
 0x4ef   :  { %v7495_v42 = vrot.slane %v6126_v58, %v10724_v17  ;;  %v7467_v49 = vrot.slane %v6119_v9, %v10724_v17  ;;  %v5361_v4 = vadd.f32 %v11427_v38, %v5103_v18  ;;  %8024 = vadd.xlane.f32.xlu1 %v8023_v19  ;;  %v7499_v52 = vrot.slane %v6127_v25, %v10724_v17  ;;  %v7839_v15 = vpop.xlane.xlu1 %7838 }
 0x4f0   :  { %v7471_v5 = vrot.slane %v6120_v2, %v10724_v17  ;;  %vm5609_vm13 = vcmp.ge.f32.partialorder %v5353_v28, 0.0  ;;  %v5865_v44 = vmul.f32 0.01, %v5353_v28  ;;  %v7727_v29 = vsel %vm7512_vm7, %v7459_v10, %v7726_v59 }
 0x4f1   :  { %v7503_v50 = vrot.slane %v6128_v41, %v10724_v17  ;;  %vm5617_vm10 = vcmp.ge.f32.partialorder %v5361_v4, 0.0  ;;  %v5873_v48 = vmul.f32 0.01, %v5361_v4  ;;  %v7734_v40 = vsel %vm7512_vm7, %v7491_v22, %v7733_v53 }
 0x4f2   :  { %v6121_v26 = vsel %vm5609_vm13, %v5353_v28, %v5865_v44  ;;  %v7911_v58 = vsub.f32 %v17734_v13, %v7839_v15  ;;  %v7728_v38 = vsel %vm7514_vm14, %v7463_v14, %v7727_v29  ;;  %v7735_v18 = vsel %vm7514_vm14, %v7495_v42, %v7734_v40  ;;  %v17736_v13 = vld [vmem:[#allocation91_spill] sm:$0xff] }
 0x4f3   :  { %v7475_v9 = vrot.slane %v6121_v26, %v10724_v17  ;;  %v6129_v25 = vsel %vm5617_vm10, %v5361_v4, %v5873_v48  ;;  %v7729_v2 = vsel %vm7516_vm15, %v7467_v49, %v7728_v38  ;;  %v7736_v59 = vsel %vm7516_vm15, %v7499_v52, %v7735_v18  ;;  %v7842_v53 = vpop.xlane.xlu1 %7841  ;;  %v17735_v4 = vld [vmem:[#allocation85_spill] sm:$0xff] }
 0x4f4   :  { %v7507_v10 = vrot.slane %v6129_v25, %v10724_v17  ;;  %v7954_v41 = vmul.f32 1.442695, %v7911_v58  ;;  %v7730_v19 = vsel %vm7518_vm0, %v7471_v5, %v7729_v2  ;;  %v7737_v28 = vsel %vm7518_vm0, %v7503_v50, %v7736_v59  ;;  %v17737_v25 = vld [vmem:[#allocation120_spill] sm:$0xff] }
 0x4f5   :  { %v7731_v22 = vsel %vm7520_vm3, %v7475_v9, %v7730_v19  ;;  %v7912_v44 = vsub.f32 %v17735_v4, %v7842_v53  ;;  %vm17742_vm5 = vmmov 0  }
 0x4f6   :  { %v16260_v14 = vpop.eup %10343  ;;  %10345 = vpow2.f32 %v7954_v41  ;;  %v16265_v42 = vsel %vm16220_vm9, -1e+09, %v7731_v22  ;;  %v7738_v17 = vsel %vm7520_vm3, %v7507_v10, %v7737_v28  ;;  %v17738_v22 = vld [vmem:[#allocation68_spill] sm:$0xff] }
 0x4f7   :  { %v7894_v49 = vsel %vm7803_vm6, %v16265_v42, -inf  ;;  %v16272_v52 = vsel %vm16228_vm12, -1e+09, %v7738_v17  ;;  %v7956_v5 = vmul.f32 1.442695, %v7912_v44  ;;  %v8026_v12 = vsel %vm7803_vm6, %v16260_v14, 0.0 }
 0x4f8   :  { %7895 = vmax.xlane.f32.xlu0 %v7894_v49  ;;  %v7897_v29 = vsel %vm7803_vm6, %v16272_v52, -inf  ;;  %v17739_v44 = vld [vmem:[#allocation6_spill] sm:$0xff]  ;;  %v17740_v49 = vld [vmem:[#allocation145_spill] sm:$0xff] }
 0x4f9   :  { %7898 = vmax.xlane.f32.xlu1 %v7897_v29  ;;  %10347 = vpow2.f32 %v7956_v5  ;;  %v8189_v17 = vpack.c.bf16 %v17739_v44, %v17739_v44  ;;  %v17741_v5 = vunpack.c.l.bf16 %v17740_v49 }
 0x4fc   :  { %8027 = vadd.xlane.f32.xlu0 %v8026_v12 }
 0x503   :  { %v16278_v50 = vpop.eup %10345 }
 0x504   :  { %v8029_v48 = vsel %vm7803_vm6, %v16278_v50, 0.0 }
 0x505   :  { %8030 = vadd.xlane.f32.xlu1 %v8029_v48 }
 0x506   :  { %v16282_v39 = vpop.eup %10347 }
 0x507   :  { %v8032_v15 = vsel %vm7803_vm6, %v16282_v39, 0.0 }
 0x508   :  { %8033 = vadd.xlane.f32.xlu0 %v8032_v15 }
 0x512   :  { %v7998_v40 = vpop.xlane.xlu0 %7997 }
 0x513   :  { %10349 = vrcp.f32 %v7998_v40 }
 0x516   :  { %v7845_v26 = vpop.xlane.xlu0 %7844 }
 0x517   :  { %v7913_v58 = vsub.f32 %v17736_v13, %v7845_v26 }
 0x519   :  { %v7958_v38 = vmul.f32 1.442695, %v7913_v58  ;;  %v8001_v18 = vpop.xlane.xlu1 %8000  ;;  %v8303_v58 = vsel %vm8255_vm1, %v8189_v17, 0 }
 0x51b   :  { %v7848_v9 = vpop.xlane.xlu0 %7847  ;;  %10351 = vpow2.f32 %v7958_v38 }
 0x51c   :  { %v7914_v2 = vsub.f32 %v17737_v25, %v7848_v9  ;;  %10353 = vrcp.f32 %v8001_v18 }
 0x51e   :  { %v7960_v10 = vmul.f32 1.442695, %v7914_v2  ;;  %v17743_v2 = vld [vmem:[#allocation136_spill] sm:$0xff] }
 0x520   :  { %10355 = vpow2.f32 %v7960_v10  ;;  %v7851_v41 = vpop.xlane.xlu1 %7850  ;;  %v10350_v19 = vpop.eup %10349 }
 0x521   :  { %v7915_v59 = vsub.f32 %v15578_v27, %v7851_v41  ;;  %v8124_v28 = vmul.f32 %v10350_v19, %v17738_v22  ;;  %v17744_v19 = vld [vmem:[#allocation8_spill] sm:$0xff] }
 0x523   :  { %v8004_v53 = vpop.xlane.xlu0 %8003  ;;  %v7962_v4 = vmul.f32 1.442695, %v7915_v59  ;;  %v8156_v29 = vmul.f32 %v17741_v5, %v8124_v28  ;;  %v8190_v59 = vpack.c.bf16 %v17744_v19, %v17744_v19 }
 0x524   :  { %10357 = vrcp.f32 %v8004_v53  ;;  %v17745_v53 = vunpack.c.h.bf16 %v17740_v49 }
 0x525   :  { %10359 = vpow2.f32 %v7962_v4  ;;  %v8220_v40 = vpack.c.bf16 %v8156_v29, %v8156_v29  ;;  %v8349_v5 = vsel %vm8255_vm1, %v8190_v59, 0 }
 0x526   :  { %v7854_v12 = vpop.xlane.xlu1 %7853 }
 0x527   :  { %v7916_v48 = vsub.f32 %v15630_v11, %v7854_v12  ;;  %v7857_v15 = vpop.xlane.xlu0 %7856  ;;  %10086 = vmatmul.mubr.msk.bf16.vlgmr.msra.gmra.mxu0 %vm7803_vm6, %v8220_v40 }
 0x528   :  { %v7917_v26 = vsub.f32 %v15642_v35, %v7857_v15  ;;  %v16298_v38 = vpop.eup %10351  ;;  %10090 = vmatpush3.bf16.msra.mxu0 %v8303_v58  ;;  %10091 = vmatprep.mubr.msk.bf16.mxu0 %vm17742_vm5, %v17719_v23  ;;  %v17746_v15 = vld [vmem:[#allocation49_spill] sm:$0xff] }
 0x529   :  { %v7964_v27 = vmul.f32 1.442695, %v7916_v48  ;;  %v10354_v25 = vpop.eup %10353  ;;  %v8035_v35 = vsel %vm7803_vm6, %v16298_v38, 0.0  ;;  %10095 = vmatprep.subr.bf16.mxu0 %v17719_v23 }
 0x52a   :  { %v7966_v13 = vmul.f32 1.442695, %v7917_v26  ;;  %8036 = vadd.xlane.f32.xlu1 %v8035_v35  ;;  %v8125_v18 = vmul.f32 %v10354_v25, %v17743_v2  ;;  %v17748_v26 = vld [vmem:[#allocation7_spill] sm:$0xff] }
 0x52b   :  { %10361 = vpow2.f32 %v7964_v27  ;;  %v8191_v27 = vpack.c.bf16 %v17748_v26, %v17748_v26 }
 0x52c   :  { %v7860_v9 = vpop.xlane.xlu0 %7859  ;;  %10363 = vpow2.f32 %v7966_v13  ;;  %v8157_v22 = vmul.f32 %v17745_v53, %v8125_v18 }
 0x52d   :  { %v7918_v11 = vsub.f32 %v15675_v32, %v7860_v9  ;;  %v16307_v41 = vpop.eup %10355  ;;  %v8395_v19 = vsel %vm8255_vm1, %v8191_v27, 0 }
 0x52e   :  { %v8038_v32 = vsel %vm7803_vm6, %v16307_v41, 0.0  ;;  %v8221_v44 = vpack.c.bf16 %v8157_v22, %v8157_v22 }
 0x52f   :  { %v7968_v10 = vmul.f32 1.442695, %v7918_v11  ;;  %8039 = vadd.xlane.f32.xlu0 %v8038_v32 }
 0x530   :  { %10092 = vmatmul.mubr.msk.bf16.vlgmr.msra.gmra.mxu0 %vm7803_vm6, %v8221_v44 }
 0x531   :  { %10365 = vpow2.f32 %v7968_v10  ;;  %v10358_v4 = vpop.eup %10357  ;;  %10096 = vmatpush3.bf16.msra.mxu0 %v8349_v5  ;;  %10097 = vmatprep.mubr.msk.bf16.mxu0 %vm17742_vm5, %v17719_v23 }
 0x532   :  { %v8007_v28 = vpop.xlane.xlu1 %8006  ;;  %v8126_v17 = vmul.f32 %v10358_v4, %v15616_v31  ;;  %v16318_v29 = vpop.eup %10359  ;;  %10101 = vmatprep.subr.bf16.mxu0 %v17719_v23  ;;  %v17747_v31 = vunpack.c.l.bf16 %v17746_v15 }
 0x533   :  { %10367 = vrcp.f32 %v8007_v28  ;;  %v8041_v48 = vsel %vm7803_vm6, %v16318_v29, 0.0 }
 0x534   :  { %v8158_v40 = vmul.f32 %v17747_v31, %v8126_v17  ;;  %8042 = vadd.xlane.f32.xlu1 %v8041_v48  ;;  %v17749_v17 = vld [vmem:[#allocation9_spill] sm:$0xff] }
 0x535   :  { %v8192_v5 = vpack.c.bf16 %v17749_v17, %v17749_v17 }
 0x536   :  { %v8222_v2 = vpack.c.bf16 %v8158_v40, %v8158_v40 }
 0x537   :  { %v7863_v12 = vpop.xlane.xlu1 %7862  ;;  %v8441_v26 = vsel %vm8255_vm1, %v8192_v5, 0 }
 0x538   :  { %v7919_v49 = vsub.f32 %v15764_v21, %v7863_v12  ;;  %v16330_v58 = vpop.eup %10361  ;;  %10098 = vmatmul.mubr.msk.bf16.vlgmr.msra.gmra.mxu0 %vm7803_vm6, %v8222_v2  ;;  %v17752_v2 = vld [vmem:[#allocation57_spill] sm:$0xff] }
 0x539   :  { %v16332_v11 = vpop.eup %10363  ;;  %v8044_v35 = vsel %vm7803_vm6, %v16330_v58, 0.0  ;;  %10102 = vmatpush3.bf16.msra.mxu0 %v8395_v19  ;;  %10103 = vmatprep.mubr.msk.bf16.mxu0 %vm17742_vm5, %v17719_v23 }
 0x53a   :  { %v7970_v13 = vmul.f32 1.442695, %v7919_v49  ;;  %8045 = vadd.xlane.f32.xlu0 %v8044_v35  ;;  %v8047_v18 = vsel %vm7803_vm6, %v16332_v11, 0.0  ;;  %10107 = vmatprep.subr.bf16.mxu0 %v17719_v23  ;;  %v17750_v49 = vunpack.c.h.bf16 %v17746_v15 }
 0x53b   :  { %v8010_v9 = vpop.xlane.xlu0 %8009  ;;  %v7866_v25 = vpop.xlane.xlu1 %7865  ;;  %8048 = vadd.xlane.f32.xlu1 %v8047_v18  ;;  %v17753_v18 = vunpack.c.l.bf16 %v17752_v2 }
 0x53c   :  { %10369 = vpow2.f32 %v7970_v13  ;;  %v7920_v21 = vsub.f32 %v15808_v0, %v7866_v25  ;;  %v17751_v25 = vld [vmem:[#allocation10_spill] sm:$0xff] }
 0x53d   :  { %10371 = vrcp.f32 %v8010_v9 }
 0x53e   :  { %v7972_v10 = vmul.f32 1.442695, %v7920_v21  ;;  %v16343_v0 = vpop.eup %10365  ;;  %v8193_v21 = vpack.c.bf16 %v17751_v25, %v17751_v25 }
 0x53f   :  { %v8050_v28 = vsel %vm7803_vm6, %v16343_v0, 0.0 }
 0x540   :  { %v7869_v59 = vpop.xlane.xlu0 %7868  ;;  %10373 = vpow2.f32 %v7972_v10  ;;  %v10368_v22 = vpop.eup %10367  ;;  %8051 = vadd.xlane.f32.xlu0 %v8050_v28 }
 0x541   :  { %v7921_v53 = vsub.f32 %v15850_v8, %v7869_v59  ;;  %v8127_v4 = vmul.f32 %v10368_v22, %v15739_v62 }
 0x543   :  { %v7974_v32 = vmul.f32 1.442695, %v7921_v53  ;;  %v8159_v8 = vmul.f32 %v17750_v49, %v8127_v4 }
 0x544   :  { %v7872_v44 = vpop.xlane.xlu0 %7871 }
 0x545   :  { %10375 = vpow2.f32 %v7974_v32  ;;  %v7922_v12 = vsub.f32 %v15881_v3, %v7872_v44  ;;  %v8223_v31 = vpack.c.bf16 %v8159_v8, %v8159_v8  ;;  %v8487_v32 = vsel %vm8255_vm1, %v8193_v21, 0 }
 0x547   :  { %v7976_v48 = vmul.f32 1.442695, %v7922_v12  ;;  %10104 = vmatmul.mubr.msk.bf16.vlgmr.msra.gmra.mxu0 %vm7803_vm6, %v8223_v31 }
 0x548   :  { %10108 = vmatpush3.bf16.msra.mxu0 %v8441_v26  ;;  %10109 = vmatprep.mubr.msk.bf16.mxu0 %vm17742_vm5, %v17719_v23  ;;  %v17755_v26 = vunpack.c.h.bf16 %v17752_v2 }
 0x549   :  { %10377 = vpow2.f32 %v7976_v48  ;;  %v16357_v27 = vpop.eup %10369  ;;  %10113 = vmatprep.subr.bf16.mxu0 %v17719_v23  ;;  %v17754_v48 = vld [vmem:[#allocation11_spill] sm:$0xff] }
 0x54a   :  { %v8013_v40 = vpop.xlane.xlu1 %8012  ;;  %v10372_v62 = vpop.eup %10371  ;;  %v8053_v3 = vsel %vm7803_vm6, %v16357_v27, 0.0  ;;  %v8194_v31 = vpack.c.bf16 %v17754_v48, %v17754_v48 }
 0x54b   :  { %10379 = vrcp.f32 %v8013_v40  ;;  %8054 = vadd.xlane.f32.xlu1 %v8053_v3  ;;  %v8128_v15 = vmul.f32 %v10372_v62, %v15827_v34 }
 0x54d   :  { %v16365_v9 = vpop.eup %10373  ;;  %v8160_v10 = vmul.f32 %v17753_v18, %v8128_v15 }
 0x54e   :  { %v7875_v13 = vpop.xlane.xlu1 %7874  ;;  %v8056_v19 = vsel %vm7803_vm6, %v16365_v9, 0.0 }
 0x54f   :  { %v7923_v35 = vsub.f32 %v15970_v43, %v7875_v13  ;;  %8057 = vadd.xlane.f32.xlu0 %v8056_v19  ;;  %v8224_v53 = vpack.c.bf16 %v8160_v10, %v8160_v10  ;;  %v17756_v19 = vld [vmem:[#allocation12_spill] sm:$0xff] }
 0x551   :  { %v7978_v59 = vmul.f32 1.442695, %v7923_v35  ;;  %10110 = vmatmul.mubr.msk.bf16.vlgmr.msra.gmra.mxu0 %vm7803_vm6, %v8224_v53 }
 0x552   :  { %v16374_v28 = vpop.eup %10375  ;;  %10114 = vmatpush3.bf16.msra.mxu0 %v8487_v32  ;;  %10115 = vmatprep.mubr.msk.bf16.mxu0 %vm17742_vm5, %v17719_v23 }
 0x553   :  { %v7878_v22 = vpop.xlane.xlu1 %7877  ;;  %10381 = vpow2.f32 %v7978_v59  ;;  %v8059_v4 = vsel %vm7803_vm6, %v16374_v28, 0.0  ;;  %10119 = vmatprep.subr.bf16.mxu0 %v17719_v23  ;;  %v8195_v59 = vpack.c.bf16 %v17756_v19, %v17756_v19  ;;  %v17761_v19 = vld [vmem:[#allocation38_spill] sm:$0xff] }
 0x554   :  { %v7924_v34 = vsub.f32 %v16002_v37, %v7878_v22  ;;  %8060 = vadd.xlane.f32.xlu1 %v8059_v4 }
 0x555   :  { %v8016_v43 = vpop.xlane.xlu0 %8015 }
 0x556   :  { %10383 = vrcp.f32 %v8016_v43  ;;  %v7980_v44 = vmul.f32 1.442695, %v7924_v34  ;;  %v16384_v17 = vpop.eup %10377  ;;  %v17757_v34 = vld [vmem:[#allocation33_spill] sm:$0xff] }
 0x557   :  { %v8062_v12 = vsel %vm7803_vm6, %v16384_v17, 0.0  ;;  %v17758_v32 = vunpack.c.l.bf16 %v17757_v34 }
 0x558   :  { %10385 = vpow2.f32 %v7980_v44  ;;  %v10380_v37 = vpop.eup %10379  ;;  %8063 = vadd.xlane.f32.xlu0 %v8062_v12  ;;  %v8579_v12 = vsel %vm8255_vm1, %v8195_v59, 0  ;;  %v17762_v59 = vunpack.c.l.bf16 %v17761_v19 }
 0x559   :  { %v8129_v8 = vmul.f32 %v10380_v37, %v15936_v46 }
 0x55a   :  { %v7881_v5 = vpop.xlane.xlu0 %7880 }
 0x55b   :  { %v7925_v49 = vsub.f32 %v16058_v54, %v7881_v5  ;;  %v8161_v62 = vmul.f32 %v17755_v26, %v8129_v8  ;;  %v8533_v54 = vsel %vm8255_vm1, %v8194_v31, 0 }
 0x55d   :  { %v7982_v40 = vmul.f32 1.442695, %v7925_v49  ;;  %v8225_v13 = vpack.c.bf16 %v8161_v62, %v8161_v62 }
 0x55e   :  { %v7884_v3 = vpop.xlane.xlu0 %7883 }
 0x55f   :  { %10387 = vpow2.f32 %v7982_v40  ;;  %v7926_v15 = vsub.f32 %v16094_v1, %v7884_v3  ;;  %10116 = vmatmul.mubr.msk.bf16.vlgmr.msra.gmra.mxu0 %vm7803_vm6, %v8225_v13 }
 0x560   :  { %v16397_v21 = vpop.eup %10381  ;;  %10120 = vmatpush3.bf16.msra.mxu0 %v8533_v54  ;;  %10121 = vmatprep.mubr.msk.bf16.mxu0 %vm17742_vm5, %v17719_v23 }
 0x561   :  { %v7984_v25 = vmul.f32 1.442695, %v7926_v15  ;;  %v8065_v35 = vsel %vm7803_vm6, %v16397_v21, 0.0  ;;  %10125 = vmatprep.subr.bf16.mxu0 %v17719_v23  ;;  %v17759_v15 = vld [vmem:[#allocation13_spill] sm:$0xff] }
 0x562   :  { %v8019_v46 = vpop.xlane.xlu1 %8018  ;;  %8066 = vadd.xlane.f32.xlu1 %v8065_v35  ;;  %v8196_v13 = vpack.c.bf16 %v17759_v15, %v17759_v15 }
 0x563   :  { %10389 = vpow2.f32 %v7984_v25  ;;  %v10384_v1 = vpop.eup %10383  ;;  %v17760_v25 = vunpack.c.h.bf16 %v17757_v34  ;;  %v17763_v34 = vld [vmem:[#allocation14_spill] sm:$0xff] }
 0x564   :  { %10391 = vrcp.f32 %v8019_v46  ;;  %v8130_v2 = vmul.f32 %v10384_v1, %v16040_v57 }
 0x565   :  { %v16405_v18 = vpop.eup %10385 }
 0x566   :  { %v8068_v22 = vsel %vm7803_vm6, %v16405_v18, 0.0  ;;  %v8162_v43 = vmul.f32 %v17758_v32, %v8130_v2  ;;  %v8625_v2 = vsel %vm8255_vm1, %v8196_v13, 0  ;;  %v8197_v32 = vpack.c.bf16 %v17763_v34, %v17763_v34 }
 0x567   :  { %v7887_v10 = vpop.xlane.xlu1 %7886  ;;  %8069 = vadd.xlane.f32.xlu0 %v8068_v22 }
 0x568   :  { %v7927_v53 = vsub.f32 %v16147_v6, %v7887_v10  ;;  %v8226_v37 = vpack.c.bf16 %v8162_v43, %v8162_v43 }
 0x56a   :  { %v7986_v4 = vmul.f32 1.442695, %v7927_v53  ;;  %v8022_v44 = vpop.xlane.xlu0 %8021  ;;  %10122 = vmatmul.mubr.msk.bf16.vlgmr.msra.gmra.mxu0 %vm7803_vm6, %v8226_v37  ;;  %v8671_v37 = vsel %vm8255_vm1, %v8197_v32, 0 }
 0x56b   :  { %10393 = vrcp.f32 %v8022_v44  ;;  %v7890_v57 = vpop.xlane.xlu1 %7889  ;;  %10126 = vmatpush3.bf16.msra.mxu0 %v8579_v12  ;;  %10127 = vmatprep.mubr.msk.bf16.mxu0 %vm17742_vm5, %v17719_v23 }
 0x56c   :  { %10395 = vpow2.f32 %v7986_v4  ;;  %v7928_v5 = vsub.f32 %v16179_v55, %v7890_v57  ;;  %v16417_v6 = vpop.eup %10387  ;;  %10131 = vmatprep.subr.bf16.mxu0 %v17719_v23 }
 0x56d   :  { %v8071_v48 = vsel %vm7803_vm6, %v16417_v6, 0.0 }
 0x56e   :  { %v7988_v49 = vmul.f32 1.442695, %v7928_v5  ;;  %v7893_v8 = vpop.xlane.xlu0 %7892  ;;  %8072 = vadd.xlane.f32.xlu1 %v8071_v48 }
 0x56f   :  { %v7929_v31 = vsub.f32 %v16185_v60, %v7893_v8 }
 0x570   :  { %10397 = vpow2.f32 %v7988_v49  ;;  %v16425_v55 = vpop.eup %10389 }
 0x571   :  { %v7990_v40 = vmul.f32 1.442695, %v7929_v31  ;;  %v10392_v26 = vpop.eup %10391  ;;  %v8074_v62 = vsel %vm7803_vm6, %v16425_v55, 0.0 }
 0x572   :  { %8075 = vadd.xlane.f32.xlu0 %v8074_v62  ;;  %v8131_v3 = vmul.f32 %v10392_v26, %v16137_v51 }
 0x573   :  { %10399 = vpow2.f32 %v7990_v40 }
 0x574   :  { %v8163_v54 = vmul.f32 %v17760_v25, %v8131_v3  ;;  %v17765_v3 = vunpack.c.h.bf16 %v17761_v19 }
 0x576   :  { %v8227_v60 = vpack.c.bf16 %v8163_v54, %v8163_v54 }
 0x578   :  { %v10394_v46 = vpop.eup %10393  ;;  %v8025_v35 = vpop.xlane.xlu1 %8024  ;;  %10128 = vmatmul.mubr.msk.bf16.vlgmr.msra.gmra.mxu0 %vm7803_vm6, %v8227_v60 }
 0x579   :  { %v16434_v1 = vpop.eup %10395  ;;  %10401 = vrcp.f32 %v8025_v35  ;;  %v8132_v10 = vmul.f32 %v10394_v46, %v16181_v56  ;;  %10132 = vmatpush3.bf16.msra.mxu0 %v8625_v2  ;;  %10133 = vmatprep.mubr.msk.bf16.mxu0 %vm17742_vm5, %v17719_v23 }
 0x57a   :  { %v8077_v51 = vsel %vm7803_vm6, %v16434_v1, 0.0  ;;  %10137 = vmatprep.subr.bf16.mxu0 %v17719_v23 }
 0x57b   :  { %8078 = vadd.xlane.f32.xlu1 %v8077_v51  ;;  %v8164_v53 = vmul.f32 %v17762_v59, %v8132_v10  ;;  %v17766_v51 = vld [vmem:[#allocation16_spill] sm:$0xff] }
 0x57c   :  { %v8199_v19 = vpack.c.bf16 %v17766_v51, %v17766_v51  ;;  %v17767_v59 = vld [vmem:[#allocation132_spill] sm:$0xff] }
 0x57d   :  { %v16446_v22 = vpop.eup %10397  ;;  %v8228_v43 = vpack.c.bf16 %v8164_v53, %v8164_v53  ;;  %v17768_v53 = vunpack.c.l.bf16 %v17767_v59 }
 0x57e   :  { %v8080_v56 = vsel %vm7803_vm6, %v16446_v22, 0.0 }
 0x57f   :  { %8081 = vadd.xlane.f32.xlu0 %v8080_v56 }
 0x580   :  { %v16452_v4 = vpop.eup %10399  ;;  %10134 = vmatmul.mubr.msk.bf16.vlgmr.msra.gmra.mxu0 %vm7803_vm6, %v8228_v43  ;;  %v8763_v43 = vsel %vm8255_vm1, %v8199_v19, 0 }
 0x581   :  { %v7896_v44 = vpop.xlane.xlu0 %7895  ;;  %v8083_v57 = vsel %vm7803_vm6, %v16452_v4, 0.0  ;;  %10138 = vmatpush3.bf16.msra.mxu0 %v8671_v37  ;;  %10139 = vmatprep.mubr.msk.bf16.mxu0 %vm17742_vm5, %v17719_v23 }
 0x582   :  { %v7930_v5 = vsub.f32 %v16265_v42, %v7896_v44  ;;  %v7899_v12 = vpop.xlane.xlu1 %7898  ;;  %8084 = vadd.xlane.f32.xlu1 %v8083_v57  ;;  %10143 = vmatprep.subr.bf16.mxu0 %v17719_v23  ;;  %v17764_v42 = vld [vmem:[#allocation15_spill] sm:$0xff] }
 0x583   :  { %v7931_v49 = vsub.f32 %v16272_v52, %v7899_v12  ;;  %v8198_v62 = vpack.c.bf16 %v17764_v42, %v17764_v42 }
 0x584   :  { %v7992_v8 = vmul.f32 1.442695, %v7930_v5  ;;  %v17770_v5 = vld [vmem:[#allocation17_spill] sm:$0xff] }
 0x585   :  { %v7994_v48 = vmul.f32 1.442695, %v7931_v49  ;;  %v8028_v31 = vpop.xlane.xlu0 %8027  ;;  %v8717_v13 = vsel %vm8255_vm1, %v8198_v62, 0  ;;  %v8201_v12 = vpack.c.bf16 %v17770_v5, %v17770_v5 }
 0x586   :  { %v10402_v40 = vpop.eup %10401  ;;  %10403 = vpow2.f32 %v7992_v8 }
 0x587   :  { %10405 = vpow2.f32 %v7994_v48  ;;  %v8133_v26 = vmul.f32 %v10402_v40, %v16232_v33  ;;  %v17771_v48 = vld [vmem:[#allocation18_spill] sm:$0xff]  ;;  %v17772_v40 = vld [vmem:[#allocation123_spill] sm:$0xff] }
 0x588   :  { %10407 = vrcp.f32 %v8028_v31  ;;  %v8202_v31 = vpack.c.bf16 %v17771_v48, %v17771_v48 }
 0x589   :  { %v8165_v52 = vmul.f32 %v17765_v3, %v8133_v26  ;;  %v17773_v26 = vunpack.c.l.bf16 %v17772_v40 }
 0x58b   :  { %v8229_v15 = vpack.c.bf16 %v8165_v52, %v8165_v52 }
 0x58d   :  { %10140 = vmatmul.mubr.msk.bf16.vlgmr.msra.gmra.mxu0 %vm7803_vm6, %v8229_v15 }
 0x58e   :  { %v8031_v25 = vpop.xlane.xlu1 %8030  ;;  %10144 = vmatpush3.bf16.msra.mxu0 %v8717_v13  ;;  %10145 = vmatprep.mubr.msk.bf16.mxu0 %vm17742_vm5, %v17719_v23 }
 0x58f   :  { %10409 = vrcp.f32 %v8031_v25  ;;  %10149 = vmatprep.subr.bf16.mxu0 %v17719_v23 }
 0x591   :  { %v8034_v33 = vpop.xlane.xlu0 %8033 }
 0x592   :  { %10411 = vrcp.f32 %v8034_v33 }
 0x593   :  { %v16473_v54 = vpop.eup %10403 }
 0x594   :  { %v16475_v60 = vpop.eup %10405  ;;  %v8086_v46 = vsel %vm7803_vm6, %v16473_v54, 0.0 }
 0x595   :  { %v10408_v35 = vpop.eup %10407  ;;  %8087 = vadd.xlane.f32.xlu0 %v8086_v46  ;;  %v8089_v2 = vsel %vm7803_vm6, %v16475_v60, 0.0 }
 0x596   :  { %8090 = vadd.xlane.f32.xlu1 %v8089_v2  ;;  %v8134_v10 = vmul.f32 %v10408_v35, %v16260_v14  ;;  %v17769_v14 = vunpack.c.h.bf16 %v17767_v59  ;;  %v17774_v35 = vld [vmem:[#allocation19_spill] sm:$0xff] }
 0x597   :  { %v8203_v2 = vpack.c.bf16 %v17774_v35, %v17774_v35 }
 0x598   :  { %v8166_v34 = vmul.f32 %v17768_v53, %v8134_v10  ;;  %v17775_v10 = vunpack.c.h.bf16 %v17772_v40 }
 0x59a   :  { %v8230_v32 = vpack.c.bf16 %v8166_v34, %v8166_v34 }
 0x59c   :  { %v10410_v56 = vpop.eup %10409  ;;  %10146 = vmatmul.mubr.msk.bf16.vlgmr.msra.gmra.mxu0 %vm7803_vm6, %v8230_v32  ;;  %v17776_v32 = vld [vmem:[#allocation20_spill] sm:$0xff] }
 0x59d   :  { %10150 = vmatpush3.bf16.msra.mxu0 %v8763_v43  ;;  %10151 = vmatprep.mubr.msk.bf16.mxu0 %vm17742_vm5, %v17719_v23  ;;  %v8135_v44 = vmul.f32 %v10410_v56, %v16278_v50  ;;  %v8855_v50 = vsel %vm8255_vm1, %v8201_v12, 0  ;;  %v8204_v56 = vpack.c.bf16 %v17776_v32, %v17776_v32  ;;  %v8947_v43 = vsel %vm8255_vm1, %v8203_v2, 0  ;;  %v17779_v12 = vld [vmem:[#allocation21_spill] sm:$0xff]  ;;  %v17785_v2 = vld [vmem:[#allocation23_spill] sm:$0xff] }
 0x59e   :  { %10161 = vmatprep.subr.bf16.mxu0 %v17719_v23 }
 0x59f   :  { %v8167_v37 = vmul.f32 %v17769_v14, %v8135_v44  ;;  %v10412_v57 = vpop.eup %10411  ;;  %v8993_v5 = vsel %vm8255_vm1, %v8204_v56, 0 }
 0x5a0   :  { %v8136_v49 = vmul.f32 %v10412_v57, %v16282_v39  ;;  %v8901_v39 = vsel %vm8255_vm1, %v8202_v31, 0 }
 0x5a1   :  { %v8231_v8 = vpack.c.bf16 %v8167_v37, %v8167_v37 }
 0x5a2   :  { %v8168_v42 = vmul.f32 %v17773_v26, %v8136_v49  ;;  %v8205_v49 = vpack.c.bf16 %v17779_v12, %v17779_v12 }
 0x5a4   :  { %10152 = vmatmul.mubr.msk.bf16.vlgmr.msra.gmra.mxu0 %vm7803_vm6, %v8231_v8  ;;  %v8232_v62 = vpack.c.bf16 %v8168_v42, %v8168_v42 }
 0x5a5   :  { %10162 = vmatpush3.bf16.msra.mxu0 %v8855_v50  ;;  %10163 = vmatprep.mubr.msk.bf16.mxu0 %vm17742_vm5, %v17719_v23 }
 0x5a6   :  { %10173 = vmatprep.subr.bf16.mxu0 %v17719_v23  ;;  %10158 = vmatmul.mubr.msk.bf16.vlgmr.msra.gmra.mxu1 %vm7803_vm6, %v8232_v62  ;;  %v17781_v62 = vld [vmem:[#allocation22_spill] sm:$0xff] }
 0x5a7   :  { %10168 = vmatpush3.bf16.msra.mxu1 %v8901_v39  ;;  %10169 = vmatprep.mubr.msk.bf16.mxu1 %vm17742_vm5, %v17719_v23  ;;  %v8206_v39 = vpack.c.bf16 %v17781_v62, %v17781_v62 }
 0x5a8   :  { %10179 = vmatprep.subr.bf16.mxu1 %v17719_v23 }
 0x5b3   :  { %v8037_v3 = vpop.xlane.xlu1 %8036 }
 0x5b4   :  { %10413 = vrcp.f32 %v8037_v3  ;;  %v9039_v3 = vsel %vm8255_vm1, %v8205_v49, 0 }
 0x5b8   :  { %v8040_v52 = vpop.xlane.xlu0 %8039 }
 0x5b9   :  { %10415 = vrcp.f32 %v8040_v52  ;;  %v17782_v52 = vld [vmem:[#allocation70_spill] sm:$0xff] }
 0x5bd   :  { %v8043_v15 = vpop.xlane.xlu1 %8042 }
 0x5be   :  { %10417 = vrcp.f32 %v8043_v15  ;;  %v17783_v15 = vunpack.c.l.bf16 %v17782_v52 }
 0x5c1   :  { %v10414_v25 = vpop.eup %10413 }
 0x5c2   :  { %v8137_v46 = vmul.f32 %v10414_v25, %v16298_v38  ;;  %v17777_v38 = vld [vmem:[#allocation35_spill] sm:$0xff] }
 0x5c3   :  { %v8046_v13 = vpop.xlane.xlu0 %8045  ;;  %v17778_v44 = vunpack.c.l.bf16 %v17777_v38  ;;  %v17780_v8 = vunpack.c.h.bf16 %v17777_v38 }
 0x5c4   :  { %10419 = vrcp.f32 %v8046_v13  ;;  %v8049_v33 = vpop.xlane.xlu1 %8048  ;;  %v8169_v51 = vmul.f32 %v17775_v10, %v8137_v46  ;;  %v8207_v10 = vpack.c.bf16 %v17785_v2, %v17785_v2 }
 0x5c5   :  { %10421 = vrcp.f32 %v8049_v33 }
 0x5c6   :  { %v10416_v19 = vpop.eup %10415  ;;  %v8233_v53 = vpack.c.bf16 %v8169_v51, %v8169_v51  ;;  %v9085_v51 = vsel %vm8255_vm1, %v8206_v39, 0 }
 0x5c7   :  { %v8138_v34 = vmul.f32 %v10416_v19, %v16307_v41 }
 0x5c8   :  { %10164 = vmatmul.mubr.msk.bf16.vlgmr.msra.gmra.mxu0 %vm7803_vm6, %v8233_v53  ;;  %v17786_v53 = vld [vmem:[#allocation143_spill] sm:$0xff] }
 0x5c9   :  { %v8052_v59 = vpop.xlane.xlu0 %8051  ;;  %v8170_v14 = vmul.f32 %v17778_v44, %v8138_v34  ;;  %10174 = vmatpush3.bf16.msra.mxu0 %v8947_v43  ;;  %10175 = vmatprep.mubr.msk.bf16.mxu0 %vm17742_vm5, %v17719_v23  ;;  %v17787_v34 = vunpack.c.l.bf16 %v17786_v53  ;;  %v9131_v43 = vsel %vm8255_vm1, %v8207_v10, 0  ;;  %v17790_v12 = vunpack.c.h.bf16 %v17786_v53  ;;  %v17795_v10 = vld [vmem:[#allocation28_spill] sm:$0xff] }
 0x5ca   :  { %10423 = vrcp.f32 %v8052_v59  ;;  %10185 = vmatprep.subr.bf16.mxu0 %v17719_v23 }
 0x5cb   :  { %v10418_v37 = vpop.eup %10417  ;;  %v8234_v57 = vpack.c.bf16 %v8170_v14, %v8170_v14 }
 0x5cc   :  { %v8139_v41 = vmul.f32 %v10418_v37, %v16318_v29 }
 0x5cd   :  { %10170 = vmatmul.mubr.msk.bf16.vlgmr.msra.gmra.mxu1 %vm7803_vm6, %v8234_v57 }
 0x5ce   :  { %10180 = vmatpush3.bf16.msra.mxu1 %v8993_v5  ;;  %v8171_v48 = vmul.f32 %v17780_v8, %v8139_v41  ;;  %10181 = vmatprep.mubr.msk.bf16.mxu1 %vm17742_vm5, %v17719_v23  ;;  %v17789_v41 = vld [vmem:[#allocation25_spill] sm:$0xff] }
 0x5cf   :  { %10191 = vmatprep.subr.bf16.mxu1 %v17719_v23  ;;  %v8209_v5 = vpack.c.bf16 %v17789_v41, %v17789_v41 }
 0x5d0   :  { %v8235_v29 = vpack.c.bf16 %v8171_v48, %v8171_v48 }
 0x5d1   :  { %v10420_v31 = vpop.eup %10419 }
 0x5d2   :  { %v10422_v26 = vpop.eup %10421  ;;  %v8140_v42 = vmul.f32 %v10420_v31, %v16330_v58  ;;  %10176 = vmatmul.mubr.msk.bf16.vlgmr.msra.gmra.mxu0 %vm7803_vm6, %v8235_v29  ;;  %v9223_v29 = vsel %vm8255_vm1, %v8209_v5, 0  ;;  %v17798_v5 = vunpack.c.h.bf16 %v15793_v20 }
 0x5d3   :  { %v8141_v50 = vmul.f32 %v10422_v26, %v16332_v11  ;;  %10186 = vmatpush3.bf16.msra.mxu0 %v9039_v3  ;;  %10187 = vmatprep.mubr.msk.bf16.mxu0 %vm17742_vm5, %v17719_v23  ;;  %v17784_v11 = vunpack.c.h.bf16 %v17782_v52  ;;  %v17793_v3 = vld [vmem:[#allocation27_spill] sm:$0xff] }
 0x5d4   :  { %v8055_v40 = vpop.xlane.xlu1 %8054  ;;  %v8172_v13 = vmul.f32 %v17783_v15, %v8140_v42  ;;  %10197 = vmatprep.subr.bf16.mxu0 %v17719_v23  ;;  %v17792_v42 = vunpack.c.l.bf16 %v15710_v16  ;;  %v8211_v52 = vpack.c.bf16 %v17793_v3, %v17793_v3 }
 0x5d5   :  { %10425 = vrcp.f32 %v8055_v40  ;;  %v8173_v46 = vmul.f32 %v17784_v11, %v8141_v50  ;;  %v17791_v40 = vld [vmem:[#allocation26_spill] sm:$0xff] }
 0x5d6   :  { %v8236_v58 = vpack.c.bf16 %v8172_v13, %v8172_v13  ;;  %v8210_v26 = vpack.c.bf16 %v17791_v40, %v17791_v40 }
 0x5d7   :  { %v10424_v33 = vpop.eup %10423  ;;  %v8237_v59 = vpack.c.bf16 %v8173_v46, %v8173_v46 }
 0x5d8   :  { %v8058_v25 = vpop.xlane.xlu0 %8057  ;;  %v8142_v35 = vmul.f32 %v10424_v33, %v16343_v0  ;;  %10182 = vmatmul.mubr.msk.bf16.vlgmr.msra.gmra.mxu1 %vm7803_vm6, %v8236_v58  ;;  %v17788_v0 = vld [vmem:[#allocation24_spill] sm:$0xff]  ;;  %v9269_v13 = vsel %vm8255_vm1, %v8210_v26, 0  ;;  %v17794_v33 = vunpack.c.h.bf16 %v15710_v16  ;;  %v9315_v16 = vsel %vm8255_vm1, %v8211_v52, 0  ;;  %v17799_v26 = vld [vmem:[#allocation30_spill] sm:$0xff] }
 0x5d9   :  { %10427 = vrcp.f32 %v8058_v25  ;;  %10192 = vmatpush3.bf16.msra.mxu1 %v9085_v51  ;;  %10193 = vmatprep.mubr.msk.bf16.mxu1 %vm17742_vm5, %v17719_v23  ;;  %v8208_v56 = vpack.c.bf16 %v17788_v0, %v17788_v0  ;;  %v8212_v51 = vpack.c.bf16 %v17795_v10, %v17795_v10  ;;  %v17803_v10 = vld [vmem:[#allocation54_spill] sm:$0xff] }
 0x5da   :  { %10203 = vmatprep.subr.bf16.mxu1 %v17719_v23  ;;  %v8174_v32 = vmul.f32 %v17787_v34, %v8142_v35  ;;  %10188 = vmatmul.mubr.msk.bf16.vlgmr.msra.gmra.mxu0 %vm7803_vm6, %v8237_v59  ;;  %v17796_v59 = vunpack.c.l.bf16 %v15793_v20 }
 0x5db   :  { %10198 = vmatpush3.bf16.msra.mxu0 %v9131_v43  ;;  %10199 = vmatprep.mubr.msk.bf16.mxu0 %vm17742_vm5, %v17719_v23  ;;  %v9177_v37 = vsel %vm8255_vm1, %v8208_v56, 0 }
 0x5dc   :  { %v8238_v44 = vpack.c.bf16 %v8174_v32, %v8174_v32  ;;  %10209 = vmatprep.subr.bf16.mxu0 %v17719_v23 }
 0x5dd   :  { %v8061_v19 = vpop.xlane.xlu1 %8060 }
 0x5de   :  { %10429 = vrcp.f32 %v8061_v19 }
 0x5e0   :  { %10194 = vmatmul.mubr.msk.bf16.vlgmr.msra.gmra.mxu1 %vm7803_vm6, %v8238_v44 }
 0x5e1   :  { %v8064_v38 = vpop.xlane.xlu0 %8063  ;;  %10204 = vmatpush3.bf16.msra.mxu1 %v9177_v37  ;;  %10205 = vmatprep.mubr.msk.bf16.mxu1 %vm17742_vm5, %v17719_v23 }
 0x5e2   :  { %10431 = vrcp.f32 %v8064_v38  ;;  %v10426_v14 = vpop.eup %10425  ;;  %10215 = vmatprep.subr.bf16.mxu1 %v17719_v23 }
 0x5e3   :  { %v8143_v57 = vmul.f32 %v10426_v14, %v16357_v27 }
 0x5e5   :  { %v8175_v49 = vmul.f32 %v17790_v12, %v8143_v57  ;;  %v17797_v57 = vld [vmem:[#allocation29_spill] sm:$0xff] }
 0x5e6   :  { %v10428_v8 = vpop.eup %10427  ;;  %v8213_v41 = vpack.c.bf16 %v17797_v57, %v17797_v57 }
 0x5e7   :  { %v8239_v48 = vpack.c.bf16 %v8175_v49, %v8175_v49  ;;  %v8144_v31 = vmul.f32 %v10428_v8, %v16365_v9  ;;  %v8293_v25 = vpop.f32.mrf.mxu0 }
 0x5e8   :  { %v9725_v46 = vmax.f32 %v8293_v25, 0.0  ;;  %v17801_v25 = vld [vmem:[#allocation31_spill] sm:$0xff] }
 0x5e9   :  { %10200 = vmatmul.mubr.msk.bf16.vlgmr.msra.gmra.mxu0 %vm7803_vm6, %v8239_v48  ;;  %v8176_v50 = vmul.f32 %v17792_v42, %v8144_v31 }
 0x5ea   :  { %10210 = vmatpush3.bf16.msra.mxu0 %v9223_v29  ;;  %10211 = vmatprep.mubr.msk.bf16.mxu0 %vm17742_vm5, %v17719_v23  ;;  %9757 = vst [vmem:[#allocation3] sm:$0xff] %v9725_v46  ;;  %v17800_v29 = vunpack.c.l.bf16 %v15910_v7 }
 0x5eb   :  { %v8067_v27 = vpop.xlane.xlu1 %8066  ;;  %v10430_v62 = vpop.eup %10429  ;;  %v8240_v39 = vpack.c.bf16 %v8176_v50, %v8176_v50  ;;  %10221 = vmatprep.subr.bf16.mxu0 %v17719_v23 }
 0x5ec   :  { %10433 = vrcp.f32 %v8067_v27  ;;  %v8145_v9 = vmul.f32 %v10430_v62, %v16374_v28  ;;  %v10087_v28 = vpop.f32.mrf.mxu0  ;;  %v8214_v27 = vpack.c.bf16 %v17799_v26, %v17799_v26  ;;  %v17806_v26 = vld [vmem:[#allocation60_spill] sm:$0xff] }
 0x5ed   :  { %10206 = vmatmul.mubr.msk.bf16.vlgmr.msra.gmra.mxu1 %vm7803_vm6, %v8240_v39 }
 0x5ee   :  { %v8177_v58 = vmul.f32 %v17794_v33, %v8145_v9  ;;  %10216 = vmatpush3.bf16.msra.mxu1 %v9269_v13  ;;  %10217 = vmatprep.mubr.msk.bf16.mxu1 %vm17742_vm5, %v17719_v23  ;;  %v8296_v19 = vpop.f32.mrf.mxu0  ;;  %v9453_v3 = vsel %vm8255_vm1, %v8214_v27, 0  ;;  %v8215_v33 = vpack.c.bf16 %v17801_v25, %v17801_v25  ;;  %v8219_v27 = vpack.c.bf16 %v17806_v26, %v17806_v26 }
 0x5ef   :  { %v10432_v11 = vpop.eup %10431  ;;  %10227 = vmatprep.subr.bf16.mxu1 %v17719_v23  ;;  %v17807_v25 = vunpack.c.l.bf16 %v16203_v47 }
 0x5f0   :  { %v8070_v15 = vpop.xlane.xlu0 %8069  ;;  %v8241_v35 = vpack.c.bf16 %v8177_v58, %v8177_v58  ;;  %v8146_v2 = vmul.f32 %v10432_v11, %v16384_v17  ;;  %v10088_v32 = vpop.f32.mrf.mxu0  ;;  %v9361_v17 = vsel %vm8255_vm1, %v8212_v51, 0  ;;  %v17802_v58 = vunpack.c.h.bf16 %v15910_v7 }
 0x5f1   :  { %10435 = vrcp.f32 %v8070_v15  ;;  %v8216_v51 = vpack.c.bf16 %v17803_v10, %v17803_v10  ;;  %v9683_v24 = vsel %vm8255_vm1, %v8219_v27, 0 }
 0x5f2   :  { %10212 = vmatmul.mubr.msk.bf16.vlgmr.msra.gmra.mxu0 %vm7803_vm6, %v8241_v35  ;;  %v8178_v53 = vmul.f32 %v17796_v59, %v8146_v2  ;;  %v8339_v56 = vpop.f32.mrf.mxu0 }
 0x5f3   :  { %10222 = vmatpush3.bf16.msra.mxu0 %v9315_v16  ;;  %10223 = vmatprep.mubr.msk.bf16.mxu0 %vm17742_vm5, %v17719_v23  ;;  %v9726_v44 = vmax.f32 %v8339_v56, 0.0  ;;  %v9499_v16 = vsel %vm8255_vm1, %v8215_v33, 0  ;;  %v17804_v56 = vld [vmem:[#allocation56_spill] sm:$0xff] }
 0x5f4   :  { %v8242_v0 = vpack.c.bf16 %v8178_v53, %v8178_v53  ;;  %10233 = vmatprep.subr.bf16.mxu0 %v17719_v23  ;;  %v10093_v37 = vpop.f32.mrf.mxu0 }
 0x5f5   :  { %9758 = vst [vmem:[#allocation3 + $0x8] sm:$0xff] %v9726_v44 }
 0x5f6   :  { %10218 = vmatmul.mubr.msk.bf16.vlgmr.msra.gmra.mxu1 %vm7803_vm6, %v8242_v0  ;;  %v8342_v49 = vpop.f32.mrf.mxu0 }
 0x5f7   :  { %v8073_v34 = vpop.xlane.xlu1 %8072  ;;  %10228 = vmatpush3.bf16.msra.mxu1 %v9361_v17  ;;  %10229 = vmatprep.mubr.msk.bf16.mxu1 %vm17742_vm5, %v17719_v23  ;;  %v17805_v49 = vld [vmem:[#allocation59_spill] sm:$0xff] }
 0x5f8   :  { %10437 = vrcp.f32 %v8073_v34  ;;  %10239 = vmatprep.subr.bf16.mxu1 %v17719_v23  ;;  %v10094_v40 = vpop.f32.mrf.mxu0  ;;  %v9545_v34 = vsel %vm8255_vm1, %v8216_v51, 0 }
 0x5f9   :  { %v10434_v43 = vpop.eup %10433 }
 0x5fa   :  { %v8147_v14 = vmul.f32 %v10434_v43, %v16397_v21  ;;  %v9407_v21 = vsel %vm8255_vm1, %v8213_v41, 0  ;;  %v8385_v50 = vpop.f32.mrf.mxu0  ;;  %v8217_v43 = vpack.c.bf16 %v17804_v56, %v17804_v56 }
 0x5fb   :  { %v8076_v38 = vpop.xlane.xlu0 %8075  ;;  %v9727_v20 = vmax.f32 %v8385_v50, 0.0 }
 0x5fc   :  { %10439 = vrcp.f32 %v8076_v38  ;;  %v8179_v12 = vmul.f32 %v17798_v5, %v8147_v14  ;;  %v10099_v39 = vpop.f32.mrf.mxu0 }
 0x5fd   :  { %9759 = vst [vmem:[#allocation3 + $0x10] sm:$0xff] %v9727_v20 }
 0x5fe   :  { %v10436_v8 = vpop.eup %10435  ;;  %v8243_v48 = vpack.c.bf16 %v8179_v12, %v8179_v12  ;;  %v8388_v15 = vpop.f32.mrf.mxu0 }
 0x5ff   :  { %v8148_v31 = vmul.f32 %v10436_v8, %v16405_v18  ;;  %v9591_v8 = vsel %vm8255_vm1, %v8217_v43, 0 }
 0x600   :  { %10224 = vmatmul.mubr.msk.bf16.vlgmr.msra.gmra.mxu0 %vm7803_vm6, %v8243_v48  ;;  %v10100_v46 = vpop.f32.mrf.mxu0 }
 0x601   :  { %v8180_v42 = vmul.f32 %v17800_v29, %v8148_v31  ;;  %10234 = vmatpush3.bf16.msra.mxu0 %v9407_v21  ;;  %10235 = vmatprep.mubr.msk.bf16.mxu0 %vm17742_vm5, %v17719_v23 }
 0x602   :  { %10245 = vmatprep.subr.bf16.mxu0 %v17719_v23 }
 0x603   :  { %v8244_v18 = vpack.c.bf16 %v8180_v42, %v8180_v42 }
 0x604   :  { %v8079_v62 = vpop.xlane.xlu1 %8078 }
 0x605   :  { %10441 = vrcp.f32 %v8079_v62  ;;  %v10438_v9 = vpop.eup %10437  ;;  %10230 = vmatmul.mubr.msk.bf16.vlgmr.msra.gmra.mxu1 %vm7803_vm6, %v8244_v18 }
 0x606   :  { %v8149_v52 = vmul.f32 %v10438_v9, %v16417_v6  ;;  %10240 = vmatpush3.bf16.msra.mxu1 %v9453_v3  ;;  %10241 = vmatprep.mubr.msk.bf16.mxu1 %vm17742_vm5, %v17719_v23 }
 0x607   :  { %10251 = vmatprep.subr.bf16.mxu1 %v17719_v23  ;;  %v8431_v19 = vpop.f32.mrf.mxu0 }
 0x608   :  { %v8082_v13 = vpop.xlane.xlu0 %8081  ;;  %v8181_v11 = vmul.f32 %v17802_v58, %v8149_v52  ;;  %v9728_v59 = vmax.f32 %v8431_v19, 0.0 }
 0x609   :  { %10443 = vrcp.f32 %v8082_v13  ;;  %v10440_v28 = vpop.eup %10439 }
 0x60a   :  { %v8245_v2 = vpack.c.bf16 %v8181_v11, %v8181_v11  ;;  %v8150_v6 = vmul.f32 %v10440_v28, %v16425_v55  ;;  %v10105_v55 = vpop.f32.mrf.mxu0  ;;  %9760 = vst [vmem:[#allocation3 + $0x18] sm:$0xff] %v9728_v59 }
 0x60b   :  { %v8085_v35 = vpop.xlane.xlu1 %8084 }
 0x60c   :  { %10445 = vrcp.f32 %v8085_v35  ;;  %10236 = vmatmul.mubr.msk.bf16.vlgmr.msra.gmra.mxu0 %vm7803_vm6, %v8245_v2  ;;  %v8182_v7 = vmul.f32 %v9943_v30, %v8150_v6  ;;  %v8434_v32 = vpop.f32.mrf.mxu0 }
 0x60d   :  { %10246 = vmatpush3.bf16.msra.mxu0 %v9499_v16  ;;  %10247 = vmatprep.mubr.msk.bf16.mxu0 %vm17742_vm5, %v17719_v23 }
 0x60e   :  { %v8246_v53 = vpack.c.bf16 %v8182_v7, %v8182_v7  ;;  %10257 = vmatprep.subr.bf16.mxu0 %v17719_v23  ;;  %v10106_v17 = vpop.f32.mrf.mxu0 }
 0x610   :  { %10242 = vmatmul.mubr.msk.bf16.vlgmr.msra.gmra.mxu1 %vm7803_vm6, %v8246_v53 }
 0x611   :  { %10252 = vmatpush3.bf16.msra.mxu1 %v9545_v34  ;;  %10253 = vmatprep.mubr.msk.bf16.mxu1 %vm17742_vm5, %v17719_v23  ;;  %v8477_v14 = vpop.f32.mrf.mxu0 }
 0x612   :  { %v10442_v0 = vpop.eup %10441  ;;  %10263 = vmatprep.subr.bf16.mxu1 %v17719_v23  ;;  %v9729_v41 = vmax.f32 %v8477_v14, 0.0 }
 0x613   :  { %v8151_v30 = vmul.f32 %v10442_v0, %v16434_v1  ;;  %v10111_v5 = vpop.f32.mrf.mxu0  ;;  %v8218_v1 = vpack.c.bf16 %v17805_v49, %v17805_v49 }
 0x614   :  { %9761 = vst [vmem:[#allocation3 + $0x20] sm:$0xff] %v9729_v41 }
 0x615   :  { %v8183_v38 = vmul.f32 %v9944_v36, %v8151_v30  ;;  %v8480_v36 = vpop.f32.mrf.mxu0 }
 0x616   :  { %v10444_v44 = vpop.eup %10443 }
 0x617   :  { %v8247_v37 = vpack.c.bf16 %v8183_v38, %v8183_v38  ;;  %v8152_v57 = vmul.f32 %v10444_v44, %v16446_v22  ;;  %v10112_v40 = vpop.f32.mrf.mxu0 }
 0x619   :  { %v10446_v12 = vpop.eup %10445  ;;  %10248 = vmatmul.mubr.msk.bf16.vlgmr.msra.gmra.mxu0 %vm7803_vm6, %v8247_v37  ;;  %v8184_v48 = vmul.f32 %v9947_v45, %v8152_v57  ;;  %v9637_v45 = vsel %vm8255_vm1, %v8218_v1, 0 }
 0x61a   :  { %v8153_v63 = vmul.f32 %v10446_v12, %v16452_v4  ;;  %10258 = vmatpush3.bf16.msra.mxu0 %v9591_v8  ;;  %10259 = vmatprep.mubr.msk.bf16.mxu0 %vm17742_vm5, %v17719_v23 }
 0x61b   :  { %v8248_v22 = vpack.c.bf16 %v8184_v48, %v8184_v48  ;;  %10269 = vmatprep.subr.bf16.mxu0 %v17719_v23 }
 0x61c   :  { %v8185_v31 = vmul.f32 %v9948_v61, %v8153_v63 }
 0x61d   :  { %10254 = vmatmul.mubr.msk.bf16.vlgmr.msra.gmra.mxu1 %vm7803_vm6, %v8248_v22 }
 0x61e   :  { %v8088_v4 = vpop.xlane.xlu0 %8087  ;;  %10264 = vmatpush3.bf16.msra.mxu1 %v9637_v45  ;;  %10265 = vmatprep.mubr.msk.bf16.mxu1 %vm17742_vm5, %v17719_v23  ;;  %v8249_v21 = vpack.c.bf16 %v8185_v31, %v8185_v31 }
 0x61f   :  { %10447 = vrcp.f32 %v8088_v4  ;;  %v8091_v29 = vpop.xlane.xlu1 %8090  ;;  %v8523_v61 = vpop.f32.mrf.mxu0 }
 0x620   :  { %10449 = vrcp.f32 %v8091_v29  ;;  %v9730_v42 = vmax.f32 %v8523_v61, 0.0 }
 0x621   :  { %10260 = vmatmul.mubr.msk.bf16.vlgmr.msra.gmra.mxu0 %vm7803_vm6, %v8249_v21  ;;  %v10117_v50 = vpop.f32.mrf.mxu0 }
 0x622   :  { %10270 = vmatpush3.bf16.msra.mxu0 %v9683_v24  ;;  %10271 = vmatprep.mubr.msk.bf16.mxu0 %vm17742_vm5, %v17719_v23  ;;  %9762 = vst [vmem:[#allocation3 + $0x28] sm:$0xff] %v9730_v42  ;;  %v17808_v23 = vunpack.c.h.bf16 %v16203_v47 }
 0x623   :  { %v8526_v62 = vpop.f32.mrf.mxu0 }
 0x625   :  { %v10118_v20 = vpop.f32.mrf.mxu0 }
 0x62a   :  { %v8569_v39 = vpop.f32.mrf.mxu0 }
 0x62b   :  { %v9731_v52 = vmax.f32 %v8569_v39, 0.0 }
 0x62c   :  { %v10448_v18 = vpop.eup %10447  ;;  %v10123_v13 = vpop.f32.mrf.mxu0 }
 0x62d   :  { %v10450_v9 = vpop.eup %10449  ;;  %v8154_v3 = vmul.f32 %v10448_v18, %v16473_v54  ;;  %9763 = vst [vmem:[#allocation3 + $0x30] sm:$0xff] %v9731_v52 }
 0x62e   :  { %v8155_v15 = vmul.f32 %v10450_v9, %v16475_v60  ;;  %v8572_v11 = vpop.f32.mrf.mxu0 }
 0x62f   :  { %v8186_v33 = vmul.f32 %v17807_v25, %v8154_v3 }
 0x630   :  { %v8187_v58 = vmul.f32 %v17808_v23, %v8155_v15  ;;  %v10124_v35 = vpop.f32.mrf.mxu0 }
 0x631   :  { %v8250_v46 = vpack.c.bf16 %v8186_v33, %v8186_v33 }
 0x632   :  { %v8251_v28 = vpack.c.bf16 %v8187_v58, %v8187_v58 }
 0x633   :  { %10266 = vmatmul.mubr.msk.bf16.vlgmr.msra.gmra.mxu1 %vm7803_vm6, %v8250_v46 }
 0x634   :  { %10272 = vmatmul.mubr.msk.bf16.vlgmr.msra.gmra.mxu0 %vm7803_vm6, %v8251_v28 }
 0x638   :  { %v8615_v54 = vpop.f32.mrf.mxu0 }
 0x639   :  { %v9732_v2 = vmax.f32 %v8615_v54, 0.0 }
 0x63a   :  { %v10129_v6 = vpop.f32.mrf.mxu0 }
 0x63b   :  { %9764 = vst [vmem:[#allocation3 + $0x38] sm:$0xff] %v9732_v2 }
 0x63c   :  { %v8618_v60 = vpop.f32.mrf.mxu0 }
 0x63e   :  { %v10130_v10 = vpop.f32.mrf.mxu0 }
 0x640   :  { %v8661_v51 = vpop.f32.mrf.mxu0 }
 0x641   :  { %v9733_v16 = vmax.f32 %v8661_v51, 0.0 }
 0x642   :  { %v10135_v7 = vpop.f32.mrf.mxu0 }
 0x643   :  { %9765 = vst [vmem:[#allocation3 + $0x40] sm:$0xff] %v9733_v16 }
 0x644   :  { %v8664_v47 = vpop.f32.mrf.mxu0 }
 0x646   :  { %v10136_v19 = vpop.f32.mrf.mxu0 }
 0x64d   :  { %v8707_v59 = vpop.f32.mrf.mxu0 }
 0x64e   :  { %v9734_v53 = vmax.f32 %v8707_v59, 0.0 }
 0x64f   :  { %v10141_v55 = vpop.f32.mrf.mxu0 }
 0x650   :  { %9766 = vst [vmem:[#allocation3 + $0x48] sm:$0xff] %v9734_v53 }
 0x651   :  { %v8710_v34 = vpop.f32.mrf.mxu0 }
 0x653   :  { %v10142_v32 = vpop.f32.mrf.mxu0 }
 0x65c   :  { %v8753_v0 = vpop.f32.mrf.mxu0 }
 0x65d   :  { %v9735_v30 = vmax.f32 %v8753_v0, 0.0 }
 0x65e   :  { %v10147_v17 = vpop.f32.mrf.mxu0 }
 0x65f   :  { %9767 = vst [vmem:[#allocation3 + $0x50] sm:$0xff] %v9735_v30 }
 0x660   :  { %v8756_v56 = vpop.f32.mrf.mxu0 }
 0x662   :  { %v10148_v43 = vpop.f32.mrf.mxu0 }
 0x664   :  { %v8799_v38 = vpop.f32.mrf.mxu0 }
 0x665   :  { %v9736_v44 = vmax.f32 %v8799_v38, 0.0 }
 0x666   :  { %v10153_v14 = vpop.f32.mrf.mxu0  ;;  %v8845_v37 = vpop.f32.mrf.mxu1 }
 0x667   :  { %9768 = vst [vmem:[#allocation3 + $0x58] sm:$0xff] %v9736_v44  ;;  %v9737_v41 = vmax.f32 %v8845_v37, 0.0 }
 0x668   :  { %v8802_v57 = vpop.f32.mrf.mxu0  ;;  %v10159_v5 = vpop.f32.mrf.mxu1 }
 0x669   :  { %9769 = vst [vmem:[#allocation3 + $0x60] sm:$0xff] %v9737_v41 }
 0x66a   :  { %v10154_v12 = vpop.f32.mrf.mxu0  ;;  %v8848_v49 = vpop.f32.mrf.mxu1 }
 0x66c   :  { %v10160_v1 = vpop.f32.mrf.mxu1 }
 0x688   :  { %v8891_v8 = vpop.f32.mrf.mxu0 }
 0x689   :  { %v9738_v48 = vmax.f32 %v8891_v8, 0.0 }
 0x68a   :  { %v10165_v63 = vpop.f32.mrf.mxu0 }
 0x68b   :  { %9770 = vst [vmem:[#allocation3 + $0x68] sm:$0xff] %v9738_v48 }
 0x68c   :  { %v8894_v36 = vpop.f32.mrf.mxu0 }
 0x68d   :  { %v8937_v22 = vpop.f32.mrf.mxu1 }
 0x68e   :  { %v9739_v31 = vmax.f32 %v8937_v22, 0.0  ;;  %v10166_v40 = vpop.f32.mrf.mxu0 }
 0x68f   :  { %v10171_v26 = vpop.f32.mrf.mxu1 }
 0x690   :  { %9771 = vst [vmem:[#allocation3 + $0x70] sm:$0xff] %v9739_v31 }
 0x691   :  { %v8940_v27 = vpop.f32.mrf.mxu1 }
 0x692   :  { %v8983_v45 = vpop.f32.mrf.mxu0 }
 0x693   :  { %v10172_v4 = vpop.f32.mrf.mxu1  ;;  %v9740_v21 = vmax.f32 %v8983_v45, 0.0 }
 0x694   :  { %v10177_v29 = vpop.f32.mrf.mxu0 }
 0x695   :  { %9772 = vst [vmem:[#allocation3 + $0x78] sm:$0xff] %v9740_v21 }
 0x696   :  { %v8986_v24 = vpop.f32.mrf.mxu0 }
 0x698   :  { %v9029_v61 = vpop.f32.mrf.mxu1  ;;  %v10178_v50 = vpop.f32.mrf.mxu0 }
 0x699   :  { %v9741_v42 = vmax.f32 %v9029_v61, 0.0 }
 0x69a   :  { %v10183_v62 = vpop.f32.mrf.mxu1  ;;  %v9075_v18 = vpop.f32.mrf.mxu0 }
 0x69b   :  { %9773 = vst [vmem:[#allocation3 + $0x80] sm:$0xff] %v9741_v42  ;;  %v9742_v39 = vmax.f32 %v9075_v18, 0.0 }
 0x69c   :  { %v9032_v20 = vpop.f32.mrf.mxu1  ;;  %v10189_v3 = vpop.f32.mrf.mxu0 }
 0x69d   :  { %9774 = vst [vmem:[#allocation3 + $0x88] sm:$0xff] %v9742_v39 }
 0x69e   :  { %v10184_v9 = vpop.f32.mrf.mxu1  ;;  %v9078_v52 = vpop.f32.mrf.mxu0 }
 0x6a0   :  { %v9121_v15 = vpop.f32.mrf.mxu1  ;;  %v10190_v25 = vpop.f32.mrf.mxu0 }
 0x6a1   :  { %v9743_v13 = vmax.f32 %v9121_v15, 0.0 }
 0x6a2   :  { %v10195_v33 = vpop.f32.mrf.mxu1 }
 0x6a3   :  { %9775 = vst [vmem:[#allocation3 + $0x90] sm:$0xff] %v9743_v13 }
 0x6a4   :  { %v9124_v23 = vpop.f32.mrf.mxu1 }
 0x6a6   :  { %v10196_v11 = vpop.f32.mrf.mxu1 }
 0x6a9   :  { %v9167_v58 = vpop.f32.mrf.mxu0 }
 0x6aa   :  { %v9744_v46 = vmax.f32 %v9167_v58, 0.0 }
 0x6ab   :  { %v10201_v28 = vpop.f32.mrf.mxu0 }
 0x6ac   :  { %9776 = vst [vmem:[#allocation3 + $0x98] sm:$0xff] %v9744_v46 }
 0x6ad   :  { %v9170_v35 = vpop.f32.mrf.mxu0  ;;  %v9213_v54 = vpop.f32.mrf.mxu1 }
 0x6ae   :  { %v9745_v2 = vmax.f32 %v9213_v54, 0.0 }
 0x6af   :  { %v10202_v6 = vpop.f32.mrf.mxu0  ;;  %v10207_v60 = vpop.f32.mrf.mxu1 }
 0x6b0   :  { %9777 = vst [vmem:[#allocation3 + $0xa0] sm:$0xff] %v9745_v2 }
 0x6b1   :  { %v9216_v10 = vpop.f32.mrf.mxu1 }
 0x6b2   :  { %v9259_v51 = vpop.f32.mrf.mxu0 }
 0x6b3   :  { %v9746_v16 = vmax.f32 %v9259_v51, 0.0  ;;  %v10208_v7 = vpop.f32.mrf.mxu1 }
 0x6b4   :  { %v10213_v47 = vpop.f32.mrf.mxu0 }
 0x6b5   :  { %9778 = vst [vmem:[#allocation3 + $0xa8] sm:$0xff] %v9746_v16 }
 0x6b6   :  { %v9262_v19 = vpop.f32.mrf.mxu0  ;;  %v9305_v59 = vpop.f32.mrf.mxu1 }
 0x6b7   :  { %v9747_v53 = vmax.f32 %v9305_v59, 0.0 }
 0x6b8   :  { %v10214_v55 = vpop.f32.mrf.mxu0  ;;  %v10219_v34 = vpop.f32.mrf.mxu1 }
 0x6b9   :  { %9779 = vst [vmem:[#allocation3 + $0xb0] sm:$0xff] %v9747_v53 }
 0x6ba   :  { %v9308_v32 = vpop.f32.mrf.mxu1 }
 0x6bc   :  { %v10220_v0 = vpop.f32.mrf.mxu1 }
 0x6c0   :  { %v9351_v30 = vpop.f32.mrf.mxu0 }
 0x6c1   :  { %v9748_v17 = vmax.f32 %v9351_v30, 0.0 }
 0x6c2   :  { %v10225_v56 = vpop.f32.mrf.mxu0 }
 0x6c3   :  { %9780 = vst [vmem:[#allocation3 + $0xb8] sm:$0xff] %v9748_v17 }
 0x6c4   :  { %v9354_v43 = vpop.f32.mrf.mxu0 }
 0x6c5   :  { %v9397_v38 = vpop.f32.mrf.mxu1 }
 0x6c6   :  { %v9749_v44 = vmax.f32 %v9397_v38, 0.0  ;;  %v10226_v14 = vpop.f32.mrf.mxu0 }
 0x6c7   :  { %v10231_v37 = vpop.f32.mrf.mxu1 }
 0x6c8   :  { %9781 = vst [vmem:[#allocation3 + $0xc0] sm:$0xff] %v9749_v44 }
 0x6c9   :  { %v9400_v57 = vpop.f32.mrf.mxu1 }
 0x6cb   :  { %v10232_v5 = vpop.f32.mrf.mxu1 }
 0x6cc   :  { %v9443_v41 = vpop.f32.mrf.mxu0 }
 0x6cd   :  { %v9750_v12 = vmax.f32 %v9443_v41, 0.0 }
 0x6ce   :  { %v10237_v49 = vpop.f32.mrf.mxu0 }
 0x6cf   :  { %9782 = vst [vmem:[#allocation3 + $0xc8] sm:$0xff] %v9750_v12 }
 0x6d0   :  { %v9446_v1 = vpop.f32.mrf.mxu0  ;;  %v9489_v8 = vpop.f32.mrf.mxu1 }
 0x6d1   :  { %v9751_v48 = vmax.f32 %v9489_v8, 0.0 }
 0x6d2   :  { %v10238_v63 = vpop.f32.mrf.mxu0  ;;  %v10243_v36 = vpop.f32.mrf.mxu1 }
 0x6d3   :  { %9783 = vst [vmem:[#allocation3 + $0xd0] sm:$0xff] %v9751_v48 }
 0x6d4   :  { %v9492_v22 = vpop.f32.mrf.mxu1 }
 0x6d6   :  { %v10244_v31 = vpop.f32.mrf.mxu1 }
 0x6d9   :  { %v9535_v40 = vpop.f32.mrf.mxu0 }
 0x6da   :  { %v9752_v26 = vmax.f32 %v9535_v40, 0.0 }
 0x6db   :  { %v10249_v27 = vpop.f32.mrf.mxu0 }
 0x6dc   :  { %9784 = vst [vmem:[#allocation3 + $0xd8] sm:$0xff] %v9752_v26 }
 0x6dd   :  { %v9538_v45 = vpop.f32.mrf.mxu0  ;;  %v9581_v4 = vpop.f32.mrf.mxu1 }
 0x6de   :  { %v9753_v21 = vmax.f32 %v9581_v4, 0.0 }
 0x6df   :  { %v10250_v29 = vpop.f32.mrf.mxu0  ;;  %v10255_v24 = vpop.f32.mrf.mxu1 }
 0x6e0   :  { %9785 = vst [vmem:[#allocation3 + $0xe0] sm:$0xff] %v9753_v21 }
 0x6e1   :  { %v9584_v61 = vpop.f32.mrf.mxu1  ;;  %v9627_v42 = vpop.f32.mrf.mxu0 }
 0x6e2   :  { %v9754_v50 = vmax.f32 %v9627_v42, 0.0 }
 0x6e3   :  { %v10256_v62 = vpop.f32.mrf.mxu1  ;;  %v10261_v20 = vpop.f32.mrf.mxu0 }
 0x6e4   :  { %9786 = vst [vmem:[#allocation3 + $0xe8] sm:$0xff] %v9754_v50 }
 0x6e5   :  { %v9630_v18 = vpop.f32.mrf.mxu0 }
 0x6e7   :  { %v10262_v39 = vpop.f32.mrf.mxu0 }
 0x6f3   :  { %v9673_v9 = vpop.f32.mrf.mxu1 }
 0x6f4   :  { %v9755_v3 = vmax.f32 %v9673_v9, 0.0  ;;  %v9719_v52 = vpop.f32.mrf.mxu0 }
 0x6f5   :  { %v10267_v15 = vpop.f32.mrf.mxu1  ;;  %v9756_v13 = vmax.f32 %v9719_v52, 0.0 }
 0x6f6   :  { %9787 = vst [vmem:[#allocation3 + $0xf0] sm:$0xff] %v9755_v3  ;;  %v10273_v25 = vpop.f32.mrf.mxu0 }
 0x6f7   :  { %9788 = vst [vmem:[#allocation3 + $0xf8] sm:$0xff] %v9756_v13  ;;  %v9676_v33 = vpop.f32.mrf.mxu1 }
 0x6f8   :  { %v9722_v23 = vpop.f32.mrf.mxu0 }
 0x6f9   :  { %10476 = shalt.err (!%p10473_p4)
}
 0x6fa   :  { %s10492_s7 = smov 128   ;;  %s10493_s6 = smov 8   ;;  %v10268_v58 = vpop.f32.mrf.mxu1  ;;  %v10274_v11 = vpop.f32.mrf.mxu0 }
 0x6fb   :  { %9800 = dma.vmem_to_hbm [thread:$0]  %s9795_s12, 4096, %s16698_s8, [#allocation4], %s10492_s7, %s10492_s7, %s10493_s6  }
 0x6fc   :  { %10485 = dma.done.wait [#allocation4], 4096  }
 0x6fd   :  { %10486 = vsyncadd [#allocation4], 4294963200 }
 0x6fe   :  { %9804 = vsyncpa [#allocation4], 1 }

</bundles_post_ra>
